<compile_context>
chip_gen: v5e
topology: v5e:2x2
jax: 0.10.0
libtpu: 0.0.40
codegen_flags: <defaults>
</compile_context>

<pallas_src>
import math

import jax
import jax.numpy as jnp
from jax import lax
from jax.experimental import pallas as pl
from jax.experimental.pallas import tpu as pltpu


def gru_encoder_kernel(
    x_ref, len_ref,
    wih0f_ref, bih0f_ref, whh0f_ref, bhh0f_ref,     # layer 0, forward dir
    wih0b_ref, bih0b_ref, whh0b_ref, bhh0b_ref,     # layer 0, backward dir
    wih1f_ref, bih1f_ref, whh1f_ref, bhh1f_ref,     # layer 1, forward dir
    wih1b_ref, bih1b_ref, whh1b_ref, bhh1b_ref,     # layer 1, backward dir
    w1_ref, b1_ref, bn_scale_ref, bn_shift_ref, w2_ref, b2_ref,
    out_ref,
    gi_f_ref, gi_b_ref, seq_ref,                    # bf16 VMEM scratch
):
    T, TB, E = x_ref.shape
    H = whh0f_ref.shape[0]
    G = 3 * H
    f32 = jnp.float32
    bf16 = jnp.bfloat16

    def dot(a, b):
        # bf16 x bf16 MXU matmul with f32 accumulation.
        return jnp.dot(a, b, preferred_element_type=f32)

    lens = len_ref[...]                      # (TB, 1) int32, valid lengths

    # ---- layer 0: hoist input-side gate projections (both directions) out of
    #      the recurrence: one (T*TB, E) x (E, 3H) matmul per direction.
    #      (TB is a multiple of 16, so these reshapes are pure re-tilings even
    #       for the bf16 scratch.)
    x2d = x_ref[...].reshape(T * TB, E).astype(bf16)
    gi_f_ref[...] = (dot(x2d, wih0f_ref[...]) + bih0f_ref[...]
                     ).reshape(T, TB, G).astype(bf16)
    gi_b_ref[...] = (dot(x2d, wih0b_ref[...]) + bih0b_ref[...]
                     ).reshape(T, TB, G).astype(bf16)

    # PyTorch GRU cell with fused gate weights (columns = [r | z | n]):
    #   r = sig(gi_r + Whh_r h + bhh_r); z = sig(gi_z + Whh_z h + bhh_z)
    #   n = tanh(gi_n + r * (Whh_n h + bhh_n)); h' = (1-z)*n + z*h
    # NOTE: the gate lane-slices are tile-aligned whenever H % 128 == 0
    # (production sizes); r and z share one fused sigmoid over [:, :2H].
    def gru_cell(gi, h, whh_ref, bhh):
        gh = dot(h.astype(bf16), whh_ref[...]) + bhh     # one dot per step, f32
        rz = jax.nn.sigmoid(gi[:, :2 * H].astype(f32) + gh[:, :2 * H])
        r = rz[:, :H]
        z = rz[:, H:]
        n = jnp.tanh(gi[:, 2 * H:].astype(f32) + r * gh[:, 2 * H:])
        return (1.0 - z) * n + z * h

    # Interleaved forward/backward recurrence: two independent carries per
    # iteration give the scheduler work to hide each step's MXU/EUP latency.
    # Packed-sequence semantics: only update h where the timestep is valid, so
    # the final hidden matches nn.GRU on a PackedSequence.
    def run_bidir(whhf_ref, bhhf_ref, whhb_ref, bhhb_ref, store):
        bhhf = bhhf_ref[...]                 # hoist (1, 3H) bias reads
        bhhb = bhhb_ref[...]

        def body(t, carry):
            hf, hb = carry
            tb = T - 1 - t
            hf_new = gru_cell(gi_f_ref[t], hf, whhf_ref, bhhf)
            hb_new = gru_cell(gi_b_ref[tb], hb, whhb_ref, bhhb)
            hf = jnp.where(lens > t, hf_new, hf)
            hb = jnp.where(lens > tb, hb_new, hb)
            if store:
                # Layer-0 outputs stored [fwd | bwd] along the feature axis so
                # the layer-1 input projection is a single K=2H matmul.
                # NOTE: timesteps past a sequence's length hold the stale
                # carry (fwd) / zeros (bwd); harmless because layer-1 updates
                # are length-masked too and only the final hiddens are used.
                seq_ref[t, :, :H] = hf.astype(bf16)
                seq_ref[tb, :, H:] = hb.astype(bf16)
            return hf, hb

        h0 = jnp.zeros((TB, H), f32)
        unroll = T if T <= 16 else 4
        return lax.fori_loop(0, T, body, (h0, h0), unroll=unroll)

    h0f, h0b = run_bidir(whh0f_ref, bhh0f_ref, whh0b_ref, bhh0b_ref, True)

    # ---- layer 1: fused input projection from the interleaved layer-0
    #      sequence: one (T*TB, 2H) x (2H, 3H) matmul per direction.
    s2d = seq_ref[...].reshape(T * TB, 2 * H)
    gi_f_ref[...] = (dot(s2d, wih1f_ref[...]) + bih1f_ref[...]
                     ).reshape(T, TB, G).astype(bf16)
    gi_b_ref[...] = (dot(s2d, wih1b_ref[...]) + bih1b_ref[...]
                     ).reshape(T, TB, G).astype(bf16)

    h1f, h1b = run_bidir(whh1f_ref, bhh1f_ref, whh1b_ref, bhh1b_ref, False)

    # ---- MLP head. hidden.permute(1,0,2).reshape(B,-1) column order is
    # [l0f | l0b | l1f | l1b]; Linear(4H,H) weight.T is a single (4H, H)
    # matrix in that row order -> one fused MXU pass.
    hcat = jnp.concatenate([h0f, h0b, h1f, h1b], axis=-1).astype(bf16)  # (TB,4H)
    y = dot(hcat, w1_ref[...]) + b1_ref[...]
    y = y * bn_scale_ref[...] + bn_shift_ref[...]   # BatchNorm1d (eval, folded)
    y = jnp.maximum(y, 0.0)                         # ReLU
    y = dot(y.astype(bf16), w2_ref[...]) + b2_ref[...]   # Linear(H, H)
    y = jnp.maximum(y, 0.0)                         # ReLU
    out_ref[...] = y.astype(out_ref.dtype)


def init_params(key, vocab_size, embedding_size, hidden_size):
    E, H = embedding_size, hidden_size
    G = 3 * H
    ks = iter(jax.random.split(key, 32))

    def u(shape, scale):
        return jax.random.uniform(next(ks), shape, jnp.float32, -scale, scale)

    s_gru = 1.0 / math.sqrt(H)
    params = {
        "embedding": jax.random.normal(next(ks), (vocab_size, E), jnp.float32),
        "gru": [],
    }
    for layer in range(2):
        for _direction in range(2):
            in_dim = E if layer == 0 else 2 * H      # layer 1 eats [fwd|bwd]
            w_ih = u((in_dim, G), s_gru)             # gate-fused columns [r|z|n]
            b_ih = u((1, G), s_gru)
            w_hh = u((H, G), s_gru)                  # gate-fused recurrent weight
            b_hh = u((1, G), s_gru)
            params["gru"].append((w_ih, b_ih, w_hh, b_hh))

    s1 = 1.0 / math.sqrt(4 * H)
    s2 = 1.0 / math.sqrt(H)
    params["w1"] = u((4 * H, H), s1)                 # Linear(4H, H) weight.T
    params["b1"] = u((1, H), s1)
    # BatchNorm1d eval-mode folded affine (gamma=1, beta=0, mean=0, var=1).
    gamma = jnp.ones((1, H), jnp.float32)
    beta = jnp.zeros((1, H), jnp.float32)
    r_mean = jnp.zeros((1, H), jnp.float32)
    r_var = jnp.ones((1, H), jnp.float32)
    scale = gamma / jnp.sqrt(r_var + 1e-5)
    params["bn_scale"] = scale
    params["bn_shift"] = beta - r_mean * scale
    params["w2"] = u((H, H), s2)                     # Linear(H, H) weight.T
    params["b2"] = u((1, H), s2)
    return params


def _full_spec(arr):
    nd = arr.ndim
    return pl.BlockSpec(arr.shape, lambda b, _nd=nd: (0,) * _nd)


def _round_up(a, m):
    return -(-a // m) * m


def _vmem_cap_bytes():
    try:
        return int(pltpu.get_tpu_info().vmem_capacity_bytes)
    except Exception:
        return 64 << 20        # conservative default == v7x per-core VMEM


def _choose_tb(batch):
    """Pick a batch tile: multiple of 16, <=128 MXU rows, and keep >=2
    'parallel' grid steps when the batch allows it (v7x megacore)."""
    b16 = _round_up(batch, 16)
    if b16 >= 256:
        tb = 128
    elif b16 >= 32:
        tb = _round_up(b16 // 2, 16)
    else:
        tb = b16
    b_pad = _round_up(b16, tb)
    return tb, b_pad


@jax.jit
def extract_gru_encoder(x_tokens, lengths, params):
    # Embedding gather + layout glue in plain JAX; all matmul/elementwise hot
    # path runs inside the Pallas kernel.
    emb = params["embedding"][x_tokens]              # (B, T, E) f32
    B, T, E = emb.shape
    H = params["w2"].shape[0]

    TB, B_pad = _choose_tb(B)
    pad = B_pad - B

    # Time-major layout: after the TB raise each per-timestep DMA chunk is
    # TB*E*4 bytes (>=16 KiB at production sizes), so the strided slab is fine.
    x_tm = jnp.transpose(emb, (1, 0, 2))             # (T, B, E)
    if pad:
        x_tm = jnp.pad(x_tm, ((0, 0), (0, pad), (0, 0)))
        lengths = jnp.pad(lengths, (0, pad))         # padded rows: length 0
    len2d = lengths.astype(jnp.int32)[:, None]       # (B_pad, 1)

    bf16 = jnp.bfloat16
    weights = []
    for (w_ih, b_ih, w_hh, b_hh) in params["gru"]:
        weights += [w_ih.astype(bf16), b_ih, w_hh.astype(bf16), b_hh]
    weights += [params["w1"].astype(bf16), params["b1"], params["bn_scale"],
                params["bn_shift"], params["w2"].astype(bf16), params["b2"]]

    grid = (B_pad // TB,)
    in_specs = ([pl.BlockSpec((T, TB, E), lambda b: (0, b, 0)),
                 pl.BlockSpec((TB, 1), lambda b: (b, 0))]
                + [_full_spec(w) for w in weights])
    out_spec = pl.BlockSpec((TB, H), lambda b: (b, 0))

    # VMEM budget: double-buffered streamed blocks + weights, single-counted
    # scratch, clamped to 85% of the physical per-core VMEM (v5e/v6e/v7x safe).
    def nbytes(a):
        return int(a.size) * a.dtype.itemsize
    block_bytes = (T * TB * E * 4) + (TB * 4) + (TB * H * 4)
    weight_bytes = sum(nbytes(w) for w in weights)
    scratch_bytes = (2 * (T * TB * 3 * H) + (T * TB * 2 * H)) * 2   # bf16
    est = 2 * (block_bytes + weight_bytes) + scratch_bytes + (8 << 20)
    vmem_limit = int(min(max(est, 16 << 20), int(0.85 * _vmem_cap_bytes())))

    out = pl.pallas_call(
        gru_encoder_kernel,
        out_shape=jax.ShapeDtypeStruct((B_pad, H), jnp.float32),
        grid=grid,
        in_specs=in_specs,
        out_specs=out_spec,
        scratch_shapes=[
            pltpu.VMEM((T, TB, 3 * H), jnp.bfloat16),   # gi fwd (reused by layer 1)
            pltpu.VMEM((T, TB, 3 * H), jnp.bfloat16),   # gi bwd (reused by layer 1)
            pltpu.VMEM((T, TB, 2 * H), jnp.bfloat16),   # layer-0 [fwd|bwd] outputs
        ],
        compiler_params=pltpu.CompilerParams(
            dimension_semantics=("parallel",),
            vmem_limit_bytes=vmem_limit,
        ),
    )(x_tm, len2d, *weights)
    return out[:B]


if __name__ == "__main__":
    VOCAB, E, H = 50, 32, 32
    B, T = 4, 8

    key = jax.random.PRNGKey(0)
    k_params, k_tokens = jax.random.split(key)
    params = init_params(k_params, VOCAB, E, H)

    x_tokens = jax.random.randint(k_tokens, (B, T), 0, VOCAB, dtype=jnp.int32)
    lengths = jnp.array([8, 5, 3, 6], dtype=jnp.int32)
    # src_key_padding_mask is unused by the reference forward (only lengths
    # drive packing), so it is not needed here.

    feature = extract_gru_encoder(x_tokens, lengths, params)
    feature = jax.block_until_ready(feature)
    assert feature.shape == (B, H)
    assert bool(jnp.all(jnp.isfinite(feature)))
    print("KERNEL_OK")
</pallas_src>

<mosaic_0001>
module attributes {stable_mosaic.version = 11 : i64} {
  func.func @gru_encoder_kernel(%arg0: i32, %arg1: memref<8x16x32xf32, #tpu.memory_space<vmem>>, %arg2: memref<16x1xi32, #tpu.memory_space<vmem>>, %arg3: memref<32x96xbf16, #tpu.memory_space<vmem>>, %arg4: memref<1x96xf32, #tpu.memory_space<vmem>>, %arg5: memref<32x96xbf16, #tpu.memory_space<vmem>>, %arg6: memref<1x96xf32, #tpu.memory_space<vmem>>, %arg7: memref<32x96xbf16, #tpu.memory_space<vmem>>, %arg8: memref<1x96xf32, #tpu.memory_space<vmem>>, %arg9: memref<32x96xbf16, #tpu.memory_space<vmem>>, %arg10: memref<1x96xf32, #tpu.memory_space<vmem>>, %arg11: memref<64x96xbf16, #tpu.memory_space<vmem>>, %arg12: memref<1x96xf32, #tpu.memory_space<vmem>>, %arg13: memref<32x96xbf16, #tpu.memory_space<vmem>>, %arg14: memref<1x96xf32, #tpu.memory_space<vmem>>, %arg15: memref<64x96xbf16, #tpu.memory_space<vmem>>, %arg16: memref<1x96xf32, #tpu.memory_space<vmem>>, %arg17: memref<32x96xbf16, #tpu.memory_space<vmem>>, %arg18: memref<1x96xf32, #tpu.memory_space<vmem>>, %arg19: memref<128x32xbf16, #tpu.memory_space<vmem>>, %arg20: memref<1x32xf32, #tpu.memory_space<vmem>>, %arg21: memref<1x32xf32, #tpu.memory_space<vmem>>, %arg22: memref<1x32xf32, #tpu.memory_space<vmem>>, %arg23: memref<32x32xbf16, #tpu.memory_space<vmem>>, %arg24: memref<1x32xf32, #tpu.memory_space<vmem>>, %arg25: memref<16x32xf32, #tpu.memory_space<vmem>>, %arg26: memref<8x16x96xbf16, #tpu.memory_space<vmem>>, %arg27: memref<8x16x96xbf16, #tpu.memory_space<vmem>>, %arg28: memref<8x16x64xbf16, #tpu.memory_space<vmem>>) attributes {dimension_semantics = [#tpu.dimension_semantics<parallel>], iteration_bounds = array<i64: 1>, scalar_prefetch = 0 : i64, scratch_operands = 3 : i64, tpu.core_type = #tpu.core_type<tc>, window_params = [{transform_indices = @transform_0, window_bounds = array<i64: 8, 16, 32>}, {transform_indices = @transform_1, window_bounds = array<i64: 16, 1>}, {pipeline_mode = #tpu.pipeline_mode<synchronous>, transform_indices = @transform_2, window_bounds = array<i64: 32, 96>}, {pipeline_mode = #tpu.pipeline_mode<synchronous>, transform_indices = @transform_3, window_bounds = array<i64: 1, 96>}, {pipeline_mode = #tpu.pipeline_mode<synchronous>, transform_indices = @transform_4, window_bounds = array<i64: 32, 96>}, {pipeline_mode = #tpu.pipeline_mode<synchronous>, transform_indices = @transform_5, window_bounds = array<i64: 1, 96>}, {pipeline_mode = #tpu.pipeline_mode<synchronous>, transform_indices = @transform_6, window_bounds = array<i64: 32, 96>}, {pipeline_mode = #tpu.pipeline_mode<synchronous>, transform_indices = @transform_7, window_bounds = array<i64: 1, 96>}, {pipeline_mode = #tpu.pipeline_mode<synchronous>, transform_indices = @transform_8, window_bounds = array<i64: 32, 96>}, {pipeline_mode = #tpu.pipeline_mode<synchronous>, transform_indices = @transform_9, window_bounds = array<i64: 1, 96>}, {pipeline_mode = #tpu.pipeline_mode<synchronous>, transform_indices = @transform_10, window_bounds = array<i64: 64, 96>}, {pipeline_mode = #tpu.pipeline_mode<synchronous>, transform_indices = @transform_11, window_bounds = array<i64: 1, 96>}, {pipeline_mode = #tpu.pipeline_mode<synchronous>, transform_indices = @transform_12, window_bounds = array<i64: 32, 96>}, {pipeline_mode = #tpu.pipeline_mode<synchronous>, transform_indices = @transform_13, window_bounds = array<i64: 1, 96>}, {pipeline_mode = #tpu.pipeline_mode<synchronous>, transform_indices = @transform_14, window_bounds = array<i64: 64, 96>}, {pipeline_mode = #tpu.pipeline_mode<synchronous>, transform_indices = @transform_15, window_bounds = array<i64: 1, 96>}, {pipeline_mode = #tpu.pipeline_mode<synchronous>, transform_indices = @transform_16, window_bounds = array<i64: 32, 96>}, {pipeline_mode = #tpu.pipeline_mode<synchronous>, transform_indices = @transform_17, window_bounds = array<i64: 1, 96>}, {pipeline_mode = #tpu.pipeline_mode<synchronous>, transform_indices = @transform_18, window_bounds = array<i64: 128, 32>}, {pipeline_mode = #tpu.pipeline_mode<synchronous>, transform_indices = @transform_19, window_bounds = array<i64: 1, 32>}, {pipeline_mode = #tpu.pipeline_mode<synchronous>, transform_indices = @transform_20, window_bounds = array<i64: 1, 32>}, {pipeline_mode = #tpu.pipeline_mode<synchronous>, transform_indices = @transform_21, window_bounds = array<i64: 1, 32>}, {pipeline_mode = #tpu.pipeline_mode<synchronous>, transform_indices = @transform_22, window_bounds = array<i64: 32, 32>}, {pipeline_mode = #tpu.pipeline_mode<synchronous>, transform_indices = @transform_23, window_bounds = array<i64: 1, 32>}, {transform_indices = @transform_24, window_bounds = array<i64: 16, 32>}]} {
    %c0 = arith.constant 0 : index
    %c0_0 = arith.constant 0 : index
    %0 = vector.load %arg2[%c0, %c0_0] : memref<16x1xi32, #tpu.memory_space<vmem>>, vector<16x1xi32>
    %c0_1 = arith.constant 0 : index
    %c0_2 = arith.constant 0 : index
    %c0_3 = arith.constant 0 : index
    %1 = vector.load %arg1[%c0_1, %c0_2, %c0_3] : memref<8x16x32xf32, #tpu.memory_space<vmem>>, vector<8x16x32xf32>
    %2 = vector.shape_cast %1 : vector<8x16x32xf32> to vector<128x32xf32>
    %3 = arith.truncf %2 : vector<128x32xf32> to vector<128x32xbf16>
    %c0_4 = arith.constant 0 : index
    %c0_5 = arith.constant 0 : index
    %4 = vector.load %arg3[%c0_4, %c0_5] : memref<32x96xbf16, #tpu.memory_space<vmem>>, vector<32x96xbf16>
    %cst = arith.constant dense<0.000000e+00> : vector<128x96xf32>
    %5 = tpu.matmul %3, %4, %cst {dimension_numbers = #tpu.dot_dimension_numbers<[1], [0], [0], [1], [0, 0, 1, 1], [], []>} : vector<128x32xbf16>, vector<32x96xbf16>, vector<128x96xf32> -> vector<128x96xf32>
    %c0_6 = arith.constant 0 : index
    %c0_7 = arith.constant 0 : index
    %6 = vector.load %arg4[%c0_6, %c0_7] : memref<1x96xf32, #tpu.memory_space<vmem>>, vector<1x96xf32>
    %7 = vector.broadcast %6 : vector<1x96xf32> to vector<128x96xf32>
    %8 = arith.addf %5, %7 : vector<128x96xf32>
    %9 = vector.shape_cast %8 : vector<128x96xf32> to vector<8x16x96xf32>
    %10 = arith.truncf %9 : vector<8x16x96xf32> to vector<8x16x96xbf16>
    %c0_8 = arith.constant 0 : index
    %c0_9 = arith.constant 0 : index
    %c0_10 = arith.constant 0 : index
    %11 = vector.load %arg26[%c0_8, %c0_9, %c0_10] : memref<8x16x96xbf16, #tpu.memory_space<vmem>>, vector<8x16x96xbf16>
    tpu.vector_store %arg26[%c0_8, %c0_9, %c0_10], %10 {strides = array<i32>} : memref<8x16x96xbf16, #tpu.memory_space<vmem>>, vector<8x16x96xbf16>,
    %c0_11 = arith.constant 0 : index
    %c0_12 = arith.constant 0 : index
    %12 = vector.load %arg7[%c0_11, %c0_12] : memref<32x96xbf16, #tpu.memory_space<vmem>>, vector<32x96xbf16>
    %cst_13 = arith.constant dense<0.000000e+00> : vector<128x96xf32>
    %13 = tpu.matmul %3, %12, %cst_13 {dimension_numbers = #tpu.dot_dimension_numbers<[1], [0], [0], [1], [0, 0, 1, 1], [], []>} : vector<128x32xbf16>, vector<32x96xbf16>, vector<128x96xf32> -> vector<128x96xf32>
    %c0_14 = arith.constant 0 : index
    %c0_15 = arith.constant 0 : index
    %14 = vector.load %arg8[%c0_14, %c0_15] : memref<1x96xf32, #tpu.memory_space<vmem>>, vector<1x96xf32>
    %15 = vector.broadcast %14 : vector<1x96xf32> to vector<128x96xf32>
    %16 = arith.addf %13, %15 : vector<128x96xf32>
    %17 = vector.shape_cast %16 : vector<128x96xf32> to vector<8x16x96xf32>
    %18 = arith.truncf %17 : vector<8x16x96xf32> to vector<8x16x96xbf16>
    %c0_16 = arith.constant 0 : index
    %c0_17 = arith.constant 0 : index
    %c0_18 = arith.constant 0 : index
    %19 = vector.load %arg27[%c0_16, %c0_17, %c0_18] : memref<8x16x96xbf16, #tpu.memory_space<vmem>>, vector<8x16x96xbf16>
    tpu.vector_store %arg27[%c0_16, %c0_17, %c0_18], %18 {strides = array<i32>} : memref<8x16x96xbf16, #tpu.memory_space<vmem>>, vector<8x16x96xbf16>,
    %c0_19 = arith.constant 0 : index
    %c0_20 = arith.constant 0 : index
    %20 = vector.load %arg6[%c0_19, %c0_20] : memref<1x96xf32, #tpu.memory_space<vmem>>, vector<1x96xf32>
    %c0_21 = arith.constant 0 : index
    %c0_22 = arith.constant 0 : index
    %21 = vector.load %arg10[%c0_21, %c0_22] : memref<1x96xf32, #tpu.memory_space<vmem>>, vector<1x96xf32>
    %cst_23 = arith.constant 0.000000e+00 : f32
    %22 = vector.broadcast %cst_23 : f32 to vector<16x32xf32>
    %c0_i32 = arith.constant 0 : i32
    %c7_i32 = arith.constant 7 : i32
    %23 = arith.subi %c7_i32, %c0_i32 : i32
    %24 = arith.index_cast %c0_i32 : i32 to index
    %c0_24 = arith.constant 0 : index
    %c0_25 = arith.constant 0 : index
    %25 = vector.load %arg26[%24, %c0_24, %c0_25] : memref<8x16x96xbf16, #tpu.memory_space<vmem>>, vector<1x16x96xbf16>
    %26 = vector.shape_cast %25 : vector<1x16x96xbf16> to vector<16x96xbf16>
    %27 = arith.truncf %22 : vector<16x32xf32> to vector<16x32xbf16>
    %c0_26 = arith.constant 0 : index
    %c0_27 = arith.constant 0 : index
    %28 = vector.load %arg5[%c0_26, %c0_27] : memref<32x96xbf16, #tpu.memory_space<vmem>>, vector<32x96xbf16>
    %cst_28 = arith.constant dense<0.000000e+00> : vector<16x96xf32>
    %29 = tpu.matmul %27, %28, %cst_28 {dimension_numbers = #tpu.dot_dimension_numbers<[1], [0], [0], [1], [0, 0, 1, 1], [], []>} : vector<16x32xbf16>, vector<32x96xbf16>, vector<16x96xf32> -> vector<16x96xf32>
    %30 = vector.broadcast %20 : vector<1x96xf32> to vector<16x96xf32>
    %31 = arith.addf %29, %30 : vector<16x96xf32>
    %32 = vector.extract_strided_slice %26 {offsets = [0, 0], sizes = [16, 64], strides = [1, 1]} : vector<16x96xbf16> to vector<16x64xbf16>
    %33 = arith.extf %32 : vector<16x64xbf16> to vector<16x64xf32>
    %34 = vector.extract_strided_slice %31 {offsets = [0, 0], sizes = [16, 64], strides = [1, 1]} : vector<16x96xf32> to vector<16x64xf32>
    %35 = arith.addf %33, %34 : vector<16x64xf32>
    %36 = arith.negf %35 : vector<16x64xf32>
    %37 = math.exp %36 : vector<16x64xf32>
    %cst_29 = arith.constant 1.000000e+00 : f32
    %38 = vector.broadcast %cst_29 : f32 to vector<16x64xf32>
    %39 = arith.addf %38, %37 : vector<16x64xf32>
    %40 = arith.divf %38, %39 : vector<16x64xf32>
    %41 = vector.extract_strided_slice %40 {offsets = [0, 0], sizes = [16, 32], strides = [1, 1]} : vector<16x64xf32> to vector<16x32xf32>
    %42 = vector.extract_strided_slice %40 {offsets = [0, 32], sizes = [16, 32], strides = [1, 1]} : vector<16x64xf32> to vector<16x32xf32>
    %43 = vector.extract_strided_slice %26 {offsets = [0, 64], sizes = [16, 32], strides = [1, 1]} : vector<16x96xbf16> to vector<16x32xbf16>
    %44 = arith.extf %43 : vector<16x32xbf16> to vector<16x32xf32>
    %45 = vector.extract_strided_slice %31 {offsets = [0, 64], sizes = [16, 32], strides = [1, 1]} : vector<16x96xf32> to vector<16x32xf32>
    %46 = arith.mulf %41, %45 : vector<16x32xf32>
    %47 = arith.addf %44, %46 : vector<16x32xf32>
    %48 = math.tanh %47 : vector<16x32xf32>
    %cst_30 = arith.constant 1.000000e+00 : f32
    %49 = vector.broadcast %cst_30 : f32 to vector<16x32xf32>
    %50 = arith.subf %49, %42 : vector<16x32xf32>
    %51 = arith.mulf %50, %48 : vector<16x32xf32>
    %52 = arith.mulf %42, %22 : vector<16x32xf32>
    %53 = arith.addf %51, %52 : vector<16x32xf32>
    %54 = arith.index_cast %23 : i32 to index
    %c0_31 = arith.constant 0 : index
    %c0_32 = arith.constant 0 : index
    %55 = vector.load %arg27[%54, %c0_31, %c0_32] : memref<8x16x96xbf16, #tpu.memory_space<vmem>>, vector<1x16x96xbf16>
    %56 = vector.shape_cast %55 : vector<1x16x96xbf16> to vector<16x96xbf16>
    %57 = arith.truncf %22 : vector<16x32xf32> to vector<16x32xbf16>
    %c0_33 = arith.constant 0 : index
    %c0_34 = arith.constant 0 : index
    %58 = vector.load %arg9[%c0_33, %c0_34] : memref<32x96xbf16, #tpu.memory_space<vmem>>, vector<32x96xbf16>
    %cst_35 = arith.constant dense<0.000000e+00> : vector<16x96xf32>
    %59 = tpu.matmul %57, %58, %cst_35 {dimension_numbers = #tpu.dot_dimension_numbers<[1], [0], [0], [1], [0, 0, 1, 1], [], []>} : vector<16x32xbf16>, vector<32x96xbf16>, vector<16x96xf32> -> vector<16x96xf32>
    %60 = vector.broadcast %21 : vector<1x96xf32> to vector<16x96xf32>
    %61 = arith.addf %59, %60 : vector<16x96xf32>
    %62 = vector.extract_strided_slice %56 {offsets = [0, 0], sizes = [16, 64], strides = [1, 1]} : vector<16x96xbf16> to vector<16x64xbf16>
    %63 = arith.extf %62 : vector<16x64xbf16> to vector<16x64xf32>
    %64 = vector.extract_strided_slice %61 {offsets = [0, 0], sizes = [16, 64], strides = [1, 1]} : vector<16x96xf32> to vector<16x64xf32>
    %65 = arith.addf %63, %64 : vector<16x64xf32>
    %66 = arith.negf %65 : vector<16x64xf32>
    %67 = math.exp %66 : vector<16x64xf32>
    %cst_36 = arith.constant 1.000000e+00 : f32
    %68 = vector.broadcast %cst_36 : f32 to vector<16x64xf32>
    %69 = arith.addf %68, %67 : vector<16x64xf32>
    %70 = arith.divf %68, %69 : vector<16x64xf32>
    %71 = vector.extract_strided_slice %70 {offsets = [0, 0], sizes = [16, 32], strides = [1, 1]} : vector<16x64xf32> to vector<16x32xf32>
    %72 = vector.extract_strided_slice %70 {offsets = [0, 32], sizes = [16, 32], strides = [1, 1]} : vector<16x64xf32> to vector<16x32xf32>
    %73 = vector.extract_strided_slice %56 {offsets = [0, 64], sizes = [16, 32], strides = [1, 1]} : vector<16x96xbf16> to vector<16x32xbf16>
    %74 = arith.extf %73 : vector<16x32xbf16> to vector<16x32xf32>
    %75 = vector.extract_strided_slice %61 {offsets = [0, 64], sizes = [16, 32], strides = [1, 1]} : vector<16x96xf32> to vector<16x32xf32>
    %76 = arith.mulf %71, %75 : vector<16x32xf32>
    %77 = arith.addf %74, %76 : vector<16x32xf32>
    %78 = math.tanh %77 : vector<16x32xf32>
    %cst_37 = arith.constant 1.000000e+00 : f32
    %79 = vector.broadcast %cst_37 : f32 to vector<16x32xf32>
    %80 = arith.subf %79, %72 : vector<16x32xf32>
    %81 = arith.mulf %80, %78 : vector<16x32xf32>
    %82 = arith.mulf %72, %22 : vector<16x32xf32>
    %83 = arith.addf %81, %82 : vector<16x32xf32>
    %84 = vector.broadcast %c0_i32 : i32 to vector<16x1xi32>
    %85 = arith.cmpi sgt, %0, %84 : vector<16x1xi32>
    %86 = vector.shape_cast %85 : vector<16x1xi1> to vector<16x1xi1>
    %87 = vector.broadcast %86 : vector<16x1xi1> to vector<16x32xi1>
    %88 = arith.select %87, %53, %22 : vector<16x32xi1>, vector<16x32xf32>
    %89 = vector.broadcast %23 : i32 to vector<16x1xi32>
    %90 = arith.cmpi sgt, %0, %89 : vector<16x1xi32>
    %91 = vector.shape_cast %90 : vector<16x1xi1> to vector<16x1xi1>
    %92 = vector.broadcast %91 : vector<16x1xi1> to vector<16x32xi1>
    %93 = arith.select %92, %83, %22 : vector<16x32xi1>, vector<16x32xf32>
    %94 = arith.truncf %88 : vector<16x32xf32> to vector<16x32xbf16>
    %95 = arith.index_cast %c0_i32 : i32 to index
    %c0_38 = arith.constant 0 : index
    %c0_39 = arith.constant 0 : index
    %96 = vector.load %arg28[%95, %c0_38, %c0_39] : memref<8x16x64xbf16, #tpu.memory_space<vmem>>, vector<1x16x32xbf16>
    %97 = vector.shape_cast %96 : vector<1x16x32xbf16> to vector<16x32xbf16>
    %98 = vector.shape_cast %94 : vector<16x32xbf16> to vector<1x16x32xbf16>
    tpu.vector_store %arg28[%95, %c0_38, %c0_39], %98 {strides = array<i32>} : memref<8x16x64xbf16, #tpu.memory_space<vmem>>, vector<1x16x32xbf16>,
    %99 = arith.truncf %93 : vector<16x32xf32> to vector<16x32xbf16>
    %100 = arith.index_cast %23 : i32 to index
    %c0_40 = arith.constant 0 : index
    %c32 = arith.constant 32 : index
    %101 = vector.load %arg28[%100, %c0_40, %c32] : memref<8x16x64xbf16, #tpu.memory_space<vmem>>, vector<1x16x32xbf16>
    %102 = vector.shape_cast %101 : vector<1x16x32xbf16> to vector<16x32xbf16>
    %103 = vector.shape_cast %99 : vector<16x32xbf16> to vector<1x16x32xbf16>
    tpu.vector_store %arg28[%100, %c0_40, %c32], %103 {strides = array<i32>} : memref<8x16x64xbf16, #tpu.memory_space<vmem>>, vector<1x16x32xbf16>,
    %c1_i32 = arith.constant 1 : i32
    %c7_i32_41 = arith.constant 7 : i32
    %104 = arith.subi %c7_i32_41, %c1_i32 : i32
    %105 = arith.index_cast %c1_i32 : i32 to index
    %c0_42 = arith.constant 0 : index
    %c0_43 = arith.constant 0 : index
    %106 = vector.load %arg26[%105, %c0_42, %c0_43] : memref<8x16x96xbf16, #tpu.memory_space<vmem>>, vector<1x16x96xbf16>
    %107 = vector.shape_cast %106 : vector<1x16x96xbf16> to vector<16x96xbf16>
    %108 = arith.truncf %88 : vector<16x32xf32> to vector<16x32xbf16>
    %c0_44 = arith.constant 0 : index
    %c0_45 = arith.constant 0 : index
    %109 = vector.load %arg5[%c0_44, %c0_45] : memref<32x96xbf16, #tpu.memory_space<vmem>>, vector<32x96xbf16>
    %cst_46 = arith.constant dense<0.000000e+00> : vector<16x96xf32>
    %110 = tpu.matmul %108, %109, %cst_46 {dimension_numbers = #tpu.dot_dimension_numbers<[1], [0], [0], [1], [0, 0, 1, 1], [], []>} : vector<16x32xbf16>, vector<32x96xbf16>, vector<16x96xf32> -> vector<16x96xf32>
    %111 = vector.broadcast %20 : vector<1x96xf32> to vector<16x96xf32>
    %112 = arith.addf %110, %111 : vector<16x96xf32>
    %113 = vector.extract_strided_slice %107 {offsets = [0, 0], sizes = [16, 64], strides = [1, 1]} : vector<16x96xbf16> to vector<16x64xbf16>
    %114 = arith.extf %113 : vector<16x64xbf16> to vector<16x64xf32>
    %115 = vector.extract_strided_slice %112 {offsets = [0, 0], sizes = [16, 64], strides = [1, 1]} : vector<16x96xf32> to vector<16x64xf32>
    %116 = arith.addf %114, %115 : vector<16x64xf32>
    %117 = arith.negf %116 : vector<16x64xf32>
    %118 = math.exp %117 : vector<16x64xf32>
    %cst_47 = arith.constant 1.000000e+00 : f32
    %119 = vector.broadcast %cst_47 : f32 to vector<16x64xf32>
    %120 = arith.addf %119, %118 : vector<16x64xf32>
    %121 = arith.divf %119, %120 : vector<16x64xf32>
    %122 = vector.extract_strided_slice %121 {offsets = [0, 0], sizes = [16, 32], strides = [1, 1]} : vector<16x64xf32> to vector<16x32xf32>
    %123 = vector.extract_strided_slice %121 {offsets = [0, 32], sizes = [16, 32], strides = [1, 1]} : vector<16x64xf32> to vector<16x32xf32>
    %124 = vector.extract_strided_slice %107 {offsets = [0, 64], sizes = [16, 32], strides = [1, 1]} : vector<16x96xbf16> to vector<16x32xbf16>
    %125 = arith.extf %124 : vector<16x32xbf16> to vector<16x32xf32>
    %126 = vector.extract_strided_slice %112 {offsets = [0, 64], sizes = [16, 32], strides = [1, 1]} : vector<16x96xf32> to vector<16x32xf32>
    %127 = arith.mulf %122, %126 : vector<16x32xf32>
    %128 = arith.addf %125, %127 : vector<16x32xf32>
    %129 = math.tanh %128 : vector<16x32xf32>
    %cst_48 = arith.constant 1.000000e+00 : f32
    %130 = vector.broadcast %cst_48 : f32 to vector<16x32xf32>
    %131 = arith.subf %130, %123 : vector<16x32xf32>
    %132 = arith.mulf %131, %129 : vector<16x32xf32>
    %133 = arith.mulf %123, %88 : vector<16x32xf32>
    %134 = arith.addf %132, %133 : vector<16x32xf32>
    %135 = arith.index_cast %104 : i32 to index
    %c0_49 = arith.constant 0 : index
    %c0_50 = arith.constant 0 : index
    %136 = vector.load %arg27[%135, %c0_49, %c0_50] : memref<8x16x96xbf16, #tpu.memory_space<vmem>>, vector<1x16x96xbf16>
    %137 = vector.shape_cast %136 : vector<1x16x96xbf16> to vector<16x96xbf16>
    %138 = arith.truncf %93 : vector<16x32xf32> to vector<16x32xbf16>
    %c0_51 = arith.constant 0 : index
    %c0_52 = arith.constant 0 : index
    %139 = vector.load %arg9[%c0_51, %c0_52] : memref<32x96xbf16, #tpu.memory_space<vmem>>, vector<32x96xbf16>
    %cst_53 = arith.constant dense<0.000000e+00> : vector<16x96xf32>
    %140 = tpu.matmul %138, %139, %cst_53 {dimension_numbers = #tpu.dot_dimension_numbers<[1], [0], [0], [1], [0, 0, 1, 1], [], []>} : vector<16x32xbf16>, vector<32x96xbf16>, vector<16x96xf32> -> vector<16x96xf32>
    %141 = vector.broadcast %21 : vector<1x96xf32> to vector<16x96xf32>
    %142 = arith.addf %140, %141 : vector<16x96xf32>
    %143 = vector.extract_strided_slice %137 {offsets = [0, 0], sizes = [16, 64], strides = [1, 1]} : vector<16x96xbf16> to vector<16x64xbf16>
    %144 = arith.extf %143 : vector<16x64xbf16> to vector<16x64xf32>
    %145 = vector.extract_strided_slice %142 {offsets = [0, 0], sizes = [16, 64], strides = [1, 1]} : vector<16x96xf32> to vector<16x64xf32>
    %146 = arith.addf %144, %145 : vector<16x64xf32>
    %147 = arith.negf %146 : vector<16x64xf32>
    %148 = math.exp %147 : vector<16x64xf32>
    %cst_54 = arith.constant 1.000000e+00 : f32
    %149 = vector.broadcast %cst_54 : f32 to vector<16x64xf32>
    %150 = arith.addf %149, %148 : vector<16x64xf32>
    %151 = arith.divf %149, %150 : vector<16x64xf32>
    %152 = vector.extract_strided_slice %151 {offsets = [0, 0], sizes = [16, 32], strides = [1, 1]} : vector<16x64xf32> to vector<16x32xf32>
    %153 = vector.extract_strided_slice %151 {offsets = [0, 32], sizes = [16, 32], strides = [1, 1]} : vector<16x64xf32> to vector<16x32xf32>
    %154 = vector.extract_strided_slice %137 {offsets = [0, 64], sizes = [16, 32], strides = [1, 1]} : vector<16x96xbf16> to vector<16x32xbf16>
    %155 = arith.extf %154 : vector<16x32xbf16> to vector<16x32xf32>
    %156 = vector.extract_strided_slice %142 {offsets = [0, 64], sizes = [16, 32], strides = [1, 1]} : vector<16x96xf32> to vector<16x32xf32>
    %157 = arith.mulf %152, %156 : vector<16x32xf32>
    %158 = arith.addf %155, %157 : vector<16x32xf32>
    %159 = math.tanh %158 : vector<16x32xf32>
    %cst_55 = arith.constant 1.000000e+00 : f32
    %160 = vector.broadcast %cst_55 : f32 to vector<16x32xf32>
    %161 = arith.subf %160, %153 : vector<16x32xf32>
    %162 = arith.mulf %161, %159 : vector<16x32xf32>
    %163 = arith.mulf %153, %93 : vector<16x32xf32>
    %164 = arith.addf %162, %163 : vector<16x32xf32>
    %165 = vector.broadcast %c1_i32 : i32 to vector<16x1xi32>
    %166 = arith.cmpi sgt, %0, %165 : vector<16x1xi32>
    %167 = vector.shape_cast %166 : vector<16x1xi1> to vector<16x1xi1>
    %168 = vector.broadcast %167 : vector<16x1xi1> to vector<16x32xi1>
    %169 = arith.select %168, %134, %88 : vector<16x32xi1>, vector<16x32xf32>
    %170 = vector.broadcast %104 : i32 to vector<16x1xi32>
    %171 = arith.cmpi sgt, %0, %170 : vector<16x1xi32>
    %172 = vector.shape_cast %171 : vector<16x1xi1> to vector<16x1xi1>
    %173 = vector.broadcast %172 : vector<16x1xi1> to vector<16x32xi1>
    %174 = arith.select %173, %164, %93 : vector<16x32xi1>, vector<16x32xf32>
    %175 = arith.truncf %169 : vector<16x32xf32> to vector<16x32xbf16>
    %176 = arith.index_cast %c1_i32 : i32 to index
    %c0_56 = arith.constant 0 : index
    %c0_57 = arith.constant 0 : index
    %177 = vector.load %arg28[%176, %c0_56, %c0_57] : memref<8x16x64xbf16, #tpu.memory_space<vmem>>, vector<1x16x32xbf16>
    %178 = vector.shape_cast %177 : vector<1x16x32xbf16> to vector<16x32xbf16>
    %179 = vector.shape_cast %175 : vector<16x32xbf16> to vector<1x16x32xbf16>
    tpu.vector_store %arg28[%176, %c0_56, %c0_57], %179 {strides = array<i32>} : memref<8x16x64xbf16, #tpu.memory_space<vmem>>, vector<1x16x32xbf16>,
    %180 = arith.truncf %174 : vector<16x32xf32> to vector<16x32xbf16>
    %181 = arith.index_cast %104 : i32 to index
    %c0_58 = arith.constant 0 : index
    %c32_59 = arith.constant 32 : index
    %182 = vector.load %arg28[%181, %c0_58, %c32_59] : memref<8x16x64xbf16, #tpu.memory_space<vmem>>, vector<1x16x32xbf16>
    %183 = vector.shape_cast %182 : vector<1x16x32xbf16> to vector<16x32xbf16>
    %184 = vector.shape_cast %180 : vector<16x32xbf16> to vector<1x16x32xbf16>
    tpu.vector_store %arg28[%181, %c0_58, %c32_59], %184 {strides = array<i32>} : memref<8x16x64xbf16, #tpu.memory_space<vmem>>, vector<1x16x32xbf16>,
    %c2_i32 = arith.constant 2 : i32
    %c7_i32_60 = arith.constant 7 : i32
    %185 = arith.subi %c7_i32_60, %c2_i32 : i32
    %186 = arith.index_cast %c2_i32 : i32 to index
    %c0_61 = arith.constant 0 : index
    %c0_62 = arith.constant 0 : index
    %187 = vector.load %arg26[%186, %c0_61, %c0_62] : memref<8x16x96xbf16, #tpu.memory_space<vmem>>, vector<1x16x96xbf16>
    %188 = vector.shape_cast %187 : vector<1x16x96xbf16> to vector<16x96xbf16>
    %189 = arith.truncf %169 : vector<16x32xf32> to vector<16x32xbf16>
    %c0_63 = arith.constant 0 : index
    %c0_64 = arith.constant 0 : index
    %190 = vector.load %arg5[%c0_63, %c0_64] : memref<32x96xbf16, #tpu.memory_space<vmem>>, vector<32x96xbf16>
    %cst_65 = arith.constant dense<0.000000e+00> : vector<16x96xf32>
    %191 = tpu.matmul %189, %190, %cst_65 {dimension_numbers = #tpu.dot_dimension_numbers<[1], [0], [0], [1], [0, 0, 1, 1], [], []>} : vector<16x32xbf16>, vector<32x96xbf16>, vector<16x96xf32> -> vector<16x96xf32>
    %192 = vector.broadcast %20 : vector<1x96xf32> to vector<16x96xf32>
    %193 = arith.addf %191, %192 : vector<16x96xf32>
    %194 = vector.extract_strided_slice %188 {offsets = [0, 0], sizes = [16, 64], strides = [1, 1]} : vector<16x96xbf16> to vector<16x64xbf16>
    %195 = arith.extf %194 : vector<16x64xbf16> to vector<16x64xf32>
    %196 = vector.extract_strided_slice %193 {offsets = [0, 0], sizes = [16, 64], strides = [1, 1]} : vector<16x96xf32> to vector<16x64xf32>
    %197 = arith.addf %195, %196 : vector<16x64xf32>
    %198 = arith.negf %197 : vector<16x64xf32>
    %199 = math.exp %198 : vector<16x64xf32>
    %cst_66 = arith.constant 1.000000e+00 : f32
    %200 = vector.broadcast %cst_66 : f32 to vector<16x64xf32>
    %201 = arith.addf %200, %199 : vector<16x64xf32>
    %202 = arith.divf %200, %201 : vector<16x64xf32>
    %203 = vector.extract_strided_slice %202 {offsets = [0, 0], sizes = [16, 32], strides = [1, 1]} : vector<16x64xf32> to vector<16x32xf32>
    %204 = vector.extract_strided_slice %202 {offsets = [0, 32], sizes = [16, 32], strides = [1, 1]} : vector<16x64xf32> to vector<16x32xf32>
    %205 = vector.extract_strided_slice %188 {offsets = [0, 64], sizes = [16, 32], strides = [1, 1]} : vector<16x96xbf16> to vector<16x32xbf16>
    %206 = arith.extf %205 : vector<16x32xbf16> to vector<16x32xf32>
    %207 = vector.extract_strided_slice %193 {offsets = [0, 64], sizes = [16, 32], strides = [1, 1]} : vector<16x96xf32> to vector<16x32xf32>
    %208 = arith.mulf %203, %207 : vector<16x32xf32>
    %209 = arith.addf %206, %208 : vector<16x32xf32>
    %210 = math.tanh %209 : vector<16x32xf32>
    %cst_67 = arith.constant 1.000000e+00 : f32
    %211 = vector.broadcast %cst_67 : f32 to vector<16x32xf32>
    %212 = arith.subf %211, %204 : vector<16x32xf32>
    %213 = arith.mulf %212, %210 : vector<16x32xf32>
    %214 = arith.mulf %204, %169 : vector<16x32xf32>
    %215 = arith.addf %213, %214 : vector<16x32xf32>
    %216 = arith.index_cast %185 : i32 to index
    %c0_68 = arith.constant 0 : index
    %c0_69 = arith.constant 0 : index
    %217 = vector.load %arg27[%216, %c0_68, %c0_69] : memref<8x16x96xbf16, #tpu.memory_space<vmem>>, vector<1x16x96xbf16>
    %218 = vector.shape_cast %217 : vector<1x16x96xbf16> to vector<16x96xbf16>
    %219 = arith.truncf %174 : vector<16x32xf32> to vector<16x32xbf16>
    %c0_70 = arith.constant 0 : index
    %c0_71 = arith.constant 0 : index
    %220 = vector.load %arg9[%c0_70, %c0_71] : memref<32x96xbf16, #tpu.memory_space<vmem>>, vector<32x96xbf16>
    %cst_72 = arith.constant dense<0.000000e+00> : vector<16x96xf32>
    %221 = tpu.matmul %219, %220, %cst_72 {dimension_numbers = #tpu.dot_dimension_numbers<[1], [0], [0], [1], [0, 0, 1, 1], [], []>} : vector<16x32xbf16>, vector<32x96xbf16>, vector<16x96xf32> -> vector<16x96xf32>
    %222 = vector.broadcast %21 : vector<1x96xf32> to vector<16x96xf32>
    %223 = arith.addf %221, %222 : vector<16x96xf32>
    %224 = vector.extract_strided_slice %218 {offsets = [0, 0], sizes = [16, 64], strides = [1, 1]} : vector<16x96xbf16> to vector<16x64xbf16>
    %225 = arith.extf %224 : vector<16x64xbf16> to vector<16x64xf32>
    %226 = vector.extract_strided_slice %223 {offsets = [0, 0], sizes = [16, 64], strides = [1, 1]} : vector<16x96xf32> to vector<16x64xf32>
    %227 = arith.addf %225, %226 : vector<16x64xf32>
    %228 = arith.negf %227 : vector<16x64xf32>
    %229 = math.exp %228 : vector<16x64xf32>
    %cst_73 = arith.constant 1.000000e+00 : f32
    %230 = vector.broadcast %cst_73 : f32 to vector<16x64xf32>
    %231 = arith.addf %230, %229 : vector<16x64xf32>
    %232 = arith.divf %230, %231 : vector<16x64xf32>
    %233 = vector.extract_strided_slice %232 {offsets = [0, 0], sizes = [16, 32], strides = [1, 1]} : vector<16x64xf32> to vector<16x32xf32>
    %234 = vector.extract_strided_slice %232 {offsets = [0, 32], sizes = [16, 32], strides = [1, 1]} : vector<16x64xf32> to vector<16x32xf32>
    %235 = vector.extract_strided_slice %218 {offsets = [0, 64], sizes = [16, 32], strides = [1, 1]} : vector<16x96xbf16> to vector<16x32xbf16>
    %236 = arith.extf %235 : vector<16x32xbf16> to vector<16x32xf32>
    %237 = vector.extract_strided_slice %223 {offsets = [0, 64], sizes = [16, 32], strides = [1, 1]} : vector<16x96xf32> to vector<16x32xf32>
    %238 = arith.mulf %233, %237 : vector<16x32xf32>
    %239 = arith.addf %236, %238 : vector<16x32xf32>
    %240 = math.tanh %239 : vector<16x32xf32>
    %cst_74 = arith.constant 1.000000e+00 : f32
    %241 = vector.broadcast %cst_74 : f32 to vector<16x32xf32>
    %242 = arith.subf %241, %234 : vector<16x32xf32>
    %243 = arith.mulf %242, %240 : vector<16x32xf32>
    %244 = arith.mulf %234, %174 : vector<16x32xf32>
    %245 = arith.addf %243, %244 : vector<16x32xf32>
    %246 = vector.broadcast %c2_i32 : i32 to vector<16x1xi32>
    %247 = arith.cmpi sgt, %0, %246 : vector<16x1xi32>
    %248 = vector.shape_cast %247 : vector<16x1xi1> to vector<16x1xi1>
    %249 = vector.broadcast %248 : vector<16x1xi1> to vector<16x32xi1>
    %250 = arith.select %249, %215, %169 : vector<16x32xi1>, vector<16x32xf32>
    %251 = vector.broadcast %185 : i32 to vector<16x1xi32>
    %252 = arith.cmpi sgt, %0, %251 : vector<16x1xi32>
    %253 = vector.shape_cast %252 : vector<16x1xi1> to vector<16x1xi1>
    %254 = vector.broadcast %253 : vector<16x1xi1> to vector<16x32xi1>
    %255 = arith.select %254, %245, %174 : vector<16x32xi1>, vector<16x32xf32>
    %256 = arith.truncf %250 : vector<16x32xf32> to vector<16x32xbf16>
    %257 = arith.index_cast %c2_i32 : i32 to index
    %c0_75 = arith.constant 0 : index
    %c0_76 = arith.constant 0 : index
    %258 = vector.load %arg28[%257, %c0_75, %c0_76] : memref<8x16x64xbf16, #tpu.memory_space<vmem>>, vector<1x16x32xbf16>
    %259 = vector.shape_cast %258 : vector<1x16x32xbf16> to vector<16x32xbf16>
    %260 = vector.shape_cast %256 : vector<16x32xbf16> to vector<1x16x32xbf16>
    tpu.vector_store %arg28[%257, %c0_75, %c0_76], %260 {strides = array<i32>} : memref<8x16x64xbf16, #tpu.memory_space<vmem>>, vector<1x16x32xbf16>,
    %261 = arith.truncf %255 : vector<16x32xf32> to vector<16x32xbf16>
    %262 = arith.index_cast %185 : i32 to index
    %c0_77 = arith.constant 0 : index
    %c32_78 = arith.constant 32 : index
    %263 = vector.load %arg28[%262, %c0_77, %c32_78] : memref<8x16x64xbf16, #tpu.memory_space<vmem>>, vector<1x16x32xbf16>
    %264 = vector.shape_cast %263 : vector<1x16x32xbf16> to vector<16x32xbf16>
    %265 = vector.shape_cast %261 : vector<16x32xbf16> to vector<1x16x32xbf16>
    tpu.vector_store %arg28[%262, %c0_77, %c32_78], %265 {strides = array<i32>} : memref<8x16x64xbf16, #tpu.memory_space<vmem>>, vector<1x16x32xbf16>,
    %c3_i32 = arith.constant 3 : i32
    %c7_i32_79 = arith.constant 7 : i32
    %266 = arith.subi %c7_i32_79, %c3_i32 : i32
    %267 = arith.index_cast %c3_i32 : i32 to index
    %c0_80 = arith.constant 0 : index
    %c0_81 = arith.constant 0 : index
    %268 = vector.load %arg26[%267, %c0_80, %c0_81] : memref<8x16x96xbf16, #tpu.memory_space<vmem>>, vector<1x16x96xbf16>
    %269 = vector.shape_cast %268 : vector<1x16x96xbf16> to vector<16x96xbf16>
    %270 = arith.truncf %250 : vector<16x32xf32> to vector<16x32xbf16>
    %c0_82 = arith.constant 0 : index
    %c0_83 = arith.constant 0 : index
    %271 = vector.load %arg5[%c0_82, %c0_83] : memref<32x96xbf16, #tpu.memory_space<vmem>>, vector<32x96xbf16>
    %cst_84 = arith.constant dense<0.000000e+00> : vector<16x96xf32>
    %272 = tpu.matmul %270, %271, %cst_84 {dimension_numbers = #tpu.dot_dimension_numbers<[1], [0], [0], [1], [0, 0, 1, 1], [], []>} : vector<16x32xbf16>, vector<32x96xbf16>, vector<16x96xf32> -> vector<16x96xf32>
    %273 = vector.broadcast %20 : vector<1x96xf32> to vector<16x96xf32>
    %274 = arith.addf %272, %273 : vector<16x96xf32>
    %275 = vector.extract_strided_slice %269 {offsets = [0, 0], sizes = [16, 64], strides = [1, 1]} : vector<16x96xbf16> to vector<16x64xbf16>
    %276 = arith.extf %275 : vector<16x64xbf16> to vector<16x64xf32>
    %277 = vector.extract_strided_slice %274 {offsets = [0, 0], sizes = [16, 64], strides = [1, 1]} : vector<16x96xf32> to vector<16x64xf32>
    %278 = arith.addf %276, %277 : vector<16x64xf32>
    %279 = arith.negf %278 : vector<16x64xf32>
    %280 = math.exp %279 : vector<16x64xf32>
    %cst_85 = arith.constant 1.000000e+00 : f32
    %281 = vector.broadcast %cst_85 : f32 to vector<16x64xf32>
    %282 = arith.addf %281, %280 : vector<16x64xf32>
    %283 = arith.divf %281, %282 : vector<16x64xf32>
    %284 = vector.extract_strided_slice %283 {offsets = [0, 0], sizes = [16, 32], strides = [1, 1]} : vector<16x64xf32> to vector<16x32xf32>
    %285 = vector.extract_strided_slice %283 {offsets = [0, 32], sizes = [16, 32], strides = [1, 1]} : vector<16x64xf32> to vector<16x32xf32>
    %286 = vector.extract_strided_slice %269 {offsets = [0, 64], sizes = [16, 32], strides = [1, 1]} : vector<16x96xbf16> to vector<16x32xbf16>
    %287 = arith.extf %286 : vector<16x32xbf16> to vector<16x32xf32>
    %288 = vector.extract_strided_slice %274 {offsets = [0, 64], sizes = [16, 32], strides = [1, 1]} : vector<16x96xf32> to vector<16x32xf32>
    %289 = arith.mulf %284, %288 : vector<16x32xf32>
    %290 = arith.addf %287, %289 : vector<16x32xf32>
    %291 = math.tanh %290 : vector<16x32xf32>
    %cst_86 = arith.constant 1.000000e+00 : f32
    %292 = vector.broadcast %cst_86 : f32 to vector<16x32xf32>
    %293 = arith.subf %292, %285 : vector<16x32xf32>
    %294 = arith.mulf %293, %291 : vector<16x32xf32>
    %295 = arith.mulf %285, %250 : vector<16x32xf32>
    %296 = arith.addf %294, %295 : vector<16x32xf32>
    %297 = arith.index_cast %266 : i32 to index
    %c0_87 = arith.constant 0 : index
    %c0_88 = arith.constant 0 : index
    %298 = vector.load %arg27[%297, %c0_87, %c0_88] : memref<8x16x96xbf16, #tpu.memory_space<vmem>>, vector<1x16x96xbf16>
    %299 = vector.shape_cast %298 : vector<1x16x96xbf16> to vector<16x96xbf16>
    %300 = arith.truncf %255 : vector<16x32xf32> to vector<16x32xbf16>
    %c0_89 = arith.constant 0 : index
    %c0_90 = arith.constant 0 : index
    %301 = vector.load %arg9[%c0_89, %c0_90] : memref<32x96xbf16, #tpu.memory_space<vmem>>, vector<32x96xbf16>
    %cst_91 = arith.constant dense<0.000000e+00> : vector<16x96xf32>
    %302 = tpu.matmul %300, %301, %cst_91 {dimension_numbers = #tpu.dot_dimension_numbers<[1], [0], [0], [1], [0, 0, 1, 1], [], []>} : vector<16x32xbf16>, vector<32x96xbf16>, vector<16x96xf32> -> vector<16x96xf32>
    %303 = vector.broadcast %21 : vector<1x96xf32> to vector<16x96xf32>
    %304 = arith.addf %302, %303 : vector<16x96xf32>
    %305 = vector.extract_strided_slice %299 {offsets = [0, 0], sizes = [16, 64], strides = [1, 1]} : vector<16x96xbf16> to vector<16x64xbf16>
    %306 = arith.extf %305 : vector<16x64xbf16> to vector<16x64xf32>
    %307 = vector.extract_strided_slice %304 {offsets = [0, 0], sizes = [16, 64], strides = [1, 1]} : vector<16x96xf32> to vector<16x64xf32>
    %308 = arith.addf %306, %307 : vector<16x64xf32>
    %309 = arith.negf %308 : vector<16x64xf32>
    %310 = math.exp %309 : vector<16x64xf32>
    %cst_92 = arith.constant 1.000000e+00 : f32
    %311 = vector.broadcast %cst_92 : f32 to vector<16x64xf32>
    %312 = arith.addf %311, %310 : vector<16x64xf32>
    %313 = arith.divf %311, %312 : vector<16x64xf32>
    %314 = vector.extract_strided_slice %313 {offsets = [0, 0], sizes = [16, 32], strides = [1, 1]} : vector<16x64xf32> to vector<16x32xf32>
    %315 = vector.extract_strided_slice %313 {offsets = [0, 32], sizes = [16, 32], strides = [1, 1]} : vector<16x64xf32> to vector<16x32xf32>
    %316 = vector.extract_strided_slice %299 {offsets = [0, 64], sizes = [16, 32], strides = [1, 1]} : vector<16x96xbf16> to vector<16x32xbf16>
    %317 = arith.extf %316 : vector<16x32xbf16> to vector<16x32xf32>
    %318 = vector.extract_strided_slice %304 {offsets = [0, 64], sizes = [16, 32], strides = [1, 1]} : vector<16x96xf32> to vector<16x32xf32>
    %319 = arith.mulf %314, %318 : vector<16x32xf32>
    %320 = arith.addf %317, %319 : vector<16x32xf32>
    %321 = math.tanh %320 : vector<16x32xf32>
    %cst_93 = arith.constant 1.000000e+00 : f32
    %322 = vector.broadcast %cst_93 : f32 to vector<16x32xf32>
    %323 = arith.subf %322, %315 : vector<16x32xf32>
    %324 = arith.mulf %323, %321 : vector<16x32xf32>
    %325 = arith.mulf %315, %255 : vector<16x32xf32>
    %326 = arith.addf %324, %325 : vector<16x32xf32>
    %327 = vector.broadcast %c3_i32 : i32 to vector<16x1xi32>
    %328 = arith.cmpi sgt, %0, %327 : vector<16x1xi32>
    %329 = vector.shape_cast %328 : vector<16x1xi1> to vector<16x1xi1>
    %330 = vector.broadcast %329 : vector<16x1xi1> to vector<16x32xi1>
    %331 = arith.select %330, %296, %250 : vector<16x32xi1>, vector<16x32xf32>
    %332 = vector.broadcast %266 : i32 to vector<16x1xi32>
    %333 = arith.cmpi sgt, %0, %332 : vector<16x1xi32>
    %334 = vector.shape_cast %333 : vector<16x1xi1> to vector<16x1xi1>
    %335 = vector.broadcast %334 : vector<16x1xi1> to vector<16x32xi1>
    %336 = arith.select %335, %326, %255 : vector<16x32xi1>, vector<16x32xf32>
    %337 = arith.truncf %331 : vector<16x32xf32> to vector<16x32xbf16>
    %338 = arith.index_cast %c3_i32 : i32 to index
    %c0_94 = arith.constant 0 : index
    %c0_95 = arith.constant 0 : index
    %339 = vector.load %arg28[%338, %c0_94, %c0_95] : memref<8x16x64xbf16, #tpu.memory_space<vmem>>, vector<1x16x32xbf16>
    %340 = vector.shape_cast %339 : vector<1x16x32xbf16> to vector<16x32xbf16>
    %341 = vector.shape_cast %337 : vector<16x32xbf16> to vector<1x16x32xbf16>
    tpu.vector_store %arg28[%338, %c0_94, %c0_95], %341 {strides = array<i32>} : memref<8x16x64xbf16, #tpu.memory_space<vmem>>, vector<1x16x32xbf16>,
    %342 = arith.truncf %336 : vector<16x32xf32> to vector<16x32xbf16>
    %343 = arith.index_cast %266 : i32 to index
    %c0_96 = arith.constant 0 : index
    %c32_97 = arith.constant 32 : index
    %344 = vector.load %arg28[%343, %c0_96, %c32_97] : memref<8x16x64xbf16, #tpu.memory_space<vmem>>, vector<1x16x32xbf16>
    %345 = vector.shape_cast %344 : vector<1x16x32xbf16> to vector<16x32xbf16>
    %346 = vector.shape_cast %342 : vector<16x32xbf16> to vector<1x16x32xbf16>
    tpu.vector_store %arg28[%343, %c0_96, %c32_97], %346 {strides = array<i32>} : memref<8x16x64xbf16, #tpu.memory_space<vmem>>, vector<1x16x32xbf16>,
    %c4_i32 = arith.constant 4 : i32
    %c7_i32_98 = arith.constant 7 : i32
    %347 = arith.subi %c7_i32_98, %c4_i32 : i32
    %348 = arith.index_cast %c4_i32 : i32 to index
    %c0_99 = arith.constant 0 : index
    %c0_100 = arith.constant 0 : index
    %349 = vector.load %arg26[%348, %c0_99, %c0_100] : memref<8x16x96xbf16, #tpu.memory_space<vmem>>, vector<1x16x96xbf16>
    %350 = vector.shape_cast %349 : vector<1x16x96xbf16> to vector<16x96xbf16>
    %351 = arith.truncf %331 : vector<16x32xf32> to vector<16x32xbf16>
    %c0_101 = arith.constant 0 : index
    %c0_102 = arith.constant 0 : index
    %352 = vector.load %arg5[%c0_101, %c0_102] : memref<32x96xbf16, #tpu.memory_space<vmem>>, vector<32x96xbf16>
    %cst_103 = arith.constant dense<0.000000e+00> : vector<16x96xf32>
    %353 = tpu.matmul %351, %352, %cst_103 {dimension_numbers = #tpu.dot_dimension_numbers<[1], [0], [0], [1], [0, 0, 1, 1], [], []>} : vector<16x32xbf16>, vector<32x96xbf16>, vector<16x96xf32> -> vector<16x96xf32>
    %354 = vector.broadcast %20 : vector<1x96xf32> to vector<16x96xf32>
    %355 = arith.addf %353, %354 : vector<16x96xf32>
    %356 = vector.extract_strided_slice %350 {offsets = [0, 0], sizes = [16, 64], strides = [1, 1]} : vector<16x96xbf16> to vector<16x64xbf16>
    %357 = arith.extf %356 : vector<16x64xbf16> to vector<16x64xf32>
    %358 = vector.extract_strided_slice %355 {offsets = [0, 0], sizes = [16, 64], strides = [1, 1]} : vector<16x96xf32> to vector<16x64xf32>
    %359 = arith.addf %357, %358 : vector<16x64xf32>
    %360 = arith.negf %359 : vector<16x64xf32>
    %361 = math.exp %360 : vector<16x64xf32>
    %cst_104 = arith.constant 1.000000e+00 : f32
    %362 = vector.broadcast %cst_104 : f32 to vector<16x64xf32>
    %363 = arith.addf %362, %361 : vector<16x64xf32>
    %364 = arith.divf %362, %363 : vector<16x64xf32>
    %365 = vector.extract_strided_slice %364 {offsets = [0, 0], sizes = [16, 32], strides = [1, 1]} : vector<16x64xf32> to vector<16x32xf32>
    %366 = vector.extract_strided_slice %364 {offsets = [0, 32], sizes = [16, 32], strides = [1, 1]} : vector<16x64xf32> to vector<16x32xf32>
    %367 = vector.extract_strided_slice %350 {offsets = [0, 64], sizes = [16, 32], strides = [1, 1]} : vector<16x96xbf16> to vector<16x32xbf16>
    %368 = arith.extf %367 : vector<16x32xbf16> to vector<16x32xf32>
    %369 = vector.extract_strided_slice %355 {offsets = [0, 64], sizes = [16, 32], strides = [1, 1]} : vector<16x96xf32> to vector<16x32xf32>
    %370 = arith.mulf %365, %369 : vector<16x32xf32>
    %371 = arith.addf %368, %370 : vector<16x32xf32>
    %372 = math.tanh %371 : vector<16x32xf32>
    %cst_105 = arith.constant 1.000000e+00 : f32
    %373 = vector.broadcast %cst_105 : f32 to vector<16x32xf32>
    %374 = arith.subf %373, %366 : vector<16x32xf32>
    %375 = arith.mulf %374, %372 : vector<16x32xf32>
    %376 = arith.mulf %366, %331 : vector<16x32xf32>
    %377 = arith.addf %375, %376 : vector<16x32xf32>
    %378 = arith.index_cast %347 : i32 to index
    %c0_106 = arith.constant 0 : index
    %c0_107 = arith.constant 0 : index
    %379 = vector.load %arg27[%378, %c0_106, %c0_107] : memref<8x16x96xbf16, #tpu.memory_space<vmem>>, vector<1x16x96xbf16>
    %380 = vector.shape_cast %379 : vector<1x16x96xbf16> to vector<16x96xbf16>
    %381 = arith.truncf %336 : vector<16x32xf32> to vector<16x32xbf16>
    %c0_108 = arith.constant 0 : index
    %c0_109 = arith.constant 0 : index
    %382 = vector.load %arg9[%c0_108, %c0_109] : memref<32x96xbf16, #tpu.memory_space<vmem>>, vector<32x96xbf16>
    %cst_110 = arith.constant dense<0.000000e+00> : vector<16x96xf32>
    %383 = tpu.matmul %381, %382, %cst_110 {dimension_numbers = #tpu.dot_dimension_numbers<[1], [0], [0], [1], [0, 0, 1, 1], [], []>} : vector<16x32xbf16>, vector<32x96xbf16>, vector<16x96xf32> -> vector<16x96xf32>
    %384 = vector.broadcast %21 : vector<1x96xf32> to vector<16x96xf32>
    %385 = arith.addf %383, %384 : vector<16x96xf32>
    %386 = vector.extract_strided_slice %380 {offsets = [0, 0], sizes = [16, 64], strides = [1, 1]} : vector<16x96xbf16> to vector<16x64xbf16>
    %387 = arith.extf %386 : vector<16x64xbf16> to vector<16x64xf32>
    %388 = vector.extract_strided_slice %385 {offsets = [0, 0], sizes = [16, 64], strides = [1, 1]} : vector<16x96xf32> to vector<16x64xf32>
    %389 = arith.addf %387, %388 : vector<16x64xf32>
    %390 = arith.negf %389 : vector<16x64xf32>
    %391 = math.exp %390 : vector<16x64xf32>
    %cst_111 = arith.constant 1.000000e+00 : f32
    %392 = vector.broadcast %cst_111 : f32 to vector<16x64xf32>
    %393 = arith.addf %392, %391 : vector<16x64xf32>
    %394 = arith.divf %392, %393 : vector<16x64xf32>
    %395 = vector.extract_strided_slice %394 {offsets = [0, 0], sizes = [16, 32], strides = [1, 1]} : vector<16x64xf32> to vector<16x32xf32>
    %396 = vector.extract_strided_slice %394 {offsets = [0, 32], sizes = [16, 32], strides = [1, 1]} : vector<16x64xf32> to vector<16x32xf32>
    %397 = vector.extract_strided_slice %380 {offsets = [0, 64], sizes = [16, 32], strides = [1, 1]} : vector<16x96xbf16> to vector<16x32xbf16>
    %398 = arith.extf %397 : vector<16x32xbf16> to vector<16x32xf32>
    %399 = vector.extract_strided_slice %385 {offsets = [0, 64], sizes = [16, 32], strides = [1, 1]} : vector<16x96xf32> to vector<16x32xf32>
    %400 = arith.mulf %395, %399 : vector<16x32xf32>
    %401 = arith.addf %398, %400 : vector<16x32xf32>
    %402 = math.tanh %401 : vector<16x32xf32>
    %cst_112 = arith.constant 1.000000e+00 : f32
    %403 = vector.broadcast %cst_112 : f32 to vector<16x32xf32>
    %404 = arith.subf %403, %396 : vector<16x32xf32>
    %405 = arith.mulf %404, %402 : vector<16x32xf32>
    %406 = arith.mulf %396, %336 : vector<16x32xf32>
    %407 = arith.addf %405, %406 : vector<16x32xf32>
    %408 = vector.broadcast %c4_i32 : i32 to vector<16x1xi32>
    %409 = arith.cmpi sgt, %0, %408 : vector<16x1xi32>
    %410 = vector.shape_cast %409 : vector<16x1xi1> to vector<16x1xi1>
    %411 = vector.broadcast %410 : vector<16x1xi1> to vector<16x32xi1>
    %412 = arith.select %411, %377, %331 : vector<16x32xi1>, vector<16x32xf32>
    %413 = vector.broadcast %347 : i32 to vector<16x1xi32>
    %414 = arith.cmpi sgt, %0, %413 : vector<16x1xi32>
    %415 = vector.shape_cast %414 : vector<16x1xi1> to vector<16x1xi1>
    %416 = vector.broadcast %415 : vector<16x1xi1> to vector<16x32xi1>
    %417 = arith.select %416, %407, %336 : vector<16x32xi1>, vector<16x32xf32>
    %418 = arith.truncf %412 : vector<16x32xf32> to vector<16x32xbf16>
    %419 = arith.index_cast %c4_i32 : i32 to index
    %c0_113 = arith.constant 0 : index
    %c0_114 = arith.constant 0 : index
    %420 = vector.load %arg28[%419, %c0_113, %c0_114] : memref<8x16x64xbf16, #tpu.memory_space<vmem>>, vector<1x16x32xbf16>
    %421 = vector.shape_cast %420 : vector<1x16x32xbf16> to vector<16x32xbf16>
    %422 = vector.shape_cast %418 : vector<16x32xbf16> to vector<1x16x32xbf16>
    tpu.vector_store %arg28[%419, %c0_113, %c0_114], %422 {strides = array<i32>} : memref<8x16x64xbf16, #tpu.memory_space<vmem>>, vector<1x16x32xbf16>,
    %423 = arith.truncf %417 : vector<16x32xf32> to vector<16x32xbf16>
    %424 = arith.index_cast %347 : i32 to index
    %c0_115 = arith.constant 0 : index
    %c32_116 = arith.constant 32 : index
    %425 = vector.load %arg28[%424, %c0_115, %c32_116] : memref<8x16x64xbf16, #tpu.memory_space<vmem>>, vector<1x16x32xbf16>
    %426 = vector.shape_cast %425 : vector<1x16x32xbf16> to vector<16x32xbf16>
    %427 = vector.shape_cast %423 : vector<16x32xbf16> to vector<1x16x32xbf16>
    tpu.vector_store %arg28[%424, %c0_115, %c32_116], %427 {strides = array<i32>} : memref<8x16x64xbf16, #tpu.memory_space<vmem>>, vector<1x16x32xbf16>,
    %c5_i32 = arith.constant 5 : i32
    %c7_i32_117 = arith.constant 7 : i32
    %428 = arith.subi %c7_i32_117, %c5_i32 : i32
    %429 = arith.index_cast %c5_i32 : i32 to index
    %c0_118 = arith.constant 0 : index
    %c0_119 = arith.constant 0 : index
    %430 = vector.load %arg26[%429, %c0_118, %c0_119] : memref<8x16x96xbf16, #tpu.memory_space<vmem>>, vector<1x16x96xbf16>
    %431 = vector.shape_cast %430 : vector<1x16x96xbf16> to vector<16x96xbf16>
    %432 = arith.truncf %412 : vector<16x32xf32> to vector<16x32xbf16>
    %c0_120 = arith.constant 0 : index
    %c0_121 = arith.constant 0 : index
    %433 = vector.load %arg5[%c0_120, %c0_121] : memref<32x96xbf16, #tpu.memory_space<vmem>>, vector<32x96xbf16>
    %cst_122 = arith.constant dense<0.000000e+00> : vector<16x96xf32>
    %434 = tpu.matmul %432, %433, %cst_122 {dimension_numbers = #tpu.dot_dimension_numbers<[1], [0], [0], [1], [0, 0, 1, 1], [], []>} : vector<16x32xbf16>, vector<32x96xbf16>, vector<16x96xf32> -> vector<16x96xf32>
    %435 = vector.broadcast %20 : vector<1x96xf32> to vector<16x96xf32>
    %436 = arith.addf %434, %435 : vector<16x96xf32>
    %437 = vector.extract_strided_slice %431 {offsets = [0, 0], sizes = [16, 64], strides = [1, 1]} : vector<16x96xbf16> to vector<16x64xbf16>
    %438 = arith.extf %437 : vector<16x64xbf16> to vector<16x64xf32>
    %439 = vector.extract_strided_slice %436 {offsets = [0, 0], sizes = [16, 64], strides = [1, 1]} : vector<16x96xf32> to vector<16x64xf32>
    %440 = arith.addf %438, %439 : vector<16x64xf32>
    %441 = arith.negf %440 : vector<16x64xf32>
    %442 = math.exp %441 : vector<16x64xf32>
    %cst_123 = arith.constant 1.000000e+00 : f32
    %443 = vector.broadcast %cst_123 : f32 to vector<16x64xf32>
    %444 = arith.addf %443, %442 : vector<16x64xf32>
    %445 = arith.divf %443, %444 : vector<16x64xf32>
    %446 = vector.extract_strided_slice %445 {offsets = [0, 0], sizes = [16, 32], strides = [1, 1]} : vector<16x64xf32> to vector<16x32xf32>
    %447 = vector.extract_strided_slice %445 {offsets = [0, 32], sizes = [16, 32], strides = [1, 1]} : vector<16x64xf32> to vector<16x32xf32>
    %448 = vector.extract_strided_slice %431 {offsets = [0, 64], sizes = [16, 32], strides = [1, 1]} : vector<16x96xbf16> to vector<16x32xbf16>
    %449 = arith.extf %448 : vector<16x32xbf16> to vector<16x32xf32>
    %450 = vector.extract_strided_slice %436 {offsets = [0, 64], sizes = [16, 32], strides = [1, 1]} : vector<16x96xf32> to vector<16x32xf32>
    %451 = arith.mulf %446, %450 : vector<16x32xf32>
    %452 = arith.addf %449, %451 : vector<16x32xf32>
    %453 = math.tanh %452 : vector<16x32xf32>
    %cst_124 = arith.constant 1.000000e+00 : f32
    %454 = vector.broadcast %cst_124 : f32 to vector<16x32xf32>
    %455 = arith.subf %454, %447 : vector<16x32xf32>
    %456 = arith.mulf %455, %453 : vector<16x32xf32>
    %457 = arith.mulf %447, %412 : vector<16x32xf32>
    %458 = arith.addf %456, %457 : vector<16x32xf32>
    %459 = arith.index_cast %428 : i32 to index
    %c0_125 = arith.constant 0 : index
    %c0_126 = arith.constant 0 : index
    %460 = vector.load %arg27[%459, %c0_125, %c0_126] : memref<8x16x96xbf16, #tpu.memory_space<vmem>>, vector<1x16x96xbf16>
    %461 = vector.shape_cast %460 : vector<1x16x96xbf16> to vector<16x96xbf16>
    %462 = arith.truncf %417 : vector<16x32xf32> to vector<16x32xbf16>
    %c0_127 = arith.constant 0 : index
    %c0_128 = arith.constant 0 : index
    %463 = vector.load %arg9[%c0_127, %c0_128] : memref<32x96xbf16, #tpu.memory_space<vmem>>, vector<32x96xbf16>
    %cst_129 = arith.constant dense<0.000000e+00> : vector<16x96xf32>
    %464 = tpu.matmul %462, %463, %cst_129 {dimension_numbers = #tpu.dot_dimension_numbers<[1], [0], [0], [1], [0, 0, 1, 1], [], []>} : vector<16x32xbf16>, vector<32x96xbf16>, vector<16x96xf32> -> vector<16x96xf32>
    %465 = vector.broadcast %21 : vector<1x96xf32> to vector<16x96xf32>
    %466 = arith.addf %464, %465 : vector<16x96xf32>
    %467 = vector.extract_strided_slice %461 {offsets = [0, 0], sizes = [16, 64], strides = [1, 1]} : vector<16x96xbf16> to vector<16x64xbf16>
    %468 = arith.extf %467 : vector<16x64xbf16> to vector<16x64xf32>
    %469 = vector.extract_strided_slice %466 {offsets = [0, 0], sizes = [16, 64], strides = [1, 1]} : vector<16x96xf32> to vector<16x64xf32>
    %470 = arith.addf %468, %469 : vector<16x64xf32>
    %471 = arith.negf %470 : vector<16x64xf32>
    %472 = math.exp %471 : vector<16x64xf32>
    %cst_130 = arith.constant 1.000000e+00 : f32
    %473 = vector.broadcast %cst_130 : f32 to vector<16x64xf32>
    %474 = arith.addf %473, %472 : vector<16x64xf32>
    %475 = arith.divf %473, %474 : vector<16x64xf32>
    %476 = vector.extract_strided_slice %475 {offsets = [0, 0], sizes = [16, 32], strides = [1, 1]} : vector<16x64xf32> to vector<16x32xf32>
    %477 = vector.extract_strided_slice %475 {offsets = [0, 32], sizes = [16, 32], strides = [1, 1]} : vector<16x64xf32> to vector<16x32xf32>
    %478 = vector.extract_strided_slice %461 {offsets = [0, 64], sizes = [16, 32], strides = [1, 1]} : vector<16x96xbf16> to vector<16x32xbf16>
    %479 = arith.extf %478 : vector<16x32xbf16> to vector<16x32xf32>
    %480 = vector.extract_strided_slice %466 {offsets = [0, 64], sizes = [16, 32], strides = [1, 1]} : vector<16x96xf32> to vector<16x32xf32>
    %481 = arith.mulf %476, %480 : vector<16x32xf32>
    %482 = arith.addf %479, %481 : vector<16x32xf32>
    %483 = math.tanh %482 : vector<16x32xf32>
    %cst_131 = arith.constant 1.000000e+00 : f32
    %484 = vector.broadcast %cst_131 : f32 to vector<16x32xf32>
    %485 = arith.subf %484, %477 : vector<16x32xf32>
    %486 = arith.mulf %485, %483 : vector<16x32xf32>
    %487 = arith.mulf %477, %417 : vector<16x32xf32>
    %488 = arith.addf %486, %487 : vector<16x32xf32>
    %489 = vector.broadcast %c5_i32 : i32 to vector<16x1xi32>
    %490 = arith.cmpi sgt, %0, %489 : vector<16x1xi32>
    %491 = vector.shape_cast %490 : vector<16x1xi1> to vector<16x1xi1>
    %492 = vector.broadcast %491 : vector<16x1xi1> to vector<16x32xi1>
    %493 = arith.select %492, %458, %412 : vector<16x32xi1>, vector<16x32xf32>
    %494 = vector.broadcast %428 : i32 to vector<16x1xi32>
    %495 = arith.cmpi sgt, %0, %494 : vector<16x1xi32>
    %496 = vector.shape_cast %495 : vector<16x1xi1> to vector<16x1xi1>
    %497 = vector.broadcast %496 : vector<16x1xi1> to vector<16x32xi1>
    %498 = arith.select %497, %488, %417 : vector<16x32xi1>, vector<16x32xf32>
    %499 = arith.truncf %493 : vector<16x32xf32> to vector<16x32xbf16>
    %500 = arith.index_cast %c5_i32 : i32 to index
    %c0_132 = arith.constant 0 : index
    %c0_133 = arith.constant 0 : index
    %501 = vector.load %arg28[%500, %c0_132, %c0_133] : memref<8x16x64xbf16, #tpu.memory_space<vmem>>, vector<1x16x32xbf16>
    %502 = vector.shape_cast %501 : vector<1x16x32xbf16> to vector<16x32xbf16>
    %503 = vector.shape_cast %499 : vector<16x32xbf16> to vector<1x16x32xbf16>
    tpu.vector_store %arg28[%500, %c0_132, %c0_133], %503 {strides = array<i32>} : memref<8x16x64xbf16, #tpu.memory_space<vmem>>, vector<1x16x32xbf16>,
    %504 = arith.truncf %498 : vector<16x32xf32> to vector<16x32xbf16>
    %505 = arith.index_cast %428 : i32 to index
    %c0_134 = arith.constant 0 : index
    %c32_135 = arith.constant 32 : index
    %506 = vector.load %arg28[%505, %c0_134, %c32_135] : memref<8x16x64xbf16, #tpu.memory_space<vmem>>, vector<1x16x32xbf16>
    %507 = vector.shape_cast %506 : vector<1x16x32xbf16> to vector<16x32xbf16>
    %508 = vector.shape_cast %504 : vector<16x32xbf16> to vector<1x16x32xbf16>
    tpu.vector_store %arg28[%505, %c0_134, %c32_135], %508 {strides = array<i32>} : memref<8x16x64xbf16, #tpu.memory_space<vmem>>, vector<1x16x32xbf16>,
    %c6_i32 = arith.constant 6 : i32
    %c7_i32_136 = arith.constant 7 : i32
    %509 = arith.subi %c7_i32_136, %c6_i32 : i32
    %510 = arith.index_cast %c6_i32 : i32 to index
    %c0_137 = arith.constant 0 : index
    %c0_138 = arith.constant 0 : index
    %511 = vector.load %arg26[%510, %c0_137, %c0_138] : memref<8x16x96xbf16, #tpu.memory_space<vmem>>, vector<1x16x96xbf16>
    %512 = vector.shape_cast %511 : vector<1x16x96xbf16> to vector<16x96xbf16>
    %513 = arith.truncf %493 : vector<16x32xf32> to vector<16x32xbf16>
    %c0_139 = arith.constant 0 : index
    %c0_140 = arith.constant 0 : index
    %514 = vector.load %arg5[%c0_139, %c0_140] : memref<32x96xbf16, #tpu.memory_space<vmem>>, vector<32x96xbf16>
    %cst_141 = arith.constant dense<0.000000e+00> : vector<16x96xf32>
    %515 = tpu.matmul %513, %514, %cst_141 {dimension_numbers = #tpu.dot_dimension_numbers<[1], [0], [0], [1], [0, 0, 1, 1], [], []>} : vector<16x32xbf16>, vector<32x96xbf16>, vector<16x96xf32> -> vector<16x96xf32>
    %516 = vector.broadcast %20 : vector<1x96xf32> to vector<16x96xf32>
    %517 = arith.addf %515, %516 : vector<16x96xf32>
    %518 = vector.extract_strided_slice %512 {offsets = [0, 0], sizes = [16, 64], strides = [1, 1]} : vector<16x96xbf16> to vector<16x64xbf16>
    %519 = arith.extf %518 : vector<16x64xbf16> to vector<16x64xf32>
    %520 = vector.extract_strided_slice %517 {offsets = [0, 0], sizes = [16, 64], strides = [1, 1]} : vector<16x96xf32> to vector<16x64xf32>
    %521 = arith.addf %519, %520 : vector<16x64xf32>
    %522 = arith.negf %521 : vector<16x64xf32>
    %523 = math.exp %522 : vector<16x64xf32>
    %cst_142 = arith.constant 1.000000e+00 : f32
    %524 = vector.broadcast %cst_142 : f32 to vector<16x64xf32>
    %525 = arith.addf %524, %523 : vector<16x64xf32>
    %526 = arith.divf %524, %525 : vector<16x64xf32>
    %527 = vector.extract_strided_slice %526 {offsets = [0, 0], sizes = [16, 32], strides = [1, 1]} : vector<16x64xf32> to vector<16x32xf32>
    %528 = vector.extract_strided_slice %526 {offsets = [0, 32], sizes = [16, 32], strides = [1, 1]} : vector<16x64xf32> to vector<16x32xf32>
    %529 = vector.extract_strided_slice %512 {offsets = [0, 64], sizes = [16, 32], strides = [1, 1]} : vector<16x96xbf16> to vector<16x32xbf16>
    %530 = arith.extf %529 : vector<16x32xbf16> to vector<16x32xf32>
    %531 = vector.extract_strided_slice %517 {offsets = [0, 64], sizes = [16, 32], strides = [1, 1]} : vector<16x96xf32> to vector<16x32xf32>
    %532 = arith.mulf %527, %531 : vector<16x32xf32>
    %533 = arith.addf %530, %532 : vector<16x32xf32>
    %534 = math.tanh %533 : vector<16x32xf32>
    %cst_143 = arith.constant 1.000000e+00 : f32
    %535 = vector.broadcast %cst_143 : f32 to vector<16x32xf32>
    %536 = arith.subf %535, %528 : vector<16x32xf32>
    %537 = arith.mulf %536, %534 : vector<16x32xf32>
    %538 = arith.mulf %528, %493 : vector<16x32xf32>
    %539 = arith.addf %537, %538 : vector<16x32xf32>
    %540 = arith.index_cast %509 : i32 to index
    %c0_144 = arith.constant 0 : index
    %c0_145 = arith.constant 0 : index
    %541 = vector.load %arg27[%540, %c0_144, %c0_145] : memref<8x16x96xbf16, #tpu.memory_space<vmem>>, vector<1x16x96xbf16>
    %542 = vector.shape_cast %541 : vector<1x16x96xbf16> to vector<16x96xbf16>
    %543 = arith.truncf %498 : vector<16x32xf32> to vector<16x32xbf16>
    %c0_146 = arith.constant 0 : index
    %c0_147 = arith.constant 0 : index
    %544 = vector.load %arg9[%c0_146, %c0_147] : memref<32x96xbf16, #tpu.memory_space<vmem>>, vector<32x96xbf16>
    %cst_148 = arith.constant dense<0.000000e+00> : vector<16x96xf32>
    %545 = tpu.matmul %543, %544, %cst_148 {dimension_numbers = #tpu.dot_dimension_numbers<[1], [0], [0], [1], [0, 0, 1, 1], [], []>} : vector<16x32xbf16>, vector<32x96xbf16>, vector<16x96xf32> -> vector<16x96xf32>
    %546 = vector.broadcast %21 : vector<1x96xf32> to vector<16x96xf32>
    %547 = arith.addf %545, %546 : vector<16x96xf32>
    %548 = vector.extract_strided_slice %542 {offsets = [0, 0], sizes = [16, 64], strides = [1, 1]} : vector<16x96xbf16> to vector<16x64xbf16>
    %549 = arith.extf %548 : vector<16x64xbf16> to vector<16x64xf32>
    %550 = vector.extract_strided_slice %547 {offsets = [0, 0], sizes = [16, 64], strides = [1, 1]} : vector<16x96xf32> to vector<16x64xf32>
    %551 = arith.addf %549, %550 : vector<16x64xf32>
    %552 = arith.negf %551 : vector<16x64xf32>
    %553 = math.exp %552 : vector<16x64xf32>
    %cst_149 = arith.constant 1.000000e+00 : f32
    %554 = vector.broadcast %cst_149 : f32 to vector<16x64xf32>
    %555 = arith.addf %554, %553 : vector<16x64xf32>
    %556 = arith.divf %554, %555 : vector<16x64xf32>
    %557 = vector.extract_strided_slice %556 {offsets = [0, 0], sizes = [16, 32], strides = [1, 1]} : vector<16x64xf32> to vector<16x32xf32>
    %558 = vector.extract_strided_slice %556 {offsets = [0, 32], sizes = [16, 32], strides = [1, 1]} : vector<16x64xf32> to vector<16x32xf32>
    %559 = vector.extract_strided_slice %542 {offsets = [0, 64], sizes = [16, 32], strides = [1, 1]} : vector<16x96xbf16> to vector<16x32xbf16>
    %560 = arith.extf %559 : vector<16x32xbf16> to vector<16x32xf32>
    %561 = vector.extract_strided_slice %547 {offsets = [0, 64], sizes = [16, 32], strides = [1, 1]} : vector<16x96xf32> to vector<16x32xf32>
    %562 = arith.mulf %557, %561 : vector<16x32xf32>
    %563 = arith.addf %560, %562 : vector<16x32xf32>
    %564 = math.tanh %563 : vector<16x32xf32>
    %cst_150 = arith.constant 1.000000e+00 : f32
    %565 = vector.broadcast %cst_150 : f32 to vector<16x32xf32>
    %566 = arith.subf %565, %558 : vector<16x32xf32>
    %567 = arith.mulf %566, %564 : vector<16x32xf32>
    %568 = arith.mulf %558, %498 : vector<16x32xf32>
    %569 = arith.addf %567, %568 : vector<16x32xf32>
    %570 = vector.broadcast %c6_i32 : i32 to vector<16x1xi32>
    %571 = arith.cmpi sgt, %0, %570 : vector<16x1xi32>
    %572 = vector.shape_cast %571 : vector<16x1xi1> to vector<16x1xi1>
    %573 = vector.broadcast %572 : vector<16x1xi1> to vector<16x32xi1>
    %574 = arith.select %573, %539, %493 : vector<16x32xi1>, vector<16x32xf32>
    %575 = vector.broadcast %509 : i32 to vector<16x1xi32>
    %576 = arith.cmpi sgt, %0, %575 : vector<16x1xi32>
    %577 = vector.shape_cast %576 : vector<16x1xi1> to vector<16x1xi1>
    %578 = vector.broadcast %577 : vector<16x1xi1> to vector<16x32xi1>
    %579 = arith.select %578, %569, %498 : vector<16x32xi1>, vector<16x32xf32>
    %580 = arith.truncf %574 : vector<16x32xf32> to vector<16x32xbf16>
    %581 = arith.index_cast %c6_i32 : i32 to index
    %c0_151 = arith.constant 0 : index
    %c0_152 = arith.constant 0 : index
    %582 = vector.load %arg28[%581, %c0_151, %c0_152] : memref<8x16x64xbf16, #tpu.memory_space<vmem>>, vector<1x16x32xbf16>
    %583 = vector.shape_cast %582 : vector<1x16x32xbf16> to vector<16x32xbf16>
    %584 = vector.shape_cast %580 : vector<16x32xbf16> to vector<1x16x32xbf16>
    tpu.vector_store %arg28[%581, %c0_151, %c0_152], %584 {strides = array<i32>} : memref<8x16x64xbf16, #tpu.memory_space<vmem>>, vector<1x16x32xbf16>,
    %585 = arith.truncf %579 : vector<16x32xf32> to vector<16x32xbf16>
    %586 = arith.index_cast %509 : i32 to index
    %c0_153 = arith.constant 0 : index
    %c32_154 = arith.constant 32 : index
    %587 = vector.load %arg28[%586, %c0_153, %c32_154] : memref<8x16x64xbf16, #tpu.memory_space<vmem>>, vector<1x16x32xbf16>
    %588 = vector.shape_cast %587 : vector<1x16x32xbf16> to vector<16x32xbf16>
    %589 = vector.shape_cast %585 : vector<16x32xbf16> to vector<1x16x32xbf16>
    tpu.vector_store %arg28[%586, %c0_153, %c32_154], %589 {strides = array<i32>} : memref<8x16x64xbf16, #tpu.memory_space<vmem>>, vector<1x16x32xbf16>,
    %c7_i32_155 = arith.constant 7 : i32
    %c7_i32_156 = arith.constant 7 : i32
    %590 = arith.subi %c7_i32_156, %c7_i32_155 : i32
    %591 = arith.index_cast %c7_i32_155 : i32 to index
    %c0_157 = arith.constant 0 : index
    %c0_158 = arith.constant 0 : index
    %592 = vector.load %arg26[%591, %c0_157, %c0_158] : memref<8x16x96xbf16, #tpu.memory_space<vmem>>, vector<1x16x96xbf16>
    %593 = vector.shape_cast %592 : vector<1x16x96xbf16> to vector<16x96xbf16>
    %594 = arith.truncf %574 : vector<16x32xf32> to vector<16x32xbf16>
    %c0_159 = arith.constant 0 : index
    %c0_160 = arith.constant 0 : index
    %595 = vector.load %arg5[%c0_159, %c0_160] : memref<32x96xbf16, #tpu.memory_space<vmem>>, vector<32x96xbf16>
    %cst_161 = arith.constant dense<0.000000e+00> : vector<16x96xf32>
    %596 = tpu.matmul %594, %595, %cst_161 {dimension_numbers = #tpu.dot_dimension_numbers<[1], [0], [0], [1], [0, 0, 1, 1], [], []>} : vector<16x32xbf16>, vector<32x96xbf16>, vector<16x96xf32> -> vector<16x96xf32>
    %597 = vector.broadcast %20 : vector<1x96xf32> to vector<16x96xf32>
    %598 = arith.addf %596, %597 : vector<16x96xf32>
    %599 = vector.extract_strided_slice %593 {offsets = [0, 0], sizes = [16, 64], strides = [1, 1]} : vector<16x96xbf16> to vector<16x64xbf16>
    %600 = arith.extf %599 : vector<16x64xbf16> to vector<16x64xf32>
    %601 = vector.extract_strided_slice %598 {offsets = [0, 0], sizes = [16, 64], strides = [1, 1]} : vector<16x96xf32> to vector<16x64xf32>
    %602 = arith.addf %600, %601 : vector<16x64xf32>
    %603 = arith.negf %602 : vector<16x64xf32>
    %604 = math.exp %603 : vector<16x64xf32>
    %cst_162 = arith.constant 1.000000e+00 : f32
    %605 = vector.broadcast %cst_162 : f32 to vector<16x64xf32>
    %606 = arith.addf %605, %604 : vector<16x64xf32>
    %607 = arith.divf %605, %606 : vector<16x64xf32>
    %608 = vector.extract_strided_slice %607 {offsets = [0, 0], sizes = [16, 32], strides = [1, 1]} : vector<16x64xf32> to vector<16x32xf32>
    %609 = vector.extract_strided_slice %607 {offsets = [0, 32], sizes = [16, 32], strides = [1, 1]} : vector<16x64xf32> to vector<16x32xf32>
    %610 = vector.extract_strided_slice %593 {offsets = [0, 64], sizes = [16, 32], strides = [1, 1]} : vector<16x96xbf16> to vector<16x32xbf16>
    %611 = arith.extf %610 : vector<16x32xbf16> to vector<16x32xf32>
    %612 = vector.extract_strided_slice %598 {offsets = [0, 64], sizes = [16, 32], strides = [1, 1]} : vector<16x96xf32> to vector<16x32xf32>
    %613 = arith.mulf %608, %612 : vector<16x32xf32>
    %614 = arith.addf %611, %613 : vector<16x32xf32>
    %615 = math.tanh %614 : vector<16x32xf32>
    %cst_163 = arith.constant 1.000000e+00 : f32
    %616 = vector.broadcast %cst_163 : f32 to vector<16x32xf32>
    %617 = arith.subf %616, %609 : vector<16x32xf32>
    %618 = arith.mulf %617, %615 : vector<16x32xf32>
    %619 = arith.mulf %609, %574 : vector<16x32xf32>
    %620 = arith.addf %618, %619 : vector<16x32xf32>
    %621 = arith.index_cast %590 : i32 to index
    %c0_164 = arith.constant 0 : index
    %c0_165 = arith.constant 0 : index
    %622 = vector.load %arg27[%621, %c0_164, %c0_165] : memref<8x16x96xbf16, #tpu.memory_space<vmem>>, vector<1x16x96xbf16>
    %623 = vector.shape_cast %622 : vector<1x16x96xbf16> to vector<16x96xbf16>
    %624 = arith.truncf %579 : vector<16x32xf32> to vector<16x32xbf16>
    %c0_166 = arith.constant 0 : index
    %c0_167 = arith.constant 0 : index
    %625 = vector.load %arg9[%c0_166, %c0_167] : memref<32x96xbf16, #tpu.memory_space<vmem>>, vector<32x96xbf16>
    %cst_168 = arith.constant dense<0.000000e+00> : vector<16x96xf32>
    %626 = tpu.matmul %624, %625, %cst_168 {dimension_numbers = #tpu.dot_dimension_numbers<[1], [0], [0], [1], [0, 0, 1, 1], [], []>} : vector<16x32xbf16>, vector<32x96xbf16>, vector<16x96xf32> -> vector<16x96xf32>
    %627 = vector.broadcast %21 : vector<1x96xf32> to vector<16x96xf32>
    %628 = arith.addf %626, %627 : vector<16x96xf32>
    %629 = vector.extract_strided_slice %623 {offsets = [0, 0], sizes = [16, 64], strides = [1, 1]} : vector<16x96xbf16> to vector<16x64xbf16>
    %630 = arith.extf %629 : vector<16x64xbf16> to vector<16x64xf32>
    %631 = vector.extract_strided_slice %628 {offsets = [0, 0], sizes = [16, 64], strides = [1, 1]} : vector<16x96xf32> to vector<16x64xf32>
    %632 = arith.addf %630, %631 : vector<16x64xf32>
    %633 = arith.negf %632 : vector<16x64xf32>
    %634 = math.exp %633 : vector<16x64xf32>
    %cst_169 = arith.constant 1.000000e+00 : f32
    %635 = vector.broadcast %cst_169 : f32 to vector<16x64xf32>
    %636 = arith.addf %635, %634 : vector<16x64xf32>
    %637 = arith.divf %635, %636 : vector<16x64xf32>
    %638 = vector.extract_strided_slice %637 {offsets = [0, 0], sizes = [16, 32], strides = [1, 1]} : vector<16x64xf32> to vector<16x32xf32>
    %639 = vector.extract_strided_slice %637 {offsets = [0, 32], sizes = [16, 32], strides = [1, 1]} : vector<16x64xf32> to vector<16x32xf32>
    %640 = vector.extract_strided_slice %623 {offsets = [0, 64], sizes = [16, 32], strides = [1, 1]} : vector<16x96xbf16> to vector<16x32xbf16>
    %641 = arith.extf %640 : vector<16x32xbf16> to vector<16x32xf32>
    %642 = vector.extract_strided_slice %628 {offsets = [0, 64], sizes = [16, 32], strides = [1, 1]} : vector<16x96xf32> to vector<16x32xf32>
    %643 = arith.mulf %638, %642 : vector<16x32xf32>
    %644 = arith.addf %641, %643 : vector<16x32xf32>
    %645 = math.tanh %644 : vector<16x32xf32>
    %cst_170 = arith.constant 1.000000e+00 : f32
    %646 = vector.broadcast %cst_170 : f32 to vector<16x32xf32>
    %647 = arith.subf %646, %639 : vector<16x32xf32>
    %648 = arith.mulf %647, %645 : vector<16x32xf32>
    %649 = arith.mulf %639, %579 : vector<16x32xf32>
    %650 = arith.addf %648, %649 : vector<16x32xf32>
    %651 = vector.broadcast %c7_i32_155 : i32 to vector<16x1xi32>
    %652 = arith.cmpi sgt, %0, %651 : vector<16x1xi32>
    %653 = vector.shape_cast %652 : vector<16x1xi1> to vector<16x1xi1>
    %654 = vector.broadcast %653 : vector<16x1xi1> to vector<16x32xi1>
    %655 = arith.select %654, %620, %574 : vector<16x32xi1>, vector<16x32xf32>
    %656 = vector.broadcast %590 : i32 to vector<16x1xi32>
    %657 = arith.cmpi sgt, %0, %656 : vector<16x1xi32>
    %658 = vector.shape_cast %657 : vector<16x1xi1> to vector<16x1xi1>
    %659 = vector.broadcast %658 : vector<16x1xi1> to vector<16x32xi1>
    %660 = arith.select %659, %650, %579 : vector<16x32xi1>, vector<16x32xf32>
    %661 = arith.truncf %655 : vector<16x32xf32> to vector<16x32xbf16>
    %662 = arith.index_cast %c7_i32_155 : i32 to index
    %c0_171 = arith.constant 0 : index
    %c0_172 = arith.constant 0 : index
    %663 = vector.load %arg28[%662, %c0_171, %c0_172] : memref<8x16x64xbf16, #tpu.memory_space<vmem>>, vector<1x16x32xbf16>
    %664 = vector.shape_cast %663 : vector<1x16x32xbf16> to vector<16x32xbf16>
    %665 = vector.shape_cast %661 : vector<16x32xbf16> to vector<1x16x32xbf16>
    tpu.vector_store %arg28[%662, %c0_171, %c0_172], %665 {strides = array<i32>} : memref<8x16x64xbf16, #tpu.memory_space<vmem>>, vector<1x16x32xbf16>,
    %666 = arith.truncf %660 : vector<16x32xf32> to vector<16x32xbf16>
    %667 = arith.index_cast %590 : i32 to index
    %c0_173 = arith.constant 0 : index
    %c32_174 = arith.constant 32 : index
    %668 = vector.load %arg28[%667, %c0_173, %c32_174] : memref<8x16x64xbf16, #tpu.memory_space<vmem>>, vector<1x16x32xbf16>
    %669 = vector.shape_cast %668 : vector<1x16x32xbf16> to vector<16x32xbf16>
    %670 = vector.shape_cast %666 : vector<16x32xbf16> to vector<1x16x32xbf16>
    tpu.vector_store %arg28[%667, %c0_173, %c32_174], %670 {strides = array<i32>} : memref<8x16x64xbf16, #tpu.memory_space<vmem>>, vector<1x16x32xbf16>,
    %c8_i32 = arith.constant 8 : i32
    %c0_175 = arith.constant 0 : index
    %c0_176 = arith.constant 0 : index
    %c0_177 = arith.constant 0 : index
    %671 = vector.load %arg28[%c0_175, %c0_176, %c0_177] : memref<8x16x64xbf16, #tpu.memory_space<vmem>>, vector<8x16x64xbf16>
    %672 = vector.shape_cast %671 : vector<8x16x64xbf16> to vector<128x64xbf16>
    %c0_178 = arith.constant 0 : index
    %c0_179 = arith.constant 0 : index
    %673 = vector.load %arg11[%c0_178, %c0_179] : memref<64x96xbf16, #tpu.memory_space<vmem>>, vector<64x96xbf16>
    %cst_180 = arith.constant dense<0.000000e+00> : vector<128x96xf32>
    %674 = tpu.matmul %672, %673, %cst_180 {dimension_numbers = #tpu.dot_dimension_numbers<[1], [0], [0], [1], [0, 0, 1, 1], [], []>} : vector<128x64xbf16>, vector<64x96xbf16>, vector<128x96xf32> -> vector<128x96xf32>
    %c0_181 = arith.constant 0 : index
    %c0_182 = arith.constant 0 : index
    %675 = vector.load %arg12[%c0_181, %c0_182] : memref<1x96xf32, #tpu.memory_space<vmem>>, vector<1x96xf32>
    %676 = vector.broadcast %675 : vector<1x96xf32> to vector<128x96xf32>
    %677 = arith.addf %674, %676 : vector<128x96xf32>
    %678 = vector.shape_cast %677 : vector<128x96xf32> to vector<8x16x96xf32>
    %679 = arith.truncf %678 : vector<8x16x96xf32> to vector<8x16x96xbf16>
    %c0_183 = arith.constant 0 : index
    %c0_184 = arith.constant 0 : index
    %c0_185 = arith.constant 0 : index
    %680 = vector.load %arg26[%c0_183, %c0_184, %c0_185] : memref<8x16x96xbf16, #tpu.memory_space<vmem>>, vector<8x16x96xbf16>
    tpu.vector_store %arg26[%c0_183, %c0_184, %c0_185], %679 {strides = array<i32>} : memref<8x16x96xbf16, #tpu.memory_space<vmem>>, vector<8x16x96xbf16>,
    %c0_186 = arith.constant 0 : index
    %c0_187 = arith.constant 0 : index
    %681 = vector.load %arg15[%c0_186, %c0_187] : memref<64x96xbf16, #tpu.memory_space<vmem>>, vector<64x96xbf16>
    %cst_188 = arith.constant dense<0.000000e+00> : vector<128x96xf32>
    %682 = tpu.matmul %672, %681, %cst_188 {dimension_numbers = #tpu.dot_dimension_numbers<[1], [0], [0], [1], [0, 0, 1, 1], [], []>} : vector<128x64xbf16>, vector<64x96xbf16>, vector<128x96xf32> -> vector<128x96xf32>
    %c0_189 = arith.constant 0 : index
    %c0_190 = arith.constant 0 : index
    %683 = vector.load %arg16[%c0_189, %c0_190] : memref<1x96xf32, #tpu.memory_space<vmem>>, vector<1x96xf32>
    %684 = vector.broadcast %683 : vector<1x96xf32> to vector<128x96xf32>
    %685 = arith.addf %682, %684 : vector<128x96xf32>
    %686 = vector.shape_cast %685 : vector<128x96xf32> to vector<8x16x96xf32>
    %687 = arith.truncf %686 : vector<8x16x96xf32> to vector<8x16x96xbf16>
    %c0_191 = arith.constant 0 : index
    %c0_192 = arith.constant 0 : index
    %c0_193 = arith.constant 0 : index
    %688 = vector.load %arg27[%c0_191, %c0_192, %c0_193] : memref<8x16x96xbf16, #tpu.memory_space<vmem>>, vector<8x16x96xbf16>
    tpu.vector_store %arg27[%c0_191, %c0_192, %c0_193], %687 {strides = array<i32>} : memref<8x16x96xbf16, #tpu.memory_space<vmem>>, vector<8x16x96xbf16>,
    %c0_194 = arith.constant 0 : index
    %c0_195 = arith.constant 0 : index
    %689 = vector.load %arg14[%c0_194, %c0_195] : memref<1x96xf32, #tpu.memory_space<vmem>>, vector<1x96xf32>
    %c0_196 = arith.constant 0 : index
    %c0_197 = arith.constant 0 : index
    %690 = vector.load %arg18[%c0_196, %c0_197] : memref<1x96xf32, #tpu.memory_space<vmem>>, vector<1x96xf32>
    %cst_198 = arith.constant 0.000000e+00 : f32
    %691 = vector.broadcast %cst_198 : f32 to vector<16x32xf32>
    %c0_i32_199 = arith.constant 0 : i32
    %c7_i32_200 = arith.constant 7 : i32
    %692 = arith.subi %c7_i32_200, %c0_i32_199 : i32
    %693 = arith.index_cast %c0_i32_199 : i32 to index
    %c0_201 = arith.constant 0 : index
    %c0_202 = arith.constant 0 : index
    %694 = vector.load %arg26[%693, %c0_201, %c0_202] : memref<8x16x96xbf16, #tpu.memory_space<vmem>>, vector<1x16x96xbf16>
    %695 = vector.shape_cast %694 : vector<1x16x96xbf16> to vector<16x96xbf16>
    %696 = arith.truncf %691 : vector<16x32xf32> to vector<16x32xbf16>
    %c0_203 = arith.constant 0 : index
    %c0_204 = arith.constant 0 : index
    %697 = vector.load %arg13[%c0_203, %c0_204] : memref<32x96xbf16, #tpu.memory_space<vmem>>, vector<32x96xbf16>
    %cst_205 = arith.constant dense<0.000000e+00> : vector<16x96xf32>
    %698 = tpu.matmul %696, %697, %cst_205 {dimension_numbers = #tpu.dot_dimension_numbers<[1], [0], [0], [1], [0, 0, 1, 1], [], []>} : vector<16x32xbf16>, vector<32x96xbf16>, vector<16x96xf32> -> vector<16x96xf32>
    %699 = vector.broadcast %689 : vector<1x96xf32> to vector<16x96xf32>
    %700 = arith.addf %698, %699 : vector<16x96xf32>
    %701 = vector.extract_strided_slice %695 {offsets = [0, 0], sizes = [16, 64], strides = [1, 1]} : vector<16x96xbf16> to vector<16x64xbf16>
    %702 = arith.extf %701 : vector<16x64xbf16> to vector<16x64xf32>
    %703 = vector.extract_strided_slice %700 {offsets = [0, 0], sizes = [16, 64], strides = [1, 1]} : vector<16x96xf32> to vector<16x64xf32>
    %704 = arith.addf %702, %703 : vector<16x64xf32>
    %705 = arith.negf %704 : vector<16x64xf32>
    %706 = math.exp %705 : vector<16x64xf32>
    %cst_206 = arith.constant 1.000000e+00 : f32
    %707 = vector.broadcast %cst_206 : f32 to vector<16x64xf32>
    %708 = arith.addf %707, %706 : vector<16x64xf32>
    %709 = arith.divf %707, %708 : vector<16x64xf32>
    %710 = vector.extract_strided_slice %709 {offsets = [0, 0], sizes = [16, 32], strides = [1, 1]} : vector<16x64xf32> to vector<16x32xf32>
    %711 = vector.extract_strided_slice %709 {offsets = [0, 32], sizes = [16, 32], strides = [1, 1]} : vector<16x64xf32> to vector<16x32xf32>
    %712 = vector.extract_strided_slice %695 {offsets = [0, 64], sizes = [16, 32], strides = [1, 1]} : vector<16x96xbf16> to vector<16x32xbf16>
    %713 = arith.extf %712 : vector<16x32xbf16> to vector<16x32xf32>
    %714 = vector.extract_strided_slice %700 {offsets = [0, 64], sizes = [16, 32], strides = [1, 1]} : vector<16x96xf32> to vector<16x32xf32>
    %715 = arith.mulf %710, %714 : vector<16x32xf32>
    %716 = arith.addf %713, %715 : vector<16x32xf32>
    %717 = math.tanh %716 : vector<16x32xf32>
    %cst_207 = arith.constant 1.000000e+00 : f32
    %718 = vector.broadcast %cst_207 : f32 to vector<16x32xf32>
    %719 = arith.subf %718, %711 : vector<16x32xf32>
    %720 = arith.mulf %719, %717 : vector<16x32xf32>
    %721 = arith.mulf %711, %691 : vector<16x32xf32>
    %722 = arith.addf %720, %721 : vector<16x32xf32>
    %723 = arith.index_cast %692 : i32 to index
    %c0_208 = arith.constant 0 : index
    %c0_209 = arith.constant 0 : index
    %724 = vector.load %arg27[%723, %c0_208, %c0_209] : memref<8x16x96xbf16, #tpu.memory_space<vmem>>, vector<1x16x96xbf16>
    %725 = vector.shape_cast %724 : vector<1x16x96xbf16> to vector<16x96xbf16>
    %726 = arith.truncf %691 : vector<16x32xf32> to vector<16x32xbf16>
    %c0_210 = arith.constant 0 : index
    %c0_211 = arith.constant 0 : index
    %727 = vector.load %arg17[%c0_210, %c0_211] : memref<32x96xbf16, #tpu.memory_space<vmem>>, vector<32x96xbf16>
    %cst_212 = arith.constant dense<0.000000e+00> : vector<16x96xf32>
    %728 = tpu.matmul %726, %727, %cst_212 {dimension_numbers = #tpu.dot_dimension_numbers<[1], [0], [0], [1], [0, 0, 1, 1], [], []>} : vector<16x32xbf16>, vector<32x96xbf16>, vector<16x96xf32> -> vector<16x96xf32>
    %729 = vector.broadcast %690 : vector<1x96xf32> to vector<16x96xf32>
    %730 = arith.addf %728, %729 : vector<16x96xf32>
    %731 = vector.extract_strided_slice %725 {offsets = [0, 0], sizes = [16, 64], strides = [1, 1]} : vector<16x96xbf16> to vector<16x64xbf16>
    %732 = arith.extf %731 : vector<16x64xbf16> to vector<16x64xf32>
    %733 = vector.extract_strided_slice %730 {offsets = [0, 0], sizes = [16, 64], strides = [1, 1]} : vector<16x96xf32> to vector<16x64xf32>
    %734 = arith.addf %732, %733 : vector<16x64xf32>
    %735 = arith.negf %734 : vector<16x64xf32>
    %736 = math.exp %735 : vector<16x64xf32>
    %cst_213 = arith.constant 1.000000e+00 : f32
    %737 = vector.broadcast %cst_213 : f32 to vector<16x64xf32>
    %738 = arith.addf %737, %736 : vector<16x64xf32>
    %739 = arith.divf %737, %738 : vector<16x64xf32>
    %740 = vector.extract_strided_slice %739 {offsets = [0, 0], sizes = [16, 32], strides = [1, 1]} : vector<16x64xf32> to vector<16x32xf32>
    %741 = vector.extract_strided_slice %739 {offsets = [0, 32], sizes = [16, 32], strides = [1, 1]} : vector<16x64xf32> to vector<16x32xf32>
    %742 = vector.extract_strided_slice %725 {offsets = [0, 64], sizes = [16, 32], strides = [1, 1]} : vector<16x96xbf16> to vector<16x32xbf16>
    %743 = arith.extf %742 : vector<16x32xbf16> to vector<16x32xf32>
    %744 = vector.extract_strided_slice %730 {offsets = [0, 64], sizes = [16, 32], strides = [1, 1]} : vector<16x96xf32> to vector<16x32xf32>
    %745 = arith.mulf %740, %744 : vector<16x32xf32>
    %746 = arith.addf %743, %745 : vector<16x32xf32>
    %747 = math.tanh %746 : vector<16x32xf32>
    %cst_214 = arith.constant 1.000000e+00 : f32
    %748 = vector.broadcast %cst_214 : f32 to vector<16x32xf32>
    %749 = arith.subf %748, %741 : vector<16x32xf32>
    %750 = arith.mulf %749, %747 : vector<16x32xf32>
    %751 = arith.mulf %741, %691 : vector<16x32xf32>
    %752 = arith.addf %750, %751 : vector<16x32xf32>
    %753 = vector.broadcast %c0_i32_199 : i32 to vector<16x1xi32>
    %754 = arith.cmpi sgt, %0, %753 : vector<16x1xi32>
    %755 = vector.shape_cast %754 : vector<16x1xi1> to vector<16x1xi1>
    %756 = vector.broadcast %755 : vector<16x1xi1> to vector<16x32xi1>
    %757 = arith.select %756, %722, %691 : vector<16x32xi1>, vector<16x32xf32>
    %758 = vector.broadcast %692 : i32 to vector<16x1xi32>
    %759 = arith.cmpi sgt, %0, %758 : vector<16x1xi32>
    %760 = vector.shape_cast %759 : vector<16x1xi1> to vector<16x1xi1>
    %761 = vector.broadcast %760 : vector<16x1xi1> to vector<16x32xi1>
    %762 = arith.select %761, %752, %691 : vector<16x32xi1>, vector<16x32xf32>
    %c1_i32_215 = arith.constant 1 : i32
    %c7_i32_216 = arith.constant 7 : i32
    %763 = arith.subi %c7_i32_216, %c1_i32_215 : i32
    %764 = arith.index_cast %c1_i32_215 : i32 to index
    %c0_217 = arith.constant 0 : index
    %c0_218 = arith.constant 0 : index
    %765 = vector.load %arg26[%764, %c0_217, %c0_218] : memref<8x16x96xbf16, #tpu.memory_space<vmem>>, vector<1x16x96xbf16>
    %766 = vector.shape_cast %765 : vector<1x16x96xbf16> to vector<16x96xbf16>
    %767 = arith.truncf %757 : vector<16x32xf32> to vector<16x32xbf16>
    %c0_219 = arith.constant 0 : index
    %c0_220 = arith.constant 0 : index
    %768 = vector.load %arg13[%c0_219, %c0_220] : memref<32x96xbf16, #tpu.memory_space<vmem>>, vector<32x96xbf16>
    %cst_221 = arith.constant dense<0.000000e+00> : vector<16x96xf32>
    %769 = tpu.matmul %767, %768, %cst_221 {dimension_numbers = #tpu.dot_dimension_numbers<[1], [0], [0], [1], [0, 0, 1, 1], [], []>} : vector<16x32xbf16>, vector<32x96xbf16>, vector<16x96xf32> -> vector<16x96xf32>
    %770 = vector.broadcast %689 : vector<1x96xf32> to vector<16x96xf32>
    %771 = arith.addf %769, %770 : vector<16x96xf32>
    %772 = vector.extract_strided_slice %766 {offsets = [0, 0], sizes = [16, 64], strides = [1, 1]} : vector<16x96xbf16> to vector<16x64xbf16>
    %773 = arith.extf %772 : vector<16x64xbf16> to vector<16x64xf32>
    %774 = vector.extract_strided_slice %771 {offsets = [0, 0], sizes = [16, 64], strides = [1, 1]} : vector<16x96xf32> to vector<16x64xf32>
    %775 = arith.addf %773, %774 : vector<16x64xf32>
    %776 = arith.negf %775 : vector<16x64xf32>
    %777 = math.exp %776 : vector<16x64xf32>
    %cst_222 = arith.constant 1.000000e+00 : f32
    %778 = vector.broadcast %cst_222 : f32 to vector<16x64xf32>
    %779 = arith.addf %778, %777 : vector<16x64xf32>
    %780 = arith.divf %778, %779 : vector<16x64xf32>
    %781 = vector.extract_strided_slice %780 {offsets = [0, 0], sizes = [16, 32], strides = [1, 1]} : vector<16x64xf32> to vector<16x32xf32>
    %782 = vector.extract_strided_slice %780 {offsets = [0, 32], sizes = [16, 32], strides = [1, 1]} : vector<16x64xf32> to vector<16x32xf32>
    %783 = vector.extract_strided_slice %766 {offsets = [0, 64], sizes = [16, 32], strides = [1, 1]} : vector<16x96xbf16> to vector<16x32xbf16>
    %784 = arith.extf %783 : vector<16x32xbf16> to vector<16x32xf32>
    %785 = vector.extract_strided_slice %771 {offsets = [0, 64], sizes = [16, 32], strides = [1, 1]} : vector<16x96xf32> to vector<16x32xf32>
    %786 = arith.mulf %781, %785 : vector<16x32xf32>
    %787 = arith.addf %784, %786 : vector<16x32xf32>
    %788 = math.tanh %787 : vector<16x32xf32>
    %cst_223 = arith.constant 1.000000e+00 : f32
    %789 = vector.broadcast %cst_223 : f32 to vector<16x32xf32>
    %790 = arith.subf %789, %782 : vector<16x32xf32>
    %791 = arith.mulf %790, %788 : vector<16x32xf32>
    %792 = arith.mulf %782, %757 : vector<16x32xf32>
    %793 = arith.addf %791, %792 : vector<16x32xf32>
    %794 = arith.index_cast %763 : i32 to index
    %c0_224 = arith.constant 0 : index
    %c0_225 = arith.constant 0 : index
    %795 = vector.load %arg27[%794, %c0_224, %c0_225] : memref<8x16x96xbf16, #tpu.memory_space<vmem>>, vector<1x16x96xbf16>
    %796 = vector.shape_cast %795 : vector<1x16x96xbf16> to vector<16x96xbf16>
    %797 = arith.truncf %762 : vector<16x32xf32> to vector<16x32xbf16>
    %c0_226 = arith.constant 0 : index
    %c0_227 = arith.constant 0 : index
    %798 = vector.load %arg17[%c0_226, %c0_227] : memref<32x96xbf16, #tpu.memory_space<vmem>>, vector<32x96xbf16>
    %cst_228 = arith.constant dense<0.000000e+00> : vector<16x96xf32>
    %799 = tpu.matmul %797, %798, %cst_228 {dimension_numbers = #tpu.dot_dimension_numbers<[1], [0], [0], [1], [0, 0, 1, 1], [], []>} : vector<16x32xbf16>, vector<32x96xbf16>, vector<16x96xf32> -> vector<16x96xf32>
    %800 = vector.broadcast %690 : vector<1x96xf32> to vector<16x96xf32>
    %801 = arith.addf %799, %800 : vector<16x96xf32>
    %802 = vector.extract_strided_slice %796 {offsets = [0, 0], sizes = [16, 64], strides = [1, 1]} : vector<16x96xbf16> to vector<16x64xbf16>
    %803 = arith.extf %802 : vector<16x64xbf16> to vector<16x64xf32>
    %804 = vector.extract_strided_slice %801 {offsets = [0, 0], sizes = [16, 64], strides = [1, 1]} : vector<16x96xf32> to vector<16x64xf32>
    %805 = arith.addf %803, %804 : vector<16x64xf32>
    %806 = arith.negf %805 : vector<16x64xf32>
    %807 = math.exp %806 : vector<16x64xf32>
    %cst_229 = arith.constant 1.000000e+00 : f32
    %808 = vector.broadcast %cst_229 : f32 to vector<16x64xf32>
    %809 = arith.addf %808, %807 : vector<16x64xf32>
    %810 = arith.divf %808, %809 : vector<16x64xf32>
    %811 = vector.extract_strided_slice %810 {offsets = [0, 0], sizes = [16, 32], strides = [1, 1]} : vector<16x64xf32> to vector<16x32xf32>
    %812 = vector.extract_strided_slice %810 {offsets = [0, 32], sizes = [16, 32], strides = [1, 1]} : vector<16x64xf32> to vector<16x32xf32>
    %813 = vector.extract_strided_slice %796 {offsets = [0, 64], sizes = [16, 32], strides = [1, 1]} : vector<16x96xbf16> to vector<16x32xbf16>
    %814 = arith.extf %813 : vector<16x32xbf16> to vector<16x32xf32>
    %815 = vector.extract_strided_slice %801 {offsets = [0, 64], sizes = [16, 32], strides = [1, 1]} : vector<16x96xf32> to vector<16x32xf32>
    %816 = arith.mulf %811, %815 : vector<16x32xf32>
    %817 = arith.addf %814, %816 : vector<16x32xf32>
    %818 = math.tanh %817 : vector<16x32xf32>
    %cst_230 = arith.constant 1.000000e+00 : f32
    %819 = vector.broadcast %cst_230 : f32 to vector<16x32xf32>
    %820 = arith.subf %819, %812 : vector<16x32xf32>
    %821 = arith.mulf %820, %818 : vector<16x32xf32>
    %822 = arith.mulf %812, %762 : vector<16x32xf32>
    %823 = arith.addf %821, %822 : vector<16x32xf32>
    %824 = vector.broadcast %c1_i32_215 : i32 to vector<16x1xi32>
    %825 = arith.cmpi sgt, %0, %824 : vector<16x1xi32>
    %826 = vector.shape_cast %825 : vector<16x1xi1> to vector<16x1xi1>
    %827 = vector.broadcast %826 : vector<16x1xi1> to vector<16x32xi1>
    %828 = arith.select %827, %793, %757 : vector<16x32xi1>, vector<16x32xf32>
    %829 = vector.broadcast %763 : i32 to vector<16x1xi32>
    %830 = arith.cmpi sgt, %0, %829 : vector<16x1xi32>
    %831 = vector.shape_cast %830 : vector<16x1xi1> to vector<16x1xi1>
    %832 = vector.broadcast %831 : vector<16x1xi1> to vector<16x32xi1>
    %833 = arith.select %832, %823, %762 : vector<16x32xi1>, vector<16x32xf32>
    %c2_i32_231 = arith.constant 2 : i32
    %c7_i32_232 = arith.constant 7 : i32
    %834 = arith.subi %c7_i32_232, %c2_i32_231 : i32
    %835 = arith.index_cast %c2_i32_231 : i32 to index
    %c0_233 = arith.constant 0 : index
    %c0_234 = arith.constant 0 : index
    %836 = vector.load %arg26[%835, %c0_233, %c0_234] : memref<8x16x96xbf16, #tpu.memory_space<vmem>>, vector<1x16x96xbf16>
    %837 = vector.shape_cast %836 : vector<1x16x96xbf16> to vector<16x96xbf16>
    %838 = arith.truncf %828 : vector<16x32xf32> to vector<16x32xbf16>
    %c0_235 = arith.constant 0 : index
    %c0_236 = arith.constant 0 : index
    %839 = vector.load %arg13[%c0_235, %c0_236] : memref<32x96xbf16, #tpu.memory_space<vmem>>, vector<32x96xbf16>
    %cst_237 = arith.constant dense<0.000000e+00> : vector<16x96xf32>
    %840 = tpu.matmul %838, %839, %cst_237 {dimension_numbers = #tpu.dot_dimension_numbers<[1], [0], [0], [1], [0, 0, 1, 1], [], []>} : vector<16x32xbf16>, vector<32x96xbf16>, vector<16x96xf32> -> vector<16x96xf32>
    %841 = vector.broadcast %689 : vector<1x96xf32> to vector<16x96xf32>
    %842 = arith.addf %840, %841 : vector<16x96xf32>
    %843 = vector.extract_strided_slice %837 {offsets = [0, 0], sizes = [16, 64], strides = [1, 1]} : vector<16x96xbf16> to vector<16x64xbf16>
    %844 = arith.extf %843 : vector<16x64xbf16> to vector<16x64xf32>
    %845 = vector.extract_strided_slice %842 {offsets = [0, 0], sizes = [16, 64], strides = [1, 1]} : vector<16x96xf32> to vector<16x64xf32>
    %846 = arith.addf %844, %845 : vector<16x64xf32>
    %847 = arith.negf %846 : vector<16x64xf32>
    %848 = math.exp %847 : vector<16x64xf32>
    %cst_238 = arith.constant 1.000000e+00 : f32
    %849 = vector.broadcast %cst_238 : f32 to vector<16x64xf32>
    %850 = arith.addf %849, %848 : vector<16x64xf32>
    %851 = arith.divf %849, %850 : vector<16x64xf32>
    %852 = vector.extract_strided_slice %851 {offsets = [0, 0], sizes = [16, 32], strides = [1, 1]} : vector<16x64xf32> to vector<16x32xf32>
    %853 = vector.extract_strided_slice %851 {offsets = [0, 32], sizes = [16, 32], strides = [1, 1]} : vector<16x64xf32> to vector<16x32xf32>
    %854 = vector.extract_strided_slice %837 {offsets = [0, 64], sizes = [16, 32], strides = [1, 1]} : vector<16x96xbf16> to vector<16x32xbf16>
    %855 = arith.extf %854 : vector<16x32xbf16> to vector<16x32xf32>
    %856 = vector.extract_strided_slice %842 {offsets = [0, 64], sizes = [16, 32], strides = [1, 1]} : vector<16x96xf32> to vector<16x32xf32>
    %857 = arith.mulf %852, %856 : vector<16x32xf32>
    %858 = arith.addf %855, %857 : vector<16x32xf32>
    %859 = math.tanh %858 : vector<16x32xf32>
    %cst_239 = arith.constant 1.000000e+00 : f32
    %860 = vector.broadcast %cst_239 : f32 to vector<16x32xf32>
    %861 = arith.subf %860, %853 : vector<16x32xf32>
    %862 = arith.mulf %861, %859 : vector<16x32xf32>
    %863 = arith.mulf %853, %828 : vector<16x32xf32>
    %864 = arith.addf %862, %863 : vector<16x32xf32>
    %865 = arith.index_cast %834 : i32 to index
    %c0_240 = arith.constant 0 : index
    %c0_241 = arith.constant 0 : index
    %866 = vector.load %arg27[%865, %c0_240, %c0_241] : memref<8x16x96xbf16, #tpu.memory_space<vmem>>, vector<1x16x96xbf16>
    %867 = vector.shape_cast %866 : vector<1x16x96xbf16> to vector<16x96xbf16>
    %868 = arith.truncf %833 : vector<16x32xf32> to vector<16x32xbf16>
    %c0_242 = arith.constant 0 : index
    %c0_243 = arith.constant 0 : index
    %869 = vector.load %arg17[%c0_242, %c0_243] : memref<32x96xbf16, #tpu.memory_space<vmem>>, vector<32x96xbf16>
    %cst_244 = arith.constant dense<0.000000e+00> : vector<16x96xf32>
    %870 = tpu.matmul %868, %869, %cst_244 {dimension_numbers = #tpu.dot_dimension_numbers<[1], [0], [0], [1], [0, 0, 1, 1], [], []>} : vector<16x32xbf16>, vector<32x96xbf16>, vector<16x96xf32> -> vector<16x96xf32>
    %871 = vector.broadcast %690 : vector<1x96xf32> to vector<16x96xf32>
    %872 = arith.addf %870, %871 : vector<16x96xf32>
    %873 = vector.extract_strided_slice %867 {offsets = [0, 0], sizes = [16, 64], strides = [1, 1]} : vector<16x96xbf16> to vector<16x64xbf16>
    %874 = arith.extf %873 : vector<16x64xbf16> to vector<16x64xf32>
    %875 = vector.extract_strided_slice %872 {offsets = [0, 0], sizes = [16, 64], strides = [1, 1]} : vector<16x96xf32> to vector<16x64xf32>
    %876 = arith.addf %874, %875 : vector<16x64xf32>
    %877 = arith.negf %876 : vector<16x64xf32>
    %878 = math.exp %877 : vector<16x64xf32>
    %cst_245 = arith.constant 1.000000e+00 : f32
    %879 = vector.broadcast %cst_245 : f32 to vector<16x64xf32>
    %880 = arith.addf %879, %878 : vector<16x64xf32>
    %881 = arith.divf %879, %880 : vector<16x64xf32>
    %882 = vector.extract_strided_slice %881 {offsets = [0, 0], sizes = [16, 32], strides = [1, 1]} : vector<16x64xf32> to vector<16x32xf32>
    %883 = vector.extract_strided_slice %881 {offsets = [0, 32], sizes = [16, 32], strides = [1, 1]} : vector<16x64xf32> to vector<16x32xf32>
    %884 = vector.extract_strided_slice %867 {offsets = [0, 64], sizes = [16, 32], strides = [1, 1]} : vector<16x96xbf16> to vector<16x32xbf16>
    %885 = arith.extf %884 : vector<16x32xbf16> to vector<16x32xf32>
    %886 = vector.extract_strided_slice %872 {offsets = [0, 64], sizes = [16, 32], strides = [1, 1]} : vector<16x96xf32> to vector<16x32xf32>
    %887 = arith.mulf %882, %886 : vector<16x32xf32>
    %888 = arith.addf %885, %887 : vector<16x32xf32>
    %889 = math.tanh %888 : vector<16x32xf32>
    %cst_246 = arith.constant 1.000000e+00 : f32
    %890 = vector.broadcast %cst_246 : f32 to vector<16x32xf32>
    %891 = arith.subf %890, %883 : vector<16x32xf32>
    %892 = arith.mulf %891, %889 : vector<16x32xf32>
    %893 = arith.mulf %883, %833 : vector<16x32xf32>
    %894 = arith.addf %892, %893 : vector<16x32xf32>
    %895 = vector.broadcast %c2_i32_231 : i32 to vector<16x1xi32>
    %896 = arith.cmpi sgt, %0, %895 : vector<16x1xi32>
    %897 = vector.shape_cast %896 : vector<16x1xi1> to vector<16x1xi1>
    %898 = vector.broadcast %897 : vector<16x1xi1> to vector<16x32xi1>
    %899 = arith.select %898, %864, %828 : vector<16x32xi1>, vector<16x32xf32>
    %900 = vector.broadcast %834 : i32 to vector<16x1xi32>
    %901 = arith.cmpi sgt, %0, %900 : vector<16x1xi32>
    %902 = vector.shape_cast %901 : vector<16x1xi1> to vector<16x1xi1>
    %903 = vector.broadcast %902 : vector<16x1xi1> to vector<16x32xi1>
    %904 = arith.select %903, %894, %833 : vector<16x32xi1>, vector<16x32xf32>
    %c3_i32_247 = arith.constant 3 : i32
    %c7_i32_248 = arith.constant 7 : i32
    %905 = arith.subi %c7_i32_248, %c3_i32_247 : i32
    %906 = arith.index_cast %c3_i32_247 : i32 to index
    %c0_249 = arith.constant 0 : index
    %c0_250 = arith.constant 0 : index
    %907 = vector.load %arg26[%906, %c0_249, %c0_250] : memref<8x16x96xbf16, #tpu.memory_space<vmem>>, vector<1x16x96xbf16>
    %908 = vector.shape_cast %907 : vector<1x16x96xbf16> to vector<16x96xbf16>
    %909 = arith.truncf %899 : vector<16x32xf32> to vector<16x32xbf16>
    %c0_251 = arith.constant 0 : index
    %c0_252 = arith.constant 0 : index
    %910 = vector.load %arg13[%c0_251, %c0_252] : memref<32x96xbf16, #tpu.memory_space<vmem>>, vector<32x96xbf16>
    %cst_253 = arith.constant dense<0.000000e+00> : vector<16x96xf32>
    %911 = tpu.matmul %909, %910, %cst_253 {dimension_numbers = #tpu.dot_dimension_numbers<[1], [0], [0], [1], [0, 0, 1, 1], [], []>} : vector<16x32xbf16>, vector<32x96xbf16>, vector<16x96xf32> -> vector<16x96xf32>
    %912 = vector.broadcast %689 : vector<1x96xf32> to vector<16x96xf32>
    %913 = arith.addf %911, %912 : vector<16x96xf32>
    %914 = vector.extract_strided_slice %908 {offsets = [0, 0], sizes = [16, 64], strides = [1, 1]} : vector<16x96xbf16> to vector<16x64xbf16>
    %915 = arith.extf %914 : vector<16x64xbf16> to vector<16x64xf32>
    %916 = vector.extract_strided_slice %913 {offsets = [0, 0], sizes = [16, 64], strides = [1, 1]} : vector<16x96xf32> to vector<16x64xf32>
    %917 = arith.addf %915, %916 : vector<16x64xf32>
    %918 = arith.negf %917 : vector<16x64xf32>
    %919 = math.exp %918 : vector<16x64xf32>
    %cst_254 = arith.constant 1.000000e+00 : f32
    %920 = vector.broadcast %cst_254 : f32 to vector<16x64xf32>
    %921 = arith.addf %920, %919 : vector<16x64xf32>
    %922 = arith.divf %920, %921 : vector<16x64xf32>
    %923 = vector.extract_strided_slice %922 {offsets = [0, 0], sizes = [16, 32], strides = [1, 1]} : vector<16x64xf32> to vector<16x32xf32>
    %924 = vector.extract_strided_slice %922 {offsets = [0, 32], sizes = [16, 32], strides = [1, 1]} : vector<16x64xf32> to vector<16x32xf32>
    %925 = vector.extract_strided_slice %908 {offsets = [0, 64], sizes = [16, 32], strides = [1, 1]} : vector<16x96xbf16> to vector<16x32xbf16>
    %926 = arith.extf %925 : vector<16x32xbf16> to vector<16x32xf32>
    %927 = vector.extract_strided_slice %913 {offsets = [0, 64], sizes = [16, 32], strides = [1, 1]} : vector<16x96xf32> to vector<16x32xf32>
    %928 = arith.mulf %923, %927 : vector<16x32xf32>
    %929 = arith.addf %926, %928 : vector<16x32xf32>
    %930 = math.tanh %929 : vector<16x32xf32>
    %cst_255 = arith.constant 1.000000e+00 : f32
    %931 = vector.broadcast %cst_255 : f32 to vector<16x32xf32>
    %932 = arith.subf %931, %924 : vector<16x32xf32>
    %933 = arith.mulf %932, %930 : vector<16x32xf32>
    %934 = arith.mulf %924, %899 : vector<16x32xf32>
    %935 = arith.addf %933, %934 : vector<16x32xf32>
    %936 = arith.index_cast %905 : i32 to index
    %c0_256 = arith.constant 0 : index
    %c0_257 = arith.constant 0 : index
    %937 = vector.load %arg27[%936, %c0_256, %c0_257] : memref<8x16x96xbf16, #tpu.memory_space<vmem>>, vector<1x16x96xbf16>
    %938 = vector.shape_cast %937 : vector<1x16x96xbf16> to vector<16x96xbf16>
    %939 = arith.truncf %904 : vector<16x32xf32> to vector<16x32xbf16>
    %c0_258 = arith.constant 0 : index
    %c0_259 = arith.constant 0 : index
    %940 = vector.load %arg17[%c0_258, %c0_259] : memref<32x96xbf16, #tpu.memory_space<vmem>>, vector<32x96xbf16>
    %cst_260 = arith.constant dense<0.000000e+00> : vector<16x96xf32>
    %941 = tpu.matmul %939, %940, %cst_260 {dimension_numbers = #tpu.dot_dimension_numbers<[1], [0], [0], [1], [0, 0, 1, 1], [], []>} : vector<16x32xbf16>, vector<32x96xbf16>, vector<16x96xf32> -> vector<16x96xf32>
    %942 = vector.broadcast %690 : vector<1x96xf32> to vector<16x96xf32>
    %943 = arith.addf %941, %942 : vector<16x96xf32>
    %944 = vector.extract_strided_slice %938 {offsets = [0, 0], sizes = [16, 64], strides = [1, 1]} : vector<16x96xbf16> to vector<16x64xbf16>
    %945 = arith.extf %944 : vector<16x64xbf16> to vector<16x64xf32>
    %946 = vector.extract_strided_slice %943 {offsets = [0, 0], sizes = [16, 64], strides = [1, 1]} : vector<16x96xf32> to vector<16x64xf32>
    %947 = arith.addf %945, %946 : vector<16x64xf32>
    %948 = arith.negf %947 : vector<16x64xf32>
    %949 = math.exp %948 : vector<16x64xf32>
    %cst_261 = arith.constant 1.000000e+00 : f32
    %950 = vector.broadcast %cst_261 : f32 to vector<16x64xf32>
    %951 = arith.addf %950, %949 : vector<16x64xf32>
    %952 = arith.divf %950, %951 : vector<16x64xf32>
    %953 = vector.extract_strided_slice %952 {offsets = [0, 0], sizes = [16, 32], strides = [1, 1]} : vector<16x64xf32> to vector<16x32xf32>
    %954 = vector.extract_strided_slice %952 {offsets = [0, 32], sizes = [16, 32], strides = [1, 1]} : vector<16x64xf32> to vector<16x32xf32>
    %955 = vector.extract_strided_slice %938 {offsets = [0, 64], sizes = [16, 32], strides = [1, 1]} : vector<16x96xbf16> to vector<16x32xbf16>
    %956 = arith.extf %955 : vector<16x32xbf16> to vector<16x32xf32>
    %957 = vector.extract_strided_slice %943 {offsets = [0, 64], sizes = [16, 32], strides = [1, 1]} : vector<16x96xf32> to vector<16x32xf32>
    %958 = arith.mulf %953, %957 : vector<16x32xf32>
    %959 = arith.addf %956, %958 : vector<16x32xf32>
    %960 = math.tanh %959 : vector<16x32xf32>
    %cst_262 = arith.constant 1.000000e+00 : f32
    %961 = vector.broadcast %cst_262 : f32 to vector<16x32xf32>
    %962 = arith.subf %961, %954 : vector<16x32xf32>
    %963 = arith.mulf %962, %960 : vector<16x32xf32>
    %964 = arith.mulf %954, %904 : vector<16x32xf32>
    %965 = arith.addf %963, %964 : vector<16x32xf32>
    %966 = vector.broadcast %c3_i32_247 : i32 to vector<16x1xi32>
    %967 = arith.cmpi sgt, %0, %966 : vector<16x1xi32>
    %968 = vector.shape_cast %967 : vector<16x1xi1> to vector<16x1xi1>
    %969 = vector.broadcast %968 : vector<16x1xi1> to vector<16x32xi1>
    %970 = arith.select %969, %935, %899 : vector<16x32xi1>, vector<16x32xf32>
    %971 = vector.broadcast %905 : i32 to vector<16x1xi32>
    %972 = arith.cmpi sgt, %0, %971 : vector<16x1xi32>
    %973 = vector.shape_cast %972 : vector<16x1xi1> to vector<16x1xi1>
    %974 = vector.broadcast %973 : vector<16x1xi1> to vector<16x32xi1>
    %975 = arith.select %974, %965, %904 : vector<16x32xi1>, vector<16x32xf32>
    %c4_i32_263 = arith.constant 4 : i32
    %c7_i32_264 = arith.constant 7 : i32
    %976 = arith.subi %c7_i32_264, %c4_i32_263 : i32
    %977 = arith.index_cast %c4_i32_263 : i32 to index
    %c0_265 = arith.constant 0 : index
    %c0_266 = arith.constant 0 : index
    %978 = vector.load %arg26[%977, %c0_265, %c0_266] : memref<8x16x96xbf16, #tpu.memory_space<vmem>>, vector<1x16x96xbf16>
    %979 = vector.shape_cast %978 : vector<1x16x96xbf16> to vector<16x96xbf16>
    %980 = arith.truncf %970 : vector<16x32xf32> to vector<16x32xbf16>
    %c0_267 = arith.constant 0 : index
    %c0_268 = arith.constant 0 : index
    %981 = vector.load %arg13[%c0_267, %c0_268] : memref<32x96xbf16, #tpu.memory_space<vmem>>, vector<32x96xbf16>
    %cst_269 = arith.constant dense<0.000000e+00> : vector<16x96xf32>
    %982 = tpu.matmul %980, %981, %cst_269 {dimension_numbers = #tpu.dot_dimension_numbers<[1], [0], [0], [1], [0, 0, 1, 1], [], []>} : vector<16x32xbf16>, vector<32x96xbf16>, vector<16x96xf32> -> vector<16x96xf32>
    %983 = vector.broadcast %689 : vector<1x96xf32> to vector<16x96xf32>
    %984 = arith.addf %982, %983 : vector<16x96xf32>
    %985 = vector.extract_strided_slice %979 {offsets = [0, 0], sizes = [16, 64], strides = [1, 1]} : vector<16x96xbf16> to vector<16x64xbf16>
    %986 = arith.extf %985 : vector<16x64xbf16> to vector<16x64xf32>
    %987 = vector.extract_strided_slice %984 {offsets = [0, 0], sizes = [16, 64], strides = [1, 1]} : vector<16x96xf32> to vector<16x64xf32>
    %988 = arith.addf %986, %987 : vector<16x64xf32>
    %989 = arith.negf %988 : vector<16x64xf32>
    %990 = math.exp %989 : vector<16x64xf32>
    %cst_270 = arith.constant 1.000000e+00 : f32
    %991 = vector.broadcast %cst_270 : f32 to vector<16x64xf32>
    %992 = arith.addf %991, %990 : vector<16x64xf32>
    %993 = arith.divf %991, %992 : vector<16x64xf32>
    %994 = vector.extract_strided_slice %993 {offsets = [0, 0], sizes = [16, 32], strides = [1, 1]} : vector<16x64xf32> to vector<16x32xf32>
    %995 = vector.extract_strided_slice %993 {offsets = [0, 32], sizes = [16, 32], strides = [1, 1]} : vector<16x64xf32> to vector<16x32xf32>
    %996 = vector.extract_strided_slice %979 {offsets = [0, 64], sizes = [16, 32], strides = [1, 1]} : vector<16x96xbf16> to vector<16x32xbf16>
    %997 = arith.extf %996 : vector<16x32xbf16> to vector<16x32xf32>
    %998 = vector.extract_strided_slice %984 {offsets = [0, 64], sizes = [16, 32], strides = [1, 1]} : vector<16x96xf32> to vector<16x32xf32>
    %999 = arith.mulf %994, %998 : vector<16x32xf32>
    %1000 = arith.addf %997, %999 : vector<16x32xf32>
    %1001 = math.tanh %1000 : vector<16x32xf32>
    %cst_271 = arith.constant 1.000000e+00 : f32
    %1002 = vector.broadcast %cst_271 : f32 to vector<16x32xf32>
    %1003 = arith.subf %1002, %995 : vector<16x32xf32>
    %1004 = arith.mulf %1003, %1001 : vector<16x32xf32>
    %1005 = arith.mulf %995, %970 : vector<16x32xf32>
    %1006 = arith.addf %1004, %1005 : vector<16x32xf32>
    %1007 = arith.index_cast %976 : i32 to index
    %c0_272 = arith.constant 0 : index
    %c0_273 = arith.constant 0 : index
    %1008 = vector.load %arg27[%1007, %c0_272, %c0_273] : memref<8x16x96xbf16, #tpu.memory_space<vmem>>, vector<1x16x96xbf16>
    %1009 = vector.shape_cast %1008 : vector<1x16x96xbf16> to vector<16x96xbf16>
    %1010 = arith.truncf %975 : vector<16x32xf32> to vector<16x32xbf16>
    %c0_274 = arith.constant 0 : index
    %c0_275 = arith.constant 0 : index
    %1011 = vector.load %arg17[%c0_274, %c0_275] : memref<32x96xbf16, #tpu.memory_space<vmem>>, vector<32x96xbf16>
    %cst_276 = arith.constant dense<0.000000e+00> : vector<16x96xf32>
    %1012 = tpu.matmul %1010, %1011, %cst_276 {dimension_numbers = #tpu.dot_dimension_numbers<[1], [0], [0], [1], [0, 0, 1, 1], [], []>} : vector<16x32xbf16>, vector<32x96xbf16>, vector<16x96xf32> -> vector<16x96xf32>
    %1013 = vector.broadcast %690 : vector<1x96xf32> to vector<16x96xf32>
    %1014 = arith.addf %1012, %1013 : vector<16x96xf32>
    %1015 = vector.extract_strided_slice %1009 {offsets = [0, 0], sizes = [16, 64], strides = [1, 1]} : vector<16x96xbf16> to vector<16x64xbf16>
    %1016 = arith.extf %1015 : vector<16x64xbf16> to vector<16x64xf32>
    %1017 = vector.extract_strided_slice %1014 {offsets = [0, 0], sizes = [16, 64], strides = [1, 1]} : vector<16x96xf32> to vector<16x64xf32>
    %1018 = arith.addf %1016, %1017 : vector<16x64xf32>
    %1019 = arith.negf %1018 : vector<16x64xf32>
    %1020 = math.exp %1019 : vector<16x64xf32>
    %cst_277 = arith.constant 1.000000e+00 : f32
    %1021 = vector.broadcast %cst_277 : f32 to vector<16x64xf32>
    %1022 = arith.addf %1021, %1020 : vector<16x64xf32>
    %1023 = arith.divf %1021, %1022 : vector<16x64xf32>
    %1024 = vector.extract_strided_slice %1023 {offsets = [0, 0], sizes = [16, 32], strides = [1, 1]} : vector<16x64xf32> to vector<16x32xf32>
    %1025 = vector.extract_strided_slice %1023 {offsets = [0, 32], sizes = [16, 32], strides = [1, 1]} : vector<16x64xf32> to vector<16x32xf32>
    %1026 = vector.extract_strided_slice %1009 {offsets = [0, 64], sizes = [16, 32], strides = [1, 1]} : vector<16x96xbf16> to vector<16x32xbf16>
    %1027 = arith.extf %1026 : vector<16x32xbf16> to vector<16x32xf32>
    %1028 = vector.extract_strided_slice %1014 {offsets = [0, 64], sizes = [16, 32], strides = [1, 1]} : vector<16x96xf32> to vector<16x32xf32>
    %1029 = arith.mulf %1024, %1028 : vector<16x32xf32>
    %1030 = arith.addf %1027, %1029 : vector<16x32xf32>
    %1031 = math.tanh %1030 : vector<16x32xf32>
    %cst_278 = arith.constant 1.000000e+00 : f32
    %1032 = vector.broadcast %cst_278 : f32 to vector<16x32xf32>
    %1033 = arith.subf %1032, %1025 : vector<16x32xf32>
    %1034 = arith.mulf %1033, %1031 : vector<16x32xf32>
    %1035 = arith.mulf %1025, %975 : vector<16x32xf32>
    %1036 = arith.addf %1034, %1035 : vector<16x32xf32>
    %1037 = vector.broadcast %c4_i32_263 : i32 to vector<16x1xi32>
    %1038 = arith.cmpi sgt, %0, %1037 : vector<16x1xi32>
    %1039 = vector.shape_cast %1038 : vector<16x1xi1> to vector<16x1xi1>
    %1040 = vector.broadcast %1039 : vector<16x1xi1> to vector<16x32xi1>
    %1041 = arith.select %1040, %1006, %970 : vector<16x32xi1>, vector<16x32xf32>
    %1042 = vector.broadcast %976 : i32 to vector<16x1xi32>
    %1043 = arith.cmpi sgt, %0, %1042 : vector<16x1xi32>
    %1044 = vector.shape_cast %1043 : vector<16x1xi1> to vector<16x1xi1>
    %1045 = vector.broadcast %1044 : vector<16x1xi1> to vector<16x32xi1>
    %1046 = arith.select %1045, %1036, %975 : vector<16x32xi1>, vector<16x32xf32>
    %c5_i32_279 = arith.constant 5 : i32
    %c7_i32_280 = arith.constant 7 : i32
    %1047 = arith.subi %c7_i32_280, %c5_i32_279 : i32
    %1048 = arith.index_cast %c5_i32_279 : i32 to index
    %c0_281 = arith.constant 0 : index
    %c0_282 = arith.constant 0 : index
    %1049 = vector.load %arg26[%1048, %c0_281, %c0_282] : memref<8x16x96xbf16, #tpu.memory_space<vmem>>, vector<1x16x96xbf16>
    %1050 = vector.shape_cast %1049 : vector<1x16x96xbf16> to vector<16x96xbf16>
    %1051 = arith.truncf %1041 : vector<16x32xf32> to vector<16x32xbf16>
    %c0_283 = arith.constant 0 : index
    %c0_284 = arith.constant 0 : index
    %1052 = vector.load %arg13[%c0_283, %c0_284] : memref<32x96xbf16, #tpu.memory_space<vmem>>, vector<32x96xbf16>
    %cst_285 = arith.constant dense<0.000000e+00> : vector<16x96xf32>
    %1053 = tpu.matmul %1051, %1052, %cst_285 {dimension_numbers = #tpu.dot_dimension_numbers<[1], [0], [0], [1], [0, 0, 1, 1], [], []>} : vector<16x32xbf16>, vector<32x96xbf16>, vector<16x96xf32> -> vector<16x96xf32>
    %1054 = vector.broadcast %689 : vector<1x96xf32> to vector<16x96xf32>
    %1055 = arith.addf %1053, %1054 : vector<16x96xf32>
    %1056 = vector.extract_strided_slice %1050 {offsets = [0, 0], sizes = [16, 64], strides = [1, 1]} : vector<16x96xbf16> to vector<16x64xbf16>
    %1057 = arith.extf %1056 : vector<16x64xbf16> to vector<16x64xf32>
    %1058 = vector.extract_strided_slice %1055 {offsets = [0, 0], sizes = [16, 64], strides = [1, 1]} : vector<16x96xf32> to vector<16x64xf32>
    %1059 = arith.addf %1057, %1058 : vector<16x64xf32>
    %1060 = arith.negf %1059 : vector<16x64xf32>
    %1061 = math.exp %1060 : vector<16x64xf32>
    %cst_286 = arith.constant 1.000000e+00 : f32
    %1062 = vector.broadcast %cst_286 : f32 to vector<16x64xf32>
    %1063 = arith.addf %1062, %1061 : vector<16x64xf32>
    %1064 = arith.divf %1062, %1063 : vector<16x64xf32>
    %1065 = vector.extract_strided_slice %1064 {offsets = [0, 0], sizes = [16, 32], strides = [1, 1]} : vector<16x64xf32> to vector<16x32xf32>
    %1066 = vector.extract_strided_slice %1064 {offsets = [0, 32], sizes = [16, 32], strides = [1, 1]} : vector<16x64xf32> to vector<16x32xf32>
    %1067 = vector.extract_strided_slice %1050 {offsets = [0, 64], sizes = [16, 32], strides = [1, 1]} : vector<16x96xbf16> to vector<16x32xbf16>
    %1068 = arith.extf %1067 : vector<16x32xbf16> to vector<16x32xf32>
    %1069 = vector.extract_strided_slice %1055 {offsets = [0, 64], sizes = [16, 32], strides = [1, 1]} : vector<16x96xf32> to vector<16x32xf32>
    %1070 = arith.mulf %1065, %1069 : vector<16x32xf32>
    %1071 = arith.addf %1068, %1070 : vector<16x32xf32>
    %1072 = math.tanh %1071 : vector<16x32xf32>
    %cst_287 = arith.constant 1.000000e+00 : f32
    %1073 = vector.broadcast %cst_287 : f32 to vector<16x32xf32>
    %1074 = arith.subf %1073, %1066 : vector<16x32xf32>
    %1075 = arith.mulf %1074, %1072 : vector<16x32xf32>
    %1076 = arith.mulf %1066, %1041 : vector<16x32xf32>
    %1077 = arith.addf %1075, %1076 : vector<16x32xf32>
    %1078 = arith.index_cast %1047 : i32 to index
    %c0_288 = arith.constant 0 : index
    %c0_289 = arith.constant 0 : index
    %1079 = vector.load %arg27[%1078, %c0_288, %c0_289] : memref<8x16x96xbf16, #tpu.memory_space<vmem>>, vector<1x16x96xbf16>
    %1080 = vector.shape_cast %1079 : vector<1x16x96xbf16> to vector<16x96xbf16>
    %1081 = arith.truncf %1046 : vector<16x32xf32> to vector<16x32xbf16>
    %c0_290 = arith.constant 0 : index
    %c0_291 = arith.constant 0 : index
    %1082 = vector.load %arg17[%c0_290, %c0_291] : memref<32x96xbf16, #tpu.memory_space<vmem>>, vector<32x96xbf16>
    %cst_292 = arith.constant dense<0.000000e+00> : vector<16x96xf32>
    %1083 = tpu.matmul %1081, %1082, %cst_292 {dimension_numbers = #tpu.dot_dimension_numbers<[1], [0], [0], [1], [0, 0, 1, 1], [], []>} : vector<16x32xbf16>, vector<32x96xbf16>, vector<16x96xf32> -> vector<16x96xf32>
    %1084 = vector.broadcast %690 : vector<1x96xf32> to vector<16x96xf32>
    %1085 = arith.addf %1083, %1084 : vector<16x96xf32>
    %1086 = vector.extract_strided_slice %1080 {offsets = [0, 0], sizes = [16, 64], strides = [1, 1]} : vector<16x96xbf16> to vector<16x64xbf16>
    %1087 = arith.extf %1086 : vector<16x64xbf16> to vector<16x64xf32>
    %1088 = vector.extract_strided_slice %1085 {offsets = [0, 0], sizes = [16, 64], strides = [1, 1]} : vector<16x96xf32> to vector<16x64xf32>
    %1089 = arith.addf %1087, %1088 : vector<16x64xf32>
    %1090 = arith.negf %1089 : vector<16x64xf32>
    %1091 = math.exp %1090 : vector<16x64xf32>
    %cst_293 = arith.constant 1.000000e+00 : f32
    %1092 = vector.broadcast %cst_293 : f32 to vector<16x64xf32>
    %1093 = arith.addf %1092, %1091 : vector<16x64xf32>
    %1094 = arith.divf %1092, %1093 : vector<16x64xf32>
    %1095 = vector.extract_strided_slice %1094 {offsets = [0, 0], sizes = [16, 32], strides = [1, 1]} : vector<16x64xf32> to vector<16x32xf32>
    %1096 = vector.extract_strided_slice %1094 {offsets = [0, 32], sizes = [16, 32], strides = [1, 1]} : vector<16x64xf32> to vector<16x32xf32>
    %1097 = vector.extract_strided_slice %1080 {offsets = [0, 64], sizes = [16, 32], strides = [1, 1]} : vector<16x96xbf16> to vector<16x32xbf16>
    %1098 = arith.extf %1097 : vector<16x32xbf16> to vector<16x32xf32>
    %1099 = vector.extract_strided_slice %1085 {offsets = [0, 64], sizes = [16, 32], strides = [1, 1]} : vector<16x96xf32> to vector<16x32xf32>
    %1100 = arith.mulf %1095, %1099 : vector<16x32xf32>
    %1101 = arith.addf %1098, %1100 : vector<16x32xf32>
    %1102 = math.tanh %1101 : vector<16x32xf32>
    %cst_294 = arith.constant 1.000000e+00 : f32
    %1103 = vector.broadcast %cst_294 : f32 to vector<16x32xf32>
    %1104 = arith.subf %1103, %1096 : vector<16x32xf32>
    %1105 = arith.mulf %1104, %1102 : vector<16x32xf32>
    %1106 = arith.mulf %1096, %1046 : vector<16x32xf32>
    %1107 = arith.addf %1105, %1106 : vector<16x32xf32>
    %1108 = vector.broadcast %c5_i32_279 : i32 to vector<16x1xi32>
    %1109 = arith.cmpi sgt, %0, %1108 : vector<16x1xi32>
    %1110 = vector.shape_cast %1109 : vector<16x1xi1> to vector<16x1xi1>
    %1111 = vector.broadcast %1110 : vector<16x1xi1> to vector<16x32xi1>
    %1112 = arith.select %1111, %1077, %1041 : vector<16x32xi1>, vector<16x32xf32>
    %1113 = vector.broadcast %1047 : i32 to vector<16x1xi32>
    %1114 = arith.cmpi sgt, %0, %1113 : vector<16x1xi32>
    %1115 = vector.shape_cast %1114 : vector<16x1xi1> to vector<16x1xi1>
    %1116 = vector.broadcast %1115 : vector<16x1xi1> to vector<16x32xi1>
    %1117 = arith.select %1116, %1107, %1046 : vector<16x32xi1>, vector<16x32xf32>
    %c6_i32_295 = arith.constant 6 : i32
    %c7_i32_296 = arith.constant 7 : i32
    %1118 = arith.subi %c7_i32_296, %c6_i32_295 : i32
    %1119 = arith.index_cast %c6_i32_295 : i32 to index
    %c0_297 = arith.constant 0 : index
    %c0_298 = arith.constant 0 : index
    %1120 = vector.load %arg26[%1119, %c0_297, %c0_298] : memref<8x16x96xbf16, #tpu.memory_space<vmem>>, vector<1x16x96xbf16>
    %1121 = vector.shape_cast %1120 : vector<1x16x96xbf16> to vector<16x96xbf16>
    %1122 = arith.truncf %1112 : vector<16x32xf32> to vector<16x32xbf16>
    %c0_299 = arith.constant 0 : index
    %c0_300 = arith.constant 0 : index
    %1123 = vector.load %arg13[%c0_299, %c0_300] : memref<32x96xbf16, #tpu.memory_space<vmem>>, vector<32x96xbf16>
    %cst_301 = arith.constant dense<0.000000e+00> : vector<16x96xf32>
    %1124 = tpu.matmul %1122, %1123, %cst_301 {dimension_numbers = #tpu.dot_dimension_numbers<[1], [0], [0], [1], [0, 0, 1, 1], [], []>} : vector<16x32xbf16>, vector<32x96xbf16>, vector<16x96xf32> -> vector<16x96xf32>
    %1125 = vector.broadcast %689 : vector<1x96xf32> to vector<16x96xf32>
    %1126 = arith.addf %1124, %1125 : vector<16x96xf32>
    %1127 = vector.extract_strided_slice %1121 {offsets = [0, 0], sizes = [16, 64], strides = [1, 1]} : vector<16x96xbf16> to vector<16x64xbf16>
    %1128 = arith.extf %1127 : vector<16x64xbf16> to vector<16x64xf32>
    %1129 = vector.extract_strided_slice %1126 {offsets = [0, 0], sizes = [16, 64], strides = [1, 1]} : vector<16x96xf32> to vector<16x64xf32>
    %1130 = arith.addf %1128, %1129 : vector<16x64xf32>
    %1131 = arith.negf %1130 : vector<16x64xf32>
    %1132 = math.exp %1131 : vector<16x64xf32>
    %cst_302 = arith.constant 1.000000e+00 : f32
    %1133 = vector.broadcast %cst_302 : f32 to vector<16x64xf32>
    %1134 = arith.addf %1133, %1132 : vector<16x64xf32>
    %1135 = arith.divf %1133, %1134 : vector<16x64xf32>
    %1136 = vector.extract_strided_slice %1135 {offsets = [0, 0], sizes = [16, 32], strides = [1, 1]} : vector<16x64xf32> to vector<16x32xf32>
    %1137 = vector.extract_strided_slice %1135 {offsets = [0, 32], sizes = [16, 32], strides = [1, 1]} : vector<16x64xf32> to vector<16x32xf32>
    %1138 = vector.extract_strided_slice %1121 {offsets = [0, 64], sizes = [16, 32], strides = [1, 1]} : vector<16x96xbf16> to vector<16x32xbf16>
    %1139 = arith.extf %1138 : vector<16x32xbf16> to vector<16x32xf32>
    %1140 = vector.extract_strided_slice %1126 {offsets = [0, 64], sizes = [16, 32], strides = [1, 1]} : vector<16x96xf32> to vector<16x32xf32>
    %1141 = arith.mulf %1136, %1140 : vector<16x32xf32>
    %1142 = arith.addf %1139, %1141 : vector<16x32xf32>
    %1143 = math.tanh %1142 : vector<16x32xf32>
    %cst_303 = arith.constant 1.000000e+00 : f32
    %1144 = vector.broadcast %cst_303 : f32 to vector<16x32xf32>
    %1145 = arith.subf %1144, %1137 : vector<16x32xf32>
    %1146 = arith.mulf %1145, %1143 : vector<16x32xf32>
    %1147 = arith.mulf %1137, %1112 : vector<16x32xf32>
    %1148 = arith.addf %1146, %1147 : vector<16x32xf32>
    %1149 = arith.index_cast %1118 : i32 to index
    %c0_304 = arith.constant 0 : index
    %c0_305 = arith.constant 0 : index
    %1150 = vector.load %arg27[%1149, %c0_304, %c0_305] : memref<8x16x96xbf16, #tpu.memory_space<vmem>>, vector<1x16x96xbf16>
    %1151 = vector.shape_cast %1150 : vector<1x16x96xbf16> to vector<16x96xbf16>
    %1152 = arith.truncf %1117 : vector<16x32xf32> to vector<16x32xbf16>
    %c0_306 = arith.constant 0 : index
    %c0_307 = arith.constant 0 : index
    %1153 = vector.load %arg17[%c0_306, %c0_307] : memref<32x96xbf16, #tpu.memory_space<vmem>>, vector<32x96xbf16>
    %cst_308 = arith.constant dense<0.000000e+00> : vector<16x96xf32>
    %1154 = tpu.matmul %1152, %1153, %cst_308 {dimension_numbers = #tpu.dot_dimension_numbers<[1], [0], [0], [1], [0, 0, 1, 1], [], []>} : vector<16x32xbf16>, vector<32x96xbf16>, vector<16x96xf32> -> vector<16x96xf32>
    %1155 = vector.broadcast %690 : vector<1x96xf32> to vector<16x96xf32>
    %1156 = arith.addf %1154, %1155 : vector<16x96xf32>
    %1157 = vector.extract_strided_slice %1151 {offsets = [0, 0], sizes = [16, 64], strides = [1, 1]} : vector<16x96xbf16> to vector<16x64xbf16>
    %1158 = arith.extf %1157 : vector<16x64xbf16> to vector<16x64xf32>
    %1159 = vector.extract_strided_slice %1156 {offsets = [0, 0], sizes = [16, 64], strides = [1, 1]} : vector<16x96xf32> to vector<16x64xf32>
    %1160 = arith.addf %1158, %1159 : vector<16x64xf32>
    %1161 = arith.negf %1160 : vector<16x64xf32>
    %1162 = math.exp %1161 : vector<16x64xf32>
    %cst_309 = arith.constant 1.000000e+00 : f32
    %1163 = vector.broadcast %cst_309 : f32 to vector<16x64xf32>
    %1164 = arith.addf %1163, %1162 : vector<16x64xf32>
    %1165 = arith.divf %1163, %1164 : vector<16x64xf32>
    %1166 = vector.extract_strided_slice %1165 {offsets = [0, 0], sizes = [16, 32], strides = [1, 1]} : vector<16x64xf32> to vector<16x32xf32>
    %1167 = vector.extract_strided_slice %1165 {offsets = [0, 32], sizes = [16, 32], strides = [1, 1]} : vector<16x64xf32> to vector<16x32xf32>
    %1168 = vector.extract_strided_slice %1151 {offsets = [0, 64], sizes = [16, 32], strides = [1, 1]} : vector<16x96xbf16> to vector<16x32xbf16>
    %1169 = arith.extf %1168 : vector<16x32xbf16> to vector<16x32xf32>
    %1170 = vector.extract_strided_slice %1156 {offsets = [0, 64], sizes = [16, 32], strides = [1, 1]} : vector<16x96xf32> to vector<16x32xf32>
    %1171 = arith.mulf %1166, %1170 : vector<16x32xf32>
    %1172 = arith.addf %1169, %1171 : vector<16x32xf32>
    %1173 = math.tanh %1172 : vector<16x32xf32>
    %cst_310 = arith.constant 1.000000e+00 : f32
    %1174 = vector.broadcast %cst_310 : f32 to vector<16x32xf32>
    %1175 = arith.subf %1174, %1167 : vector<16x32xf32>
    %1176 = arith.mulf %1175, %1173 : vector<16x32xf32>
    %1177 = arith.mulf %1167, %1117 : vector<16x32xf32>
    %1178 = arith.addf %1176, %1177 : vector<16x32xf32>
    %1179 = vector.broadcast %c6_i32_295 : i32 to vector<16x1xi32>
    %1180 = arith.cmpi sgt, %0, %1179 : vector<16x1xi32>
    %1181 = vector.shape_cast %1180 : vector<16x1xi1> to vector<16x1xi1>
    %1182 = vector.broadcast %1181 : vector<16x1xi1> to vector<16x32xi1>
    %1183 = arith.select %1182, %1148, %1112 : vector<16x32xi1>, vector<16x32xf32>
    %1184 = vector.broadcast %1118 : i32 to vector<16x1xi32>
    %1185 = arith.cmpi sgt, %0, %1184 : vector<16x1xi32>
    %1186 = vector.shape_cast %1185 : vector<16x1xi1> to vector<16x1xi1>
    %1187 = vector.broadcast %1186 : vector<16x1xi1> to vector<16x32xi1>
    %1188 = arith.select %1187, %1178, %1117 : vector<16x32xi1>, vector<16x32xf32>
    %c7_i32_311 = arith.constant 7 : i32
    %c7_i32_312 = arith.constant 7 : i32
    %1189 = arith.subi %c7_i32_312, %c7_i32_311 : i32
    %1190 = arith.index_cast %c7_i32_311 : i32 to index
    %c0_313 = arith.constant 0 : index
    %c0_314 = arith.constant 0 : index
    %1191 = vector.load %arg26[%1190, %c0_313, %c0_314] : memref<8x16x96xbf16, #tpu.memory_space<vmem>>, vector<1x16x96xbf16>
    %1192 = vector.shape_cast %1191 : vector<1x16x96xbf16> to vector<16x96xbf16>
    %1193 = arith.truncf %1183 : vector<16x32xf32> to vector<16x32xbf16>
    %c0_315 = arith.constant 0 : index
    %c0_316 = arith.constant 0 : index
    %1194 = vector.load %arg13[%c0_315, %c0_316] : memref<32x96xbf16, #tpu.memory_space<vmem>>, vector<32x96xbf16>
    %cst_317 = arith.constant dense<0.000000e+00> : vector<16x96xf32>
    %1195 = tpu.matmul %1193, %1194, %cst_317 {dimension_numbers = #tpu.dot_dimension_numbers<[1], [0], [0], [1], [0, 0, 1, 1], [], []>} : vector<16x32xbf16>, vector<32x96xbf16>, vector<16x96xf32> -> vector<16x96xf32>
    %1196 = vector.broadcast %689 : vector<1x96xf32> to vector<16x96xf32>
    %1197 = arith.addf %1195, %1196 : vector<16x96xf32>
    %1198 = vector.extract_strided_slice %1192 {offsets = [0, 0], sizes = [16, 64], strides = [1, 1]} : vector<16x96xbf16> to vector<16x64xbf16>
    %1199 = arith.extf %1198 : vector<16x64xbf16> to vector<16x64xf32>
    %1200 = vector.extract_strided_slice %1197 {offsets = [0, 0], sizes = [16, 64], strides = [1, 1]} : vector<16x96xf32> to vector<16x64xf32>
    %1201 = arith.addf %1199, %1200 : vector<16x64xf32>
    %1202 = arith.negf %1201 : vector<16x64xf32>
    %1203 = math.exp %1202 : vector<16x64xf32>
    %cst_318 = arith.constant 1.000000e+00 : f32
    %1204 = vector.broadcast %cst_318 : f32 to vector<16x64xf32>
    %1205 = arith.addf %1204, %1203 : vector<16x64xf32>
    %1206 = arith.divf %1204, %1205 : vector<16x64xf32>
    %1207 = vector.extract_strided_slice %1206 {offsets = [0, 0], sizes = [16, 32], strides = [1, 1]} : vector<16x64xf32> to vector<16x32xf32>
    %1208 = vector.extract_strided_slice %1206 {offsets = [0, 32], sizes = [16, 32], strides = [1, 1]} : vector<16x64xf32> to vector<16x32xf32>
    %1209 = vector.extract_strided_slice %1192 {offsets = [0, 64], sizes = [16, 32], strides = [1, 1]} : vector<16x96xbf16> to vector<16x32xbf16>
    %1210 = arith.extf %1209 : vector<16x32xbf16> to vector<16x32xf32>
    %1211 = vector.extract_strided_slice %1197 {offsets = [0, 64], sizes = [16, 32], strides = [1, 1]} : vector<16x96xf32> to vector<16x32xf32>
    %1212 = arith.mulf %1207, %1211 : vector<16x32xf32>
    %1213 = arith.addf %1210, %1212 : vector<16x32xf32>
    %1214 = math.tanh %1213 : vector<16x32xf32>
    %cst_319 = arith.constant 1.000000e+00 : f32
    %1215 = vector.broadcast %cst_319 : f32 to vector<16x32xf32>
    %1216 = arith.subf %1215, %1208 : vector<16x32xf32>
    %1217 = arith.mulf %1216, %1214 : vector<16x32xf32>
    %1218 = arith.mulf %1208, %1183 : vector<16x32xf32>
    %1219 = arith.addf %1217, %1218 : vector<16x32xf32>
    %1220 = arith.index_cast %1189 : i32 to index
    %c0_320 = arith.constant 0 : index
    %c0_321 = arith.constant 0 : index
    %1221 = vector.load %arg27[%1220, %c0_320, %c0_321] : memref<8x16x96xbf16, #tpu.memory_space<vmem>>, vector<1x16x96xbf16>
    %1222 = vector.shape_cast %1221 : vector<1x16x96xbf16> to vector<16x96xbf16>
    %1223 = arith.truncf %1188 : vector<16x32xf32> to vector<16x32xbf16>
    %c0_322 = arith.constant 0 : index
    %c0_323 = arith.constant 0 : index
    %1224 = vector.load %arg17[%c0_322, %c0_323] : memref<32x96xbf16, #tpu.memory_space<vmem>>, vector<32x96xbf16>
    %cst_324 = arith.constant dense<0.000000e+00> : vector<16x96xf32>
    %1225 = tpu.matmul %1223, %1224, %cst_324 {dimension_numbers = #tpu.dot_dimension_numbers<[1], [0], [0], [1], [0, 0, 1, 1], [], []>} : vector<16x32xbf16>, vector<32x96xbf16>, vector<16x96xf32> -> vector<16x96xf32>
    %1226 = vector.broadcast %690 : vector<1x96xf32> to vector<16x96xf32>
    %1227 = arith.addf %1225, %1226 : vector<16x96xf32>
    %1228 = vector.extract_strided_slice %1222 {offsets = [0, 0], sizes = [16, 64], strides = [1, 1]} : vector<16x96xbf16> to vector<16x64xbf16>
    %1229 = arith.extf %1228 : vector<16x64xbf16> to vector<16x64xf32>
    %1230 = vector.extract_strided_slice %1227 {offsets = [0, 0], sizes = [16, 64], strides = [1, 1]} : vector<16x96xf32> to vector<16x64xf32>
    %1231 = arith.addf %1229, %1230 : vector<16x64xf32>
    %1232 = arith.negf %1231 : vector<16x64xf32>
    %1233 = math.exp %1232 : vector<16x64xf32>
    %cst_325 = arith.constant 1.000000e+00 : f32
    %1234 = vector.broadcast %cst_325 : f32 to vector<16x64xf32>
    %1235 = arith.addf %1234, %1233 : vector<16x64xf32>
    %1236 = arith.divf %1234, %1235 : vector<16x64xf32>
    %1237 = vector.extract_strided_slice %1236 {offsets = [0, 0], sizes = [16, 32], strides = [1, 1]} : vector<16x64xf32> to vector<16x32xf32>
    %1238 = vector.extract_strided_slice %1236 {offsets = [0, 32], sizes = [16, 32], strides = [1, 1]} : vector<16x64xf32> to vector<16x32xf32>
    %1239 = vector.extract_strided_slice %1222 {offsets = [0, 64], sizes = [16, 32], strides = [1, 1]} : vector<16x96xbf16> to vector<16x32xbf16>
    %1240 = arith.extf %1239 : vector<16x32xbf16> to vector<16x32xf32>
    %1241 = vector.extract_strided_slice %1227 {offsets = [0, 64], sizes = [16, 32], strides = [1, 1]} : vector<16x96xf32> to vector<16x32xf32>
    %1242 = arith.mulf %1237, %1241 : vector<16x32xf32>
    %1243 = arith.addf %1240, %1242 : vector<16x32xf32>
    %1244 = math.tanh %1243 : vector<16x32xf32>
    %cst_326 = arith.constant 1.000000e+00 : f32
    %1245 = vector.broadcast %cst_326 : f32 to vector<16x32xf32>
    %1246 = arith.subf %1245, %1238 : vector<16x32xf32>
    %1247 = arith.mulf %1246, %1244 : vector<16x32xf32>
    %1248 = arith.mulf %1238, %1188 : vector<16x32xf32>
    %1249 = arith.addf %1247, %1248 : vector<16x32xf32>
    %1250 = vector.broadcast %c7_i32_311 : i32 to vector<16x1xi32>
    %1251 = arith.cmpi sgt, %0, %1250 : vector<16x1xi32>
    %1252 = vector.shape_cast %1251 : vector<16x1xi1> to vector<16x1xi1>
    %1253 = vector.broadcast %1252 : vector<16x1xi1> to vector<16x32xi1>
    %1254 = arith.select %1253, %1219, %1183 : vector<16x32xi1>, vector<16x32xf32>
    %1255 = vector.broadcast %1189 : i32 to vector<16x1xi32>
    %1256 = arith.cmpi sgt, %0, %1255 : vector<16x1xi32>
    %1257 = vector.shape_cast %1256 : vector<16x1xi1> to vector<16x1xi1>
    %1258 = vector.broadcast %1257 : vector<16x1xi1> to vector<16x32xi1>
    %1259 = arith.select %1258, %1249, %1188 : vector<16x32xi1>, vector<16x32xf32>
    %c8_i32_327 = arith.constant 8 : i32
    %1260 = tpu.concatenate %655, %660, %1254, %1259 in 1 : vector<16x32xf32>, vector<16x32xf32>, vector<16x32xf32>, vector<16x32xf32> -> vector<16x128xf32>
    %1261 = arith.truncf %1260 : vector<16x128xf32> to vector<16x128xbf16>
    %c0_328 = arith.constant 0 : index
    %c0_329 = arith.constant 0 : index
    %1262 = vector.load %arg19[%c0_328, %c0_329] : memref<128x32xbf16, #tpu.memory_space<vmem>>, vector<128x32xbf16>
    %cst_330 = arith.constant dense<0.000000e+00> : vector<16x32xf32>
    %1263 = tpu.matmul %1261, %1262, %cst_330 {dimension_numbers = #tpu.dot_dimension_numbers<[1], [0], [0], [1], [0, 0, 1, 1], [], []>} : vector<16x128xbf16>, vector<128x32xbf16>, vector<16x32xf32> -> vector<16x32xf32>
    %c0_331 = arith.constant 0 : index
    %c0_332 = arith.constant 0 : index
    %1264 = vector.load %arg20[%c0_331, %c0_332] : memref<1x32xf32, #tpu.memory_space<vmem>>, vector<1x32xf32>
    %1265 = vector.broadcast %1264 : vector<1x32xf32> to vector<16x32xf32>
    %1266 = arith.addf %1263, %1265 : vector<16x32xf32>
    %c0_333 = arith.constant 0 : index
    %c0_334 = arith.constant 0 : index
    %1267 = vector.load %arg21[%c0_333, %c0_334] : memref<1x32xf32, #tpu.memory_space<vmem>>, vector<1x32xf32>
    %1268 = vector.broadcast %1267 : vector<1x32xf32> to vector<16x32xf32>
    %1269 = arith.mulf %1266, %1268 : vector<16x32xf32>
    %c0_335 = arith.constant 0 : index
    %c0_336 = arith.constant 0 : index
    %1270 = vector.load %arg22[%c0_335, %c0_336] : memref<1x32xf32, #tpu.memory_space<vmem>>, vector<1x32xf32>
    %1271 = vector.broadcast %1270 : vector<1x32xf32> to vector<16x32xf32>
    %1272 = arith.addf %1269, %1271 : vector<16x32xf32>
    %cst_337 = arith.constant 0.000000e+00 : f32
    %1273 = vector.broadcast %cst_337 : f32 to vector<16x32xf32>
    %1274 = arith.maximumf %1272, %1273 : vector<16x32xf32>
    %1275 = arith.truncf %1274 : vector<16x32xf32> to vector<16x32xbf16>
    %c0_338 = arith.constant 0 : index
    %c0_339 = arith.constant 0 : index
    %1276 = vector.load %arg23[%c0_338, %c0_339] : memref<32x32xbf16, #tpu.memory_space<vmem>>, vector<32x32xbf16>
    %cst_340 = arith.constant dense<0.000000e+00> : vector<16x32xf32>
    %1277 = tpu.matmul %1275, %1276, %cst_340 {dimension_numbers = #tpu.dot_dimension_numbers<[1], [0], [0], [1], [0, 0, 1, 1], [], []>} : vector<16x32xbf16>, vector<32x32xbf16>, vector<16x32xf32> -> vector<16x32xf32>
    %c0_341 = arith.constant 0 : index
    %c0_342 = arith.constant 0 : index
    %1278 = vector.load %arg24[%c0_341, %c0_342] : memref<1x32xf32, #tpu.memory_space<vmem>>, vector<1x32xf32>
    %1279 = vector.broadcast %1278 : vector<1x32xf32> to vector<16x32xf32>
    %1280 = arith.addf %1277, %1279 : vector<16x32xf32>
    %cst_343 = arith.constant 0.000000e+00 : f32
    %1281 = vector.broadcast %cst_343 : f32 to vector<16x32xf32>
    %1282 = arith.maximumf %1280, %1281 : vector<16x32xf32>
    %c0_344 = arith.constant 0 : index
    %c0_345 = arith.constant 0 : index
    %1283 = vector.load %arg25[%c0_344, %c0_345] : memref<16x32xf32, #tpu.memory_space<vmem>>, vector<16x32xf32>
    tpu.vector_store %arg25[%c0_344, %c0_345], %1282 {strides = array<i32>} : memref<16x32xf32, #tpu.memory_space<vmem>>, vector<16x32xf32>,
    return
  }
  func.func @transform_0(%arg0: i32) -> (i32, i32, i32) {
    %c0_i32 = arith.constant 0 : i32
    %c0_i32_0 = arith.constant 0 : i32
    %c0_i32_1 = arith.constant 0 : i32
    return %c0_i32, %arg0, %c0_i32_0 : i32, i32, i32
  }
  func.func @transform_1(%arg0: i32) -> (i32, i32) {
    %c0_i32 = arith.constant 0 : i32
    %c0_i32_0 = arith.constant 0 : i32
    return %arg0, %c0_i32 : i32, i32
  }
  func.func @transform_2(%arg0: i32) -> (i32, i32) {
    %c0_i32 = arith.constant 0 : i32
    %c0_i32_0 = arith.constant 0 : i32
    %c0_i32_1 = arith.constant 0 : i32
    return %c0_i32, %c0_i32_0 : i32, i32
  }
  func.func @transform_3(%arg0: i32) -> (i32, i32) {
    %c0_i32 = arith.constant 0 : i32
    %c0_i32_0 = arith.constant 0 : i32
    %c0_i32_1 = arith.constant 0 : i32
    return %c0_i32, %c0_i32_0 : i32, i32
  }
  func.func @transform_4(%arg0: i32) -> (i32, i32) {
    %c0_i32 = arith.constant 0 : i32
    %c0_i32_0 = arith.constant 0 : i32
    %c0_i32_1 = arith.constant 0 : i32
    return %c0_i32, %c0_i32_0 : i32, i32
  }
  func.func @transform_5(%arg0: i32) -> (i32, i32) {
    %c0_i32 = arith.constant 0 : i32
    %c0_i32_0 = arith.constant 0 : i32
    %c0_i32_1 = arith.constant 0 : i32
    return %c0_i32, %c0_i32_0 : i32, i32
  }
  func.func @transform_6(%arg0: i32) -> (i32, i32) {
    %c0_i32 = arith.constant 0 : i32
    %c0_i32_0 = arith.constant 0 : i32
    %c0_i32_1 = arith.constant 0 : i32
    return %c0_i32, %c0_i32_0 : i32, i32
  }
  func.func @transform_7(%arg0: i32) -> (i32, i32) {
    %c0_i32 = arith.constant 0 : i32
    %c0_i32_0 = arith.constant 0 : i32
    %c0_i32_1 = arith.constant 0 : i32
    return %c0_i32, %c0_i32_0 : i32, i32
  }
  func.func @transform_8(%arg0: i32) -> (i32, i32) {
    %c0_i32 = arith.constant 0 : i32
    %c0_i32_0 = arith.constant 0 : i32
    %c0_i32_1 = arith.constant 0 : i32
    return %c0_i32, %c0_i32_0 : i32, i32
  }
  func.func @transform_9(%arg0: i32) -> (i32, i32) {
    %c0_i32 = arith.constant 0 : i32
    %c0_i32_0 = arith.constant 0 : i32
    %c0_i32_1 = arith.constant 0 : i32
    return %c0_i32, %c0_i32_0 : i32, i32
  }
  func.func @transform_10(%arg0: i32) -> (i32, i32) {
    %c0_i32 = arith.constant 0 : i32
    %c0_i32_0 = arith.constant 0 : i32
    %c0_i32_1 = arith.constant 0 : i32
    return %c0_i32, %c0_i32_0 : i32, i32
  }
  func.func @transform_11(%arg0: i32) -> (i32, i32) {
    %c0_i32 = arith.constant 0 : i32
    %c0_i32_0 = arith.constant 0 : i32
    %c0_i32_1 = arith.constant 0 : i32
    return %c0_i32, %c0_i32_0 : i32, i32
  }
  func.func @transform_12(%arg0: i32) -> (i32, i32) {
    %c0_i32 = arith.constant 0 : i32
    %c0_i32_0 = arith.constant 0 : i32
    %c0_i32_1 = arith.constant 0 : i32
    return %c0_i32, %c0_i32_0 : i32, i32
  }
  func.func @transform_13(%arg0: i32) -> (i32, i32) {
    %c0_i32 = arith.constant 0 : i32
    %c0_i32_0 = arith.constant 0 : i32
    %c0_i32_1 = arith.constant 0 : i32
    return %c0_i32, %c0_i32_0 : i32, i32
  }
  func.func @transform_14(%arg0: i32) -> (i32, i32) {
    %c0_i32 = arith.constant 0 : i32
    %c0_i32_0 = arith.constant 0 : i32
    %c0_i32_1 = arith.constant 0 : i32
    return %c0_i32, %c0_i32_0 : i32, i32
  }
  func.func @transform_15(%arg0: i32) -> (i32, i32) {
    %c0_i32 = arith.constant 0 : i32
    %c0_i32_0 = arith.constant 0 : i32
    %c0_i32_1 = arith.constant 0 : i32
    return %c0_i32, %c0_i32_0 : i32, i32
  }
  func.func @transform_16(%arg0: i32) -> (i32, i32) {
    %c0_i32 = arith.constant 0 : i32
    %c0_i32_0 = arith.constant 0 : i32
    %c0_i32_1 = arith.constant 0 : i32
    return %c0_i32, %c0_i32_0 : i32, i32
  }
  func.func @transform_17(%arg0: i32) -> (i32, i32) {
    %c0_i32 = arith.constant 0 : i32
    %c0_i32_0 = arith.constant 0 : i32
    %c0_i32_1 = arith.constant 0 : i32
    return %c0_i32, %c0_i32_0 : i32, i32
  }
  func.func @transform_18(%arg0: i32) -> (i32, i32) {
    %c0_i32 = arith.constant 0 : i32
    %c0_i32_0 = arith.constant 0 : i32
    %c0_i32_1 = arith.constant 0 : i32
    return %c0_i32, %c0_i32_0 : i32, i32
  }
  func.func @transform_19(%arg0: i32) -> (i32, i32) {
    %c0_i32 = arith.constant 0 : i32
    %c0_i32_0 = arith.constant 0 : i32
    %c0_i32_1 = arith.constant 0 : i32
    return %c0_i32, %c0_i32_0 : i32, i32
  }
  func.func @transform_20(%arg0: i32) -> (i32, i32) {
    %c0_i32 = arith.constant 0 : i32
    %c0_i32_0 = arith.constant 0 : i32
    %c0_i32_1 = arith.constant 0 : i32
    return %c0_i32, %c0_i32_0 : i32, i32
  }
  func.func @transform_21(%arg0: i32) -> (i32, i32) {
    %c0_i32 = arith.constant 0 : i32
    %c0_i32_0 = arith.constant 0 : i32
    %c0_i32_1 = arith.constant 0 : i32
    return %c0_i32, %c0_i32_0 : i32, i32
  }
  func.func @transform_22(%arg0: i32) -> (i32, i32) {
    %c0_i32 = arith.constant 0 : i32
    %c0_i32_0 = arith.constant 0 : i32
    %c0_i32_1 = arith.constant 0 : i32
    return %c0_i32, %c0_i32_0 : i32, i32
  }
  func.func @transform_23(%arg0: i32) -> (i32, i32) {
    %c0_i32 = arith.constant 0 : i32
    %c0_i32_0 = arith.constant 0 : i32
    %c0_i32_1 = arith.constant 0 : i32
    return %c0_i32, %c0_i32_0 : i32, i32
  }
  func.func @transform_24(%arg0: i32) -> (i32, i32) {
    %c0_i32 = arith.constant 0 : i32
    %c0_i32_0 = arith.constant 0 : i32
    return %arg0, %c0_i32 : i32, i32
  }
}

</mosaic_0001>

<bundles_post_ra>
// kernel: extract_gru_encoder.1
= control target key start
LH: loop header
LB: loop body
LE: loop exit
PB: predicated region body
PF: predicated region fallthrough
CT: control target
= control target key end

     0   :  { %vm124_vm0 = vcmask 261120   ;;  %v8089_v7 = vmov 0   ;;  %vm214_vm1 = vcmask 781312   ;;  %s8046_s6 = inlined_call_operand.vmem [shape: bf16[32,96], index: 6, kind: input, shape index: {}]   ;;  %s8047_s0 = inlined_call_operand.vmem [shape: f32[8,16,32], index: 0, kind: input, shape index: {}]   ;;  %s8048_s8 = inlined_call_operand.vmem [shape: bf16[32,96], index: 8, kind: input, shape index: {}]   ;;  %s8049_s7 = inlined_call_operand.vmem [shape: f32[1,96], index: 7, kind: input, shape index: {}]   ;;  %s8050_s9 = inlined_call_operand.vmem [shape: f32[1,96], index: 9, kind: input, shape index: {}]   ;;  %s8051_s4 = inlined_call_operand.vmem [shape: bf16[32,96], index: 4, kind: input, shape index: {}]   ;;  %s8052_s5 = inlined_call_operand.vmem [shape: f32[1,96], index: 5, kind: input, shape index: {}]   ;;  %s8053_s2 = inlined_call_operand.vmem [shape: bf16[32,96], index: 2, kind: input, shape index: {}]   ;;  %s8054_s3 = inlined_call_operand.vmem [shape: f32[1,96], index: 3, kind: input, shape index: {}]   ;;  %s8055_s1 = inlined_call_operand.vmem [shape: s32[16,1], index: 1, kind: input, shape index: {}]   ;;  %s8056_s12 = inlined_call_operand.vmem [shape: bf16[32,96], index: 12, kind: input, shape index: {}]   ;;  %s8057_s13 = inlined_call_operand.vmem [shape: f32[1,96], index: 13, kind: input, shape index: {}]   ;;  %s8058_s10 = inlined_call_operand.vmem [shape: bf16[64,96], index: 10, kind: input, shape index: {}]   ;;  %s8059_s14 = inlined_call_operand.vmem [shape: bf16[64,96], index: 14, kind: input, shape index: {}]   ;;  %s8060_s11 = inlined_call_operand.vmem [shape: f32[1,96], index: 11, kind: input, shape index: {}]   ;;  %s8061_s15 = inlined_call_operand.vmem [shape: f32[1,96], index: 15, kind: input, shape index: {}]   ;;  %s8062_s16 = inlined_call_operand.vmem [shape: bf16[32,96], index: 16, kind: input, shape index: {}]   ;;  %s8063_s17 = inlined_call_operand.vmem [shape: f32[1,96], index: 17, kind: input, shape index: {}]   ;;  %s8064_s18 = inlined_call_operand.vmem [shape: bf16[128,32], index: 18, kind: input, shape index: {}]   ;;  %s8065_s19 = inlined_call_operand.vmem [shape: f32[1,32], index: 19, kind: input, shape index: {}]   ;;  %s8066_s20 = inlined_call_operand.vmem [shape: f32[1,32], index: 20, kind: input, shape index: {}]   ;;  %s8067_s21 = inlined_call_operand.vmem [shape: f32[1,32], index: 21, kind: input, shape index: {}]   ;;  %s8068_s22 = inlined_call_operand.vmem [shape: bf16[32,32], index: 22, kind: input, shape index: {}]   ;;  %s8069_s23 = inlined_call_operand.vmem [shape: f32[1,32], index: 23, kind: input, shape index: {}]   ;;  %s8070_s24 = inlined_call_operand.vmem [shape: f32[16,32], index: 24, kind: output, shape index: {}]  }
   0x1   :  { %8092 = sst [smem:[#allocation5_spill]] %s8046_s6  ;;  %5322 = vset.pattern.permute.xlu2 %v8089_v7  ;;  %5323 = vset.pattern.permute.xlu0 %v8089_v7 }
   0x2   :  { %8093 = sst [smem:[#allocation6_spill]] %s8047_s0  ;;  %5324 = vset.pattern.permute.xlu1 %v8089_v7 }
   0x3   :  { %8094 = sst [smem:[#allocation7_spill]] %s8048_s8 }
   0x4   :  { %8095 = sst [smem:[#allocation8_spill]] %s8049_s7 }
   0x5   :  { %8096 = sst [smem:[#allocation9_spill]] %s8050_s9 }
   0x6   :  { %8097 = sst [smem:[#allocation10_spill]] %s8051_s4 }
   0x7   :  { %8098 = sst [smem:[#allocation11_spill]] %s8052_s5  ;;  %s5754_s5 = smov 96  }
   0x8   :  { %8099 = sst [smem:[#allocation12_spill]] %s8053_s2  ;;  %s5753_s2 = smov 64  }
   0x9   :  { %8100 = sst [smem:[#allocation13_spill]] %s8054_s3 }
   0xa   :  { %s8101_s27 = sld [smem:[#allocation5_spill]] }
   0xb   :  { %s8102_s29 = sld [smem:[#allocation6_spill]] }
   0xc   :  { %s8103_s25 = sld [smem:[#allocation7_spill]] }
   0xd   :  { %s8104_s26 = sld [smem:[#allocation10_spill]] }
   0xe   :  { %s8105_s7 = sld [smem:[#allocation12_spill]] }
   0xf   :  { %s8107_s8 = sld [smem:[#allocation9_spill]] }
  0x10   :  { %v5127_v0 = vld [vmem:[%s8101_s27 + $0x8] sm:$0xff]  ;;  %v5126_v1 = vld [vmem:[%s8101_s27] sm:$0xff]  ;;  %s8108_s3 = sld [smem:[#allocation11_spill]] }
  0x11   :  { %257 = vmatpush.bf16.msra.mxu1 %v5127_v0  ;;  %v80_v2 = vld [vmem:[%s8102_s29] sm:$0xff]  ;;  %v81_v3 = vld [vmem:[%s8102_s29 + $0x8] sm:$0xff]  ;;  %v82_v8 = vld [vmem:[%s8102_s29 + $0x10] sm:$0xff]  ;;  %s8109_s0 = sld [smem:[#allocation13_spill]] }
  0x12   :  { %v5131_v4 = vld [vmem:[%s8103_s25 + $0x8] sm:$0xff]  ;;  %v5130_v5 = vld [vmem:[%s8103_s25] sm:$0xff]  ;;  %v96_v6 = vpack.c.bf16 %v81_v3, %v80_v2  ;;  %v83_v9 = vld [vmem:[%s8102_s29 + $0x18] sm:$0xff] }
  0x13   :  { %480 = vmatpush.bf16.msra.mxu3 %v5131_v4  ;;  %v97_v10 = vpack.c.bf16 %v83_v9, %v82_v8  ;;  %v84_v11 = vld [vmem:[%s8102_s29 + $0x20] sm:$0xff]  ;;  %v85_v12 = vld [vmem:[%s8102_s29 + $0x28] sm:$0xff]  ;;  %v86_v14 = vld [vmem:[%s8102_s29 + $0x30] sm:$0xff] }
  0x14   :  { %v5917_v13 = vpack.c.bf16 %v85_v12, %v84_v11  ;;  %v87_v15 = vld [vmem:[%s8102_s29 + $0x38] sm:$0xff]  ;;  %v5129_v17 = vld [vmem:[%s8104_s26 + $0x8] sm:$0xff]  ;;  %v5128_v18 = vld [vmem:[%s8104_s26] sm:$0xff] }
  0x15   :  { %258 = vmatpush.bf16.msra.mxu1 %v5126_v1  ;;  %v5927_v16 = vpack.c.bf16 %v87_v15, %v86_v14  ;;  %364 = vmatpush.bf16.msra.mxu2 %v5129_v17  ;;  %v88_v19 = vld [vmem:[%s8102_s29 + $0x40] sm:$0xff]  ;;  %v89_v20 = vld [vmem:[%s8102_s29 + $0x48] sm:$0xff]  ;;  %v90_v22 = vld [vmem:[%s8102_s29 + $0x50] sm:$0xff] }
  0x16   :  { %v5944_v21 = vpack.c.bf16 %v89_v20, %v88_v19  ;;  %v91_v23 = vld [vmem:[%s8102_s29 + $0x58] sm:$0xff]  ;;  %v92_v25 = vld [vmem:[%s8102_s29 + $0x60] sm:$0xff]  ;;  %v93_v26 = vld [vmem:[%s8102_s29 + $0x68] sm:$0xff] }
  0x17   :  { %481 = vmatpush.bf16.msra.mxu3 %v5130_v5  ;;  %v5954_v24 = vpack.c.bf16 %v91_v23, %v90_v22  ;;  %v5964_v27 = vpack.c.bf16 %v93_v26, %v92_v25  ;;  %v94_v28 = vld [vmem:[%s8102_s29 + $0x70] sm:$0xff]  ;;  %v95_v29 = vld [vmem:[%s8102_s29 + $0x78] sm:$0xff]  ;;  %v5125_v31 = vld [vmem:[%s8105_s7 + $0x8] sm:$0xff]  ;;  %s8106_s29 = sld [smem:[#allocation8_spill]] }
  0x18   :  { %4759 = vmatmul.msk.bf16.vlgmr.msra.gmra.mxu1 %vm124_vm0, %v96_v6  ;;  %v5974_v30 = vpack.c.bf16 %v95_v29, %v94_v28  ;;  %155 = vmatpush.bf16.msra.mxu0 %v5125_v31  ;;  %v5124_v32 = vld [vmem:[%s8105_s7] sm:$0xff] }
  0x19   :  { %365 = vmatpush.bf16.msra.mxu2 %v5128_v18  ;;  %v5995_v37 = vld [vmem:[%s8107_s8] ss:$0 sm:$0xff] }
  0x1a   :  { %482 = vmatmul.bf16.vlgmr.msra.gmra.mxu3 %v8089_v7  ;;  %v6033_v2 = vld [vmem:[%s8108_s3] ss:$0 sm:$0xff] }
  0x1b   :  { %v6063_v26 = vld [vmem:[%s8109_s0] ss:$0 sm:$0xff] }
  0x1c   :  { %366 = vmatmul.bf16.vlgmr.msra.gmra.mxu2 %v8089_v7  ;;  %156 = vmatpush.bf16.msra.mxu0 %v5124_v32 }
  0x1d   :  { %v5988_v33 = vld [vmem:[%s8106_s29] ss:$0 sm:$0xff] }
  0x1f   :  { %4743 = vmatmul.msk.bf16.vlgmr.msra.gmra.mxu0 %vm124_vm0, %v96_v6 }
  0x28   :  { %4760 = vmatmul.msk.bf16.gmra.mxu1 %vm124_vm0, %v97_v10 }
  0x2f   :  { %4744 = vmatmul.msk.bf16.gmra.mxu0 %vm124_vm0, %v97_v10 }
  0x38   :  { %4761 = vmatmul.msk.bf16.gmra.mxu1 %vm124_vm0, %v5917_v13 }
  0x3f   :  { %4745 = vmatmul.msk.bf16.gmra.mxu0 %vm124_vm0, %v5917_v13 }
  0x48   :  { %4762 = vmatmul.msk.bf16.gmra.mxu1 %vm124_vm0, %v5927_v16 }
  0x4f   :  { %4746 = vmatmul.msk.bf16.gmra.mxu0 %vm124_vm0, %v5927_v16 }
  0x58   :  { %4763 = vmatmul.msk.bf16.gmra.mxu1 %vm124_vm0, %v5944_v21 }
  0x5f   :  { %4747 = vmatmul.msk.bf16.gmra.mxu0 %vm124_vm0, %v5944_v21 }
  0x68   :  { %4764 = vmatmul.msk.bf16.gmra.mxu1 %vm124_vm0, %v5954_v24 }
  0x6f   :  { %4748 = vmatmul.msk.bf16.gmra.mxu0 %vm124_vm0, %v5954_v24 }
  0x78   :  { %4765 = vmatmul.msk.bf16.gmra.mxu1 %vm124_vm0, %v5964_v27 }
  0x7f   :  { %4749 = vmatmul.msk.bf16.gmra.mxu0 %vm124_vm0, %v5964_v27 }
  0x88   :  { %4766 = vmatmul.msk.bf16.gmra.mxu1 %vm124_vm0, %v5974_v30 }
  0x8f   :  { %4750 = vmatmul.msk.bf16.gmra.mxu0 %vm124_vm0, %v5974_v30 }
  0x95   :  { %v260_v34 = vpop.f32.mrf.mxu1 }
  0x96   :  { %v261_v35 = vadd.f32 %v5988_v33, %v260_v34 }
  0x98   :  { %v300_v36 = vpack.c.bf16 %v261_v35, %v261_v35 }
  0x9a   :  { %316 = vst.msk [vmem:[#allocation3] sm:$0xf] %vm214_vm1, %v300_v36 }
  0x9c   :  { %v158_v28 = vpop.f32.mrf.mxu0 }
  0x9d   :  { %v262_v38 = vpop.f32.mrf.mxu1  ;;  %v483_v39 = vpop.f32.mrf.mxu3  ;;  %v159_v31 = vadd.f32 %v6063_v26, %v158_v28 }
  0x9e   :  { %v263_v40 = vadd.f32 %v5988_v33, %v262_v38  ;;  %v5999_v41 = vadd.f32 %v5995_v37, %v483_v39 }
  0x9f   :  { %v367_v3 = vpop.f32.mrf.mxu2  ;;  %v198_v32 = vpack.c.bf16 %v159_v31, %v159_v31 }
  0xa0   :  { %v301_v42 = vpack.c.bf16 %v263_v40, %v263_v40  ;;  %532 = vrot.lane.b32.xlu0 %v5999_v41, %s5753_s2  ;;  %v6036_v4 = vadd.f32 %v6033_v2, %v367_v3 }
  0xa1   :  { %215 = vst.msk [vmem:[#allocation2] sm:$0xf] %vm214_vm1, %v198_v32 }
  0xa2   :  { %317 = vst.msk [vmem:[#allocation3 + $0x4] sm:$0xf] %vm214_vm1, %v301_v42  ;;  %416 = vrot.lane.b32.xlu2 %v6036_v4, %s5753_s2 }
  0xa4   :  { %v160_v34 = vpop.f32.mrf.mxu0 }
  0xa5   :  { %v265_v43 = vpop.f32.mrf.mxu1  ;;  %v485_v44 = vpop.f32.mrf.mxu3  ;;  %v161_v35 = vadd.f32 %v6063_v26, %v160_v34 }
  0xa6   :  { %v266_v45 = vadd.f32 %v5988_v33, %v265_v43  ;;  %v6007_v46 = vadd.f32 %v5995_v37, %v485_v44 }
  0xa7   :  { %v369_v9 = vpop.f32.mrf.mxu2  ;;  %v199_v36 = vpack.c.bf16 %v161_v35, %v161_v35 }
  0xa8   :  { %v302_v47 = vpack.c.bf16 %v266_v45, %v266_v45  ;;  %534 = vrot.lane.b32.xlu0 %v6007_v46, %s5753_s2  ;;  %v370_v10 = vadd.f32 %v6033_v2, %v369_v9 }
  0xa9   :  { %216 = vst.msk [vmem:[#allocation2 + $0x4] sm:$0xf] %vm214_vm1, %v199_v36 }
  0xaa   :  { %318 = vst.msk [vmem:[#allocation3 + $0x8] sm:$0xf] %vm214_vm1, %v302_v47  ;;  %418 = vrot.lane.b32.xlu2 %v370_v10, %s5753_s2 }
  0xad   :  { %v267_v48 = vpop.f32.mrf.mxu1 }
  0xae   :  { %v268_v49 = vadd.f32 %v5988_v33, %v267_v48 }
  0xb0   :  { %v303_v50 = vpack.c.bf16 %v268_v49, %v268_v49  ;;  %v6081_v45 = vld [vmem:[#allocation2] sm:$0xff]  }
  0xb1   :  { %v5193_v47 = vunpack.c.h.bf16 %v6081_v45  ;;  %v5192_v34 = vunpack.c.l.bf16 %v6081_v45  ;;  %v5135_v45 = vld [vmem:[%s8103_s25 + $0x8] sm:$0xff] }
  0xb2   :  { %319 = vst.msk [vmem:[#allocation3 + $0xc] sm:$0xf] %vm214_vm1, %v303_v50  ;;  %771 = vmatpush.bf16.msrb.mxu3 %v5135_v45 }
  0xb3   :  { %v375_v48 = vadd.f32 %v5193_v47, %v370_v10  ;;  %v374_v35 = vadd.f32 %v5192_v34, %v6036_v4 }
  0xb5   :  { %v270_v51 = vpop.f32.mrf.mxu1  ;;  %v4775_v36 = vmul.f32 -1.442695, %v374_v35 }
  0xb6   :  { %v271_v52 = vadd.f32 %v5988_v33, %v270_v51 }
  0xb8   :  { %v304_v53 = vpack.c.bf16 %v271_v52, %v271_v52  ;;  %v4776_v52 = vmul.f32 -1.442695, %v375_v48 }
  0xba   :  { %320 = vst.msk [vmem:[#allocation3 + $0x10] sm:$0xf] %vm214_vm1, %v304_v53 }
  0xbd   :  { %v272_v54 = vpop.f32.mrf.mxu1 }
  0xbe   :  { %v273_v55 = vadd.f32 %v5988_v33, %v272_v54 }
  0xc0   :  { %v305_v56 = vpack.c.bf16 %v273_v55, %v273_v55 }
  0xc2   :  { %321 = vst.msk [vmem:[#allocation3 + $0x14] sm:$0xf] %vm214_vm1, %v305_v56 }
  0xc5   :  { %v275_v57 = vpop.f32.mrf.mxu1 }
  0xc6   :  { %v276_v58 = vadd.f32 %v5988_v33, %v275_v57 }
  0xc8   :  { %v306_v59 = vpack.c.bf16 %v276_v58, %v276_v58 }
  0xca   :  { %322 = vst.msk [vmem:[#allocation3 + $0x18] sm:$0xf] %vm214_vm1, %v306_v59 }
  0xcd   :  { %v277_v60 = vpop.f32.mrf.mxu1 }
  0xce   :  { %v278_v61 = vadd.f32 %v5988_v33, %v277_v60 }
  0xd0   :  { %v307_v62 = vpack.c.bf16 %v278_v61, %v278_v61 }
  0xd2   :  { %323 = vst.msk [vmem:[#allocation3 + $0x1c] sm:$0xf] %vm214_vm1, %v307_v62 }
  0xd5   :  { %v280_v63 = vpop.f32.mrf.mxu1 }
  0xd6   :  { %v281_v0 = vadd.f32 %v5988_v33, %v280_v63 }
  0xd8   :  { %v308_v1 = vpack.c.bf16 %v281_v0, %v281_v0 }
  0xda   :  { %324 = vst.msk [vmem:[#allocation3 + $0x20] sm:$0xf] %vm214_vm1, %v308_v1 }
  0xdd   :  { %v282_v5 = vpop.f32.mrf.mxu1 }
  0xde   :  { %v283_v6 = vadd.f32 %v5988_v33, %v282_v5 }
  0xe0   :  { %v309_v8 = vpack.c.bf16 %v283_v6, %v283_v6 }
  0xe2   :  { %325 = vst.msk [vmem:[#allocation3 + $0x24] sm:$0xf] %vm214_vm1, %v309_v8 }
  0xe5   :  { %v285_v11 = vpop.f32.mrf.mxu1 }
  0xe6   :  { %v286_v12 = vadd.f32 %v5988_v33, %v285_v11 }
  0xe8   :  { %v310_v13 = vpack.c.bf16 %v286_v12, %v286_v12 }
  0xea   :  { %326 = vst.msk [vmem:[#allocation3 + $0x28] sm:$0xf] %vm214_vm1, %v310_v13 }
  0xed   :  { %v287_v14 = vpop.f32.mrf.mxu1 }
  0xee   :  { %v288_v15 = vadd.f32 %v5988_v33, %v287_v14 }
  0xf0   :  { %v311_v16 = vpack.c.bf16 %v288_v15, %v288_v15 }
  0xf2   :  { %327 = vst.msk [vmem:[#allocation3 + $0x2c] sm:$0xf] %vm214_vm1, %v311_v16 }
  0xf5   :  { %v290_v17 = vpop.f32.mrf.mxu1 }
  0xf6   :  { %v291_v18 = vadd.f32 %v5988_v33, %v290_v17 }
  0xf8   :  { %v312_v19 = vpack.c.bf16 %v291_v18, %v291_v18 }
  0xfa   :  { %328 = vst.msk [vmem:[#allocation3 + $0x30] sm:$0xf] %vm214_vm1, %v312_v19 }
  0xfc   :  { %v6093_v11 = vpop.permute.xlu2 %416 }
  0xfd   :  { %v292_v20 = vpop.f32.mrf.mxu1 }
  0xfe   :  { %v293_v21 = vadd.f32 %v5988_v33, %v292_v20 }
 0x100   :  { %v313_v22 = vpack.c.bf16 %v293_v21, %v293_v21 }
 0x102   :  { %329 = vst.msk [vmem:[#allocation3 + $0x34] sm:$0xf] %vm214_vm1, %v313_v22 }
 0x105   :  { %v295_v23 = vpop.f32.mrf.mxu1 }
 0x106   :  { %v296_v24 = vadd.f32 %v5988_v33, %v295_v23 }
 0x108   :  { %v314_v25 = vpack.c.bf16 %v296_v24, %v296_v24 }
 0x10a   :  { %330 = vst.msk [vmem:[#allocation3 + $0x38] sm:$0xf] %vm214_vm1, %v314_v25 }
 0x10d   :  { %v297_v27 = vpop.f32.mrf.mxu1 }
 0x10e   :  { %v298_v29 = vadd.f32 %v5988_v33, %v297_v27 }
 0x110   :  { %v315_v30 = vpack.c.bf16 %v298_v29, %v298_v29  ;;  %v419_v29 = vpop.permute.xlu2 %418 }
 0x112   :  { %331 = vst.msk [vmem:[#allocation3 + $0x3c] sm:$0xf] %vm214_vm1, %v315_v30  ;;  %v533_v3 = vpop.permute.xlu0 %532 }
 0x119   :  { %v6070_v38 = vld [vmem:[#allocation3 + $0x38] sm:$0xff]  }
 0x11a   :  { %v5197_v39 = vunpack.c.h.bf16 %v6070_v38  ;;  %v5196_v33 = vunpack.c.l.bf16 %v6070_v38  ;;  %v535_v22 = vpop.permute.xlu0 %534 }
 0x11c   :  { %v491_v40 = vadd.f32 %v5197_v39, %v6007_v46  ;;  %v490_v42 = vadd.f32 %v5196_v33, %v5999_v41  ;;  %v6089_v46 = vld [vmem:[%s8055_s1] sm:$0xff] }
 0x11d   :  { %vm582_vm2 = vcmp.gt.s32.totalorder %v6089_v46, 7 }
 0x11e   :  { %v4786_v43 = vmul.f32 -1.442695, %v491_v40  ;;  %v4785_v44 = vmul.f32 -1.442695, %v490_v42  ;;  %v584_v53 = vsel %vm582_vm2, 1, %v8089_v7 }
 0x11f   :  { %587 = vperm.xlu2 %5322, %v584_v53   ;;  %v6120_v53 = vld [vmem:[%s8055_s1 + $0x8] sm:$0xff] }
 0x120   :  { %5352 = vpow2.f32 %v4786_v43 }
 0x121   :  { %5354 = vpow2.f32 %v4785_v44 }
 0x126   :  { %v5353_v49 = vpop.eup %5352 }
 0x127   :  { %v5355_v50 = vpop.eup %5354  ;;  %v499_v51 = vadd.f32 1.0, %v5353_v49 }
 0x128   :  { %v498_v41 = vadd.f32 1.0, %v5355_v50 }
 0x129   :  { %5356 = vrcp.f32 %v499_v51  ;;  %v526_v6 = vand.u32 2147483648, %v499_v51  ;;  %vm520_vm8 = vweird.f32 %v499_v51  ;;  %v524_v14 = vand.u32 2147483647, %v499_v51 }
 0x12a   :  { %5358 = vrcp.f32 %v498_v41  ;;  %v509_v62 = vand.u32 2147483647, %v498_v41  ;;  %v511_v63 = vand.u32 2147483648, %v498_v41  ;;  %vm505_vm4 = vweird.f32 %v498_v41 }
 0x12b   :  { %5360 = vpow2.f32 %v4776_v52  ;;  %v527_v18 = vor.u32 1.1754944e-38, %v526_v6  ;;  %vm525_vm12 = vcmp.eq.f32.partialorder %v524_v14, 8.507059e+37 }
 0x12c   :  { %v512_v8 = vor.u32 1.1754944e-38, %v511_v63  ;;  %vm510_vm7 = vcmp.eq.f32.partialorder %v509_v62, 8.507059e+37 }
 0x12f   :  { %v5357_v54 = vpop.eup %5356 }
 0x130   :  { %v5359_v55 = vpop.eup %5358  ;;  %v516_v56 = vmul.f32 %v5357_v54, %v499_v51  ;;  %vm521_vm6 = vweird.f32 %v5357_v54 }
 0x131   :  { %v501_v57 = vmul.f32 %v5359_v55, %v498_v41  ;;  %v5361_v58 = vpop.eup %5360  ;;  %vm506_vm3 = vweird.f32 %v5359_v55  ;;  %vm522_vm9 = vmor %vm520_vm8, %vm521_vm6 }
 0x132   :  { %v517_v59 = vsub.f32 1.0, %v516_v56  ;;  %v383_v61 = vadd.f32 1.0, %v5361_v58  ;;  %vm507_vm5 = vmor %vm505_vm4, %vm506_vm3  ;;  %vm583_vm3 = vcmp.gt.s32.totalorder %v6120_v53, 7 }
 0x133   :  { %v502_v60 = vsub.f32 1.0, %v501_v57  ;;  %v585_v57 = vsel %vm583_vm3, 1, %v8089_v7 }
 0x134   :  { %v518_v0 = vmul.f32 %v5357_v54, %v517_v59  ;;  %5362 = vrcp.f32 %v383_v61  ;;  %v410_v19 = vand.u32 2147483648, %v383_v61  ;;  %vm404_vm10 = vweird.f32 %v383_v61 }
 0x135   :  { %v503_v1 = vmul.f32 %v5359_v55, %v502_v60  ;;  %v408_v21 = vand.u32 2147483647, %v383_v61  ;;  %5364 = vpow2.f32 %v4775_v36 }
 0x136   :  { %v519_v9 = vadd.f32 %v5357_v54, %v518_v0  ;;  %v411_v25 = vor.u32 1.1754944e-38, %v410_v19 }
 0x137   :  { %v504_v5 = vadd.f32 %v5359_v55, %v503_v1  ;;  %vm409_vm14 = vcmp.eq.f32.partialorder %v408_v21, 8.507059e+37 }
 0x138   :  { %v523_v17 = vsel %vm522_vm9, %v5357_v54, %v519_v9  ;;  %vm568_vm9 = vcmp.gt.s32.totalorder %v6089_v46, 0 }
 0x139   :  { %v508_v10 = vsel %vm507_vm5, %v5359_v55, %v504_v5  ;;  %v6099_v23 = vsel %vm525_vm12, %v527_v18, %v523_v17 }
 0x13a   :  { %v6095_v12 = vsel %vm510_vm7, %v512_v8, %v508_v10  ;;  %v5363_v13 = vpop.eup %5362  ;;  %v539_v28 = vmul.f32 %v535_v22, %v6099_v23  ;;  %vm8085_vm7 = vcmask 519424   ;;  %v553_v9 = vsub.f32 1.0, %v6099_v23 }
 0x13b   :  { %v538_v15 = vmul.f32 %v533_v3, %v6095_v12  ;;  %v400_v16 = vmul.f32 %v5363_v13, %v383_v61  ;;  %vm405_vm11 = vweird.f32 %v5363_v13  ;;  %v5365_v40 = vpop.eup %5364  ;;  %v564_v1 = vmul.f32 0.0, %v6095_v12 }
 0x13c   :  { %vm406_vm13 = vmor %vm404_vm10, %vm405_vm11  ;;  %v382_v42 = vadd.f32 1.0, %v5365_v40  ;;  %vm569_vm10 = vcmp.gt.s32.totalorder %v6120_v53, 0 }
 0x13d   :  { %542 = vrot.lane.b32.xlu1 %v538_v15, %s5753_s2  ;;  %v401_v20 = vsub.f32 1.0, %v400_v16 }
 0x13e   :  { %5366 = vrcp.f32 %v382_v42  ;;  %vm389_vm15 = vweird.f32 %v382_v42  ;;  %v393_v56 = vand.u32 2147483647, %v382_v42 }
 0x13f   :  { %v402_v24 = vmul.f32 %v5363_v13, %v401_v20 }
 0x140   :  { %vm394_vm5 = vcmp.eq.f32.partialorder %v393_v56, 8.507059e+37 }
 0x141   :  { %v403_v27 = vadd.f32 %v5363_v13, %v402_v24  ;;  %v571_v24 = vsel %vm569_vm10, 1, %v8089_v7  ;;  %vm873_vm10 = vcmp.gt.s32.totalorder %v6089_v46, 6 }
 0x143   :  { %v407_v31 = vsel %vm406_vm13, %v5363_v13, %v403_v27  ;;  %v5133_v27 = vld [vmem:[%s8104_s26 + $0x8] sm:$0xff] }
 0x144   :  { %v6103_v30 = vsel %vm409_vm14, %v411_v25, %v407_v31  ;;  %v5367_v43 = vpop.eup %5366  ;;  %v5134_v25 = vld [vmem:[%s8103_s25] sm:$0xff]  ;;  %648 = vmatpush.bf16.msrb.mxu2 %v5133_v27 }
 0x145   :  { %544 = vrot.lane.b32.xlu1 %v539_v28, %s5753_s2  ;;  %v423_v32 = vmul.f32 %v419_v29, %v6103_v30  ;;  %v385_v50 = vmul.f32 %v5367_v43, %v382_v42  ;;  %vm390_vm2 = vweird.f32 %v5367_v43  ;;  %772 = vmatpush.bf16.msrb.mxu3 %v5134_v25  ;;  %v5132_v28 = vld [vmem:[%s8104_s26] sm:$0xff]  ;;  %v449_v40 = vmul.f32 0.0, %v6103_v30 }
 0x146   :  { %vm391_vm4 = vmor %vm389_vm15, %vm390_vm2 }
 0x147   :  { %428 = vrot.lane.b32.xlu2 %v423_v32, %s5753_s2  ;;  %v386_v51 = vsub.f32 1.0, %v385_v50  ;;  %v437_v32 = vsub.f32 1.0, %v6103_v30 }
 0x148   :  { %649 = vmatpush.bf16.msrb.mxu2 %v5132_v28 }
 0x149   :  { %v387_v54 = vmul.f32 %v5367_v43, %v386_v51 }
 0x179   :  { %v6111_v48 = vpop.permute.xlu2 %587 }
 0x17a   :  { %vm8079_vm6 = vcmp.eq.s32.totalorder %v6111_v48, 1 }
 0x1a1   :  { %v429_v55 = vpop.permute.xlu2 %428 }
 0x1a2   :  { %v433_v38 = vadd.f32 %v5193_v47, %v429_v55  ;;  %v552_v47 = vsub.f32 1.0, %v6095_v12  ;;  %v565_v12 = vmul.f32 0.0, %v6099_v23  ;;  %v570_v23 = vsel %vm568_vm9, 1, %v8089_v7 }
 0x1af   :  { %v543_v44 = vpop.permute.xlu1 %542 }
 0x1b0   :  { %v548_v49 = vadd.f32 %v5196_v33, %v543_v44  ;;  %v395_v33 = vand.u32 2147483648, %v382_v42 }
 0x1b2   :  { %5368 = vtanh.f32 %v548_v49  ;;  %v396_v59 = vor.u32 1.1754944e-38, %v395_v33 }
 0x1b7   :  { %v545_v41 = vpop.permute.xlu1 %544 }
 0x1b8   :  { %v5369_v52 = vpop.eup %5368  ;;  %v549_v4 = vadd.f32 %v5197_v39, %v545_v41  ;;  %v388_v39 = vadd.f32 %v5367_v43, %v387_v54 }
 0x1b9   :  { %556 = vrot.lane.b32.xlu0 %v5369_v52, %s5754_s5 }
 0x1ba   :  { %5370 = vtanh.f32 %v549_v4  ;;  %v392_v60 = vsel %vm391_vm4, %v5367_v43, %v388_v39 }
 0x1bb   :  { %5372 = vtanh.f32 %v433_v38  ;;  %v397_v61 = vsel %vm394_vm5, %v396_v59, %v392_v60  ;;  %v6206_v59 = vld [vmem:[#allocation3 + $0x30] sm:$0xff]  }
 0x1bc   :  { %v422_v63 = vmul.f32 %v6093_v11, %v397_v61  ;;  %v436_v42 = vsub.f32 1.0, %v397_v61  ;;  %v448_v49 = vmul.f32 0.0, %v397_v61  ;;  %v5205_v60 = vunpack.c.h.bf16 %v6206_v59 }
 0x1c0   :  { %v5371_v58 = vpop.eup %5370 }
 0x1c1   :  { %590 = vperm.xlu0 %5323, %v585_v57   ;;  %558 = vrot.lane.b32.xlu1 %v5371_v58, %s5754_s5  ;;  %v5373_v62 = vpop.eup %5372 }
 0x1c9   :  { %442 = vrot.lane.b32.xlu0 %v5373_v62, %s5754_s5  ;;  %426 = vrot.lane.b32.xlu1 %v422_v63, %s5753_s2 }
 0x22b   :  { %v557_v0 = vpop.permute.xlu0 %556 }
 0x22c   :  { %v562_v3 = vmul.f32 %v557_v0, %v552_v47  ;;  %v5204_v47 = vunpack.c.l.bf16 %v6206_v59 }
 0x22e   :  { %v566_v5 = vadd.f32 %v564_v1, %v562_v3 }
 0x230   :  { %v6136_v6 = vsel %vm8079_vm6, %v566_v5, 0.0  ;;  %v163_v5 = vpop.f32.mrf.mxu0 }
 0x231   :  { %v609_v8 = vpack.c.bf16 %v6136_v6, %v6136_v6 }
 0x233   :  { %v559_v10 = vpop.permute.xlu1 %558  ;;  %613 = vst.msk [vmem:[#allocation4 + $0x38] sm:$0xf] %vm8085_vm7, %v609_v8  ;;  %v6142_v11 = vpop.permute.xlu0 %590  ;;  %v745_v18 = vunpack.c.l.b16 %v609_v8  ;;  %v164_v8 = vadd.f32 %v6063_v26, %v163_v5 }
 0x234   :  { %v563_v13 = vmul.f32 %v559_v10, %v553_v9  ;;  %vm8080_vm8 = vcmp.eq.s32.totalorder %v6142_v11, 1 }
 0x235   :  { %v200_v9 = vpack.c.bf16 %v164_v8, %v164_v8 }
 0x236   :  { %v567_v14 = vadd.f32 %v565_v12, %v563_v13 }
 0x237   :  { %217 = vst.msk [vmem:[#allocation2 + $0x8] sm:$0xf] %vm214_vm1, %v200_v9 }
 0x238   :  { %v6148_v15 = vsel %vm8080_vm8, %v567_v14, 0.0 }
 0x239   :  { %v610_v16 = vpack.c.bf16 %v6148_v15, %v6148_v15 }
 0x23b   :  { %v427_v17 = vpop.permute.xlu1 %426  ;;  %v746_v19 = vunpack.c.l.b16 %v610_v16  ;;  %614 = vst.msk [vmem:[#allocation4 + $0x3c] sm:$0xf] %vm8085_vm7, %v610_v16  ;;  %v443_v31 = vpop.permute.xlu0 %442 }
 0x23c   :  { %v432_v20 = vadd.f32 %v5192_v34, %v427_v17  ;;  %v447_v34 = vmul.f32 %v443_v31, %v437_v32  ;;  %v165_v17 = vpop.f32.mrf.mxu0 }
 0x23d   :  { %v747_v21 = vpack.c.b16 %v746_v19, %v745_v18  ;;  %v166_v18 = vadd.f32 %v6063_v26, %v165_v17 }
 0x23e   :  { %5374 = vtanh.f32 %v432_v20  ;;  %v451_v43 = vadd.f32 %v449_v40, %v447_v34 }
 0x23f   :  { %748 = vrot.lane.b32.xlu1 %v747_v21, %s5754_s5  ;;  %v201_v19 = vpack.c.bf16 %v166_v18, %v166_v18 }
 0x241   :  { %218 = vst.msk [vmem:[#allocation2 + $0xc] sm:$0xf] %vm214_vm1, %v201_v19 }
 0x244   :  { %v5375_v22 = vpop.eup %5374 }
 0x245   :  { %440 = vrot.lane.b32.xlu2 %v5375_v22, %s5754_s5 }
 0x247   :  { %573 = vperm.xlu1 %5324, %v570_v23  }
 0x24d   :  { %576 = vperm.xlu2 %5322, %v571_v24  }
 0x29f   :  { %v441_v29 = vpop.permute.xlu2 %440 }
 0x2a0   :  { %v446_v44 = vmul.f32 %v441_v29, %v436_v42 }
 0x2a2   :  { %v450_v51 = vadd.f32 %v448_v49, %v446_v44 }
 0x2a7   :  { %v6174_v35 = vpop.permute.xlu2 %576 }
 0x2a8   :  { %vm8081_vm11 = vcmp.eq.s32.totalorder %v6174_v35, 1 }
 0x2a9   :  { %v6181_v50 = vsel %vm8081_vm11, %v451_v43, 0.0 }
 0x2aa   :  { %v6188_v52 = vpack.c.bf16 %v6181_v50, %v6181_v50 }
 0x2ac   :  { %v623_v55 = vunpack.c.l.b16 %v6188_v52 }
 0x2b1   :  { %v749_v36 = vpop.permute.xlu1 %748 }
 0x2b2   :  { %4806 = vmatmul.msk.bf16.vlgmr.msrb.gmra.mxu3 %vm124_vm0, %v749_v36 }
 0x2b9   :  { %v6183_v41 = vpop.permute.xlu1 %573 }
 0x2ba   :  { %vm8082_vm12 = vcmp.eq.s32.totalorder %v6183_v41, 1 }
 0x2bb   :  { %v6192_v30 = vsel %vm8082_vm12, %v450_v51, 0.0 }
 0x2bc   :  { %v6196_v4 = vpack.c.bf16 %v6192_v30, %v6192_v30 }
 0x2be   :  { %v622_v54 = vunpack.c.l.b16 %v6196_v4 }
 0x2c0   :  { %v624_v33 = vpack.c.b16 %v623_v55, %v622_v54 }
 0x2c2   :  { %625 = vrot.lane.b32.xlu0 %v624_v33, %s5754_s5 }
 0x334   :  { %v626_v38 = vpop.permute.xlu0 %625 }
 0x335   :  { %4795 = vmatmul.msk.bf16.vlgmr.msrb.gmra.mxu2 %vm124_vm0, %v626_v38  ;;  %v774_v39 = vpop.f32.mrf.mxu3 }
 0x336   :  { %v775_v56 = vadd.f32 %v5995_v37, %v774_v39 }
 0x338   :  { %823 = vrot.lane.b32.xlu1 %v775_v56, %s5753_s2  ;;  %v781_v0 = vadd.f32 %v5204_v47, %v775_v56  ;;  %v875_v56 = vsel %vm873_vm10, 1, %v8089_v7 }
 0x33a   :  { %v4807_v3 = vmul.f32 -1.442695, %v781_v0 }
 0x33d   :  { %v776_v57 = vpop.f32.mrf.mxu3 }
 0x33e   :  { %v777_v58 = vadd.f32 %v5995_v37, %v776_v57  ;;  %v6232_v57 = vld [vmem:[#allocation2 + $0x8] sm:$0xff]  }
 0x340   :  { %825 = vrot.lane.b32.xlu2 %v777_v58, %s5753_s2  ;;  %v782_v61 = vadd.f32 %v5205_v60, %v777_v58  ;;  %v5200_v58 = vunpack.c.l.bf16 %v6232_v57 }
 0x342   :  { %v4808_v62 = vmul.f32 -1.442695, %v782_v61 }
 0x344   :  { %5376 = vpow2.f32 %v4808_v62 }
 0x34a   :  { %v5377_v63 = vpop.eup %5376 }
 0x34b   :  { %v790_v1 = vadd.f32 1.0, %v5377_v63 }
 0x34d   :  { %5378 = vrcp.f32 %v790_v1  ;;  %v817_v23 = vand.u32 2147483648, %v790_v1  ;;  %vm811_vm14 = vweird.f32 %v790_v1  ;;  %v815_v24 = vand.u32 2147483647, %v790_v1 }
 0x34e   :  { %5380 = vpow2.f32 %v4807_v3 }
 0x34f   :  { %v818_v27 = vor.u32 1.1754944e-38, %v817_v23  ;;  %vm816_vm2 = vcmp.eq.f32.partialorder %v815_v24, 8.507059e+37 }
 0x353   :  { %v5379_v10 = vpop.eup %5378 }
 0x354   :  { %v5381_v12 = vpop.eup %5380  ;;  %v807_v13 = vmul.f32 %v5379_v10, %v790_v1  ;;  %vm812_vm13 = vweird.f32 %v5379_v10 }
 0x355   :  { %v789_v14 = vadd.f32 1.0, %v5381_v12  ;;  %vm813_vm15 = vmor %vm811_vm14, %vm812_vm13 }
 0x356   :  { %v808_v16 = vsub.f32 1.0, %v807_v13 }
 0x357   :  { %5382 = vrcp.f32 %v789_v14  ;;  %v802_v40 = vand.u32 2147483648, %v789_v14  ;;  %vm796_vm4 = vweird.f32 %v789_v14  ;;  %v800_v42 = vand.u32 2147483647, %v789_v14 }
 0x358   :  { %v809_v20 = vmul.f32 %v5379_v10, %v808_v16 }
 0x359   :  { %v803_v44 = vor.u32 1.1754944e-38, %v802_v40  ;;  %vm801_vm9 = vcmp.eq.f32.partialorder %v800_v42, 8.507059e+37 }
 0x35a   :  { %v810_v21 = vadd.f32 %v5379_v10, %v809_v20 }
 0x35c   :  { %v814_v45 = vsel %vm813_vm15, %v5379_v10, %v810_v21 }
 0x35d   :  { %v5383_v22 = vpop.eup %5382  ;;  %v6218_v29 = vsel %vm816_vm2, %v818_v27, %v814_v45 }
 0x35e   :  { %v792_v25 = vmul.f32 %v5383_v22, %v789_v14  ;;  %vm797_vm3 = vweird.f32 %v5383_v22 }
 0x35f   :  { %vm798_vm5 = vmor %vm796_vm4, %vm797_vm3  ;;  %vm874_vm3 = vcmp.gt.s32.totalorder %v6120_v53, 6 }
 0x360   :  { %v793_v32 = vsub.f32 1.0, %v792_v25 }
 0x362   :  { %v794_v34 = vmul.f32 %v5383_v22, %v793_v32 }
 0x364   :  { %v795_v36 = vadd.f32 %v5383_v22, %v794_v34 }
 0x366   :  { %v799_v43 = vsel %vm798_vm5, %v5383_v22, %v795_v36  ;;  %v876_v36 = vsel %vm874_vm3, 1, %v8089_v7 }
 0x367   :  { %v6222_v49 = vsel %vm801_vm9, %v803_v44, %v799_v43 }
 0x39a   :  { %v826_v28 = vpop.permute.xlu2 %825 }
 0x39b   :  { %v830_v31 = vmul.f32 %v826_v28, %v6218_v29 }
 0x39d   :  { %835 = vrot.lane.b32.xlu1 %v830_v31, %s5753_s2 }
 0x3aa   :  { %v824_v51 = vpop.permute.xlu1 %823 }
 0x3ab   :  { %v829_v54 = vmul.f32 %v824_v51, %v6222_v49 }
 0x3ad   :  { %833 = vrot.lane.b32.xlu0 %v829_v54, %s5753_s2 }
 0x3b8   :  { %v651_v55 = vpop.f32.mrf.mxu2 }
 0x3b9   :  { %v652_v33 = vadd.f32 %v6033_v2, %v651_v55 }
 0x3bb   :  { %700 = vrot.lane.b32.xlu2 %v652_v33, %s5753_s2  ;;  %v658_v61 = vadd.f32 %v5200_v58, %v652_v33 }
 0x3bd   :  { %v4796_v62 = vmul.f32 -1.442695, %v658_v61  ;;  %v843_v61 = vsub.f32 1.0, %v6222_v49 }
 0x3bf   :  { %5384 = vpow2.f32 %v4796_v62 }
 0x3c0   :  { %v653_v38 = vpop.f32.mrf.mxu2 }
 0x3c1   :  { %v654_v39 = vadd.f32 %v6033_v2, %v653_v38  ;;  %v5201_v2 = vunpack.c.h.bf16 %v6232_v57  ;;  %v5138_v57 = vld [vmem:[%s8103_s25] sm:$0xff] }
 0x3c3   :  { %702 = vrot.lane.b32.xlu0 %v654_v39, %s5753_s2  ;;  %v659_v1 = vadd.f32 %v5201_v2, %v654_v39 }
 0x3c5   :  { %v5385_v63 = vpop.eup %5384  ;;  %v4797_v5 = vmul.f32 -1.442695, %v659_v1 }
 0x3c6   :  { %v666_v0 = vadd.f32 1.0, %v5385_v63 }
 0x3c8   :  { %5386 = vrcp.f32 %v666_v0  ;;  %v679_v19 = vand.u32 2147483648, %v666_v0  ;;  %vm673_vm14 = vweird.f32 %v666_v0  ;;  %v677_v20 = vand.u32 2147483647, %v666_v0 }
 0x3c9   :  { %5388 = vpow2.f32 %v4797_v5 }
 0x3ca   :  { %v680_v23 = vor.u32 1.1754944e-38, %v679_v19  ;;  %vm678_vm2 = vcmp.eq.f32.partialorder %v677_v20, 8.507059e+37  ;;  %v5139_v20 = vld [vmem:[%s8103_s25 + $0x8] sm:$0xff] }
 0x3cb   :  { %878 = vperm.xlu0 %5323, %v875_v56   ;;  %1061 = vmatpush.bf16.msra.mxu3 %v5139_v20 }
 0x3ce   :  { %v5387_v3 = vpop.eup %5386 }
 0x3cf   :  { %v669_v8 = vmul.f32 %v5387_v3, %v666_v0  ;;  %v5389_v13 = vpop.eup %5388  ;;  %vm674_vm13 = vweird.f32 %v5387_v3  ;;  %v855_v0 = vmul.f32 %v6222_v49, %v6136_v6  ;;  %1062 = vmatpush.bf16.msra.mxu3 %v5138_v57 }
 0x3d0   :  { %v667_v16 = vadd.f32 1.0, %v5389_v13  ;;  %vm675_vm15 = vmor %vm673_vm14, %vm674_vm13  ;;  %vm860_vm13 = vcmp.gt.s32.totalorder %v6120_v53, 1 }
 0x3d1   :  { %v670_v10 = vsub.f32 1.0, %v669_v8  ;;  %v862_v56 = vsel %vm860_vm13, 1, %v8089_v7 }
 0x3d2   :  { %v694_v42 = vand.u32 2147483648, %v667_v16  ;;  %vm688_vm5 = vweird.f32 %v667_v16  ;;  %v692_v43 = vand.u32 2147483647, %v667_v16 }
 0x3d3   :  { %v671_v14 = vmul.f32 %v5387_v3, %v670_v10 }
 0x3d4   :  { %vm693_vm10 = vcmp.eq.f32.partialorder %v692_v43, 8.507059e+37 }
 0x3d5   :  { %v672_v17 = vadd.f32 %v5387_v3, %v671_v14 }
 0x3d7   :  { %v676_v21 = vsel %vm675_vm15, %v5387_v3, %v672_v17 }
 0x3d8   :  { %v6243_v24 = vsel %vm678_vm2, %v680_v23, %v676_v21  ;;  %vm859_vm2 = vcmp.gt.s32.totalorder %v6089_v46, 1  ;;  %v5136_v21 = vld [vmem:[%s8104_s26] sm:$0xff] }
 0x40f   :  { %v836_v9 = vpop.permute.xlu1 %835 }
 0x410   :  { %v840_v12 = vadd.f32 %v5205_v60, %v836_v9  ;;  %v856_v9 = vmul.f32 %v6218_v29, %v6148_v15 }
 0x412   :  { %5390 = vtanh.f32 %v840_v12 }
 0x413   :  { %5392 = vrcp.f32 %v667_v16 }
 0x415   :  { %v701_v22 = vpop.permute.xlu2 %700 }
 0x416   :  { %v706_v45 = vmul.f32 %v701_v22, %v6243_v24 }
 0x418   :  { %v5391_v18 = vpop.eup %5390 }
 0x419   :  { %849 = vrot.lane.b32.xlu2 %v5391_v18, %s5754_s5  ;;  %v5393_v60 = vpop.eup %5392 }
 0x41a   :  { %v684_v28 = vmul.f32 %v5393_v60, %v667_v16  ;;  %vm689_vm4 = vweird.f32 %v5393_v60 }
 0x41b   :  { %vm690_vm9 = vmor %vm688_vm5, %vm689_vm4 }
 0x41c   :  { %v685_v31 = vsub.f32 1.0, %v684_v28 }
 0x41e   :  { %v686_v34 = vmul.f32 %v5393_v60, %v685_v31 }
 0x41f   :  { %v834_v25 = vpop.permute.xlu0 %833 }
 0x420   :  { %v839_v27 = vadd.f32 %v5204_v47, %v834_v25  ;;  %v687_v40 = vadd.f32 %v5393_v60, %v686_v34  ;;  %v695_v47 = vor.u32 1.1754944e-38, %v694_v42  ;;  %v732_v25 = vmul.f32 %v6243_v24, %v6192_v30 }
 0x421   :  { %710 = vrot.lane.b32.xlu2 %v706_v45, %s5753_s2 }
 0x422   :  { %5394 = vtanh.f32 %v839_v27  ;;  %v691_v59 = vsel %vm690_vm9, %v5393_v60, %v687_v40  ;;  %v720_v60 = vsub.f32 1.0, %v6243_v24 }
 0x423   :  { %v6252_v44 = vsel %vm693_vm10, %v695_v47, %v691_v59 }
 0x424   :  { %v721_v27 = vsub.f32 1.0, %v6252_v44 }
 0x428   :  { %v5395_v32 = vpop.eup %5394 }
 0x429   :  { %847 = vrot.lane.b32.xlu1 %v5395_v32, %s5754_s5 }
 0x431   :  { %881 = vperm.xlu1 %5324, %v876_v36   ;;  %v733_v36 = vmul.f32 %v6252_v44, %v6181_v50 }
 0x435   :  { %v703_v51 = vpop.permute.xlu0 %702 }
 0x436   :  { %v707_v54 = vmul.f32 %v703_v51, %v6252_v44 }
 0x438   :  { %712 = vrot.lane.b32.xlu0 %v707_v54, %s5753_s2 }
 0x43d   :  { %v6262_v63 = vpop.permute.xlu0 %878 }
 0x43e   :  { %vm8083_vm14 = vcmp.eq.s32.totalorder %v6262_v63, 1 }
 0x473   :  { %v850_v55 = vpop.permute.xlu2 %849 }
 0x47b   :  { %v711_v33 = vpop.permute.xlu2 %710 }
 0x47c   :  { %v716_v38 = vadd.f32 %v5200_v58, %v711_v33  ;;  %v844_v58 = vsub.f32 1.0, %v6218_v29 }
 0x47e   :  { %5396 = vtanh.f32 %v716_v38  ;;  %v854_v5 = vmul.f32 %v850_v55, %v844_v58 }
 0x480   :  { %v858_v12 = vadd.f32 %v856_v9, %v854_v5 }
 0x484   :  { %v5397_v39 = vpop.eup %5396 }
 0x485   :  { %724 = vrot.lane.b32.xlu2 %v5397_v39, %s5754_s5  ;;  %v6346_v39 = vld [vmem:[#allocation3 + $0x28] sm:$0xff]  }
 0x48d   :  { %867 = vperm.xlu2 %5322, %v862_v56   ;;  %v5213_v56 = vunpack.c.h.bf16 %v6346_v39 }
 0x49b   :  { %v848_v62 = vpop.permute.xlu1 %847 }
 0x49c   :  { %v853_v1 = vmul.f32 %v848_v62, %v843_v61 }
 0x49e   :  { %v857_v3 = vadd.f32 %v855_v0, %v853_v1  ;;  %v5212_v1 = vunpack.c.l.bf16 %v6346_v39 }
 0x4a0   :  { %v6271_v8 = vsel %vm8083_vm14, %v857_v3, %v6136_v6 }
 0x4a1   :  { %v900_v10 = vpack.c.bf16 %v6271_v8, %v6271_v8 }
 0x4a3   :  { %v6277_v49 = vpop.permute.xlu1 %881  ;;  %903 = vst.msk [vmem:[#allocation4 + $0x30] sm:$0xf] %vm8085_vm7, %v900_v10  ;;  %v1035_v14 = vunpack.c.l.b16 %v900_v10 }
 0x4a4   :  { %vm8084_vm15 = vcmp.eq.s32.totalorder %v6277_v49, 1 }
 0x4a5   :  { %v6284_v13 = vsel %vm8084_vm15, %v858_v12, %v6148_v15  ;;  %v861_v15 = vsel %vm859_vm2, 1, %v8089_v7 }
 0x4a6   :  { %v901_v6 = vpack.c.bf16 %v6284_v13, %v6284_v13 }
 0x4a8   :  { %v1036_v29 = vunpack.c.l.b16 %v901_v6  ;;  %904 = vst.msk [vmem:[#allocation4 + $0x34] sm:$0xf] %vm8085_vm7, %v901_v6 }
 0x4aa   :  { %v713_v16 = vpop.permute.xlu0 %712  ;;  %v1037_v17 = vpack.c.b16 %v1036_v29, %v1035_v14 }
 0x4ab   :  { %v717_v18 = vadd.f32 %v5201_v2, %v713_v16  ;;  %v5137_v2 = vld [vmem:[%s8104_s26 + $0x8] sm:$0xff] }
 0x4ac   :  { %1038 = vrot.lane.b32.xlu1 %v1037_v17, %s5754_s5  ;;  %938 = vmatpush.bf16.msra.mxu2 %v5137_v2 }
 0x4ad   :  { %5398 = vtanh.f32 %v717_v18 }
 0x4b0   :  { %939 = vmatpush.bf16.msra.mxu2 %v5136_v21 }
 0x4b3   :  { %v5399_v19 = vpop.eup %5398 }
 0x4b4   :  { %726 = vrot.lane.b32.xlu0 %v5399_v19, %s5754_s5  ;;  %864 = vperm.xlu1 %5324, %v861_v15  }
 0x4df   :  { %v725_v22 = vpop.permute.xlu2 %724 }
 0x4e0   :  { %v730_v45 = vmul.f32 %v725_v22, %v720_v60 }
 0x4e2   :  { %v734_v28 = vadd.f32 %v732_v25, %v730_v45 }
 0x4e7   :  { %v6314_v34 = vpop.permute.xlu2 %867 }
 0x4e8   :  { %vm8086_vm4 = vcmp.eq.s32.totalorder %v6314_v34, 1 }
 0x51e   :  { %v1039_v23 = vpop.permute.xlu1 %1038 }
 0x51f   :  { %4828 = vmatmul.msk.bf16.vlgmr.msra.gmra.mxu3 %vm124_vm0, %v1039_v23 }
 0x526   :  { %v727_v31 = vpop.permute.xlu0 %726  ;;  %v6312_v32 = vpop.permute.xlu1 %864 }
 0x527   :  { %v731_v40 = vmul.f32 %v727_v31, %v721_v27  ;;  %vm869_vm3 = vcmp.eq.s32.totalorder %v6312_v32, 1 }
 0x528   :  { %v6322_v42 = vsel %vm869_vm3, %v734_v28, %v6192_v30 }
 0x529   :  { %v735_v24 = vadd.f32 %v733_v36, %v731_v40  ;;  %v6327_v43 = vpack.c.bf16 %v6322_v42, %v6322_v42 }
 0x52b   :  { %v6332_v59 = vsel %vm8086_vm4, %v735_v24, %v6181_v50  ;;  %v912_v44 = vunpack.c.l.b16 %v6327_v43 }
 0x52c   :  { %v6336_v47 = vpack.c.bf16 %v6332_v59, %v6332_v59 }
 0x52e   :  { %v913_v30 = vunpack.c.l.b16 %v6336_v47 }
 0x530   :  { %v914_v51 = vpack.c.b16 %v913_v30, %v912_v44 }
 0x532   :  { %915 = vrot.lane.b32.xlu0 %v914_v51, %s5754_s5 }
 0x5a2   :  { %v1064_v54 = vpop.f32.mrf.mxu3 }
 0x5a3   :  { %v1065_v55 = vadd.f32 %v5995_v37, %v1064_v54 }
 0x5a4   :  { %v916_v33 = vpop.permute.xlu0 %915 }
 0x5a5   :  { %1113 = vrot.lane.b32.xlu1 %v1065_v55, %s5753_s2  ;;  %4817 = vmatmul.msk.bf16.vlgmr.msra.gmra.mxu2 %vm124_vm0, %v916_v33  ;;  %v1071_v58 = vadd.f32 %v5212_v1, %v1065_v55  ;;  %v6369_v33 = vld [vmem:[%s8108_s3] ss:$0 sm:$0xff] }
 0x5a7   :  { %v4829_v5 = vmul.f32 -1.442695, %v1071_v58 }
 0x5aa   :  { %v1066_v50 = vpop.f32.mrf.mxu3 }
 0x5ab   :  { %v1067_v38 = vadd.f32 %v5995_v37, %v1066_v50  ;;  %v168_v37 = vpop.f32.mrf.mxu0 }
 0x5ac   :  { %v169_v9 = vadd.f32 %v6063_v26, %v168_v37 }
 0x5ad   :  { %1115 = vrot.lane.b32.xlu2 %v1067_v38, %s5753_s2  ;;  %v1072_v61 = vadd.f32 %v5213_v56, %v1067_v38 }
 0x5ae   :  { %v202_v10 = vpack.c.bf16 %v169_v9, %v169_v9 }
 0x5af   :  { %v4830_v62 = vmul.f32 -1.442695, %v1072_v61 }
 0x5b0   :  { %219 = vst.msk [vmem:[#allocation2 + $0x10] sm:$0xf] %vm214_vm1, %v202_v10 }
 0x5b1   :  { %5400 = vpow2.f32 %v4830_v62 }
 0x5b3   :  { %v170_v17 = vpop.f32.mrf.mxu0 }
 0x5b4   :  { %v171_v18 = vadd.f32 %v6063_v26, %v170_v17 }
 0x5b6   :  { %v203_v19 = vpack.c.bf16 %v171_v18, %v171_v18 }
 0x5b7   :  { %v5401_v0 = vpop.eup %5400 }
 0x5b8   :  { %v1080_v3 = vadd.f32 1.0, %v5401_v0  ;;  %220 = vst.msk [vmem:[#allocation2 + $0x14] sm:$0xf] %vm214_vm1, %v203_v19 }
 0x5ba   :  { %5402 = vrcp.f32 %v1080_v3  ;;  %v1107_v2 = vand.u32 2147483648, %v1080_v3  ;;  %vm1101_vm9 = vweird.f32 %v1080_v3  ;;  %v1105_v21 = vand.u32 2147483647, %v1080_v3 }
 0x5bb   :  { %5404 = vpow2.f32 %v4829_v5 }
 0x5bc   :  { %v1108_v60 = vor.u32 1.1754944e-38, %v1107_v2  ;;  %vm1106_vm13 = vcmp.eq.f32.partialorder %v1105_v21, 8.507059e+37 }
 0x5bf   :  { %v6377_v0 = vld [vmem:[#allocation2 + $0x10] sm:$0xff]  }
 0x5c0   :  { %v5403_v12 = vpop.eup %5402  ;;  %v5208_v58 = vunpack.c.l.bf16 %v6377_v0  ;;  %v5209_v10 = vunpack.c.h.bf16 %v6377_v0  ;;  %v5142_v0 = vld [vmem:[%s8103_s25] sm:$0xff] }
 0x5c1   :  { %v5405_v6 = vpop.eup %5404  ;;  %v1097_v14 = vmul.f32 %v5403_v12, %v1080_v3  ;;  %vm1102_vm5 = vweird.f32 %v5403_v12 }
 0x5c2   :  { %v1079_v29 = vadd.f32 1.0, %v5405_v6  ;;  %vm1103_vm10 = vmor %vm1101_vm9, %vm1102_vm5 }
 0x5c3   :  { %v1098_v16 = vsub.f32 1.0, %v1097_v14 }
 0x5c4   :  { %5406 = vrcp.f32 %v1079_v29  ;;  %v1092_v36 = vand.u32 2147483648, %v1079_v29  ;;  %vm1086_vm6 = vweird.f32 %v1079_v29  ;;  %v1090_v40 = vand.u32 2147483647, %v1079_v29 }
 0x5c5   :  { %v1099_v15 = vmul.f32 %v5403_v12, %v1098_v16 }
 0x5c6   :  { %v1093_v44 = vor.u32 1.1754944e-38, %v1092_v36  ;;  %vm1091_vm5 = vcmp.eq.f32.partialorder %v1090_v40, 8.507059e+37 }
 0x5c7   :  { %v1100_v20 = vadd.f32 %v5403_v12, %v1099_v15 }
 0x5c9   :  { %v1104_v22 = vsel %vm1103_vm10, %v5403_v12, %v1100_v20 }
 0x5ca   :  { %v5407_v57 = vpop.eup %5406  ;;  %v6358_v25 = vsel %vm1106_vm13, %v1108_v60, %v1104_v22 }
 0x5cb   :  { %v1082_v23 = vmul.f32 %v5407_v57, %v1079_v29  ;;  %vm1087_vm2 = vweird.f32 %v5407_v57 }
 0x5cc   :  { %vm1088_vm8 = vmor %vm1086_vm6, %vm1087_vm2  ;;  %vm1163_vm6 = vcmp.gt.s32.totalorder %v6089_v46, 5  ;;  %vm1164_vm2 = vcmp.gt.s32.totalorder %v6120_v53, 5 }
 0x5cd   :  { %v1083_v27 = vsub.f32 1.0, %v1082_v23  ;;  %v1165_v62 = vsel %vm1163_vm6, 1, %v8089_v7 }
 0x5cf   :  { %v1084_v28 = vmul.f32 %v5407_v57, %v1083_v27 }
 0x5d1   :  { %v1085_v31 = vadd.f32 %v5407_v57, %v1084_v28 }
 0x5d3   :  { %v1089_v24 = vsel %vm1088_vm8, %v5407_v57, %v1085_v31 }
 0x5d4   :  { %v6362_v30 = vsel %vm1091_vm5, %v1093_v44, %v1089_v24  ;;  %v1166_v44 = vsel %vm1164_vm2, 1, %v8089_v7 }
 0x607   :  { %v1116_v45 = vpop.permute.xlu2 %1115 }
 0x608   :  { %v1120_v26 = vmul.f32 %v1116_v45, %v6358_v25 }
 0x60a   :  { %1125 = vrot.lane.b32.xlu1 %v1120_v26, %s5753_s2 }
 0x617   :  { %v1114_v51 = vpop.permute.xlu1 %1113 }
 0x618   :  { %v1119_v54 = vmul.f32 %v1114_v51, %v6362_v30 }
 0x61a   :  { %1123 = vrot.lane.b32.xlu0 %v1119_v54, %s5753_s2 }
 0x628   :  { %v941_v55 = vpop.f32.mrf.mxu2 }
 0x629   :  { %v942_v50 = vadd.f32 %v6369_v33, %v941_v55 }
 0x62b   :  { %990 = vrot.lane.b32.xlu2 %v942_v50, %s5753_s2  ;;  %v948_v3 = vadd.f32 %v5208_v58, %v942_v50 }
 0x62d   :  { %v4818_v5 = vmul.f32 -1.442695, %v948_v3 }
 0x62f   :  { %5408 = vpow2.f32 %v4818_v5 }
 0x630   :  { %v943_v38 = vpop.f32.mrf.mxu2 }
 0x631   :  { %v944_v61 = vadd.f32 %v6369_v33, %v943_v38 }
 0x633   :  { %992 = vrot.lane.b32.xlu0 %v944_v61, %s5753_s2  ;;  %v949_v46 = vadd.f32 %v5209_v10, %v944_v61 }
 0x635   :  { %v5409_v37 = vpop.eup %5408  ;;  %v4819_v6 = vmul.f32 -1.442695, %v949_v46  ;;  %v1133_v46 = vsub.f32 1.0, %v6362_v30 }
 0x636   :  { %v956_v9 = vadd.f32 1.0, %v5409_v37 }
 0x638   :  { %5410 = vrcp.f32 %v956_v9  ;;  %v969_v2 = vand.u32 2147483648, %v956_v9  ;;  %vm963_vm9 = vweird.f32 %v956_v9  ;;  %v967_v21 = vand.u32 2147483647, %v956_v9 }
 0x639   :  { %5412 = vpow2.f32 %v4819_v6 }
 0x63a   :  { %v970_v60 = vor.u32 1.1754944e-38, %v969_v2  ;;  %vm968_vm13 = vcmp.eq.f32.partialorder %v967_v21, 8.507059e+37 }
 0x63b   :  { %1168 = vperm.xlu0 %5323, %v1165_v62  }
 0x63e   :  { %v5411_v12 = vpop.eup %5410 }
 0x63f   :  { %v959_v14 = vmul.f32 %v5411_v12, %v956_v9  ;;  %v5413_v15 = vpop.eup %5412  ;;  %vm964_vm8 = vweird.f32 %v5411_v12 }
 0x640   :  { %v957_v57 = vadd.f32 1.0, %v5413_v15  ;;  %vm965_vm10 = vmor %vm963_vm9, %vm964_vm8 }
 0x641   :  { %v960_v16 = vsub.f32 1.0, %v959_v14  ;;  %v1145_v14 = vmul.f32 %v6362_v30, %v6271_v8 }
 0x642   :  { %v984_v54 = vand.u32 2147483648, %v957_v57  ;;  %vm978_vm6 = vweird.f32 %v957_v57  ;;  %v982_v39 = vand.u32 2147483647, %v957_v57 }
 0x643   :  { %v961_v18 = vmul.f32 %v5411_v12, %v960_v16 }
 0x644   :  { %v985_v55 = vor.u32 1.1754944e-38, %v984_v54  ;;  %vm983_vm9 = vcmp.eq.f32.partialorder %v982_v39, 8.507059e+37 }
 0x645   :  { %v962_v19 = vadd.f32 %v5411_v12, %v961_v18  ;;  %v1146_v18 = vmul.f32 %v6358_v25, %v6284_v13 }
 0x647   :  { %v966_v22 = vsel %vm965_vm10, %v5411_v12, %v962_v19  ;;  %vm1150_vm10 = vcmp.gt.s32.totalorder %v6120_v53, 2 }
 0x648   :  { %v6388_v45 = vsel %vm968_vm13, %v970_v60, %v966_v22  ;;  %v1152_v9 = vsel %vm1150_vm10, 1, %v8089_v7 }
 0x67c   :  { %v1126_v29 = vpop.permute.xlu1 %1125 }
 0x67d   :  { %v1130_v17 = vadd.f32 %v5213_v56, %v1126_v29 }
 0x67f   :  { %5414 = vtanh.f32 %v1130_v17 }
 0x680   :  { %5416 = vrcp.f32 %v957_v57 }
 0x685   :  { %v5415_v20 = vpop.eup %5414  ;;  %v991_v23 = vpop.permute.xlu2 %990 }
 0x686   :  { %1139 = vrot.lane.b32.xlu2 %v5415_v20, %s5754_s5  ;;  %v996_v56 = vmul.f32 %v991_v23, %v6388_v45  ;;  %v5417_v28 = vpop.eup %5416  ;;  %v6440_v23 = vld [vmem:[%s8055_s1] sm:$0xff] }
 0x687   :  { %v974_v31 = vmul.f32 %v5417_v28, %v957_v57  ;;  %vm979_vm5 = vweird.f32 %v5417_v28 }
 0x688   :  { %vm980_vm8 = vmor %vm978_vm6, %vm979_vm5  ;;  %vm1149_vm5 = vcmp.gt.s32.totalorder %v6440_v23, 2 }
 0x689   :  { %v975_v40 = vsub.f32 1.0, %v974_v31 }
 0x68b   :  { %v976_v24 = vmul.f32 %v5417_v28, %v975_v40 }
 0x68c   :  { %v1124_v26 = vpop.permute.xlu0 %1123 }
 0x68d   :  { %v1129_v27 = vadd.f32 %v5212_v1, %v1124_v26  ;;  %v977_v51 = vadd.f32 %v5417_v28, %v976_v24 }
 0x68e   :  { %1000 = vrot.lane.b32.xlu2 %v996_v56, %s5753_s2  ;;  %v5143_v56 = vld [vmem:[%s8103_s25 + $0x8] sm:$0xff] }
 0x68f   :  { %5418 = vtanh.f32 %v1129_v27  ;;  %v981_v1 = vsel %vm980_vm8, %v5417_v28, %v977_v51  ;;  %1351 = vmatpush.bf16.msrb.mxu3 %v5143_v56  ;;  %v1010_v28 = vsub.f32 1.0, %v6388_v45 }
 0x690   :  { %v6397_v50 = vsel %vm983_vm9, %v985_v55, %v981_v1 }
 0x691   :  { %v1023_v1 = vmul.f32 %v6397_v50, %v6332_v59 }
 0x693   :  { %1352 = vmatpush.bf16.msrb.mxu3 %v5142_v0 }
 0x695   :  { %v5419_v36 = vpop.eup %5418 }
 0x696   :  { %1137 = vrot.lane.b32.xlu1 %v5419_v36, %s5754_s5  ;;  %v1022_v36 = vmul.f32 %v6388_v45, %v6322_v42 }
 0x69e   :  { %1171 = vperm.xlu1 %5324, %v1166_v44   ;;  %v1011_v44 = vsub.f32 1.0, %v6397_v50 }
 0x6a5   :  { %v993_v38 = vpop.permute.xlu0 %992 }
 0x6a6   :  { %v997_v61 = vmul.f32 %v993_v38, %v6397_v50 }
 0x6a8   :  { %1002 = vrot.lane.b32.xlu0 %v997_v61, %s5753_s2 }
 0x6ad   :  { %v6407_v6 = vpop.permute.xlu0 %1168 }
 0x6ae   :  { %vm1173_vm13 = vcmp.eq.s32.totalorder %v6407_v6, 1 }
 0x6e0   :  { %v1140_v62 = vpop.permute.xlu2 %1139 }
 0x6e8   :  { %v1001_v3 = vpop.permute.xlu2 %1000 }
 0x6e9   :  { %v1006_v5 = vadd.f32 %v5208_v58, %v1001_v3  ;;  %v1134_v58 = vsub.f32 1.0, %v6358_v25 }
 0x6eb   :  { %5420 = vtanh.f32 %v1006_v5  ;;  %v1144_v17 = vmul.f32 %v1140_v62, %v1134_v58  ;;  %v5140_v5 = vld [vmem:[%s8104_s26] sm:$0xff] }
 0x6ed   :  { %v1148_v19 = vadd.f32 %v1146_v18, %v1144_v17 }
 0x6f1   :  { %v5421_v37 = vpop.eup %5420 }
 0x6f2   :  { %1014 = vrot.lane.b32.xlu2 %v5421_v37, %s5754_s5 }
 0x6fa   :  { %1157 = vperm.xlu2 %5322, %v1152_v9  }
 0x708   :  { %v1138_v12 = vpop.permute.xlu1 %1137 }
 0x709   :  { %v1143_v29 = vmul.f32 %v1138_v12, %v1133_v46 }
 0x70b   :  { %v1147_v16 = vadd.f32 %v1145_v14, %v1143_v29  ;;  %v6501_v29 = vld [vmem:[#allocation3 + $0x20] sm:$0xff]  }
 0x70c   :  { %v5221_v58 = vunpack.c.h.bf16 %v6501_v29 }
 0x70d   :  { %v6416_v53 = vsel %vm1173_vm13, %v1147_v16, %v6271_v8 }
 0x70e   :  { %v1190_v15 = vpack.c.bf16 %v6416_v53, %v6416_v53 }
 0x710   :  { %v6422_v30 = vpop.permute.xlu1 %1171  ;;  %1193 = vst.msk [vmem:[#allocation4 + $0x28] sm:$0xf] %vm8085_vm7, %v1190_v15  ;;  %v1325_v57 = vunpack.c.l.b16 %v1190_v15  ;;  %v5220_v15 = vunpack.c.l.bf16 %v6501_v29 }
 0x711   :  { %vm1174_vm2 = vcmp.eq.s32.totalorder %v6422_v30, 1 }
 0x712   :  { %v6429_v20 = vsel %vm1174_vm2, %v1148_v19, %v6284_v13  ;;  %v1151_v13 = vsel %vm1149_vm5, 1, %v8089_v7 }
 0x713   :  { %v1191_v8 = vpack.c.bf16 %v6429_v20, %v6429_v20 }
 0x715   :  { %v1326_v25 = vunpack.c.l.b16 %v1191_v8  ;;  %1194 = vst.msk [vmem:[#allocation4 + $0x2c] sm:$0xf] %vm8085_vm7, %v1191_v8 }
 0x717   :  { %v1327_v2 = vpack.c.b16 %v1326_v25, %v1325_v57  ;;  %v173_v25 = vpop.f32.mrf.mxu0 }
 0x719   :  { %1328 = vrot.lane.b32.xlu1 %v1327_v2, %s5754_s5  ;;  %v6512_v2 = vld [vmem:[%s8109_s0] ss:$0 sm:$0xff] }
 0x71a   :  { %v1003_v21 = vpop.permute.xlu0 %1002 }
 0x71b   :  { %v1007_v22 = vadd.f32 %v5209_v10, %v1003_v21  ;;  %v5141_v10 = vld [vmem:[%s8104_s26 + $0x8] sm:$0xff]  ;;  %v174_v21 = vadd.f32 %v6512_v2, %v173_v25 }
 0x71c   :  { %1228 = vmatpush.bf16.msrb.mxu2 %v5141_v10 }
 0x71d   :  { %5422 = vtanh.f32 %v1007_v22  ;;  %v204_v22 = vpack.c.bf16 %v174_v21, %v174_v21 }
 0x71f   :  { %221 = vst.msk [vmem:[#allocation2 + $0x18] sm:$0xf] %vm214_vm1, %v204_v22 }
 0x720   :  { %1229 = vmatpush.bf16.msrb.mxu2 %v5140_v5 }
 0x721   :  { %1154 = vperm.xlu1 %5324, %v1151_v13  }
 0x723   :  { %v5423_v60 = vpop.eup %5422 }
 0x724   :  { %1016 = vrot.lane.b32.xlu0 %v5423_v60, %s5754_s5 }
 0x74c   :  { %v1015_v27 = vpop.permute.xlu2 %1014 }
 0x74d   :  { %v1020_v31 = vmul.f32 %v1015_v27, %v1010_v28 }
 0x74f   :  { %v1024_v24 = vadd.f32 %v1022_v36, %v1020_v31 }
 0x754   :  { %v6462_v54 = vpop.permute.xlu2 %1157 }
 0x755   :  { %vm1160_vm8 = vcmp.eq.s32.totalorder %v6462_v54, 1 }
 0x78b   :  { %v1329_v26 = vpop.permute.xlu1 %1328 }
 0x78c   :  { %4850 = vmatmul.msk.bf16.vlgmr.msrb.gmra.mxu3 %vm124_vm0, %v1329_v26  ;;  %v175_v26 = vpop.f32.mrf.mxu0 }
 0x78d   :  { %v176_v27 = vadd.f32 %v6512_v2, %v175_v26 }
 0x78f   :  { %v205_v31 = vpack.c.bf16 %v176_v27, %v176_v27 }
 0x791   :  { %222 = vst.msk [vmem:[#allocation2 + $0x1c] sm:$0xf] %vm214_vm1, %v205_v31 }
 0x793   :  { %v6458_v40 = vpop.permute.xlu1 %1154 }
 0x794   :  { %vm1159_vm6 = vcmp.eq.s32.totalorder %v6458_v40, 1  ;;  %v7831_v40 = vld [vmem:[%s8057_s13] ss:$0 sm:$0xff] }
 0x795   :  { %v6467_v39 = vsel %vm1159_vm6, %v1024_v24, %v6322_v42 }
 0x796   :  { %v1017_v51 = vpop.permute.xlu0 %1016  ;;  %v6474_v38 = vpack.c.bf16 %v6467_v39, %v6467_v39 }
 0x797   :  { %v1021_v55 = vmul.f32 %v1017_v51, %v1011_v44 }
 0x798   :  { %v1202_v62 = vunpack.c.l.b16 %v6474_v38 }
 0x799   :  { %v1025_v45 = vadd.f32 %v1023_v1, %v1021_v55 }
 0x79b   :  { %v6479_v61 = vsel %vm1160_vm8, %v1025_v45, %v6332_v59  ;;  %v6494_v59 = vld [vmem:[%s8107_s8] ss:$0 sm:$0xff] }
 0x79c   :  { %v6483_v42 = vpack.c.bf16 %v6479_v61, %v6479_v61 }
 0x79e   :  { %v1203_v50 = vunpack.c.l.b16 %v6483_v42 }
 0x7a0   :  { %v1204_v3 = vpack.c.b16 %v1203_v50, %v1202_v62 }
 0x7a2   :  { %1205 = vrot.lane.b32.xlu0 %v1204_v3, %s5754_s5 }
 0x80f   :  { %v1354_v37 = vpop.f32.mrf.mxu3 }
 0x810   :  { %v1355_v9 = vadd.f32 %v6494_v59, %v1354_v37 }
 0x812   :  { %1403 = vrot.lane.b32.xlu1 %v1355_v9, %s5753_s2  ;;  %v1361_v19 = vadd.f32 %v5220_v15, %v1355_v9 }
 0x814   :  { %v1206_v46 = vpop.permute.xlu0 %1205  ;;  %v4851_v57 = vmul.f32 -1.442695, %v1361_v19 }
 0x815   :  { %4839 = vmatmul.msk.bf16.vlgmr.msrb.gmra.mxu2 %vm124_vm0, %v1206_v46 }
 0x817   :  { %v1356_v12 = vpop.f32.mrf.mxu3 }
 0x818   :  { %v1357_v14 = vadd.f32 %v6494_v59, %v1356_v12 }
 0x81a   :  { %1405 = vrot.lane.b32.xlu2 %v1357_v14, %s5753_s2  ;;  %v1362_v16 = vadd.f32 %v5221_v58, %v1357_v14 }
 0x81c   :  { %v4852_v17 = vmul.f32 -1.442695, %v1362_v16 }
 0x81e   :  { %5424 = vpow2.f32 %v4852_v17 }
 0x824   :  { %v5425_v18 = vpop.eup %5424 }
 0x825   :  { %v1370_v8 = vadd.f32 1.0, %v5425_v18 }
 0x827   :  { %5426 = vrcp.f32 %v1370_v8  ;;  %v1397_v44 = vand.u32 2147483648, %v1370_v8  ;;  %vm1391_vm10 = vweird.f32 %v1370_v8  ;;  %v1395_v51 = vand.u32 2147483647, %v1370_v8 }
 0x828   :  { %5428 = vpow2.f32 %v4851_v57 }
 0x829   :  { %v1398_v45 = vor.u32 1.1754944e-38, %v1397_v44  ;;  %vm1396_vm11 = vcmp.eq.f32.partialorder %v1395_v51, 8.507059e+37 }
 0x82d   :  { %v5427_v13 = vpop.eup %5426 }
 0x82e   :  { %v5429_v60 = vpop.eup %5428  ;;  %v1387_v56 = vmul.f32 %v5427_v13, %v1370_v8  ;;  %vm1392_vm9 = vweird.f32 %v5427_v13 }
 0x82f   :  { %v1369_v0 = vadd.f32 1.0, %v5429_v60  ;;  %vm1393_vm5 = vmor %vm1391_vm10, %vm1392_vm9 }
 0x830   :  { %v1388_v10 = vsub.f32 1.0, %v1387_v56 }
 0x831   :  { %5430 = vrcp.f32 %v1369_v0  ;;  %v1382_v46 = vand.u32 2147483648, %v1369_v0  ;;  %vm1376_vm14 = vweird.f32 %v1369_v0  ;;  %v1380_v12 = vand.u32 2147483647, %v1369_v0 }
 0x832   :  { %v1389_v28 = vmul.f32 %v5427_v13, %v1388_v10 }
 0x833   :  { %v1383_v16 = vor.u32 1.1754944e-38, %v1382_v46  ;;  %vm1381_vm9 = vcmp.eq.f32.partialorder %v1380_v12, 8.507059e+37 }
 0x834   :  { %v1390_v36 = vadd.f32 %v5427_v13, %v1389_v28 }
 0x836   :  { %v1394_v1 = vsel %vm1393_vm5, %v5427_v13, %v1390_v36  ;;  %v6532_v13 = vld [vmem:[#allocation2 + $0x18] sm:$0xff]  }
 0x837   :  { %v5431_v24 = vpop.eup %5430  ;;  %v6518_v50 = vsel %vm1396_vm11, %v1398_v45, %v1394_v1  ;;  %vm1453_vm11 = vcmp.gt.s32.totalorder %v6440_v23, 4  ;;  %v5216_v60 = vunpack.c.l.bf16 %v6532_v13  ;;  %v5217_v27 = vunpack.c.h.bf16 %v6532_v13 }
 0x838   :  { %v1372_v55 = vmul.f32 %v5431_v24, %v1369_v0  ;;  %vm1377_vm12 = vweird.f32 %v5431_v24  ;;  %v1455_v22 = vsel %vm1453_vm11, 1, %v8089_v7 }
 0x839   :  { %vm1378_vm15 = vmor %vm1376_vm14, %vm1377_vm12 }
 0x83a   :  { %v1373_v5 = vsub.f32 1.0, %v1372_v55 }
 0x83c   :  { %v1374_v37 = vmul.f32 %v5431_v24, %v1373_v5 }
 0x83e   :  { %v1375_v9 = vadd.f32 %v5431_v24, %v1374_v37 }
 0x840   :  { %v1379_v14 = vsel %vm1378_vm15, %v5431_v24, %v1375_v9 }
 0x841   :  { %v6522_v17 = vsel %vm1381_vm9, %v1383_v16, %v1379_v14 }
 0x874   :  { %v1406_v62 = vpop.permute.xlu2 %1405 }
 0x875   :  { %v1410_v3 = vmul.f32 %v1406_v62, %v6518_v50 }
 0x877   :  { %1415 = vrot.lane.b32.xlu1 %v1410_v3, %s5753_s2 }
 0x884   :  { %v1404_v18 = vpop.permute.xlu1 %1403 }
 0x885   :  { %v1409_v19 = vmul.f32 %v1404_v18, %v6522_v17 }
 0x887   :  { %1413 = vrot.lane.b32.xlu0 %v1409_v19, %s5753_s2 }
 0x898   :  { %v1231_v8 = vpop.f32.mrf.mxu2 }
 0x899   :  { %v1232_v57 = vadd.f32 %v6369_v33, %v1231_v8 }
 0x89b   :  { %1280 = vrot.lane.b32.xlu2 %v1232_v57, %s5753_s2  ;;  %v1238_v56 = vadd.f32 %v5216_v60, %v1232_v57 }
 0x89d   :  { %v4840_v0 = vmul.f32 -1.442695, %v1238_v56 }
 0x89f   :  { %5432 = vpow2.f32 %v4840_v0 }
 0x8a0   :  { %v1233_v25 = vpop.f32.mrf.mxu2 }
 0x8a1   :  { %v1234_v21 = vadd.f32 %v6369_v33, %v1233_v25 }
 0x8a3   :  { %1282 = vrot.lane.b32.xlu0 %v1234_v21, %s5753_s2  ;;  %v1239_v31 = vadd.f32 %v5217_v27, %v1234_v21  ;;  %v5740_v21 = vld [vmem:[%s8055_s1 + $0x8] sm:$0xff] }
 0x8a4   :  { %vm1454_vm5 = vcmp.gt.s32.totalorder %v5740_v21, 4 }
 0x8a5   :  { %v5433_v10 = vpop.eup %5432  ;;  %v4841_v24 = vmul.f32 -1.442695, %v1239_v31  ;;  %v1456_v56 = vsel %vm1454_vm5, 1, %v8089_v7 }
 0x8a6   :  { %v1246_v26 = vadd.f32 1.0, %v5433_v10 }
 0x8a8   :  { %5434 = vrcp.f32 %v1246_v26  ;;  %v1259_v5 = vand.u32 2147483648, %v1246_v26  ;;  %vm1253_vm14 = vweird.f32 %v1246_v26  ;;  %v1257_v37 = vand.u32 2147483647, %v1246_v26 }
 0x8a9   :  { %5436 = vpow2.f32 %v4841_v24 }
 0x8aa   :  { %v1260_v14 = vor.u32 1.1754944e-38, %v1259_v5  ;;  %vm1258_vm10 = vcmp.eq.f32.partialorder %v1257_v37, 8.507059e+37  ;;  %v1435_v37 = vmul.f32 %v6522_v17, %v6416_v53 }
 0x8ab   :  { %1458 = vperm.xlu0 %5323, %v1455_v22  }
 0x8ae   :  { %v5435_v28 = vpop.eup %5434 }
 0x8af   :  { %v1249_v36 = vmul.f32 %v5435_v28, %v1246_v26  ;;  %v5437_v45 = vpop.eup %5436  ;;  %vm1254_vm12 = vweird.f32 %v5435_v28 }
 0x8b0   :  { %vm1255_vm15 = vmor %vm1253_vm14, %vm1254_vm12  ;;  %v1247_v9 = vadd.f32 1.0, %v5437_v45 }
 0x8b1   :  { %v1250_v51 = vsub.f32 1.0, %v1249_v36 }
 0x8b2   :  { %vm1268_vm11 = vweird.f32 %v1247_v9  ;;  %v1272_v10 = vand.u32 2147483647, %v1247_v9 }
 0x8b3   :  { %v1251_v55 = vmul.f32 %v5435_v28, %v1250_v51 }
 0x8b4   :  { %vm1273_vm14 = vcmp.eq.f32.partialorder %v1272_v10, 8.507059e+37 }
 0x8b5   :  { %v1252_v62 = vadd.f32 %v5435_v28, %v1251_v55 }
 0x8b7   :  { %v1256_v46 = vsel %vm1255_vm15, %v5435_v28, %v1252_v62  ;;  %vm1440_vm15 = vcmp.gt.s32.totalorder %v5740_v21, 3  ;;  %v1423_v62 = vsub.f32 1.0, %v6522_v17 }
 0x8b8   :  { %v6543_v16 = vsel %vm1258_vm10, %v1260_v14, %v1256_v46  ;;  %v1442_v45 = vsel %vm1440_vm15, 1, %v8089_v7  ;;  %v1424_v46 = vsub.f32 1.0, %v6518_v50 }
 0x8e9   :  { %v1416_v44 = vpop.permute.xlu1 %1415 }
 0x8ea   :  { %v1420_v1 = vadd.f32 %v5221_v58, %v1416_v44 }
 0x8ec   :  { %5438 = vtanh.f32 %v1420_v1 }
 0x8ed   :  { %5440 = vrcp.f32 %v1247_v9 }
 0x8f2   :  { %v5439_v3 = vpop.eup %5438 }
 0x8f3   :  { %1429 = vrot.lane.b32.xlu2 %v5439_v3, %s5754_s5  ;;  %v5441_v8 = vpop.eup %5440 }
 0x8f4   :  { %v1264_v25 = vmul.f32 %v5441_v8, %v1247_v9  ;;  %vm1269_vm9 = vweird.f32 %v5441_v8 }
 0x8f5   :  { %v1281_v12 = vpop.permute.xlu2 %1280  ;;  %vm1270_vm12 = vmor %vm1268_vm11, %vm1269_vm9  ;;  %vm1439_vm9 = vcmp.gt.s32.totalorder %v6440_v23, 3  ;;  %v5146_v23 = vld [vmem:[%s8103_s25] sm:$0xff] }
 0x8f6   :  { %v1286_v58 = vmul.f32 %v1281_v12, %v6543_v16  ;;  %v1265_v22 = vsub.f32 1.0, %v1264_v25 }
 0x8f8   :  { %v1266_v0 = vmul.f32 %v5441_v8, %v1265_v22 }
 0x8f9   :  { %v1414_v18 = vpop.permute.xlu0 %1413 }
 0x8fa   :  { %v1419_v19 = vadd.f32 %v5220_v15, %v1414_v18  ;;  %v1267_v29 = vadd.f32 %v5441_v8, %v1266_v0  ;;  %v1274_v15 = vand.u32 2147483648, %v1247_v9  ;;  %v5147_v0 = vld [vmem:[%s8103_s25 + $0x8] sm:$0xff] }
 0x8fb   :  { %1290 = vrot.lane.b32.xlu2 %v1286_v58, %s5753_s2  ;;  %v1436_v58 = vmul.f32 %v6518_v50, %v6429_v20  ;;  %1641 = vmatpush.bf16.msra.mxu3 %v5147_v0 }
 0x8fc   :  { %5442 = vtanh.f32 %v1419_v19  ;;  %v1271_v26 = vsel %vm1270_vm12, %v5441_v8, %v1267_v29  ;;  %v1275_v28 = vor.u32 1.1754944e-38, %v1274_v15 }
 0x8fe   :  { %v6554_v31 = vsel %vm1273_vm14, %v1275_v28, %v1271_v26  ;;  %v1312_v26 = vmul.f32 %v6543_v16, %v6467_v39 }
 0x8ff   :  { %1642 = vmatpush.bf16.msra.mxu3 %v5146_v23 }
 0x902   :  { %v5443_v57 = vpop.eup %5442 }
 0x903   :  { %1427 = vrot.lane.b32.xlu1 %v5443_v57, %s5754_s5 }
 0x90b   :  { %1461 = vperm.xlu1 %5324, %v1456_v56   ;;  %v1441_v56 = vsel %vm1439_vm9, 1, %v8089_v7 }
 0x915   :  { %v1283_v36 = vpop.permute.xlu0 %1282 }
 0x916   :  { %v1287_v24 = vmul.f32 %v1283_v36, %v6554_v31  ;;  %v1301_v36 = vsub.f32 1.0, %v6554_v31 }
 0x918   :  { %1292 = vrot.lane.b32.xlu0 %v1287_v24, %s5753_s2 }
 0x91d   :  { %v6563_v5 = vpop.permute.xlu0 %1458 }
 0x91e   :  { %vm8088_vm10 = vcmp.eq.s32.totalorder %v6563_v5, 1 }
 0x94d   :  { %v1430_v44 = vpop.permute.xlu2 %1429 }
 0x94e   :  { %v1434_v12 = vmul.f32 %v1430_v44, %v1424_v46 }
 0x950   :  { %v1438_v19 = vadd.f32 %v1436_v58, %v1434_v12 }
 0x955   :  { %v1291_v51 = vpop.permute.xlu2 %1290 }
 0x956   :  { %v1296_v1 = vadd.f32 %v5216_v60, %v1291_v51 }
 0x958   :  { %5444 = vtanh.f32 %v1296_v1  ;;  %v1313_v1 = vmul.f32 %v6554_v31, %v6479_v61 }
 0x95e   :  { %v5445_v55 = vpop.eup %5444 }
 0x95f   :  { %1304 = vrot.lane.b32.xlu2 %v5445_v55, %s5754_s5 }
 0x967   :  { %1447 = vperm.xlu2 %5322, %v1442_v45  }
 0x975   :  { %v1428_v3 = vpop.permute.xlu1 %1427 }
 0x976   :  { %v1433_v9 = vmul.f32 %v1428_v3, %v1423_v62 }
 0x978   :  { %v1437_v60 = vadd.f32 %v1435_v37, %v1433_v9  ;;  %v5145_v9 = vld [vmem:[%s8104_s26 + $0x8] sm:$0xff] }
 0x979   :  { %1518 = vmatpush.bf16.msra.mxu2 %v5145_v9 }
 0x97a   :  { %v6572_v14 = vsel %vm8088_vm10, %v1437_v60, %v6416_v53 }
 0x97b   :  { %v1480_v18 = vpack.c.bf16 %v6572_v14, %v6572_v14 }
 0x97d   :  { %v6578_v17 = vpop.permute.xlu1 %1461  ;;  %1483 = vst.msk [vmem:[#allocation4 + $0x20] sm:$0xf] %vm8085_vm7, %v1480_v18  ;;  %v1615_v57 = vunpack.c.l.b16 %v1480_v18 }
 0x97e   :  { %vm8087_vm5 = vcmp.eq.s32.totalorder %v6578_v17, 1 }
 0x97f   :  { %v6585_v8 = vsel %vm8087_vm5, %v1438_v19, %v6429_v20  ;;  %v6647_v19 = vld [vmem:[#allocation3 + $0x18] sm:$0xff]  }
 0x980   :  { %v1481_v53 = vpack.c.bf16 %v6585_v8, %v6585_v8 }
 0x982   :  { %v1616_v50 = vunpack.c.l.b16 %v1481_v53  ;;  %1484 = vst.msk [vmem:[#allocation4 + $0x24] sm:$0xf] %vm8085_vm7, %v1481_v53  ;;  %v5229_v53 = vunpack.c.h.bf16 %v6647_v19 }
 0x984   :  { %v1617_v25 = vpack.c.b16 %v1616_v50, %v1615_v57 }
 0x986   :  { %1618 = vrot.lane.b32.xlu1 %v1617_v25, %s5754_s5 }
 0x98a   :  { %v1293_v21 = vpop.permute.xlu0 %1292 }
 0x98b   :  { %v1297_v22 = vadd.f32 %v5217_v27, %v1293_v21  ;;  %v1300_v27 = vsub.f32 1.0, %v6543_v16  ;;  %v5228_v21 = vunpack.c.l.bf16 %v6647_v19 }
 0x98d   :  { %5446 = vtanh.f32 %v1297_v22 }
 0x98e   :  { %1444 = vperm.xlu1 %5324, %v1441_v56  }
 0x993   :  { %v5447_v20 = vpop.eup %5446 }
 0x994   :  { %1306 = vrot.lane.b32.xlu0 %v5447_v20, %s5754_s5 }
 0x9b9   :  { %v1305_v13 = vpop.permute.xlu2 %1304 }
 0x9ba   :  { %v1310_v15 = vmul.f32 %v1305_v13, %v1300_v27 }
 0x9bc   :  { %v1314_v28 = vadd.f32 %v1312_v26, %v1310_v15  ;;  %v178_v15 = vpop.f32.mrf.mxu0 }
 0x9bd   :  { %v179_v26 = vadd.f32 %v6512_v2, %v178_v15 }
 0x9c1   :  { %v6610_v44 = vpop.permute.xlu2 %1447 }
 0x9c2   :  { %vm8091_vm12 = vcmp.eq.s32.totalorder %v6610_v44, 1 }
 0x9f8   :  { %v1619_v29 = vpop.permute.xlu1 %1618 }
 0x9f9   :  { %4872 = vmatmul.msk.bf16.vlgmr.msra.gmra.mxu3 %vm124_vm0, %v1619_v29 }
 0xa00   :  { %v6604_v10 = vpop.permute.xlu1 %1444 }
 0xa01   :  { %vm1449_vm11 = vcmp.eq.s32.totalorder %v6604_v10, 1 }
 0xa02   :  { %v6615_v51 = vsel %vm1449_vm11, %v1314_v28, %v6467_v39  ;;  %v206_v28 = vpack.c.bf16 %v179_v26, %v179_v26 }
 0xa03   :  { %v6622_v16 = vpack.c.bf16 %v6615_v51, %v6615_v51 }
 0xa04   :  { %223 = vst.msk [vmem:[#allocation2 + $0x20] sm:$0xf] %vm214_vm1, %v206_v28 }
 0xa05   :  { %v1492_v3 = vunpack.c.l.b16 %v6622_v16 }
 0xa06   :  { %v1307_v24 = vpop.permute.xlu0 %1306 }
 0xa07   :  { %v1311_v55 = vmul.f32 %v1307_v24, %v1301_v36 }
 0xa09   :  { %v1315_v45 = vadd.f32 %v1313_v1, %v1311_v55  ;;  %v180_v1 = vpop.f32.mrf.mxu0 }
 0xa0b   :  { %v6627_v62 = vsel %vm8091_vm12, %v1315_v45, %v6479_v61  ;;  %v5144_v61 = vld [vmem:[%s8104_s26] sm:$0xff] }
 0xa0c   :  { %v6631_v39 = vpack.c.bf16 %v6627_v62, %v6627_v62  ;;  %1519 = vmatpush.bf16.msra.mxu2 %v5144_v61 }
 0xa0e   :  { %v1493_v31 = vunpack.c.l.b16 %v6631_v39 }
 0xa10   :  { %v1494_v37 = vpack.c.b16 %v1493_v31, %v1492_v3  ;;  %v181_v3 = vadd.f32 %v6512_v2, %v180_v1 }
 0xa12   :  { %1495 = vrot.lane.b32.xlu0 %v1494_v37, %s5754_s5  ;;  %v207_v37 = vpack.c.bf16 %v181_v3, %v181_v3 }
 0xa14   :  { %224 = vst.msk [vmem:[#allocation2 + $0x24] sm:$0xf] %vm214_vm1, %v207_v37 }
 0xa7c   :  { %v1644_v46 = vpop.f32.mrf.mxu3 }
 0xa7d   :  { %v1645_v60 = vadd.f32 %v6494_v59, %v1644_v46 }
 0xa7f   :  { %1693 = vrot.lane.b32.xlu1 %v1645_v60, %s5753_s2  ;;  %v1651_v22 = vadd.f32 %v5228_v21, %v1645_v60 }
 0xa81   :  { %v4873_v20 = vmul.f32 -1.442695, %v1651_v22 }
 0xa84   :  { %v1646_v12 = vpop.f32.mrf.mxu3  ;;  %v1496_v58 = vpop.permute.xlu0 %1495 }
 0xa85   :  { %v1647_v18 = vadd.f32 %v6494_v59, %v1646_v12  ;;  %4861 = vmatmul.msk.bf16.vlgmr.msra.gmra.mxu2 %vm124_vm0, %v1496_v58 }
 0xa87   :  { %1695 = vrot.lane.b32.xlu2 %v1647_v18, %s5753_s2  ;;  %v1652_v57 = vadd.f32 %v5229_v53, %v1647_v18 }
 0xa89   :  { %v4874_v50 = vmul.f32 -1.442695, %v1652_v57 }
 0xa8b   :  { %5448 = vpow2.f32 %v4874_v50 }
 0xa91   :  { %v5449_v25 = vpop.eup %5448 }
 0xa92   :  { %v1660_v56 = vadd.f32 1.0, %v5449_v25 }
 0xa94   :  { %5450 = vrcp.f32 %v1660_v56  ;;  %v1687_v45 = vand.u32 2147483648, %v1660_v56  ;;  %vm1681_vm15 = vweird.f32 %v1660_v56  ;;  %v1685_v31 = vand.u32 2147483647, %v1660_v56 }
 0xa95   :  { %5452 = vpow2.f32 %v4873_v20 }
 0xa96   :  { %v1688_v46 = vor.u32 1.1754944e-38, %v1687_v45  ;;  %vm1686_vm7 = vcmp.eq.f32.partialorder %v1685_v31, 8.507059e+37 }
 0xa9a   :  { %v5451_v0 = vpop.eup %5450 }
 0xa9b   :  { %v5453_v23 = vpop.eup %5452  ;;  %v1677_v29 = vmul.f32 %v5451_v0, %v1660_v56  ;;  %vm1682_vm14 = vweird.f32 %v5451_v0 }
 0xa9c   :  { %v1659_v13 = vadd.f32 1.0, %v5453_v23  ;;  %vm1683_vm9 = vmor %vm1681_vm15, %vm1682_vm14 }
 0xa9d   :  { %v1678_v27 = vsub.f32 1.0, %v1677_v29 }
 0xa9e   :  { %5454 = vrcp.f32 %v1659_v13  ;;  %v1672_v25 = vand.u32 2147483648, %v1659_v13  ;;  %vm1666_vm14 = vweird.f32 %v1659_v13  ;;  %v1670_v22 = vand.u32 2147483647, %v1659_v13 }
 0xa9f   :  { %v1679_v36 = vmul.f32 %v5451_v0, %v1678_v27 }
 0xaa0   :  { %v1673_v20 = vor.u32 1.1754944e-38, %v1672_v25 }
 0xaa1   :  { %v1680_v24 = vadd.f32 %v5451_v0, %v1679_v36 }
 0xaa3   :  { %v1684_v9 = vsel %vm1683_vm9, %v5451_v0, %v1680_v24  ;;  %vm1671_vm9 = vcmp.eq.f32.partialorder %v1670_v22, 8.507059e+37 }
 0xaa4   :  { %v5455_v55 = vpop.eup %5454  ;;  %v6659_v12 = vsel %vm1686_vm7, %v1688_v46, %v1684_v9 }
 0xaa5   :  { %v1662_v61 = vmul.f32 %v5455_v55, %v1659_v13  ;;  %vm1667_vm4 = vweird.f32 %v5455_v55  ;;  %v6671_v13 = vld [vmem:[#allocation2 + $0x20] sm:$0xff]  }
 0xaa6   :  { %vm1668_vm15 = vmor %vm1666_vm14, %vm1667_vm4  ;;  %v5224_v36 = vunpack.c.l.bf16 %v6671_v13  ;;  %v5225_v31 = vunpack.c.h.bf16 %v6671_v13 }
 0xaa7   :  { %v1663_v18 = vsub.f32 1.0, %v1662_v61 }
 0xaa9   :  { %v1664_v57 = vmul.f32 %v5455_v55, %v1663_v18 }
 0xaab   :  { %v1665_v50 = vadd.f32 %v5455_v55, %v1664_v57 }
 0xaad   :  { %v1669_v56 = vsel %vm1668_vm15, %v5455_v55, %v1665_v50 }
 0xaae   :  { %v6663_v0 = vsel %vm1671_vm9, %v1673_v20, %v1669_v56 }
 0xae1   :  { %v1696_v60 = vpop.permute.xlu2 %1695 }
 0xae2   :  { %v1700_v58 = vmul.f32 %v1696_v60, %v6659_v12 }
 0xae4   :  { %1705 = vrot.lane.b32.xlu1 %v1700_v58, %s5753_s2 }
 0xaf1   :  { %v1694_v23 = vpop.permute.xlu1 %1693 }
 0xaf2   :  { %v1699_v29 = vmul.f32 %v1694_v23, %v6663_v0 }
 0xaf4   :  { %1703 = vrot.lane.b32.xlu0 %v1699_v29, %s5753_s2 }
 0xb08   :  { %v1521_v27 = vpop.f32.mrf.mxu2 }
 0xb09   :  { %v1522_v15 = vadd.f32 %v6369_v33, %v1521_v27 }
 0xb0b   :  { %1570 = vrot.lane.b32.xlu2 %v1522_v15, %s5753_s2  ;;  %v1528_v24 = vadd.f32 %v5224_v36, %v1522_v15 }
 0xb0d   :  { %v4862_v1 = vmul.f32 -1.442695, %v1528_v24 }
 0xb0f   :  { %5456 = vpow2.f32 %v4862_v1 }
 0xb10   :  { %v1523_v26 = vpop.f32.mrf.mxu2 }
 0xb11   :  { %v1524_v28 = vadd.f32 %v6369_v33, %v1523_v26 }
 0xb13   :  { %1572 = vrot.lane.b32.xlu0 %v1524_v28, %s5753_s2  ;;  %v1529_v9 = vadd.f32 %v5225_v31, %v1524_v28 }
 0xb15   :  { %v5457_v55 = vpop.eup %5456  ;;  %v4863_v46 = vmul.f32 -1.442695, %v1529_v9 }
 0xb16   :  { %v1536_v45 = vadd.f32 1.0, %v5457_v55 }
 0xb18   :  { %5458 = vrcp.f32 %v1536_v45  ;;  %v1549_v50 = vand.u32 2147483648, %v1536_v45  ;;  %vm1543_vm4 = vweird.f32 %v1536_v45  ;;  %v1547_v25 = vand.u32 2147483647, %v1536_v45 }
 0xb1a   :  { %v1550_v20 = vor.u32 1.1754944e-38, %v1549_v50  ;;  %vm1548_vm15 = vcmp.eq.f32.partialorder %v1547_v25, 8.507059e+37  ;;  %v1726_v25 = vmul.f32 %v6659_v12, %v6585_v8 }
 0xb1e   :  { %v5459_v3 = vpop.eup %5458 }
 0xb1f   :  { %v1539_v37 = vmul.f32 %v5459_v3, %v1536_v45  ;;  %vm1544_vm7 = vweird.f32 %v5459_v3 }
 0xb20   :  { %vm1545_vm14 = vmor %vm1543_vm4, %vm1544_vm7 }
 0xb21   :  { %v1540_v61 = vsub.f32 1.0, %v1539_v37 }
 0xb23   :  { %v1541_v58 = vmul.f32 %v5459_v3, %v1540_v61 }
 0xb25   :  { %v1542_v18 = vadd.f32 %v5459_v3, %v1541_v58  ;;  %v1714_v58 = vsub.f32 1.0, %v6659_v12  ;;  %v5151_v12 = vld [vmem:[%s8103_s25 + $0x8] sm:$0xff] }
 0xb26   :  { %1905 = vmatpush.bf16.msrb.mxu3 %v5151_v12 }
 0xb27   :  { %v1546_v56 = vsel %vm1545_vm14, %v5459_v3, %v1542_v18 }
 0xb28   :  { %v6680_v27 = vsel %vm1548_vm15, %v1550_v20, %v1546_v56  ;;  %v1713_v56 = vsub.f32 1.0, %v6663_v0 }
 0xb56   :  { %v1706_v33 = vpop.permute.xlu1 %1705 }
 0xb57   :  { %v1710_v60 = vadd.f32 %v5229_v53, %v1706_v33 }
 0xb59   :  { %5460 = vtanh.f32 %v1710_v60 }
 0xb5a   :  { %5462 = vpow2.f32 %v4863_v46 }
 0xb5f   :  { %v5461_v57 = vpop.eup %5460 }
 0xb60   :  { %1719 = vrot.lane.b32.xlu2 %v5461_v57, %s5754_s5  ;;  %v5463_v22 = vpop.eup %5462 }
 0xb61   :  { %v1537_v23 = vadd.f32 1.0, %v5463_v22 }
 0xb63   :  { %5464 = vrcp.f32 %v1537_v23  ;;  %v1564_v37 = vand.u32 2147483648, %v1537_v23  ;;  %vm1558_vm7 = vweird.f32 %v1537_v23  ;;  %v1562_v9 = vand.u32 2147483647, %v1537_v23 }
 0xb65   :  { %v1571_v29 = vpop.permute.xlu2 %1570  ;;  %v1565_v19 = vor.u32 1.1754944e-38, %v1564_v37  ;;  %vm1563_vm14 = vcmp.eq.f32.partialorder %v1562_v9, 8.507059e+37 }
 0xb66   :  { %v1576_v53 = vmul.f32 %v1571_v29, %v6680_v27  ;;  %v1704_v15 = vpop.permute.xlu0 %1703 }
 0xb67   :  { %v1709_v26 = vadd.f32 %v5228_v21, %v1704_v15 }
 0xb68   :  { %1580 = vrot.lane.b32.xlu0 %v1576_v53, %s5753_s2  ;;  %v1725_v53 = vmul.f32 %v6663_v0, %v6572_v14 }
 0xb69   :  { %5466 = vtanh.f32 %v1709_v26  ;;  %v5465_v28 = vpop.eup %5464 }
 0xb6a   :  { %v1554_v1 = vmul.f32 %v5465_v28, %v1537_v23  ;;  %vm1559_vm9 = vweird.f32 %v5465_v28 }
 0xb6b   :  { %vm1560_vm4 = vmor %vm1558_vm7, %vm1559_vm9 }
 0xb6c   :  { %v1555_v55 = vsub.f32 1.0, %v1554_v1 }
 0xb6e   :  { %v1556_v45 = vmul.f32 %v5465_v28, %v1555_v55 }
 0xb6f   :  { %v5467_v24 = vpop.eup %5466 }
 0xb70   :  { %1717 = vrot.lane.b32.xlu1 %v5467_v24, %s5754_s5  ;;  %v1557_v3 = vadd.f32 %v5465_v28, %v1556_v45 }
 0xb72   :  { %v1561_v33 = vsel %vm1560_vm4, %v5465_v28, %v1557_v3 }
 0xb73   :  { %v1566_v21 = vsel %vm1563_vm14, %v1565_v19, %v1561_v33  ;;  %v1590_v33 = vsub.f32 1.0, %v6680_v27 }
 0xb85   :  { %v1573_v61 = vpop.permute.xlu0 %1572 }
 0xb86   :  { %v1577_v46 = vmul.f32 %v1573_v61, %v1566_v21  ;;  %v1602_v61 = vmul.f32 %v6680_v27, %v6615_v51 }
 0xb88   :  { %1582 = vrot.lane.b32.xlu1 %v1577_v46, %s5753_s2 }
 0xbba   :  { %v1720_v60 = vpop.permute.xlu2 %1719 }
 0xbbb   :  { %v1724_v57 = vmul.f32 %v1720_v60, %v1714_v58  ;;  %v1591_v60 = vsub.f32 1.0, %v1566_v21 }
 0xbbd   :  { %v1728_v22 = vadd.f32 %v1726_v25, %v1724_v57 }
 0xbbf   :  { %v6695_v29 = vsel %vm8091_vm12, %v1728_v22, %v6585_v8  ;;  %v5150_v8 = vld [vmem:[%s8103_s25] sm:$0xff] }
 0xbc0   :  { %v6705_v26 = vpack.c.bf16 %v6695_v29, %v6695_v29  ;;  %1906 = vmatpush.bf16.msrb.mxu3 %v5150_v8 }
 0xbc2   :  { %v1880_v1 = vunpack.c.l.b16 %v6705_v26 }
 0xbda   :  { %v1581_v18 = vpop.permute.xlu0 %1580 }
 0xbdb   :  { %v1586_v50 = vadd.f32 %v5224_v36, %v1581_v18 }
 0xbdd   :  { %5468 = vtanh.f32 %v1586_v50 }
 0xbe2   :  { %v1718_v20 = vpop.permute.xlu1 %1717 }
 0xbe3   :  { %v5469_v23 = vpop.eup %5468  ;;  %v1723_v15 = vmul.f32 %v1718_v20, %v1713_v56  ;;  %v5149_v56 = vld [vmem:[%s8104_s26 + $0x8] sm:$0xff] }
 0xbe4   :  { %1594 = vrot.lane.b32.xlu0 %v5469_v23, %s5754_s5  ;;  %1782 = vmatpush.bf16.msrb.mxu2 %v5149_v56 }
 0xbe5   :  { %v1727_v36 = vadd.f32 %v1725_v53, %v1723_v15 }
 0xbe7   :  { %v6713_v0 = vsel %vm1449_vm11, %v1727_v36, %v6572_v14  ;;  %v6762_v36 = vld [vmem:[#allocation3 + $0x10] sm:$0xff]  }
 0xbe8   :  { %v6717_v28 = vpack.c.bf16 %v6713_v0, %v6713_v0  ;;  %v5236_v8 = vunpack.c.l.bf16 %v6762_v36 }
 0xbea   :  { %v1879_v24 = vunpack.c.l.b16 %v6717_v28 }
 0xbec   :  { %v1881_v55 = vpack.c.b16 %v1880_v1, %v1879_v24 }
 0xbee   :  { %1882 = vrot.lane.b32.xlu2 %v1881_v55, %s5754_s5  ;;  %v5237_v55 = vunpack.c.h.bf16 %v6762_v36 }
 0xbfa   :  { %v1583_v45 = vpop.permute.xlu1 %1582 }
 0xbfb   :  { %v1587_v3 = vadd.f32 %v5225_v31, %v1583_v45  ;;  %v1603_v31 = vmul.f32 %v1566_v21, %v6627_v62 }
 0xbfd   :  { %5470 = vtanh.f32 %v1587_v3 }
 0xc03   :  { %v5471_v37 = vpop.eup %5470 }
 0xc04   :  { %1596 = vrot.lane.b32.xlu1 %v5471_v37, %s5754_s5 }
 0xc48   :  { %v1883_v14 = vpop.permute.xlu2 %1882 }
 0xc49   :  { %4894 = vmatmul.msk.bf16.vlgmr.msrb.gmra.mxu3 %vm124_vm0, %v1883_v14 }
 0xc56   :  { %v1595_v9 = vpop.permute.xlu0 %1594 }
 0xc57   :  { %v1600_v19 = vmul.f32 %v1595_v9, %v1590_v33  ;;  %v183_v33 = vpop.f32.mrf.mxu0 }
 0xc59   :  { %v1604_v46 = vadd.f32 %v1602_v61, %v1600_v19  ;;  %v184_v61 = vadd.f32 %v6512_v2, %v183_v33 }
 0xc5b   :  { %v6732_v13 = vsel %vm8088_vm10, %v1604_v46, %v6615_v51  ;;  %v208_v46 = vpack.c.bf16 %v184_v61, %v184_v61 }
 0xc5c   :  { %v6737_v50 = vpack.c.bf16 %v6732_v13, %v6732_v13 }
 0xc5d   :  { %225 = vst.msk [vmem:[#allocation2 + $0x28] sm:$0xf] %vm214_vm1, %v208_v46 }
 0xc5e   :  { %v1756_v51 = vunpack.c.l.b16 %v6737_v50 }
 0xc76   :  { %v1597_v58 = vpop.permute.xlu1 %1596 }
 0xc77   :  { %v1601_v18 = vmul.f32 %v1597_v58, %v1591_v60 }
 0xc79   :  { %v1605_v57 = vadd.f32 %v1603_v31, %v1601_v18  ;;  %v185_v31 = vpop.f32.mrf.mxu0 }
 0xc7b   :  { %v6742_v27 = vsel %vm8087_vm5, %v1605_v57, %v6627_v62  ;;  %v5148_v62 = vld [vmem:[%s8104_s26] sm:$0xff]  ;;  %v186_v57 = vadd.f32 %v6512_v2, %v185_v31 }
 0xc7c   :  { %v6746_v25 = vpack.c.bf16 %v6742_v27, %v6742_v27  ;;  %1783 = vmatpush.bf16.msrb.mxu2 %v5148_v62 }
 0xc7e   :  { %v1757_v22 = vunpack.c.l.b16 %v6746_v25 }
 0xc80   :  { %v1758_v21 = vpack.c.b16 %v1757_v22, %v1756_v51  ;;  %v209_v51 = vpack.c.bf16 %v186_v57, %v186_v57 }
 0xc82   :  { %1759 = vrot.lane.b32.xlu2 %v1758_v21, %s5754_s5  ;;  %226 = vst.msk [vmem:[#allocation2 + $0x2c] sm:$0xf] %vm214_vm1, %v209_v51 }
 0xccc   :  { %v1908_v20 = vpop.f32.mrf.mxu3 }
 0xccd   :  { %v1909_v23 = vadd.f32 %v6494_v59, %v1908_v20 }
 0xccf   :  { %1957 = vrot.lane.b32.xlu0 %v1909_v23, %s5753_s2  ;;  %v1915_v24 = vadd.f32 %v5236_v8, %v1909_v23 }
 0xcd1   :  { %v4895_v1 = vmul.f32 -1.442695, %v1915_v24 }
 0xcd3   :  { %5472 = vpow2.f32 %v4895_v1 }
 0xcd4   :  { %v1910_v53 = vpop.f32.mrf.mxu3 }
 0xcd5   :  { %v1911_v15 = vadd.f32 %v6494_v59, %v1910_v53 }
 0xcd7   :  { %1959 = vrot.lane.b32.xlu1 %v1911_v15, %s5753_s2  ;;  %v1916_v45 = vadd.f32 %v5237_v55, %v1911_v15 }
 0xcd9   :  { %v4896_v59 = vmul.f32 -1.442695, %v1916_v45  ;;  %v5473_v3 = vpop.eup %5472 }
 0xcda   :  { %v1923_v37 = vadd.f32 1.0, %v5473_v3 }
 0xcdb   :  { %5474 = vpow2.f32 %v4896_v59 }
 0xcdc   :  { %v1760_v12 = vpop.permute.xlu2 %1759  ;;  %5476 = vrcp.f32 %v1923_v37  ;;  %v1936_v20 = vand.u32 2147483648, %v1923_v37  ;;  %vm1930_vm9 = vweird.f32 %v1923_v37  ;;  %v1934_v23 = vand.u32 2147483647, %v1923_v37 }
 0xcdd   :  { %4883 = vmatmul.msk.bf16.vlgmr.msrb.gmra.mxu2 %vm124_vm0, %v1760_v12 }
 0xcde   :  { %v1937_v12 = vor.u32 1.1754944e-38, %v1936_v20  ;;  %vm1935_vm4 = vcmp.eq.f32.partialorder %v1934_v23, 8.507059e+37 }
 0xce1   :  { %v5475_v14 = vpop.eup %5474 }
 0xce2   :  { %v1924_v9 = vadd.f32 1.0, %v5475_v14  ;;  %v5477_v19 = vpop.eup %5476 }
 0xce3   :  { %v1926_v60 = vmul.f32 %v5477_v19, %v1923_v37  ;;  %vm1931_vm15 = vweird.f32 %v5477_v19 }
 0xce4   :  { %5478 = vrcp.f32 %v1924_v9  ;;  %vm1932_vm7 = vmor %vm1930_vm9, %vm1931_vm15  ;;  %v1951_v59 = vand.u32 2147483648, %v1924_v9  ;;  %vm1945_vm5 = vweird.f32 %v1924_v9  ;;  %v1949_v3 = vand.u32 2147483647, %v1924_v9 }
 0xce5   :  { %v1927_v58 = vsub.f32 1.0, %v1926_v60  ;;  %v6785_v60 = vld [vmem:[%s8108_s3] ss:$0 sm:$0xff] }
 0xce6   :  { %v1952_v37 = vor.u32 1.1754944e-38, %v1951_v59  ;;  %vm1950_vm15 = vcmp.eq.f32.partialorder %v1949_v3, 8.507059e+37 }
 0xce7   :  { %v1928_v22 = vmul.f32 %v5477_v19, %v1927_v58 }
 0xce9   :  { %v1929_v56 = vadd.f32 %v5477_v19, %v1928_v22 }
 0xcea   :  { %v5479_v18 = vpop.eup %5478 }
 0xceb   :  { %v1941_v21 = vmul.f32 %v5479_v18, %v1924_v9  ;;  %v1933_v53 = vsel %vm1932_vm7, %v5477_v19, %v1929_v56  ;;  %vm1946_vm14 = vweird.f32 %v5479_v18 }
 0xcec   :  { %v6774_v1 = vsel %vm1935_vm4, %v1937_v12, %v1933_v53  ;;  %vm1947_vm10 = vmor %vm1945_vm5, %vm1946_vm14 }
 0xced   :  { %v1942_v62 = vsub.f32 1.0, %v1941_v21 }
 0xcef   :  { %v1943_v15 = vmul.f32 %v5479_v18, %v1942_v62 }
 0xcf1   :  { %v1944_v45 = vadd.f32 %v5479_v18, %v1943_v15 }
 0xcf3   :  { %v1948_v14 = vsel %vm1947_vm10, %v5479_v18, %v1944_v45  ;;  %v6791_v18 = vld [vmem:[#allocation2 + $0x28] sm:$0xff]  }
 0xcf4   :  { %v6778_v33 = vsel %vm1950_vm15, %v1952_v37, %v1948_v14  ;;  %v5233_v57 = vunpack.c.h.bf16 %v6791_v18  ;;  %v5232_v62 = vunpack.c.l.bf16 %v6791_v18 }
 0xd41   :  { %v1958_v24 = vpop.permute.xlu0 %1957 }
 0xd42   :  { %v1963_v2 = vmul.f32 %v1958_v24, %v6774_v1 }
 0xd44   :  { %1967 = vrot.lane.b32.xlu2 %v1963_v2, %s5753_s2 }
 0xd49   :  { %v1960_v19 = vpop.permute.xlu1 %1959 }
 0xd4a   :  { %v1964_v61 = vmul.f32 %v1960_v19, %v6778_v33 }
 0xd4c   :  { %1969 = vrot.lane.b32.xlu0 %v1964_v61, %s5753_s2 }
 0xd60   :  { %v1785_v46 = vpop.f32.mrf.mxu2 }
 0xd61   :  { %v1786_v58 = vadd.f32 %v6785_v60, %v1785_v46 }
 0xd63   :  { %1834 = vrot.lane.b32.xlu1 %v1786_v58, %s5753_s2  ;;  %v1792_v23 = vadd.f32 %v5232_v62, %v1786_v58 }
 0xd65   :  { %v4884_v12 = vmul.f32 -1.442695, %v1792_v23 }
 0xd68   :  { %v1787_v9 = vpop.f32.mrf.mxu2 }
 0xd69   :  { %v1788_v31 = vadd.f32 %v6785_v60, %v1787_v9 }
 0xd6b   :  { %1836 = vrot.lane.b32.xlu2 %v1788_v31, %s5753_s2  ;;  %v1793_v51 = vadd.f32 %v5233_v57, %v1788_v31 }
 0xd6d   :  { %v4885_v22 = vmul.f32 -1.442695, %v1793_v51 }
 0xd6f   :  { %5480 = vpow2.f32 %v4885_v22 }
 0xd75   :  { %v5481_v20 = vpop.eup %5480 }
 0xd76   :  { %v1801_v53 = vadd.f32 1.0, %v5481_v20 }
 0xd78   :  { %v1828_v46 = vand.u32 2147483648, %v1801_v53  ;;  %vm1822_vm5 = vweird.f32 %v1801_v53  ;;  %v1826_v58 = vand.u32 2147483647, %v1801_v53 }
 0xd7a   :  { %v1829_v51 = vor.u32 1.1754944e-38, %v1828_v46  ;;  %vm1827_vm7 = vcmp.eq.f32.partialorder %v1826_v58, 8.507059e+37  ;;  %v1989_v58 = vmul.f32 %v6774_v1, %v6713_v0 }
 0xd9e   :  { %v1968_v21 = vpop.permute.xlu2 %1967 }
 0xd9f   :  { %v1973_v56 = vadd.f32 %v5236_v8, %v1968_v21 }
 0xda1   :  { %5482 = vtanh.f32 %v1973_v56 }
 0xda2   :  { %5484 = vrcp.f32 %v1801_v53 }
 0xda3   :  { %5486 = vpow2.f32 %v4884_v12 }
 0xda7   :  { %v5483_v15 = vpop.eup %5482 }
 0xda8   :  { %1981 = vrot.lane.b32.xlu0 %v5483_v15, %s5754_s5  ;;  %v5485_v24 = vpop.eup %5484 }
 0xda9   :  { %v5487_v2 = vpop.eup %5486  ;;  %v1818_v45 = vmul.f32 %v5485_v24, %v1801_v53  ;;  %vm1823_vm10 = vweird.f32 %v5485_v24 }
 0xdaa   :  { %v1800_v59 = vadd.f32 1.0, %v5487_v2  ;;  %vm1824_vm9 = vmor %vm1822_vm5, %vm1823_vm10 }
 0xdab   :  { %v1819_v3 = vsub.f32 1.0, %v1818_v45 }
 0xdac   :  { %5488 = vrcp.f32 %v1800_v59  ;;  %v1813_v53 = vand.u32 2147483648, %v1800_v59  ;;  %vm1807_vm14 = vweird.f32 %v1800_v59  ;;  %v1811_v15 = vand.u32 2147483647, %v1800_v59 }
 0xdad   :  { %v1820_v14 = vmul.f32 %v5485_v24, %v1819_v3 }
 0xdae   :  { %vm1812_vm10 = vcmp.eq.f32.partialorder %v1811_v15, 8.507059e+37  ;;  %v5153_v15 = vld [vmem:[%s8104_s26 + $0x8] sm:$0xff] }
 0xdaf   :  { %v1821_v37 = vadd.f32 %v5485_v24, %v1820_v14  ;;  %2046 = vmatpush.bf16.msra.mxu2 %v5153_v15 }
 0xdb1   :  { %v1825_v9 = vsel %vm1824_vm9, %v5485_v24, %v1821_v37  ;;  %v1814_v24 = vor.u32 1.1754944e-38, %v1813_v53  ;;  %v5155_v53 = vld [vmem:[%s8103_s25 + $0x8] sm:$0xff] }
 0xdb2   :  { %v5489_v19 = vpop.eup %5488  ;;  %v6802_v22 = vsel %vm1827_vm7, %v1829_v51, %v1825_v9  ;;  %2169 = vmatpush.bf16.msra.mxu3 %v5155_v53 }
 0xdb3   :  { %v1803_v31 = vmul.f32 %v5489_v19, %v1800_v59  ;;  %vm1808_vm4 = vweird.f32 %v5489_v19 }
 0xdb4   :  { %vm1809_vm15 = vmor %vm1807_vm14, %vm1808_vm4 }
 0xdb5   :  { %v1804_v20 = vsub.f32 1.0, %v1803_v31 }
 0xdb7   :  { %v1805_v36 = vmul.f32 %v5489_v19, %v1804_v20 }
 0xdbe   :  { %v1970_v8 = vpop.permute.xlu0 %1969 }
 0xdbf   :  { %v1974_v61 = vadd.f32 %v5237_v55, %v1970_v8  ;;  %v1806_v55 = vadd.f32 %v5489_v19, %v1805_v36  ;;  %v1977_v8 = vsub.f32 1.0, %v6774_v1 }
 0xdc1   :  { %5490 = vtanh.f32 %v1974_v61  ;;  %v1810_v12 = vsel %vm1809_vm15, %v5489_v19, %v1806_v55  ;;  %v1978_v19 = vsub.f32 1.0, %v6778_v33 }
 0xdc2   :  { %v1815_v2 = vsel %vm1812_vm10, %v1814_v24, %v1810_v12  ;;  %v5152_v12 = vld [vmem:[%s8104_s26] sm:$0xff] }
 0xdc3   :  { %2047 = vmatpush.bf16.msra.mxu2 %v5152_v12 }
 0xdc5   :  { %v1837_v21 = vpop.permute.xlu2 %1836 }
 0xdc6   :  { %v1841_v56 = vmul.f32 %v1837_v21, %v6802_v22 }
 0xdc7   :  { %v5491_v23 = vpop.eup %5490 }
 0xdc8   :  { %1846 = vrot.lane.b32.xlu0 %v1841_v56, %s5753_s2  ;;  %1983 = vrot.lane.b32.xlu1 %v5491_v23, %s5754_s5 }
 0xdd5   :  { %v1835_v45 = vpop.permute.xlu1 %1834 }
 0xdd6   :  { %v1840_v3 = vmul.f32 %v1835_v45, %v1815_v2  ;;  %v1854_v45 = vsub.f32 1.0, %v1815_v2 }
 0xdd8   :  { %1844 = vrot.lane.b32.xlu2 %v1840_v3, %s5753_s2 }
 0xe1a   :  { %v1982_v14 = vpop.permute.xlu0 %1981 }
 0xe1b   :  { %v1987_v61 = vmul.f32 %v1982_v14, %v1977_v8  ;;  %v1866_v14 = vmul.f32 %v1815_v2, %v6732_v13 }
 0xe1d   :  { %v1991_v59 = vadd.f32 %v1989_v58, %v1987_v61  ;;  %v1867_v58 = vmul.f32 %v6802_v22, %v6742_v27 }
 0xe1f   :  { %v6815_v21 = vsel %vm1159_vm6, %v1991_v59, %v6713_v0 }
 0xe20   :  { %v6824_v23 = vpack.c.bf16 %v6815_v21, %v6815_v21 }
 0xe32   :  { %v1845_v37 = vpop.permute.xlu2 %1844 }
 0xe33   :  { %v1850_v46 = vadd.f32 %v5232_v62, %v1845_v37  ;;  %v1990_v62 = vmul.f32 %v6778_v33, %v6695_v29  ;;  %v2143_v33 = vunpack.c.l.b16 %v6824_v23  ;;  %v1855_v37 = vsub.f32 1.0, %v6802_v22 }
 0xe35   :  { %5492 = vtanh.f32 %v1850_v46 }
 0xe3a   :  { %v1847_v9 = vpop.permute.xlu0 %1846  ;;  %v1984_v31 = vpop.permute.xlu1 %1983 }
 0xe3b   :  { %v5493_v51 = vpop.eup %5492  ;;  %v1851_v56 = vadd.f32 %v5233_v57, %v1847_v9  ;;  %v1988_v20 = vmul.f32 %v1984_v31, %v1978_v19 }
 0xe3c   :  { %1858 = vrot.lane.b32.xlu2 %v5493_v51, %s5754_s5 }
 0xe3d   :  { %5494 = vtanh.f32 %v1851_v56  ;;  %v1992_v1 = vadd.f32 %v1990_v62, %v1988_v20 }
 0xe3f   :  { %v6829_v0 = vsel %vm1160_vm8, %v1992_v1, %v6695_v29  ;;  %v5154_v29 = vld [vmem:[%s8103_s25] sm:$0xff] }
 0xe40   :  { %v6833_v18 = vpack.c.bf16 %v6829_v0, %v6829_v0  ;;  %2170 = vmatpush.bf16.msra.mxu3 %v5154_v29 }
 0xe42   :  { %v2144_v57 = vunpack.c.l.b16 %v6833_v18 }
 0xe43   :  { %v5495_v36 = vpop.eup %5494 }
 0xe44   :  { %1860 = vrot.lane.b32.xlu0 %v5495_v36, %s5754_s5  ;;  %v2145_v55 = vpack.c.b16 %v2144_v57, %v2143_v33  ;;  %v6887_v36 = vld [vmem:[#allocation3 + $0x8] sm:$0xff]  }
 0xe46   :  { %2146 = vrot.lane.b32.xlu1 %v2145_v55, %s5754_s5  ;;  %v5244_v55 = vunpack.c.l.bf16 %v6887_v36 }
 0xe96   :  { %v1859_v24 = vpop.permute.xlu2 %1858 }
 0xe97   :  { %v1864_v3 = vmul.f32 %v1859_v24, %v1854_v45  ;;  %v188_v24 = vpop.f32.mrf.mxu0  ;;  %v6895_v45 = vld [vmem:[%s8109_s0] ss:$0 sm:$0xff] }
 0xe99   :  { %v1868_v8 = vadd.f32 %v1866_v14, %v1864_v3  ;;  %v189_v3 = vadd.f32 %v6895_v45, %v188_v24 }
 0xe9b   :  { %v6856_v46 = vsel %vm1173_vm13, %v1868_v8, %v6732_v13  ;;  %v210_v14 = vpack.c.bf16 %v189_v3, %v189_v3 }
 0xe9c   :  { %v6863_v2 = vpack.c.bf16 %v6856_v46, %v6856_v46 }
 0xe9d   :  { %227 = vst.msk [vmem:[#allocation2 + $0x30] sm:$0xf] %vm214_vm1, %v210_v14 }
 0xe9e   :  { %v2020_v22 = vunpack.c.l.b16 %v6863_v2 }
 0xeb6   :  { %v1861_v61 = vpop.permute.xlu0 %1860 }
 0xeb7   :  { %v1865_v59 = vmul.f32 %v1861_v61, %v1855_v37  ;;  %v190_v37 = vpop.f32.mrf.mxu0 }
 0xeb8   :  { %v2147_v19 = vpop.permute.xlu1 %2146  ;;  %v191_v61 = vadd.f32 %v6895_v45, %v190_v37 }
 0xeb9   :  { %v1869_v9 = vadd.f32 %v1867_v58, %v1865_v59  ;;  %4916 = vmatmul.msk.bf16.vlgmr.msra.gmra.mxu3 %vm124_vm0, %v2147_v19  ;;  %v5245_v58 = vunpack.c.h.bf16 %v6887_v36 }
 0xeba   :  { %v211_v19 = vpack.c.bf16 %v191_v61, %v191_v61 }
 0xebb   :  { %v6868_v31 = vsel %vm1174_vm2, %v1869_v9, %v6742_v27  ;;  %v6881_v27 = vld [vmem:[%s8107_s8] ss:$0 sm:$0xff] }
 0xebc   :  { %v6872_v13 = vpack.c.bf16 %v6868_v31, %v6868_v31  ;;  %228 = vst.msk [vmem:[#allocation2 + $0x34] sm:$0xf] %vm214_vm1, %v211_v19 }
 0xebe   :  { %v2021_v51 = vunpack.c.l.b16 %v6872_v13 }
 0xec0   :  { %v2022_v56 = vpack.c.b16 %v2021_v51, %v2020_v22 }
 0xec2   :  { %2023 = vrot.lane.b32.xlu1 %v2022_v56, %s5754_s5 }
 0xf34   :  { %v2024_v62 = vpop.permute.xlu1 %2023 }
 0xf35   :  { %4905 = vmatmul.msk.bf16.vlgmr.msra.gmra.mxu2 %vm124_vm0, %v2024_v62 }
 0xf3c   :  { %v2172_v20 = vpop.f32.mrf.mxu3 }
 0xf3d   :  { %v2173_v1 = vadd.f32 %v6881_v27, %v2172_v20 }
 0xf3f   :  { %2221 = vrot.lane.b32.xlu2 %v2173_v1, %s5753_s2  ;;  %v2179_v53 = vadd.f32 %v5244_v55, %v2173_v1 }
 0xf41   :  { %v4917_v29 = vmul.f32 -1.442695, %v2179_v53 }
 0xf43   :  { %5496 = vpow2.f32 %v4917_v29 }
 0xf44   :  { %v2174_v33 = vpop.f32.mrf.mxu3 }
 0xf45   :  { %v2175_v57 = vadd.f32 %v6881_v27, %v2174_v33 }
 0xf47   :  { %2223 = vrot.lane.b32.xlu0 %v2175_v57, %s5753_s2  ;;  %v2180_v9 = vadd.f32 %v5245_v58, %v2175_v57 }
 0xf49   :  { %v5497_v15 = vpop.eup %5496  ;;  %v4918_v51 = vmul.f32 -1.442695, %v2180_v9 }
 0xf4a   :  { %v2187_v12 = vadd.f32 1.0, %v5497_v15 }
 0xf4c   :  { %5498 = vrcp.f32 %v2187_v12  ;;  %v2200_v20 = vand.u32 2147483648, %v2187_v12  ;;  %vm2194_vm9 = vweird.f32 %v2187_v12  ;;  %v2198_v1 = vand.u32 2147483647, %v2187_v12 }
 0xf4d   :  { %5500 = vpow2.f32 %v4918_v51 }
 0xf4e   :  { %v2201_v29 = vor.u32 1.1754944e-38, %v2200_v20  ;;  %vm2199_vm4 = vcmp.eq.f32.partialorder %v2198_v1, 8.507059e+37 }
 0xf52   :  { %v5499_v8 = vpop.eup %5498 }
 0xf53   :  { %v2190_v59 = vmul.f32 %v5499_v8, %v2187_v12  ;;  %vm2195_vm5 = vweird.f32 %v5499_v8  ;;  %v5501_v33 = vpop.eup %5500 }
 0xf54   :  { %vm2196_vm7 = vmor %vm2194_vm9, %vm2195_vm5  ;;  %v2188_v15 = vadd.f32 1.0, %v5501_v33 }
 0xf55   :  { %v2191_v22 = vsub.f32 1.0, %v2190_v59 }
 0xf56   :  { %5502 = vrcp.f32 %v2188_v15  ;;  %v2215_v12 = vand.u32 2147483648, %v2188_v15  ;;  %vm2209_vm15 = vweird.f32 %v2188_v15 }
 0xf57   :  { %v2192_v56 = vmul.f32 %v5499_v8, %v2191_v22 }
 0xf58   :  { %v2216_v22 = vor.u32 1.1754944e-38, %v2215_v12 }
 0xf59   :  { %v2193_v62 = vadd.f32 %v5499_v8, %v2192_v56 }
 0xf5b   :  { %v2197_v53 = vsel %vm2196_vm7, %v5499_v8, %v2193_v62  ;;  %v2213_v8 = vand.u32 2147483647, %v2188_v15 }
 0xf5c   :  { %v6904_v3 = vsel %vm2199_vm4, %v2201_v29, %v2197_v53  ;;  %v5503_v14 = vpop.eup %5502  ;;  %v6916_v29 = vld [vmem:[#allocation2 + $0x30] sm:$0xff]  }
 0xf5d   :  { %v2205_v37 = vmul.f32 %v5503_v14, %v2188_v15  ;;  %vm2210_vm14 = vweird.f32 %v5503_v14  ;;  %vm2214_vm5 = vcmp.eq.f32.partialorder %v2213_v8, 8.507059e+37  ;;  %v5240_v15 = vunpack.c.l.bf16 %v6916_v29 }
 0xf5e   :  { %vm2211_vm10 = vmor %vm2209_vm15, %vm2210_vm14 }
 0xf5f   :  { %v2206_v61 = vsub.f32 1.0, %v2205_v37 }
 0xf61   :  { %v2207_v59 = vmul.f32 %v5503_v14, %v2206_v61 }
 0xf63   :  { %v2208_v19 = vadd.f32 %v5503_v14, %v2207_v59 }
 0xf65   :  { %v2212_v9 = vsel %vm2211_vm10, %v5503_v14, %v2208_v19  ;;  %v5241_v14 = vunpack.c.h.bf16 %v6916_v29 }
 0xf66   :  { %v6909_v20 = vsel %vm2214_vm5, %v2216_v22, %v2212_v9 }
 0xf99   :  { %v2222_v24 = vpop.permute.xlu2 %2221 }
 0xf9a   :  { %v2227_v57 = vmul.f32 %v2222_v24, %v6904_v3 }
 0xf9c   :  { %2231 = vrot.lane.b32.xlu1 %v2227_v57, %s5753_s2 }
 0xfb8   :  { %v2049_v51 = vpop.f32.mrf.mxu2 }
 0xfb9   :  { %v2050_v56 = vadd.f32 %v6785_v60, %v2049_v51  ;;  %v2224_v62 = vpop.permute.xlu0 %2223 }
 0xfba   :  { %v2228_v1 = vmul.f32 %v2224_v62, %v6909_v20 }
 0xfbb   :  { %2098 = vrot.lane.b32.xlu0 %v2050_v56, %s5753_s2  ;;  %v2056_v24 = vadd.f32 %v5240_v15, %v2050_v56 }
 0xfbc   :  { %2233 = vrot.lane.b32.xlu2 %v2228_v1, %s5753_s2 }
 0xfbd   :  { %v4906_v57 = vmul.f32 -1.442695, %v2056_v24 }
 0xfbf   :  { %5504 = vpow2.f32 %v4906_v57 }
 0xfc0   :  { %v2051_v33 = vpop.f32.mrf.mxu2 }
 0xfc1   :  { %v2052_v53 = vadd.f32 %v6785_v60, %v2051_v33 }
 0xfc3   :  { %2100 = vrot.lane.b32.xlu1 %v2052_v53, %s5753_s2  ;;  %v2057_v37 = vadd.f32 %v5241_v14, %v2052_v53 }
 0xfc5   :  { %v4907_v61 = vmul.f32 -1.442695, %v2057_v37  ;;  %v5505_v59 = vpop.eup %5504 }
 0xfc6   :  { %v2064_v19 = vadd.f32 1.0, %v5505_v59 }
 0xfc7   :  { %5506 = vpow2.f32 %v4907_v61 }
 0xfc8   :  { %5508 = vrcp.f32 %v2064_v19  ;;  %vm2071_vm7 = vweird.f32 %v2064_v19 }
 0xfcd   :  { %v5507_v9 = vpop.eup %5506 }
 0xfce   :  { %v2065_v22 = vadd.f32 1.0, %v5507_v9  ;;  %v5509_v51 = vpop.eup %5508 }
 0xfcf   :  { %v2067_v33 = vmul.f32 %v5509_v51, %v2064_v19  ;;  %vm2072_vm9 = vweird.f32 %v5509_v51 }
 0xfd0   :  { %vm2073_vm4 = vmor %vm2071_vm7, %vm2072_vm9  ;;  %v2092_v7 = vand.u32 2147483648, %v2065_v22  ;;  %vm2086_vm10 = vweird.f32 %v2065_v22  ;;  %vm8111_vm9 = vcmp.eq.s32.totalorder %v6277_v49, 1  ;;  %vm8112_vm7 = vcmp.eq.s32.totalorder %v6262_v63, 1 }
 0xfd1   :  { %v2068_v24 = vsub.f32 1.0, %v2067_v33 }
0x100e   :  { %v2232_v12 = vpop.permute.xlu1 %2231 }
0x100f   :  { %v2237_v8 = vadd.f32 %v5244_v55, %v2232_v12  ;;  %v2069_v55 = vmul.f32 %v5509_v51, %v2068_v24  ;;  %v2077_v12 = vand.u32 2147483648, %v2064_v19  ;;  %v2090_v24 = vand.u32 2147483647, %v2065_v22 }
0x1011   :  { %5510 = vtanh.f32 %v2237_v8  ;;  %v2070_v61 = vadd.f32 %v5509_v51, %v2069_v55  ;;  %v2075_v8 = vand.u32 2147483647, %v2064_v19  ;;  %v2078_v9 = vor.u32 1.1754944e-38, %v2077_v12 }
0x1012   :  { %5512 = vrcp.f32 %v2065_v22  ;;  %v2093_v55 = vor.u32 1.1754944e-38, %v2092_v7  ;;  %vm2091_vm12 = vcmp.eq.f32.partialorder %v2090_v24, 8.507059e+37 }
0x1013   :  { %v2074_v36 = vsel %vm2073_vm4, %v5509_v51, %v2070_v61  ;;  %vm2076_vm14 = vcmp.eq.f32.partialorder %v2075_v8, 8.507059e+37  ;;  %v2253_v8 = vmul.f32 %v6904_v3, %v6815_v21 }
0x1016   :  { %v2234_v56 = vpop.permute.xlu2 %2233 }
0x1017   :  { %v5511_v62 = vpop.eup %5510  ;;  %v2238_v1 = vadd.f32 %v5245_v58, %v2234_v56 }
0x1018   :  { %2245 = vrot.lane.b32.xlu2 %v5511_v62, %s5754_s5  ;;  %v5513_v53 = vpop.eup %5512  ;;  %v2079_v62 = vsel %vm2076_vm14, %v2078_v9, %v2074_v36 }
0x1019   :  { %5514 = vtanh.f32 %v2238_v1  ;;  %v2082_v37 = vmul.f32 %v5513_v53, %v2065_v22  ;;  %vm2087_vm15 = vweird.f32 %v5513_v53 }
0x101a   :  { %vm2088_vm5 = vmor %vm2086_vm10, %vm2087_vm15 }
0x101b   :  { %v2083_v59 = vsub.f32 1.0, %v2082_v37 }
0x101d   :  { %v2084_v58 = vmul.f32 %v5513_v53, %v2083_v59  ;;  %v2241_v59 = vsub.f32 1.0, %v6904_v3 }
0x101f   :  { %v5515_v57 = vpop.eup %5514  ;;  %v2085_v33 = vadd.f32 %v5513_v53, %v2084_v58  ;;  %v2242_v58 = vsub.f32 1.0, %v6909_v20 }
0x1020   :  { %2247 = vrot.lane.b32.xlu0 %v5515_v57, %s5754_s5 }
0x1021   :  { %v2089_v57 = vsel %vm2088_vm5, %v5513_v53, %v2085_v33  ;;  %v2254_v53 = vmul.f32 %v6909_v20, %v6829_v0 }
0x1022   :  { %v2094_v19 = vsel %vm2091_vm12, %v2093_v55, %v2089_v57  ;;  %vm8110_vm12 = vcmp.eq.s32.totalorder %v6314_v34, 1 }
0x1023   :  { %v2119_v29 = vsub.f32 1.0, %v2094_v19 }
0x102d   :  { %v2099_v56 = vpop.permute.xlu0 %2098 }
0x102e   :  { %v2104_v1 = vmul.f32 %v2099_v56, %v2079_v62 }
0x1030   :  { %2108 = vrot.lane.b32.xlu1 %v2104_v1, %s5753_s2 }
0x1035   :  { %v2101_v37 = vpop.permute.xlu1 %2100 }
0x1036   :  { %v2105_v51 = vmul.f32 %v2101_v37, %v2094_v19 }
0x1038   :  { %2110 = vrot.lane.b32.xlu2 %v2105_v51, %s5753_s2 }
0x1072   :  { %v2246_v61 = vpop.permute.xlu2 %2245 }
0x1073   :  { %v2251_v12 = vmul.f32 %v2246_v61, %v2241_v59  ;;  %v5159_v61 = vld [vmem:[%s8103_s25 + $0x8] sm:$0xff]  ;;  %v5158_v59 = vld [vmem:[%s8103_s25] sm:$0xff] }
0x1074   :  { %2432 = vmatpush.bf16.msrb.mxu3 %v5159_v61 }
0x1075   :  { %v2255_v36 = vadd.f32 %v2253_v8, %v2251_v12 }
0x1077   :  { %v6939_v7 = vsel %vm869_vm3, %v2255_v36, %v6815_v21  ;;  %v2131_v36 = vmul.f32 %v2094_v19, %v6868_v31 }
0x1078   :  { %v6947_v3 = vpack.c.bf16 %v6939_v7, %v6939_v7  ;;  %2433 = vmatpush.bf16.msrb.mxu3 %v5158_v59 }
0x107a   :  { %v2406_v20 = vunpack.c.l.b16 %v6947_v3 }
0x1092   :  { %v2248_v22 = vpop.permute.xlu0 %2247  ;;  %v2111_v9 = vpop.permute.xlu2 %2110 }
0x1093   :  { %v2252_v56 = vmul.f32 %v2248_v22, %v2242_v58  ;;  %v2115_v1 = vadd.f32 %v5241_v14, %v2111_v9  ;;  %v2118_v22 = vsub.f32 1.0, %v2079_v62 }
0x1095   :  { %v2256_v33 = vadd.f32 %v2254_v53, %v2252_v56  ;;  %5516 = vtanh.f32 %v2115_v1  ;;  %v2130_v56 = vmul.f32 %v2079_v62, %v6856_v46 }
0x1097   :  { %v6952_v24 = vsel %vm8110_vm12, %v2256_v33, %v6829_v0 }
0x1098   :  { %v6956_v21 = vpack.c.bf16 %v6952_v24, %v6952_v24 }
0x109a   :  { %v2407_v57 = vunpack.c.l.b16 %v6956_v21 }
0x109b   :  { %v5517_v14 = vpop.eup %5516 }
0x109c   :  { %2124 = vrot.lane.b32.xlu2 %v5517_v14, %s5754_s5  ;;  %v2408_v55 = vpack.c.b16 %v2407_v57, %v2406_v20 }
0x109e   :  { %2409 = vrot.lane.b32.xlu0 %v2408_v55, %s5754_s5  ;;  %v5157_v55 = vld [vmem:[%s8104_s26 + $0x8] sm:$0xff] }
0x109f   :  { %2310 = vmatpush.bf16.msrb.mxu2 %v5157_v55 }
0x10a2   :  { %v2109_v37 = vpop.permute.xlu1 %2108 }
0x10a3   :  { %v2114_v51 = vadd.f32 %v5240_v15, %v2109_v37 }
0x10a5   :  { %5518 = vtanh.f32 %v2114_v51 }
0x10ab   :  { %v5519_v0 = vpop.eup %5518 }
0x10ac   :  { %2122 = vrot.lane.b32.xlu1 %v5519_v0, %s5754_s5 }
0x10f6   :  { %v2125_v8 = vpop.permute.xlu2 %2124 }
0x10f7   :  { %v2129_v15 = vmul.f32 %v2125_v8, %v2119_v29 }
0x10f9   :  { %v2133_v58 = vadd.f32 %v2131_v36, %v2129_v15 }
0x10fb   :  { %v6976_v53 = vsel %vm8111_vm9, %v2133_v58, %v6868_v31 }
0x10fc   :  { %v6981_v20 = vpack.c.bf16 %v6976_v53, %v6976_v53 }
0x10fe   :  { %v2285_v14 = vunpack.c.l.b16 %v6981_v20 }
0x1110   :  { %v2410_v12 = vpop.permute.xlu0 %2409 }
0x1111   :  { %4938 = vmatmul.msk.bf16.vlgmr.msrb.gmra.mxu3 %vm124_vm0, %v2410_v12  ;;  %v7006_v12 = vld [vmem:[#allocation3] sm:$0xff]  }
0x1112   :  { %v5253_v8 = vunpack.c.h.bf16 %v7006_v12  ;;  %v5252_v58 = vunpack.c.l.bf16 %v7006_v12 }
0x111e   :  { %v2123_v9 = vpop.permute.xlu1 %2122 }
0x111f   :  { %v2128_v1 = vmul.f32 %v2123_v9, %v2118_v22 }
0x1121   :  { %v2132_v33 = vadd.f32 %v2130_v56, %v2128_v1 }
0x1123   :  { %v6986_v19 = vsel %vm8112_vm7, %v2132_v33, %v6856_v46  ;;  %v5156_v46 = vld [vmem:[%s8104_s26] sm:$0xff] }
0x1124   :  { %v6990_v57 = vpack.c.bf16 %v6986_v19, %v6986_v19  ;;  %2311 = vmatpush.bf16.msrb.mxu2 %v5156_v46 }
0x1126   :  { %v2284_v31 = vunpack.c.l.b16 %v6990_v57 }
0x1128   :  { %v2286_v62 = vpack.c.b16 %v2285_v14, %v2284_v31 }
0x112a   :  { %2287 = vrot.lane.b32.xlu0 %v2286_v62, %s5754_s5  ;;  %v193_v62 = vpop.f32.mrf.mxu0 }
0x112b   :  { %v194_v55 = vadd.f32 %v6895_v45, %v193_v62 }
0x112d   :  { %v212_v46 = vpack.c.bf16 %v194_v55, %v194_v55 }
0x112f   :  { %229 = vst.msk [vmem:[#allocation2 + $0x38] sm:$0xf] %vm214_vm1, %v212_v46 }
0x1194   :  { %v2435_v37 = vpop.f32.mrf.mxu3 }
0x1195   :  { %v2436_v51 = vadd.f32 %v6881_v27, %v2435_v37 }
0x1197   :  { %2484 = vrot.lane.b32.xlu1 %v2436_v51, %s5753_s2  ;;  %v2442_v22 = vadd.f32 %v5252_v58, %v2436_v51  ;;  %v195_v51 = vpop.f32.mrf.mxu0 }
0x1199   :  { %v4939_v9 = vmul.f32 -1.442695, %v2442_v22 }
0x119c   :  { %v2437_v0 = vpop.f32.mrf.mxu3  ;;  %v2288_v61 = vpop.permute.xlu0 %2287 }
0x119d   :  { %v2438_v59 = vadd.f32 %v6881_v27, %v2437_v0  ;;  %4927 = vmatmul.msk.bf16.vlgmr.msrb.gmra.mxu2 %vm124_vm0, %v2288_v61 }
0x119f   :  { %2486 = vrot.lane.b32.xlu2 %v2438_v59, %s5753_s2  ;;  %v2443_v29 = vadd.f32 %v5253_v8, %v2438_v59 }
0x11a1   :  { %v4940_v15 = vmul.f32 -1.442695, %v2443_v29  ;;  %v196_v29 = vadd.f32 %v6895_v45, %v195_v51 }
0x11a3   :  { %5520 = vpow2.f32 %v4940_v15 }
0x11a9   :  { %v5521_v36 = vpop.eup %5520 }
0x11aa   :  { %v2451_v27 = vadd.f32 1.0, %v5521_v36  ;;  %v213_v36 = vpack.c.bf16 %v196_v29, %v196_v29 }
0x11ac   :  { %5522 = vrcp.f32 %v2451_v27  ;;  %v2478_v59 = vand.u32 2147483648, %v2451_v27  ;;  %vm2472_vm14 = vweird.f32 %v2451_v27  ;;  %v2476_v15 = vand.u32 2147483647, %v2451_v27  ;;  %230 = vst.msk [vmem:[#allocation2 + $0x3c] sm:$0xf] %vm214_vm1, %v213_v36 }
0x11ad   :  { %5524 = vpow2.f32 %v4939_v9 }
0x11ae   :  { %vm2477_vm10 = vcmp.eq.f32.partialorder %v2476_v15, 8.507059e+37 }
0x11b2   :  { %v5523_v56 = vpop.eup %5522 }
0x11b3   :  { %v5525_v1 = vpop.eup %5524  ;;  %v2468_v33 = vmul.f32 %v5523_v56, %v2451_v27  ;;  %vm2473_vm4 = vweird.f32 %v5523_v56 }
0x11b4   :  { %v2450_v31 = vadd.f32 1.0, %v5525_v1  ;;  %vm2474_vm15 = vmor %vm2472_vm14, %vm2473_vm4  ;;  %v2479_v1 = vor.u32 1.1754944e-38, %v2478_v59 }
0x11b5   :  { %v2469_v14 = vsub.f32 1.0, %v2468_v33 }
0x11b6   :  { %5526 = vrcp.f32 %v2450_v31  ;;  %v2463_v27 = vand.u32 2147483648, %v2450_v31  ;;  %vm2457_vm12 = vweird.f32 %v2450_v31 }
0x11b7   :  { %v2470_v37 = vmul.f32 %v5523_v56, %v2469_v14 }
0x11b9   :  { %v2471_v0 = vadd.f32 %v5523_v56, %v2470_v37  ;;  %v2461_v37 = vand.u32 2147483647, %v2450_v31 }
0x11bb   :  { %v2475_v22 = vsel %vm2474_vm15, %v5523_v56, %v2471_v0  ;;  %v2464_v0 = vor.u32 1.1754944e-38, %v2463_v27  ;;  %vm2462_vm7 = vcmp.eq.f32.partialorder %v2461_v37, 8.507059e+37 }
0x11bc   :  { %v5527_v61 = vpop.eup %5526  ;;  %v7018_v33 = vsel %vm2477_vm10, %v2479_v1, %v2475_v22 }
0x11bd   :  { %v2453_v9 = vmul.f32 %v5527_v61, %v2450_v31  ;;  %vm2458_vm5 = vweird.f32 %v5527_v61  ;;  %v7038_v31 = vld [vmem:[#allocation2 + $0x38] sm:$0xff]  }
0x11be   :  { %vm2459_vm9 = vmor %vm2457_vm12, %vm2458_vm5  ;;  %v5249_v1 = vunpack.c.h.bf16 %v7038_v31 }
0x11bf   :  { %v2454_v55 = vsub.f32 1.0, %v2453_v9 }
0x11c1   :  { %v2455_v46 = vmul.f32 %v5527_v61, %v2454_v55 }
0x11c3   :  { %v2456_v45 = vadd.f32 %v5527_v61, %v2455_v46 }
0x11c5   :  { %v2460_v56 = vsel %vm2459_vm9, %v5527_v61, %v2456_v45  ;;  %v5248_v61 = vunpack.c.l.bf16 %v7038_v31 }
0x11c6   :  { %v7022_v51 = vsel %vm2462_vm7, %v2464_v0, %v2460_v56 }
0x11f9   :  { %v2487_v14 = vpop.permute.xlu2 %2486 }
0x11fa   :  { %v2491_v62 = vmul.f32 %v2487_v14, %v7018_v33 }
0x11fc   :  { %2496 = vrot.lane.b32.xlu1 %v2491_v62, %s5753_s2 }
0x1209   :  { %v2485_v59 = vpop.permute.xlu1 %2484 }
0x120a   :  { %v2490_v29 = vmul.f32 %v2485_v59, %v7022_v51 }
0x120c   :  { %2494 = vrot.lane.b32.xlu0 %v2490_v29, %s5753_s2 }
0x1220   :  { %v2313_v15 = vpop.f32.mrf.mxu2 }
0x1221   :  { %v2314_v36 = vadd.f32 %v6785_v60, %v2313_v15 }
0x1223   :  { %2362 = vrot.lane.b32.xlu2 %v2314_v36, %s5753_s2 }
0x1228   :  { %v2315_v22 = vpop.f32.mrf.mxu2 }
0x1229   :  { %v2316_v9 = vadd.f32 %v6785_v60, %v2315_v22  ;;  %v2320_v60 = vadd.f32 %v5248_v61, %v2314_v36 }
0x122b   :  { %2364 = vrot.lane.b32.xlu0 %v2316_v9, %s5753_s2  ;;  %v4928_v14 = vmul.f32 -1.442695, %v2320_v60 }
0x122d   :  { %5528 = vpow2.f32 %v4928_v14 }
0x1233   :  { %600 = vrot.lane.b32.xlu0 %v6196_v4, %s5754_s5  ;;  %v2321_v4 = vadd.f32 %v5249_v1, %v2316_v9 }
0x1235   :  { %v4929_v62 = vmul.f32 -1.442695, %v2321_v4 }
0x123b   :  { %893 = vrot.lane.b32.xlu0 %v6336_v47, %s5754_s5 }
0x1243   :  { %1181 = vrot.lane.b32.xlu0 %v6474_v38, %s5754_s5 }
0x124b   :  { %1473 = vrot.lane.b32.xlu0 %v6631_v39, %s5754_s5  ;;  %v5529_v39 = vpop.eup %5528 }
0x124c   :  { %v2328_v55 = vadd.f32 1.0, %v5529_v39 }
0x124e   :  { %v2341_v14 = vand.u32 2147483648, %v2328_v55  ;;  %vm2335_vm14 = vweird.f32 %v2328_v55  ;;  %v2339_v12 = vand.u32 2147483647, %v2328_v55 }
0x1250   :  { %vm2340_vm10 = vcmp.eq.f32.partialorder %v2339_v12, 8.507059e+37 }
0x126e   :  { %v2497_v47 = vpop.permute.xlu1 %2496 }
0x126f   :  { %v2501_v38 = vadd.f32 %v5253_v8, %v2497_v47  ;;  %v2342_v47 = vor.u32 1.1754944e-38, %v2341_v14  ;;  %v2504_v14 = vsub.f32 1.0, %v7022_v51 }
0x1271   :  { %5530 = vtanh.f32 %v2501_v38 }
0x1272   :  { %5532 = vpow2.f32 %v4929_v62 }
0x1273   :  { %5534 = vrcp.f32 %v2328_v55 }
0x1277   :  { %v5531_v46 = vpop.eup %5530 }
0x1278   :  { %2510 = vrot.lane.b32.xlu2 %v5531_v46, %s5754_s5  ;;  %v5533_v45 = vpop.eup %5532 }
0x1279   :  { %v2329_v27 = vadd.f32 1.0, %v5533_v45  ;;  %v5535_v56 = vpop.eup %5534 }
0x127a   :  { %v2331_v8 = vmul.f32 %v5535_v56, %v2328_v55  ;;  %vm2336_vm4 = vweird.f32 %v5535_v56 }
0x127b   :  { %5536 = vrcp.f32 %v2329_v27  ;;  %vm2337_vm15 = vmor %vm2335_vm14, %vm2336_vm4  ;;  %v2356_v46 = vand.u32 2147483648, %v2329_v27  ;;  %vm2350_vm12 = vweird.f32 %v2329_v27  ;;  %v2354_v55 = vand.u32 2147483647, %v2329_v27 }
0x127c   :  { %v2332_v29 = vsub.f32 1.0, %v2331_v8  ;;  %vm606_vm4 = vcmask 257024   ;;  %vm8113_vm14 = vcmask 519424  }
0x127d   :  { %v2363_v4 = vpop.permute.xlu2 %2362  ;;  %vm2355_vm7 = vcmp.eq.f32.partialorder %v2354_v55, 8.507059e+37 }
0x127e   :  { %v2495_v37 = vpop.permute.xlu0 %2494  ;;  %v2333_v36 = vmul.f32 %v5535_v56, %v2332_v29  ;;  %v5174_v29 = vld [vmem:[%s8059_s14 + $0x10] sm:$0xff] }
0x127f   :  { %v2500_v0 = vadd.f32 %v5252_v58, %v2495_v37 }
0x1280   :  { %891 = vrot.lane.b32.xlu2 %v6327_v43, %s5754_s5  ;;  %v2334_v9 = vadd.f32 %v5535_v56, %v2333_v36  ;;  %v5168_v36 = vld [vmem:[%s8058_s10] sm:$0xff] }
0x1281   :  { %5538 = vtanh.f32 %v2500_v0  ;;  %v5537_v59 = vpop.eup %5536 }
0x1282   :  { %v2346_v22 = vmul.f32 %v5537_v59, %v2329_v27  ;;  %v2338_v43 = vsel %vm2337_vm15, %v5535_v56, %v2334_v9  ;;  %vm2351_vm5 = vweird.f32 %v5537_v59  ;;  %vm8114_vm15 = vmmov %vm8113_vm14  ;;  %v2505_v9 = vsub.f32 1.0, %v7018_v33 }
0x1283   :  { %v7056_v62 = vsel %vm2340_vm10, %v2342_v47, %v2338_v43  ;;  %vm2352_vm9 = vmor %vm2350_vm12, %vm2351_vm5  ;;  %v2516_v47 = vmul.f32 %v7022_v51, %v6939_v7  ;;  %vm8118_vm12 = vcmp.eq.s32.totalorder %v6183_v41, 1 }
0x1284   :  { %v2347_v60 = vsub.f32 1.0, %v2346_v22  ;;  %v2368_v38 = vmul.f32 %v2363_v4, %v7056_v62  ;;  %vm8116_vm10 = vmmov %vm8113_vm14  ;;  %v5172_v22 = vld [vmem:[%s8059_s14] sm:$0xff] }
0x1285   :  { %vm8117_vm5 = vmmov %vm8116_vm10 }
0x1286   :  { %v2348_v58 = vmul.f32 %v5537_v59, %v2347_v60 }
0x1287   :  { %v5539_v15 = vpop.eup %5538 }
0x1288   :  { %2508 = vrot.lane.b32.xlu1 %v5539_v15, %s5754_s5  ;;  %v2349_v39 = vadd.f32 %v5537_v59, %v2348_v58  ;;  %v5173_v15 = vld [vmem:[%s8059_s14 + $0x8] sm:$0xff]  ;;  %v2517_v58 = vmul.f32 %v7018_v33, %v6952_v24 }
0x128a   :  { %v2353_v45 = vsel %vm2352_vm9, %v5537_v59, %v2349_v39  ;;  %v7079_v59 = vld [vmem:[%s8056_s12 + $0x8] sm:$0xff]  ;;  %vm8119_vm9 = vcmp.eq.s32.totalorder %v6174_v35, 1 }
0x128b   :  { %2884 = vmatpush.bf16.msra.mxu2 %v7079_v59 }
0x1290   :  { %602 = vrot.lane.b32.xlu1 %v6188_v52, %s5754_s5  ;;  %v2357_v52 = vor.u32 1.1754944e-38, %v2356_v46 }
0x1292   :  { %v7060_v37 = vsel %vm2355_vm7, %v2357_v52, %v2353_v45  ;;  %vm8120_vm7 = vmmov %vm8117_vm5 }
0x1298   :  { %2372 = vrot.lane.b32.xlu1 %v2368_v38, %s5753_s2 }
0x129d   :  { %v2365_v56 = vpop.permute.xlu0 %2364 }
0x129e   :  { %v2369_v0 = vmul.f32 %v2365_v56, %v7060_v37 }
0x12a0   :  { %1183 = vrot.lane.b32.xlu1 %v6483_v42, %s5754_s5  ;;  %2374 = vrot.lane.b32.xlu2 %v2369_v0, %s5753_s2 }
0x12a5   :  { %v601_v8 = vpop.permute.xlu0 %600 }
0x12a6   :  { %607 = vst.msk [vmem:[#allocation4] sm:$0xf] %vm606_vm4, %v601_v8 }
0x12a8   :  { %1737 = vrot.lane.b32.xlu1 %v6737_v50, %s5754_s5  ;;  %1471 = vrot.lane.b32.xlu2 %v6622_v16, %s5754_s5  ;;  %v7090_v16 = vld [vmem:[%s8056_s12] sm:$0xff] }
0x12a9   :  { %2885 = vmatpush.bf16.msra.mxu2 %v7090_v16 }
0x12ad   :  { %v894_v27 = vpop.permute.xlu0 %893  ;;  %3106 = vmatpush.bf16.msrb.mxu2 %v7079_v59 }
0x12ae   :  { %899 = vst.msk [vmem:[#allocation4 + $0xc] sm:$0xf] %vm606_vm4, %v894_v27 }
0x12af   :  { %2276 = vst.msk [vmem:[#allocation4 + $0xc] sm:$0xf] %vm8113_vm14, %v6956_v21  ;;  %v5175_v21 = vld [vmem:[%s8059_s14 + $0x18] sm:$0xff]  ;;  %vm8121_vm14 = vmmov %vm8117_vm5 }
0x12b0   :  { %1739 = vrot.lane.b32.xlu2 %v6746_v25, %s5754_s5  ;;  %v8115_v25 = vmov 0   ;;  %2778 = vmatpush.bf16.msrb.mxu1 %v5175_v21 }
0x12b1   :  { %2886 = vmatmul.bf16.vlgmr.msra.gmra.mxu2 %v8115_v25 }
0x12b2   :  { %3107 = vmatpush.bf16.msrb.mxu2 %v7090_v16 }
0x12b4   :  { %2779 = vmatpush.bf16.msrb.mxu1 %v5174_v29  ;;  %v2383_v29 = vsub.f32 1.0, %v7060_v37 }
0x12b5   :  { %v1182_v42 = vpop.permute.xlu0 %1181 }
0x12b6   :  { %1188 = vst.msk [vmem:[#allocation4 + $0x10] sm:$0xf] %vm606_vm4, %v1182_v42  ;;  %3316 = vmatpush.bf16.msra.mxu2 %v7079_v59 }
0x12b7   :  { %2011 = vst.msk [vmem:[#allocation4 + $0x10] sm:$0xf] %vm8114_vm15, %v6824_v23  ;;  %vm8122_vm15 = vmmov %vm8117_vm5 }
0x12b8   :  { %2001 = vrot.lane.b32.xlu2 %v6863_v2, %s5754_s5  ;;  %2780 = vmatpush.bf16.msrb.mxu1 %v5173_v15  ;;  %v2395_v15 = vmul.f32 %v7060_v37, %v6976_v53  ;;  %v2394_v37 = vmul.f32 %v7056_v62, %v6986_v19 }
0x12ba   :  { %3317 = vmatpush.bf16.msra.mxu2 %v7090_v16 }
0x12bc   :  { %2781 = vmatpush.bf16.msrb.mxu1 %v5172_v22 }
0x12bd   :  { %v1474_v50 = vpop.permute.xlu0 %1473 }
0x12be   :  { %1479 = vst.msk [vmem:[#allocation4 + $0x1c] sm:$0xf] %vm606_vm4, %v1474_v50 }
0x12bf   :  { %1748 = vst.msk [vmem:[#allocation4 + $0x1c] sm:$0xf] %vm8116_vm10, %v6705_v26  ;;  %v5171_v26 = vld [vmem:[%s8058_s10 + $0x18] sm:$0xff]  ;;  %vm2632_vm10 = vcmask 523264  }
0x12c0   :  { %2267 = vrot.lane.b32.xlu2 %v6981_v20, %s5754_s5  ;;  %2661 = vmatpush.bf16.msrb.mxu0 %v5171_v26  ;;  %v5170_v20 = vld [vmem:[%s8058_s10 + $0x10] sm:$0xff] }
0x12c4   :  { %2662 = vmatpush.bf16.msrb.mxu0 %v5170_v20  ;;  %v7202_v20 = vld [vmem:[%s8062_s16] sm:$0xff] }
0x12d2   :  { %v2511_v23 = vpop.permute.xlu2 %2510 }
0x12d3   :  { %v2515_v60 = vmul.f32 %v2511_v23, %v2505_v9 }
0x12d5   :  { %v2519_v39 = vadd.f32 %v2517_v58, %v2515_v60 }
0x12d7   :  { %v7148_v33 = vsel %vm8119_vm9, %v2519_v39, %v6952_v24  ;;  %vm8124_vm9 = vcmp.eq.s32.totalorder %v6111_v48, 1 }
0x12da   :  { %v892_v2 = vpop.permute.xlu2 %891 }
0x12db   :  { %898 = vst.msk [vmem:[#allocation4 + $0x8] sm:$0xf] %vm606_vm4, %v892_v2 }
0x12dc   :  { %2275 = vst.msk [vmem:[#allocation4 + $0x8] sm:$0xf] %vm8117_vm5, %v6947_v3  ;;  %v5169_v3 = vld [vmem:[%s8058_s10 + $0x8] sm:$0xff] }
0x12dd   :  { %2663 = vmatpush.bf16.msrb.mxu0 %v5169_v3 }
0x12e1   :  { %2664 = vmatpush.bf16.msrb.mxu0 %v5168_v36 }
0x12fa   :  { %v2375_v12 = vpop.permute.xlu2 %2374  ;;  %v2509_v43 = vpop.permute.xlu1 %2508 }
0x12fb   :  { %v2379_v4 = vadd.f32 %v5249_v1, %v2375_v12  ;;  %v2514_v38 = vmul.f32 %v2509_v43, %v2504_v14  ;;  %v2382_v14 = vsub.f32 1.0, %v7056_v62 }
0x12fd   :  { %5540 = vtanh.f32 %v2379_v4  ;;  %v2518_v46 = vadd.f32 %v2516_v47, %v2514_v38  ;;  %v7233_v4 = vld [vmem:[%s8061_s15] ss:$0 sm:$0xff] }
0x12ff   :  { %v7141_v55 = vsel %vm8118_vm12, %v2518_v46, %v6939_v7  ;;  %v2537_v7 = vpack.c.bf16 %v7148_v33, %v7148_v33  ;;  %vm8123_vm12 = vcmp.eq.s32.totalorder %v6142_v11, 1 }
0x1300   :  { %v2536_v45 = vpack.c.bf16 %v7141_v55, %v7141_v55 }
0x1302   :  { %2538 = vst.msk [vmem:[#allocation4] sm:$0xf] %vm8120_vm7, %v2536_v45  ;;  %v1472_v51 = vpop.permute.xlu2 %1471  ;;  %v603_v1 = vpop.permute.xlu1 %602 }
0x1303   :  { %v5541_v52 = vpop.eup %5540  ;;  %1478 = vst.msk [vmem:[#allocation4 + $0x18] sm:$0xf] %vm606_vm4, %v1472_v51 }
0x1304   :  { %1747 = vst.msk [vmem:[#allocation4 + $0x18] sm:$0xf] %vm8121_vm14, %v6717_v28  ;;  %2388 = vrot.lane.b32.xlu1 %v5541_v52, %s5754_s5 }
0x1305   :  { %608 = vst.msk [vmem:[#allocation4 + $0x4] sm:$0xf] %vm606_vm4, %v603_v1 }
0x1306   :  { %2539 = vst.msk [vmem:[#allocation4 + $0x4] sm:$0xf] %vm8122_vm15, %v2537_v7 }
0x130a   :  { %v1740_v24 = vpop.permute.xlu2 %1739  ;;  %v2373_v56 = vpop.permute.xlu1 %2372 }
0x130b   :  { %1744 = vst.msk [vmem:[#allocation4 + $0x24] sm:$0xf] %vm606_vm4, %v1740_v24  ;;  %v2378_v0 = vadd.f32 %v5248_v61, %v2373_v56  ;;  %v5161_v61 = vld [vmem:[#allocation4 + $0x8] sm:$0xff]  ;;  %v5163_v23 = vld [vmem:[#allocation4 + $0x18] sm:$0xff] }
0x130c   :  { %2265 = vrot.lane.b32.xlu1 %v6990_v57, %s5754_s5 }
0x130d   :  { %5542 = vtanh.f32 %v2378_v0  ;;  %v5160_v28 = vld [vmem:[#allocation4] sm:$0xff] }
0x130e   :  { %4989 = vmatmul.msk.bf16.vlgmr.msrb.gmra.mxu0 %vm2632_vm10, %v5160_v28  ;;  %5013 = vmatmul.msk.bf16.vlgmr.msrb.gmra.mxu1 %vm2632_vm10, %v5160_v28 }
0x1312   :  { %v2002_v8 = vpop.permute.xlu2 %2001  ;;  %v1184_v27 = vpop.permute.xlu1 %1183 }
0x1313   :  { %v5543_v42 = vpop.eup %5542  ;;  %2007 = vst.msk [vmem:[#allocation4 + $0x28] sm:$0xf] %vm606_vm4, %v2002_v8 }
0x1314   :  { %1189 = vst.msk [vmem:[#allocation4 + $0x14] sm:$0xf] %vm606_vm4, %v1184_v27  ;;  %2386 = vrot.lane.b32.xlu0 %v5543_v42, %s5754_s5 }
0x1315   :  { %2012 = vst.msk [vmem:[#allocation4 + $0x14] sm:$0xf] %vm8117_vm5, %v6833_v18  ;;  %v7182_v18 = vld [vmem:[%s8062_s16 + $0x8] sm:$0xff] }
0x1316   :  { %2999 = vmatpush.bf16.msra.mxu3 %v7182_v18 }
0x131a   :  { %v2268_v57 = vpop.permute.xlu2 %2267  ;;  %v1738_v31 = vpop.permute.xlu1 %1737  ;;  %3000 = vmatpush.bf16.msra.mxu3 %v7202_v20 }
0x131b   :  { %2272 = vst.msk [vmem:[#allocation4 + $0x34] sm:$0xf] %vm606_vm4, %v2268_v57 }
0x131c   :  { %1743 = vst.msk [vmem:[#allocation4 + $0x20] sm:$0xf] %vm606_vm4, %v1738_v31  ;;  %2003 = vrot.lane.b32.xlu0 %v6872_v13, %s5754_s5  ;;  %v5162_v50 = vld [vmem:[#allocation4 + $0x10] sm:$0xff]  ;;  %v7188_v13 = vld [vmem:[%s8057_s13] ss:$0 sm:$0xff] }
0x131d   :  { %3001 = vmatmul.bf16.vlgmr.msra.gmra.mxu3 %v8115_v25 }
0x131e   :  { %4990 = vmatmul.msk.bf16.gmra.mxu0 %vm2632_vm10, %v5161_v61  ;;  %5014 = vmatmul.msk.bf16.gmra.mxu1 %vm2632_vm10, %v5161_v61 }
0x131f   :  { %3209 = vmatpush.bf16.msrb.mxu3 %v7182_v18 }
0x1323   :  { %v5164_v21 = vld [vmem:[#allocation4 + $0x20] sm:$0xff]  ;;  %3210 = vmatpush.bf16.msrb.mxu3 %v7202_v20 }
0x1327   :  { %3419 = vmatpush.bf16.msra.mxu3 %v7182_v18 }
0x132b   :  { %3420 = vmatpush.bf16.msra.mxu3 %v7202_v20 }
0x132e   :  { %4991 = vmatmul.msk.bf16.gmra.mxu0 %vm2632_vm10, %v5162_v50  ;;  %5015 = vmatmul.msk.bf16.gmra.mxu1 %vm2632_vm10, %v5162_v50 }
0x1334   :  { %v2887_v2 = vpop.f32.mrf.mxu2 }
0x1335   :  { %v7193_v26 = vadd.f32 %v7188_v13, %v2887_v2 }
0x1337   :  { %2936 = vrot.lane.b32.xlu2 %v7193_v26, %s5753_s2 }
0x133e   :  { %4992 = vmatmul.msk.bf16.gmra.mxu0 %vm2632_vm10, %v5163_v23  ;;  %5016 = vmatmul.msk.bf16.gmra.mxu1 %vm2632_vm10, %v5163_v23 }
0x134e   :  { %4993 = vmatmul.msk.bf16.gmra.mxu0 %vm2632_vm10, %v5164_v21  ;;  %5017 = vmatmul.msk.bf16.gmra.mxu1 %vm2632_vm10, %v5164_v21 }
0x1376   :  { %v2389_v3 = vpop.permute.xlu1 %2388 }
0x1377   :  { %v2393_v36 = vmul.f32 %v2389_v3, %v2383_v29 }
0x1379   :  { %v2397_v22 = vadd.f32 %v2395_v15, %v2393_v36 }
0x137b   :  { %v7216_v9 = vsel %vm8123_vm12, %v2397_v22, %v6976_v53  ;;  %v7228_v53 = vld [vmem:[%s8060_s11] ss:$0 sm:$0xff] }
0x137c   :  { %v2525_v25 = vpack.c.bf16 %v7216_v9, %v7216_v9 }
0x137e   :  { %2530 = vrot.lane.b32.xlu1 %v2525_v25, %s5754_s5  ;;  %v2266_v60 = vpop.permute.xlu1 %2265 }
0x137f   :  { %2271 = vst.msk [vmem:[#allocation4 + $0x30] sm:$0xf] %vm606_vm4, %v2266_v60 }
0x1386   :  { %v2387_v12 = vpop.permute.xlu0 %2386 }
0x1387   :  { %v2392_v43 = vmul.f32 %v2387_v12, %v2382_v14  ;;  %v5166_v12 = vld [vmem:[#allocation4 + $0x30] sm:$0xff] }
0x1389   :  { %v2396_v58 = vadd.f32 %v2394_v37, %v2392_v43 }
0x138b   :  { %v7238_v47 = vsel %vm8124_vm9, %v2396_v58, %v6986_v19  ;;  %v2666_v38 = vpop.f32.mrf.mxu0  ;;  %v2783_v39 = vpop.f32.mrf.mxu1 }
0x138c   :  { %v2524_v62 = vpack.c.bf16 %v7238_v47, %v7238_v47  ;;  %v5325_v46 = vpack.i.bf16 %v7216_v9, %v7238_v47  ;;  %v2667_v45 = vadd.f32 %v7228_v53, %v2666_v38  ;;  %v2784_v51 = vadd.f32 %v7233_v4, %v2783_v39  ;;  %v2889_v19 = vpop.f32.mrf.mxu2 }
0x138d   :  { %v7251_v24 = vadd.f32 %v7188_v13, %v2889_v19 }
0x138e   :  { %2528 = vrot.lane.b32.xlu0 %v2524_v62, %s5754_s5  ;;  %v2004_v1 = vpop.permute.xlu0 %2003  ;;  %v2706_v52 = vpack.c.bf16 %v2667_v45, %v2667_v45  ;;  %v2823_v7 = vpack.c.bf16 %v2784_v51, %v2784_v51 }
0x138f   :  { %2008 = vst.msk [vmem:[#allocation4 + $0x2c] sm:$0xf] %vm606_vm4, %v2004_v1 }
0x1390   :  { %2722 = vst.msk [vmem:[#allocation2] sm:$0xf] %vm214_vm1, %v2706_v52 }
0x1391   :  { %2839 = vst.msk [vmem:[#allocation3] sm:$0xf] %vm214_vm1, %v2823_v7 }
0x1393   :  { %v2668_v56 = vpop.f32.mrf.mxu0  ;;  %v2785_v0 = vpop.f32.mrf.mxu1 }
0x1394   :  { %v2669_v28 = vadd.f32 %v7228_v53, %v2668_v56  ;;  %v2786_v8 = vadd.f32 %v7233_v4, %v2785_v0 }
0x1396   :  { %2938 = vrot.lane.b32.xlu0 %v7251_v24, %s5753_s2  ;;  %v5165_v27 = vld [vmem:[#allocation4 + $0x28] sm:$0xff]  ;;  %v2707_v42 = vpack.c.bf16 %v2669_v28, %v2669_v28  ;;  %v2824_v57 = vpack.c.bf16 %v2786_v8, %v2786_v8 }
0x1397   :  { %4994 = vmatmul.msk.bf16.gmra.mxu0 %vm2632_vm10, %v5165_v27  ;;  %5018 = vmatmul.msk.bf16.gmra.mxu1 %vm2632_vm10, %v5165_v27 }
0x1398   :  { %2723 = vst.msk [vmem:[#allocation2 + $0x4] sm:$0xf] %vm214_vm1, %v2707_v42 }
0x1399   :  { %2840 = vst.msk [vmem:[#allocation3 + $0x4] sm:$0xf] %vm214_vm1, %v2824_v57 }
0x139b   :  { %v2671_v31 = vpop.f32.mrf.mxu0  ;;  %v2788_v61 = vpop.f32.mrf.mxu1 }
0x139c   :  { %v2672_v50 = vadd.f32 %v7228_v53, %v2671_v31  ;;  %v2789_v23 = vadd.f32 %v7233_v4, %v2788_v61 }
0x139e   :  { %v2708_v2 = vpack.c.bf16 %v2672_v50, %v2672_v50  ;;  %v2825_v21 = vpack.c.bf16 %v2789_v23, %v2789_v23 }
0x139f   :  { %v7263_v29 = vld [vmem:[#allocation2] sm:$0xff]  }
0x13a0   :  { %v5256_v3 = vunpack.c.l.bf16 %v7263_v29  ;;  %2724 = vst.msk [vmem:[#allocation2 + $0x8] sm:$0xf] %vm214_vm1, %v2708_v2 }
0x13a1   :  { %2841 = vst.msk [vmem:[#allocation3 + $0x8] sm:$0xf] %vm214_vm1, %v2825_v21 }
0x13a2   :  { %v2894_v15 = vadd.f32 %v5256_v3, %v7193_v26 }
0x13a3   :  { %v2673_v36 = vpop.f32.mrf.mxu0  ;;  %v2790_v22 = vpop.f32.mrf.mxu1 }
0x13a4   :  { %v5029_v25 = vmul.f32 -1.442695, %v2894_v15  ;;  %v2674_v60 = vadd.f32 %v7228_v53, %v2673_v36  ;;  %v2791_v14 = vadd.f32 %v7233_v4, %v2790_v22  ;;  %v2937_v36 = vpop.permute.xlu2 %2936 }
0x13a6   :  { %5544 = vpow2.f32 %v5029_v25  ;;  %v2709_v37 = vpack.c.bf16 %v2674_v60, %v2674_v60  ;;  %v2826_v43 = vpack.c.bf16 %v2791_v14, %v2791_v14 }
0x13a7   :  { %4995 = vmatmul.msk.bf16.gmra.mxu0 %vm2632_vm10, %v5166_v12  ;;  %5019 = vmatmul.msk.bf16.gmra.mxu1 %vm2632_vm10, %v5166_v12 }
0x13a8   :  { %2725 = vst.msk [vmem:[#allocation2 + $0xc] sm:$0xf] %vm214_vm1, %v2709_v37 }
0x13a9   :  { %2842 = vst.msk [vmem:[#allocation3 + $0xc] sm:$0xf] %vm214_vm1, %v2826_v43 }
0x13ab   :  { %v2676_v26 = vpop.f32.mrf.mxu0  ;;  %v2793_v58 = vpop.f32.mrf.mxu1 }
0x13ac   :  { %v5545_v38 = vpop.eup %5544  ;;  %v2677_v39 = vadd.f32 %v7228_v53, %v2676_v26  ;;  %v2794_v62 = vadd.f32 %v7233_v4, %v2793_v58 }
0x13ad   :  { %v2902_v45 = vadd.f32 1.0, %v5545_v38 }
0x13ae   :  { %v2710_v51 = vpack.c.bf16 %v2677_v39, %v2677_v39  ;;  %v2827_v1 = vpack.c.bf16 %v2794_v62, %v2794_v62 }
0x13af   :  { %5546 = vrcp.f32 %v2902_v45  ;;  %v2915_v57 = vand.u32 2147483648, %v2902_v45  ;;  %v2913_v61 = vand.u32 2147483647, %v2902_v45  ;;  %vm2909_vm14 = vweird.f32 %v2902_v45 }
0x13b0   :  { %2726 = vst.msk [vmem:[#allocation2 + $0x10] sm:$0xf] %vm214_vm1, %v2710_v51 }
0x13b1   :  { %2843 = vst.msk [vmem:[#allocation3 + $0x10] sm:$0xf] %vm214_vm1, %v2827_v1  ;;  %v2916_v22 = vor.u32 1.1754944e-38, %v2915_v57  ;;  %vm2914_vm5 = vcmp.eq.f32.partialorder %v2913_v61, 8.507059e+37 }
0x13b3   :  { %v2678_v52 = vpop.f32.mrf.mxu0  ;;  %v2795_v7 = vpop.f32.mrf.mxu1 }
0x13b4   :  { %v2679_v19 = vadd.f32 %v7228_v53, %v2678_v52  ;;  %v2796_v56 = vadd.f32 %v7233_v4, %v2795_v7 }
0x13b5   :  { %v5547_v0 = vpop.eup %5546 }
0x13b6   :  { %v2711_v28 = vpack.c.bf16 %v2679_v19, %v2679_v19  ;;  %v2828_v8 = vpack.c.bf16 %v2796_v56, %v2796_v56  ;;  %v2905_v27 = vmul.f32 %v5547_v0, %v2902_v45  ;;  %vm2910_vm7 = vweird.f32 %v5547_v0 }
0x13b7   :  { %vm2911_vm15 = vmor %vm2909_vm14, %vm2910_vm7  ;;  %v5257_v56 = vunpack.c.h.bf16 %v7263_v29 }
0x13b8   :  { %2727 = vst.msk [vmem:[#allocation2 + $0x14] sm:$0xf] %vm214_vm1, %v2711_v28  ;;  %v2906_v42 = vsub.f32 1.0, %v2905_v27 }
0x13b9   :  { %2844 = vst.msk [vmem:[#allocation3 + $0x14] sm:$0xf] %vm214_vm1, %v2828_v8 }
0x13ba   :  { %v2907_v31 = vmul.f32 %v5547_v0, %v2906_v42  ;;  %v2895_v42 = vadd.f32 %v5257_v56, %v7251_v24 }
0x13bb   :  { %v2681_v50 = vpop.f32.mrf.mxu0  ;;  %v2798_v23 = vpop.f32.mrf.mxu1 }
0x13bc   :  { %v2682_v2 = vadd.f32 %v7228_v53, %v2681_v50  ;;  %v2799_v21 = vadd.f32 %v7233_v4, %v2798_v23  ;;  %v2908_v15 = vadd.f32 %v5547_v0, %v2907_v31  ;;  %v5030_v61 = vmul.f32 -1.442695, %v2895_v42  ;;  %v7312_v50 = vld [vmem:[%s8063_s17] ss:$0 sm:$0xff]  ;;  %v3002_v23 = vpop.f32.mrf.mxu3 }
0x13be   :  { %v2712_v25 = vpack.c.bf16 %v2682_v2, %v2682_v2  ;;  %v2829_v60 = vpack.c.bf16 %v2799_v21, %v2799_v21  ;;  %v2912_v14 = vsel %vm2911_vm15, %v5547_v0, %v2908_v15  ;;  %5548 = vpow2.f32 %v5030_v61 }
0x13bf   :  { %v7287_v12 = vsel %vm2914_vm5, %v2916_v22, %v2912_v14  ;;  %v7315_v2 = vadd.f32 %v7312_v50, %v3002_v23 }
0x13c0   :  { %2728 = vst.msk [vmem:[#allocation2 + $0x18] sm:$0xf] %vm214_vm1, %v2712_v25  ;;  %v2942_v37 = vmul.f32 %v2937_v36, %v7287_v12  ;;  %v2968_v29 = vmul.f32 0.0, %v7287_v12 }
0x13c1   :  { %2845 = vst.msk [vmem:[#allocation3 + $0x18] sm:$0xf] %vm214_vm1, %v2829_v60  ;;  %3051 = vrot.lane.b32.xlu1 %v7315_v2, %s5753_s2 }
0x13c2   :  { %2946 = vrot.lane.b32.xlu0 %v2942_v37, %s5753_s2 }
0x13c3   :  { %v2683_v43 = vpop.f32.mrf.mxu0  ;;  %v2800_v26 = vpop.f32.mrf.mxu1 }
0x13c4   :  { %v2684_v58 = vadd.f32 %v7228_v53, %v2683_v43  ;;  %v2801_v38 = vadd.f32 %v7233_v4, %v2800_v26  ;;  %v5549_v24 = vpop.eup %5548 }
0x13c5   :  { %v2903_v21 = vadd.f32 1.0, %v5549_v24 }
0x13c6   :  { %v2713_v39 = vpack.c.bf16 %v2684_v58, %v2684_v58  ;;  %v2830_v62 = vpack.c.bf16 %v2801_v38, %v2801_v38 }
0x13c7   :  { %5550 = vrcp.f32 %v2903_v21  ;;  %v2930_v43 = vand.u32 2147483648, %v2903_v21  ;;  %vm2924_vm9 = vweird.f32 %v2903_v21  ;;  %v2928_v26 = vand.u32 2147483647, %v2903_v21 }
0x13c8   :  { %2729 = vst.msk [vmem:[#allocation2 + $0x1c] sm:$0xf] %vm214_vm1, %v2713_v39 }
0x13c9   :  { %2846 = vst.msk [vmem:[#allocation3 + $0x1c] sm:$0xf] %vm214_vm1, %v2830_v62  ;;  %v2931_v38 = vor.u32 1.1754944e-38, %v2930_v43  ;;  %vm2929_vm14 = vcmp.eq.f32.partialorder %v2928_v26, 8.507059e+37 }
0x13cb   :  { %v2686_v45 = vpop.f32.mrf.mxu0  ;;  %v2803_v51 = vpop.f32.mrf.mxu1 }
0x13cc   :  { %v2687_v1 = vadd.f32 %v7228_v53, %v2686_v45  ;;  %v2804_v52 = vadd.f32 %v7233_v4, %v2803_v51 }
0x13cd   :  { %v5551_v36 = vpop.eup %5550 }
0x13ce   :  { %v2714_v7 = vpack.c.bf16 %v2687_v1, %v2687_v1  ;;  %v2831_v19 = vpack.c.bf16 %v2804_v52, %v2804_v52  ;;  %v2920_v22 = vmul.f32 %v5551_v36, %v2903_v21  ;;  %vm2925_vm12 = vweird.f32 %v5551_v36 }
0x13cf   :  { %vm2926_vm7 = vmor %vm2924_vm9, %vm2925_vm12 }
0x13d0   :  { %2730 = vst.msk [vmem:[#allocation2 + $0x20] sm:$0xf] %vm214_vm1, %v2714_v7  ;;  %v2921_v25 = vsub.f32 1.0, %v2920_v22 }
0x13d1   :  { %2847 = vst.msk [vmem:[#allocation3 + $0x20] sm:$0xf] %vm214_vm1, %v2831_v19 }
0x13d2   :  { %v2922_v60 = vmul.f32 %v5551_v36, %v2921_v25 }
0x13d3   :  { %v2688_v0 = vpop.f32.mrf.mxu0  ;;  %v2805_v28 = vpop.f32.mrf.mxu1 }
0x13d4   :  { %v2689_v8 = vadd.f32 %v7228_v53, %v2688_v0  ;;  %v2806_v27 = vadd.f32 %v7233_v4, %v2805_v28  ;;  %v2923_v37 = vadd.f32 %v5551_v36, %v2922_v60 }
0x13d6   :  { %v2715_v57 = vpack.c.bf16 %v2689_v8, %v2689_v8  ;;  %v2832_v31 = vpack.c.bf16 %v2806_v27, %v2806_v27  ;;  %v2927_v58 = vsel %vm2926_vm7, %v5551_v36, %v2923_v37 }
0x13d7   :  { %v7321_v39 = vsel %vm2929_vm14, %v2931_v38, %v2927_v58 }
0x13d8   :  { %2731 = vst.msk [vmem:[#allocation2 + $0x24] sm:$0xf] %vm214_vm1, %v2715_v57 }
0x13d9   :  { %2848 = vst.msk [vmem:[#allocation3 + $0x24] sm:$0xf] %vm214_vm1, %v2832_v31  ;;  %v3004_v31 = vpop.f32.mrf.mxu3 }
0x13da   :  { %v3005_v24 = vadd.f32 %v7312_v50, %v3004_v31 }
0x13dc   :  { %3053 = vrot.lane.b32.xlu2 %v3005_v24, %s5753_s2 }
0x13f0   :  { %v2531_v15 = vpop.permute.xlu1 %2530 }
0x13f1   :  { %2535 = vst.msk [vmem:[#allocation4 + $0x3c] sm:$0xf] %vm606_vm4, %v2531_v15 }
0x1400   :  { %v2529_v14 = vpop.permute.xlu0 %2528 }
0x1401   :  { %2534 = vst.msk [vmem:[#allocation4 + $0x38] sm:$0xf] %vm606_vm4, %v2529_v14 }
0x1408   :  { %v2939_v62 = vpop.permute.xlu0 %2938  ;;  %v5167_v45 = vld [vmem:[#allocation4 + $0x38] sm:$0xff] }
0x1409   :  { %v2943_v51 = vmul.f32 %v2939_v62, %v7321_v39  ;;  %4996 = vmatmul.msk.bf16.gmra.mxu0 %vm2632_vm10, %v5167_v45  ;;  %5020 = vmatmul.msk.bf16.gmra.mxu1 %vm2632_vm10, %v5167_v45 }
0x140b   :  { %2948 = vrot.lane.b32.xlu1 %v2943_v51, %s5753_s2 }
0x1414   :  { %v2691_v1 = vpop.f32.mrf.mxu0  ;;  %v2808_v52 = vpop.f32.mrf.mxu1 }
0x1415   :  { %v2692_v7 = vadd.f32 %v7228_v53, %v2691_v1  ;;  %v2809_v19 = vadd.f32 %v7233_v4, %v2808_v52 }
0x1417   :  { %v2716_v0 = vpack.c.bf16 %v2692_v7, %v2692_v7  ;;  %v2833_v28 = vpack.c.bf16 %v2809_v19, %v2809_v19 }
0x1419   :  { %2732 = vst.msk [vmem:[#allocation2 + $0x28] sm:$0xf] %vm214_vm1, %v2716_v0 }
0x141a   :  { %2849 = vst.msk [vmem:[#allocation3 + $0x28] sm:$0xf] %vm214_vm1, %v2833_v28 }
0x141c   :  { %v2693_v8 = vpop.f32.mrf.mxu0  ;;  %v2810_v27 = vpop.f32.mrf.mxu1 }
0x141d   :  { %v2694_v42 = vadd.f32 %v7228_v53, %v2693_v8  ;;  %v2811_v57 = vadd.f32 %v7233_v4, %v2810_v27 }
0x141f   :  { %v2717_v61 = vpack.c.bf16 %v2694_v42, %v2694_v42  ;;  %v2834_v23 = vpack.c.bf16 %v2811_v57, %v2811_v57 }
0x1421   :  { %2733 = vst.msk [vmem:[#allocation2 + $0x2c] sm:$0xf] %vm214_vm1, %v2717_v61 }
0x1422   :  { %2850 = vst.msk [vmem:[#allocation3 + $0x2c] sm:$0xf] %vm214_vm1, %v2834_v23 }
0x1424   :  { %v2696_v21 = vpop.f32.mrf.mxu0  ;;  %v2813_v15 = vpop.f32.mrf.mxu1 }
0x1425   :  { %v2697_v36 = vadd.f32 %v7228_v53, %v2696_v21  ;;  %v2814_v22 = vadd.f32 %v7233_v4, %v2813_v15 }
0x1427   :  { %v2718_v25 = vpack.c.bf16 %v2697_v36, %v2697_v36  ;;  %v2835_v60 = vpack.c.bf16 %v2814_v22, %v2814_v22 }
0x1429   :  { %2734 = vst.msk [vmem:[#allocation2 + $0x30] sm:$0xf] %vm214_vm1, %v2718_v25 }
0x142a   :  { %2851 = vst.msk [vmem:[#allocation3 + $0x30] sm:$0xf] %vm214_vm1, %v2835_v60 }
0x142c   :  { %v2698_v14 = vpop.f32.mrf.mxu0  ;;  %v2815_v37 = vpop.f32.mrf.mxu1 }
0x142d   :  { %v2699_v43 = vadd.f32 %v7228_v53, %v2698_v14  ;;  %v2816_v26 = vadd.f32 %v7233_v4, %v2815_v37 }
0x142f   :  { %v2719_v58 = vpack.c.bf16 %v2699_v43, %v2699_v43  ;;  %v2836_v38 = vpack.c.bf16 %v2816_v26, %v2816_v26 }
0x1431   :  { %2735 = vst.msk [vmem:[#allocation2 + $0x34] sm:$0xf] %vm214_vm1, %v2719_v58 }
0x1432   :  { %2852 = vst.msk [vmem:[#allocation3 + $0x34] sm:$0xf] %vm214_vm1, %v2836_v38 }
0x1433   :  { %v3052_v37 = vpop.permute.xlu1 %3051 }
0x1434   :  { %v2947_v62 = vpop.permute.xlu0 %2946 }
0x1435   :  { %v2952_v45 = vadd.f32 %v5256_v3, %v2947_v62 }
0x1437   :  { %5552 = vtanh.f32 %v2952_v45 }
0x143d   :  { %v5553_v51 = vpop.eup %5552 }
0x143e   :  { %2960 = vrot.lane.b32.xlu1 %v5553_v51, %s5754_s5 }
0x1486   :  { %v2701_v1 = vpop.f32.mrf.mxu0  ;;  %v2818_v52 = vpop.f32.mrf.mxu1 }
0x1487   :  { %v2702_v7 = vadd.f32 %v7228_v53, %v2701_v1  ;;  %v2819_v19 = vadd.f32 %v7233_v4, %v2818_v52 }
0x1489   :  { %v2720_v0 = vpack.c.bf16 %v2702_v7, %v2702_v7  ;;  %v2837_v28 = vpack.c.bf16 %v2819_v19, %v2819_v19 }
0x148b   :  { %2736 = vst.msk [vmem:[#allocation2 + $0x38] sm:$0xf] %vm214_vm1, %v2720_v0  ;;  %v2949_v0 = vpop.permute.xlu1 %2948 }
0x148c   :  { %2853 = vst.msk [vmem:[#allocation3 + $0x38] sm:$0xf] %vm214_vm1, %v2837_v28 }
0x148e   :  { %v2703_v8 = vpop.f32.mrf.mxu0  ;;  %v2820_v27 = vpop.f32.mrf.mxu1 }
0x148f   :  { %v2704_v3 = vadd.f32 %v7228_v53, %v2703_v8  ;;  %v2821_v42 = vadd.f32 %v7233_v4, %v2820_v27 }
0x1491   :  { %v2721_v57 = vpack.c.bf16 %v2704_v3, %v2704_v3  ;;  %v2838_v31 = vpack.c.bf16 %v2821_v42, %v2821_v42  ;;  %v3054_v42 = vpop.permute.xlu2 %3053 }
0x1493   :  { %2737 = vst.msk [vmem:[#allocation2 + $0x3c] sm:$0xf] %vm214_vm1, %v2721_v57 }
0x1494   :  { %2854 = vst.msk [vmem:[#allocation3 + $0x3c] sm:$0xf] %vm214_vm1, %v2838_v31 }
0x149b   :  { %v7356_v61 = vld [vmem:[#allocation3 + $0x38] sm:$0xff]  }
0x149c   :  { %v5260_v23 = vunpack.c.l.bf16 %v7356_v61  ;;  %v5261_v21 = vunpack.c.h.bf16 %v7356_v61 }
0x149e   :  { %v3009_v15 = vadd.f32 %v5260_v23, %v7315_v2  ;;  %v3010_v36 = vadd.f32 %v5261_v21, %v3005_v24 }
0x14a0   :  { %v5040_v53 = vmul.f32 -1.442695, %v3010_v36  ;;  %v5039_v22 = vmul.f32 -1.442695, %v3009_v15  ;;  %v2953_v15 = vadd.f32 %v5257_v56, %v2949_v0  ;;  %v2957_v56 = vsub.f32 1.0, %v7321_v39 }
0x14a2   :  { %5554 = vpow2.f32 %v5040_v53 }
0x14a3   :  { %5556 = vpow2.f32 %v5039_v22 }
0x14a8   :  { %v5555_v4 = vpop.eup %5554 }
0x14a9   :  { %v5557_v25 = vpop.eup %5556  ;;  %v3018_v60 = vadd.f32 1.0, %v5555_v4 }
0x14aa   :  { %v3017_v14 = vadd.f32 1.0, %v5557_v25 }
0x14ab   :  { %5558 = vrcp.f32 %v3018_v60  ;;  %v3045_v2 = vand.u32 2147483648, %v3018_v60  ;;  %v3043_v24 = vand.u32 2147483647, %v3018_v60  ;;  %vm3039_vm15 = vweird.f32 %v3018_v60 }
0x14ac   :  { %5560 = vrcp.f32 %v3017_v14  ;;  %v3030_v1 = vand.u32 2147483648, %v3017_v14  ;;  %v3028_v7 = vand.u32 2147483647, %v3017_v14  ;;  %vm3024_vm12 = vweird.f32 %v3017_v14 }
0x14ad   :  { %v3046_v28 = vor.u32 1.1754944e-38, %v3045_v2  ;;  %vm3044_vm9 = vcmp.eq.f32.partialorder %v3043_v24, 8.507059e+37  ;;  %5562 = vtanh.f32 %v2953_v15 }
0x14ae   :  { %v3031_v3 = vor.u32 1.1754944e-38, %v3030_v1  ;;  %vm3029_vm14 = vcmp.eq.f32.partialorder %v3028_v7, 8.507059e+37 }
0x14b1   :  { %v5559_v43 = vpop.eup %5558 }
0x14b2   :  { %v5561_v26 = vpop.eup %5560  ;;  %v3035_v58 = vmul.f32 %v5559_v43, %v3018_v60  ;;  %vm3040_vm1 = vweird.f32 %v5559_v43 }
0x14b3   :  { %v3020_v38 = vmul.f32 %v5561_v26, %v3017_v14  ;;  %vm3025_vm4 = vweird.f32 %v5561_v26  ;;  %vm3041_vm5 = vmor %vm3039_vm15, %vm3040_vm1  ;;  %v5563_v4 = vpop.eup %5562  ;;  %v2961_v14 = vpop.permute.xlu1 %2960  ;;  %vm8125_vm1 = vcmp.eq.s32.totalorder %v6183_v41, 1  ;;  %vm8127_vm15 = vcmp.eq.s32.totalorder %v6111_v48, 1 }
0x14b4   :  { %v3036_v62 = vsub.f32 1.0, %v3035_v58  ;;  %vm3026_vm7 = vmor %vm3024_vm12, %vm3025_vm4  ;;  %vm8126_vm4 = vcmp.eq.s32.totalorder %v6174_v35, 1 }
0x14b5   :  { %v3021_v45 = vsub.f32 1.0, %v3020_v38 }
0x14b6   :  { %v3037_v51 = vmul.f32 %v5559_v43, %v3036_v62  ;;  %v2969_v62 = vmul.f32 0.0, %v7321_v39 }
0x14b7   :  { %v3022_v52 = vmul.f32 %v5561_v26, %v3021_v45 }
0x14b8   :  { %v3038_v19 = vadd.f32 %v5559_v43, %v3037_v51 }
0x14b9   :  { %v3023_v8 = vadd.f32 %v5561_v26, %v3022_v52 }
0x14ba   :  { %v3042_v27 = vsel %vm3041_vm5, %v5559_v43, %v3038_v19  ;;  %v2956_v43 = vsub.f32 1.0, %v7287_v12  ;;  %vm8128_vm5 = vcmp.eq.s32.totalorder %v6142_v11, 1 }
0x14bb   :  { %v3047_v57 = vsel %vm3044_vm9, %v3046_v28, %v3042_v27  ;;  %v3027_v31 = vsel %vm3026_vm7, %v5561_v26, %v3023_v8 }
0x14bc   :  { %v3058_v36 = vmul.f32 %v3054_v42, %v3047_v57  ;;  %v3032_v53 = vsel %vm3029_vm14, %v3031_v3, %v3027_v31  ;;  %v2966_v26 = vmul.f32 %v2961_v14, %v2956_v43  ;;  %v3072_v8 = vsub.f32 1.0, %v3047_v57 }
0x14bd   :  { %v3057_v22 = vmul.f32 %v3052_v37, %v3032_v53  ;;  %v3071_v19 = vsub.f32 1.0, %v3032_v53  ;;  %v3083_v28 = vmul.f32 0.0, %v3032_v53  ;;  %v3084_v61 = vmul.f32 0.0, %v3047_v57 }
0x14be   :  { %3063 = vrot.lane.b32.xlu0 %v3058_v36, %s5753_s2  ;;  %v2970_v38 = vadd.f32 %v2968_v29, %v2966_v26 }
0x14bf   :  { %3061 = vrot.lane.b32.xlu2 %v3057_v22, %s5753_s2 }
0x14c7   :  { %2962 = vrot.lane.b32.xlu2 %v5563_v4, %s5754_s5  ;;  %v7408_v4 = vld [vmem:[#allocation2 + $0x8] sm:$0xff]  }
0x1519   :  { %v3062_v25 = vpop.permute.xlu2 %3061 }
0x151a   :  { %v3067_v60 = vadd.f32 %v5260_v23, %v3062_v25  ;;  %v7375_v23 = vsel %vm8125_vm1, %v2970_v38, 0.0  ;;  %v5264_v25 = vunpack.c.l.bf16 %v7408_v4 }
0x151c   :  { %5564 = vtanh.f32 %v3067_v60 }
0x1521   :  { %v2963_v37 = vpop.permute.xlu2 %2962 }
0x1522   :  { %v5565_v58 = vpop.eup %5564  ;;  %v2967_v2 = vmul.f32 %v2963_v37, %v2957_v56 }
0x1523   :  { %3075 = vrot.lane.b32.xlu0 %v5565_v58, %s5754_s5 }
0x1524   :  { %v2971_v45 = vadd.f32 %v2969_v62, %v2967_v2 }
0x1526   :  { %v7379_v51 = vsel %vm8126_vm4, %v2971_v45, 0.0 }
0x1527   :  { %v3093_v12 = vpack.c.bf16 %v7379_v51, %v7375_v23 }
0x1529   :  { %3095 = vrot.lane.b32.xlu2 %v3093_v12, %s5754_s5 }
0x1530   :  { %v3064_v24 = vpop.permute.xlu0 %3063 }
0x1531   :  { %v3068_v39 = vadd.f32 %v5261_v21, %v3064_v24 }
0x1533   :  { %5566 = vtanh.f32 %v3068_v39  ;;  %v5265_v39 = vunpack.c.h.bf16 %v7408_v4 }
0x1539   :  { %v5567_v1 = vpop.eup %5566 }
0x153a   :  { %3077 = vrot.lane.b32.xlu1 %v5567_v1, %s5754_s5 }
0x1583   :  { %v3096_v52 = vpop.permute.xlu2 %3095 }
0x1584   :  { %5041 = vmatmul.msk.bf16.vlgmr.msrb.gmra.mxu2 %vm124_vm0, %v3096_v52 }
0x1585   :  { %3526 = vmatpush.bf16.msrb.mxu2 %v7079_v59 }
0x1589   :  { %3527 = vmatpush.bf16.msrb.mxu2 %v7090_v16 }
0x1595   :  { %v3076_v7 = vpop.permute.xlu0 %3075 }
0x1596   :  { %v3081_v0 = vmul.f32 %v3076_v7, %v3071_v19 }
0x1598   :  { %v3085_v3 = vadd.f32 %v3083_v28, %v3081_v0 }
0x159a   :  { %v7392_v31 = vsel %vm8127_vm15, %v3085_v3, 0.0 }
0x15ac   :  { %v3078_v27 = vpop.permute.xlu1 %3077 }
0x15ad   :  { %v3082_v21 = vmul.f32 %v3078_v27, %v3072_v8 }
0x15af   :  { %v3086_v42 = vadd.f32 %v3084_v61, %v3082_v21 }
0x15b1   :  { %v7396_v15 = vsel %vm8128_vm5, %v3086_v42, 0.0 }
0x15b2   :  { %v3196_v59 = vpack.c.bf16 %v7396_v15, %v7392_v31 }
0x15b4   :  { %3198 = vrot.lane.b32.xlu0 %v3196_v59, %s5754_s5 }
0x1607   :  { %v3109_v16 = vpop.f32.mrf.mxu2 }
0x1608   :  { %v3110_v36 = vadd.f32 %v7188_v13, %v3109_v16 }
0x160a   :  { %3158 = vrot.lane.b32.xlu1 %v3110_v36, %s5753_s2  ;;  %v3116_v60 = vadd.f32 %v5264_v25, %v3110_v36 }
0x160c   :  { %v5042_v14 = vmul.f32 -1.442695, %v3116_v60 }
0x160e   :  { %5568 = vpow2.f32 %v5042_v14 }
0x160f   :  { %v3111_v57 = vpop.f32.mrf.mxu2 }
0x1610   :  { %v3112_v53 = vadd.f32 %v7188_v13, %v3111_v57 }
0x1612   :  { %3160 = vrot.lane.b32.xlu2 %v3112_v53, %s5753_s2  ;;  %v3117_v1 = vadd.f32 %v5265_v39, %v3112_v53 }
0x1614   :  { %v5569_v43 = vpop.eup %5568  ;;  %v5043_v52 = vmul.f32 -1.442695, %v3117_v1 }
0x1615   :  { %v3124_v26 = vadd.f32 1.0, %v5569_v43 }
0x1617   :  { %5570 = vrcp.f32 %v3124_v26  ;;  %v3137_v38 = vand.u32 2147483648, %v3124_v26  ;;  %vm3131_vm9 = vweird.f32 %v3124_v26 }
0x1618   :  { %5572 = vpow2.f32 %v5043_v52 }
0x1619   :  { %v3138_v2 = vor.u32 1.1754944e-38, %v3137_v38 }
0x161d   :  { %v5571_v13 = vpop.eup %5570 }
0x161e   :  { %v3127_v29 = vmul.f32 %v5571_v13, %v3124_v26  ;;  %vm3132_vm12 = vweird.f32 %v5571_v13  ;;  %v5573_v7 = vpop.eup %5572 }
0x161f   :  { %vm3133_vm7 = vmor %vm3131_vm9, %vm3132_vm12  ;;  %v3125_v19 = vadd.f32 1.0, %v5573_v7 }
0x1620   :  { %v3128_v56 = vsub.f32 1.0, %v3127_v29  ;;  %v5267_v29 = vld [vmem:[#allocation3 + $0x30] sm:$0xff]  }
0x1621   :  { %5574 = vrcp.f32 %v3125_v19  ;;  %v3152_v42 = vand.u32 2147483648, %v3125_v19  ;;  %vm3146_vm4 = vweird.f32 %v3125_v19  ;;  %v3150_v59 = vand.u32 2147483647, %v3125_v19 }
0x1622   :  { %v3129_v37 = vmul.f32 %v5571_v13, %v3128_v56  ;;  %v5268_v56 = vunpack.c.l.bf16 %v5267_v29  ;;  %v5269_v38 = vunpack.c.h.bf16 %v5267_v29 }
0x1623   :  { %v3153_v57 = vor.u32 1.1754944e-38, %v3152_v42  ;;  %vm3151_vm5 = vcmp.eq.f32.partialorder %v3150_v59, 8.507059e+37 }
0x1624   :  { %v3130_v58 = vadd.f32 %v5571_v13, %v3129_v37 }
0x1626   :  { %v3199_v22 = vpop.permute.xlu0 %3198  ;;  %v3134_v62 = vsel %vm3133_vm7, %v5571_v13, %v3130_v58 }
0x1627   :  { %5044 = vmatmul.msk.bf16.vlgmr.msrb.gmra.mxu3 %vm124_vm0, %v3199_v22  ;;  %v5575_v0 = vpop.eup %5574 }
0x1628   :  { %3629 = vmatpush.bf16.msrb.mxu3 %v7182_v18  ;;  %v3135_v18 = vand.u32 2147483647, %v3124_v26  ;;  %v3142_v28 = vmul.f32 %v5575_v0, %v3125_v19  ;;  %vm3147_vm1 = vweird.f32 %v5575_v0 }
0x1629   :  { %vm3148_vm15 = vmor %vm3146_vm4, %vm3147_vm1 }
0x162a   :  { %vm3136_vm14 = vcmp.eq.f32.partialorder %v3135_v18, 8.507059e+37  ;;  %v3143_v8 = vsub.f32 1.0, %v3142_v28 }
0x162b   :  { %v7411_v12 = vsel %vm3136_vm14, %v3138_v2, %v3134_v62 }
0x162c   :  { %3630 = vmatpush.bf16.msrb.mxu3 %v7202_v20  ;;  %v3144_v27 = vmul.f32 %v5575_v0, %v3143_v8  ;;  %v3178_v4 = vsub.f32 1.0, %v7411_v12 }
0x162e   :  { %v3145_v61 = vadd.f32 %v5575_v0, %v3144_v27 }
0x1630   :  { %v3149_v16 = vsel %vm3148_vm15, %v5575_v0, %v3145_v61 }
0x1631   :  { %v7420_v53 = vsel %vm3151_vm5, %v3153_v57, %v3149_v16 }
0x166c   :  { %v3161_v36 = vpop.permute.xlu2 %3160 }
0x166d   :  { %v3165_v60 = vmul.f32 %v3161_v36, %v7420_v53 }
0x167c   :  { %v3159_v45 = vpop.permute.xlu1 %3158 }
0x167d   :  { %v3164_v24 = vmul.f32 %v3159_v45, %v7411_v12 }
0x167f   :  { %3168 = vrot.lane.b32.xlu2 %v3164_v24, %s5753_s2 }
0x16aa   :  { %v3212_v3 = vpop.f32.mrf.mxu3 }
0x16ab   :  { %v3213_v21 = vadd.f32 %v7312_v50, %v3212_v3 }
0x16ad   :  { %3261 = vrot.lane.b32.xlu0 %v3213_v21, %s5753_s2  ;;  %v3219_v37 = vadd.f32 %v5268_v56, %v3213_v21 }
0x16af   :  { %v5045_v58 = vmul.f32 -1.442695, %v3219_v37 }
0x16b2   :  { %v3214_v22 = vpop.f32.mrf.mxu3 }
0x16b3   :  { %v3215_v14 = vadd.f32 %v7312_v50, %v3214_v22 }
0x16b5   :  { %3170 = vrot.lane.b32.xlu0 %v3165_v60, %s5753_s2  ;;  %3263 = vrot.lane.b32.xlu1 %v3215_v14, %s5753_s2  ;;  %v3220_v18 = vadd.f32 %v5269_v38, %v3215_v14 }
0x16b7   :  { %v5046_v62 = vmul.f32 -1.442695, %v3220_v18 }
0x16d9   :  { %v3169_v43 = vpop.permute.xlu2 %3168 }
0x16da   :  { %v3174_v26 = vadd.f32 %v5264_v25, %v3169_v43 }
0x16dc   :  { %5576 = vtanh.f32 %v3174_v26 }
0x16dd   :  { %5578 = vpow2.f32 %v5045_v58 }
0x16de   :  { %5580 = vpow2.f32 %v5046_v62 }
0x16e2   :  { %v5577_v13 = vpop.eup %5576 }
0x16e3   :  { %3182 = vrot.lane.b32.xlu0 %v5577_v13, %s5754_s5  ;;  %v5579_v2 = vpop.eup %5578 }
0x16e4   :  { %v3227_v45 = vadd.f32 1.0, %v5579_v2  ;;  %v5581_v24 = vpop.eup %5580 }
0x16e5   :  { %v3228_v1 = vadd.f32 1.0, %v5581_v24 }
0x16e6   :  { %5582 = vrcp.f32 %v3227_v45  ;;  %v3240_v3 = vand.u32 2147483648, %v3227_v45  ;;  %vm3234_vm9 = vweird.f32 %v3227_v45  ;;  %v3238_v61 = vand.u32 2147483647, %v3227_v45 }
0x16e7   :  { %5584 = vrcp.f32 %v3228_v1  ;;  %v3255_v60 = vand.u32 2147483648, %v3228_v1  ;;  %vm3249_vm4 = vweird.f32 %v3228_v1  ;;  %v3253_v14 = vand.u32 2147483647, %v3228_v1 }
0x16e8   :  { %v3241_v59 = vor.u32 1.1754944e-38, %v3240_v3  ;;  %vm3239_vm14 = vcmp.eq.f32.partialorder %v3238_v61, 8.507059e+37 }
0x16e9   :  { %v3256_v26 = vor.u32 1.1754944e-38, %v3255_v60  ;;  %vm3254_vm5 = vcmp.eq.f32.partialorder %v3253_v14, 8.507059e+37 }
0x16ec   :  { %v5583_v52 = vpop.eup %5582 }
0x16ed   :  { %v3230_v25 = vmul.f32 %v5583_v52, %v3227_v45  ;;  %v5585_v19 = vpop.eup %5584  ;;  %vm3235_vm12 = vweird.f32 %v5583_v52 }
0x16ee   :  { %v3245_v28 = vmul.f32 %v5585_v19, %v3228_v1  ;;  %vm3236_vm7 = vmor %vm3234_vm9, %vm3235_vm12  ;;  %vm3250_vm1 = vweird.f32 %v5585_v19  ;;  %vm8129_vm12 = vcmp.eq.s32.totalorder %v6314_v34, 1  ;;  %vm8130_vm9 = vcmp.eq.s32.totalorder %v6262_v63, 1 }
0x16ef   :  { %v3231_v7 = vsub.f32 1.0, %v3230_v25  ;;  %vm3251_vm15 = vmor %vm3249_vm4, %vm3250_vm1 }
0x16f0   :  { %v3246_v27 = vsub.f32 1.0, %v3245_v28 }
0x16f1   :  { %v3232_v0 = vmul.f32 %v5583_v52, %v3231_v7 }
0x16f2   :  { %v3247_v42 = vmul.f32 %v5585_v19, %v3246_v27 }
0x16f3   :  { %v3233_v8 = vadd.f32 %v5583_v52, %v3232_v0  ;;  %v3179_v0 = vsub.f32 1.0, %v7420_v53 }
0x16f4   :  { %v3248_v22 = vadd.f32 %v5585_v19, %v3247_v42 }
0x16f5   :  { %v3237_v21 = vsel %vm3236_vm7, %v5583_v52, %v3233_v8  ;;  %v3191_v8 = vmul.f32 %v7420_v53, %v7379_v51  ;;  %vm8131_vm7 = vcmp.eq.s32.totalorder %v6277_v49, 1 }
0x16f6   :  { %v3242_v36 = vsel %vm3239_vm14, %v3241_v59, %v3237_v21  ;;  %v3252_v43 = vsel %vm3251_vm15, %v5585_v19, %v3248_v22  ;;  %v3190_v19 = vmul.f32 %v7411_v12, %v7375_v23 }
0x16f7   :  { %v3257_v37 = vsel %vm3254_vm5, %v3256_v26, %v3252_v43  ;;  %v3281_v42 = vsub.f32 1.0, %v3242_v36  ;;  %v3293_v59 = vmul.f32 %v3242_v36, %v7392_v31 }
0x171f   :  { %v3262_v16 = vpop.permute.xlu0 %3261 }
0x1720   :  { %v3267_v57 = vmul.f32 %v3262_v16, %v3242_v36  ;;  %v3282_v16 = vsub.f32 1.0, %v3257_v37 }
0x1722   :  { %3271 = vrot.lane.b32.xlu1 %v3267_v57, %s5753_s2 }
0x1727   :  { %v3171_v13 = vpop.permute.xlu0 %3170  ;;  %v3264_v29 = vpop.permute.xlu1 %3263 }
0x1728   :  { %v3175_v58 = vadd.f32 %v5265_v39, %v3171_v13  ;;  %v3268_v18 = vmul.f32 %v3264_v29, %v3257_v37  ;;  %v7472_v13 = vld [vmem:[%s8056_s12 + $0x8] sm:$0xff] }
0x1729   :  { %v7485_v29 = vld [vmem:[%s8062_s16 + $0x8] sm:$0xff] }
0x172a   :  { %5586 = vtanh.f32 %v3175_v58  ;;  %3273 = vrot.lane.b32.xlu2 %v3268_v18, %s5753_s2  ;;  %v7492_v58 = vld [vmem:[%s8057_s13] ss:$0 sm:$0xff] }
0x1730   :  { %v5587_v62 = vpop.eup %5586 }
0x1731   :  { %3184 = vrot.lane.b32.xlu1 %v5587_v62, %s5754_s5 }
0x1755   :  { %v3183_v7 = vpop.permute.xlu0 %3182 }
0x1756   :  { %v3188_v39 = vmul.f32 %v3183_v7, %v3178_v4 }
0x1758   :  { %v3192_v28 = vadd.f32 %v3190_v19, %v3188_v39 }
0x175a   :  { %v7443_v3 = vsel %vm869_vm3, %v3192_v28, %v7375_v23  ;;  %v3294_v23 = vmul.f32 %v3257_v37, %v7396_v15 }
0x1784   :  { %v3274_v2 = vpop.permute.xlu2 %3273 }
0x1785   :  { %v3278_v45 = vadd.f32 %v5269_v38, %v3274_v2 }
0x1787   :  { %5588 = vtanh.f32 %v3278_v45  ;;  %v7498_v45 = vld [vmem:[#allocation2 + $0x10] sm:$0xff]  }
0x1788   :  { %v5273_v7 = vunpack.c.h.bf16 %v7498_v45 }
0x178d   :  { %v5589_v24 = vpop.eup %5588 }
0x178e   :  { %3287 = vrot.lane.b32.xlu0 %v5589_v24, %s5754_s5  ;;  %v5272_v24 = vunpack.c.l.bf16 %v7498_v45 }
0x1794   :  { %v3272_v1 = vpop.permute.xlu1 %3271 }
0x1795   :  { %v3277_v52 = vadd.f32 %v5268_v56, %v3272_v1 }
0x1797   :  { %5590 = vtanh.f32 %v3277_v52 }
0x179d   :  { %v5591_v25 = vpop.eup %5590 }
0x179e   :  { %3285 = vrot.lane.b32.xlu2 %v5591_v25, %s5754_s5 }
0x17a3   :  { %v3185_v38 = vpop.permute.xlu1 %3184 }
0x17a4   :  { %v3189_v27 = vmul.f32 %v3185_v38, %v3179_v0 }
0x17a6   :  { %v3193_v56 = vadd.f32 %v3191_v8, %v3189_v27 }
0x17a8   :  { %v7448_v61 = vsel %vm8129_vm12, %v3193_v56, %v7379_v51 }
0x17a9   :  { %v3303_v12 = vpack.c.bf16 %v7448_v61, %v7443_v3 }
0x17ab   :  { %3305 = vrot.lane.b32.xlu1 %v3303_v12, %s5754_s5 }
0x17f8   :  { %v3286_v21 = vpop.permute.xlu2 %3285 }
0x17f9   :  { %v3291_v53 = vmul.f32 %v3286_v21, %v3281_v42 }
0x17fb   :  { %v3295_v22 = vadd.f32 %v3293_v59, %v3291_v53 }
0x17fd   :  { %v7458_v51 = vsel %vm8130_vm9, %v3295_v22, %v7392_v31  ;;  %v7478_v31 = vld [vmem:[%s8056_s12] sm:$0xff] }
0x1800   :  { %v3288_v57 = vpop.permute.xlu0 %3287 }
0x1801   :  { %v3292_v60 = vmul.f32 %v3288_v57, %v3282_v16  ;;  %v7510_v16 = vld [vmem:[#allocation3 + $0x28] sm:$0xff]  }
0x1802   :  { %v5276_v22 = vunpack.c.l.bf16 %v7510_v16 }
0x1803   :  { %v3296_v14 = vadd.f32 %v3294_v23, %v3292_v60 }
0x1805   :  { %v7463_v43 = vsel %vm8131_vm7, %v3296_v14, %v7396_v15 }
0x1806   :  { %v3406_v36 = vpack.c.bf16 %v7463_v43, %v7458_v51 }
0x1808   :  { %3408 = vrot.lane.b32.xlu2 %v3406_v36, %s5754_s5 }
0x181d   :  { %v3306_v26 = vpop.permute.xlu1 %3305 }
0x181e   :  { %5047 = vmatmul.msk.bf16.vlgmr.msra.gmra.mxu2 %vm124_vm0, %v3306_v26 }
0x181f   :  { %3736 = vmatpush.bf16.msra.mxu2 %v7472_v13 }
0x1823   :  { %3737 = vmatpush.bf16.msra.mxu2 %v7478_v31 }
0x1862   :  { %v3409_v15 = vpop.permute.xlu2 %3408 }
0x1863   :  { %5050 = vmatmul.msk.bf16.vlgmr.msra.gmra.mxu3 %vm124_vm0, %v3409_v15 }
0x1864   :  { %3839 = vmatpush.bf16.msra.mxu3 %v7485_v29 }
0x1868   :  { %3840 = vmatpush.bf16.msra.mxu3 %v7202_v20 }
0x18a1   :  { %v3319_v37 = vpop.f32.mrf.mxu2 }
0x18a2   :  { %v3320_v18 = vadd.f32 %v7492_v58, %v3319_v37 }
0x18a4   :  { %3368 = vrot.lane.b32.xlu0 %v3320_v18, %s5753_s2  ;;  %v3326_v20 = vadd.f32 %v5272_v24, %v3320_v18 }
0x18a6   :  { %v5048_v25 = vmul.f32 -1.442695, %v3326_v20 }
0x18a8   :  { %5592 = vpow2.f32 %v5048_v25 }
0x18a9   :  { %v3321_v62 = vpop.f32.mrf.mxu2 }
0x18aa   :  { %v3322_v2 = vadd.f32 %v7492_v58, %v3321_v62 }
0x18ac   :  { %3370 = vrot.lane.b32.xlu1 %v3322_v2, %s5753_s2  ;;  %v3327_v4 = vadd.f32 %v5273_v7, %v3322_v2 }
0x18ae   :  { %v5049_v0 = vmul.f32 -1.442695, %v3327_v4  ;;  %v5593_v38 = vpop.eup %5592 }
0x18af   :  { %v3334_v28 = vadd.f32 1.0, %v5593_v38 }
0x18b0   :  { %5594 = vpow2.f32 %v5049_v0 }
0x18b1   :  { %5596 = vrcp.f32 %v3334_v28  ;;  %v3347_v23 = vand.u32 2147483648, %v3334_v28  ;;  %vm3341_vm1 = vweird.f32 %v3334_v28  ;;  %v3345_v60 = vand.u32 2147483647, %v3334_v28 }
0x18b3   :  { %v3348_v15 = vor.u32 1.1754944e-38, %v3347_v23  ;;  %vm3346_vm15 = vcmp.eq.f32.partialorder %v3345_v60, 8.507059e+37 }
0x18b6   :  { %v5595_v8 = vpop.eup %5594 }
0x18b7   :  { %v3335_v27 = vadd.f32 1.0, %v5595_v8  ;;  %v5597_v56 = vpop.eup %5596 }
0x18b8   :  { %v3337_v12 = vmul.f32 %v5597_v56, %v3334_v28  ;;  %vm3342_vm14 = vweird.f32 %v5597_v56 }
0x18b9   :  { %5598 = vrcp.f32 %v3335_v27  ;;  %vm3343_vm4 = vmor %vm3341_vm1, %vm3342_vm14  ;;  %vm3356_vm12 = vweird.f32 %v3335_v27  ;;  %v3360_v25 = vand.u32 2147483647, %v3335_v27 }
0x18ba   :  { %v3338_v21 = vsub.f32 1.0, %v3337_v12  ;;  %v5277_v12 = vunpack.c.h.bf16 %v7510_v16 }
0x18bb   :  { %vm3361_vm7 = vcmp.eq.f32.partialorder %v3360_v25, 8.507059e+37 }
0x18bc   :  { %v3339_v53 = vmul.f32 %v5597_v56, %v3338_v21 }
0x18be   :  { %v3340_v57 = vadd.f32 %v5597_v56, %v3339_v53 }
0x18bf   :  { %v5599_v42 = vpop.eup %5598 }
0x18c0   :  { %v3352_v59 = vmul.f32 %v5599_v42, %v3335_v27  ;;  %v3344_v36 = vsel %vm3343_vm4, %v5597_v56, %v3340_v57  ;;  %vm3357_vm5 = vweird.f32 %v5599_v42 }
0x18c1   :  { %v7515_v62 = vsel %vm3346_vm15, %v3348_v15, %v3344_v36  ;;  %vm3358_vm9 = vmor %vm3356_vm12, %vm3357_vm5 }
0x18e6   :  { %v3422_v1 = vpop.f32.mrf.mxu3 }
0x18e7   :  { %v3423_v52 = vadd.f32 %v7312_v50, %v3422_v1  ;;  %v3362_v1 = vand.u32 2147483648, %v3335_v27 }
0x18e9   :  { %3471 = vrot.lane.b32.xlu2 %v3423_v52, %s5753_s2  ;;  %v3429_v14 = vadd.f32 %v5276_v22, %v3423_v52  ;;  %v3363_v4 = vor.u32 1.1754944e-38, %v3362_v1 }
0x18eb   :  { %v5051_v37 = vmul.f32 -1.442695, %v3429_v14 }
0x18ed   :  { %5600 = vpow2.f32 %v5051_v37 }
0x18ee   :  { %v3424_v39 = vpop.f32.mrf.mxu3 }
0x18ef   :  { %v3425_v19 = vadd.f32 %v7312_v50, %v3424_v39  ;;  %v3353_v50 = vsub.f32 1.0, %v3352_v59 }
0x18f1   :  { %3473 = vrot.lane.b32.xlu0 %v3425_v19, %s5753_s2  ;;  %v3354_v26 = vmul.f32 %v5599_v42, %v3353_v50  ;;  %v3430_v27 = vadd.f32 %v5277_v12, %v3425_v19 }
0x18f3   :  { %v3355_v20 = vadd.f32 %v5599_v42, %v3354_v26  ;;  %v5601_v28 = vpop.eup %5600  ;;  %v5052_v59 = vmul.f32 -1.442695, %v3430_v27 }
0x18f4   :  { %v3437_v8 = vadd.f32 1.0, %v5601_v28 }
0x18f5   :  { %v3359_v52 = vsel %vm3358_vm9, %v5599_v42, %v3355_v20 }
0x18f6   :  { %v7519_v0 = vsel %vm3361_vm7, %v3363_v4, %v3359_v52  ;;  %5602 = vrcp.f32 %v3437_v8  ;;  %v3450_v50 = vand.u32 2147483648, %v3437_v8  ;;  %vm3444_vm1 = vweird.f32 %v3437_v8 }
0x18f7   :  { %5604 = vpow2.f32 %v5052_v59  ;;  %v3448_v23 = vand.u32 2147483647, %v3437_v8  ;;  %v3389_v16 = vsub.f32 1.0, %v7519_v0 }
0x18f8   :  { %v3451_v36 = vor.u32 1.1754944e-38, %v3450_v50 }
0x18f9   :  { %vm3449_vm15 = vcmp.eq.f32.partialorder %v3448_v23, 8.507059e+37 }
0x18fc   :  { %v5603_v56 = vpop.eup %5602 }
0x18fd   :  { %v3440_v21 = vmul.f32 %v5603_v56, %v3437_v8  ;;  %vm3445_vm14 = vweird.f32 %v5603_v56  ;;  %v5605_v60 = vpop.eup %5604 }
0x18fe   :  { %vm3446_vm4 = vmor %vm3444_vm1, %vm3445_vm14  ;;  %v3438_v26 = vadd.f32 1.0, %v5605_v60 }
0x18ff   :  { %v3441_v53 = vsub.f32 1.0, %v3440_v21 }
0x1900   :  { %5606 = vrcp.f32 %v3438_v26  ;;  %v3465_v52 = vand.u32 2147483648, %v3438_v26  ;;  %vm3459_vm12 = vweird.f32 %v3438_v26  ;;  %v3463_v4 = vand.u32 2147483647, %v3438_v26 }
0x1901   :  { %v3442_v42 = vmul.f32 %v5603_v56, %v3441_v53 }
0x1902   :  { %vm3464_vm7 = vcmp.eq.f32.partialorder %v3463_v4, 8.507059e+37 }
0x1903   :  { %v3443_v57 = vadd.f32 %v5603_v56, %v3442_v42 }
0x1905   :  { %v3447_v14 = vsel %vm3446_vm4, %v5603_v56, %v3443_v57 }
0x1906   :  { %v3452_v37 = vsel %vm3449_vm15, %v3451_v36, %v3447_v14  ;;  %v5607_v19 = vpop.eup %5606 }
0x1907   :  { %vm3460_vm5 = vweird.f32 %v5607_v19  ;;  %v3503_v4 = vmul.f32 %v3452_v37, %v7458_v51 }
0x1908   :  { %vm3461_vm9 = vmor %vm3459_vm12, %vm3460_vm5 }
0x1916   :  { %v3369_v18 = vpop.permute.xlu0 %3368 }
0x1917   :  { %v3374_v2 = vmul.f32 %v3369_v18, %v7515_v62 }
0x1919   :  { %3378 = vrot.lane.b32.xlu1 %v3374_v2, %s5753_s2  ;;  %v3455_v2 = vmul.f32 %v5607_v19, %v3438_v26 }
0x191b   :  { %v3456_v20 = vsub.f32 1.0, %v3455_v2 }
0x191d   :  { %v3457_v1 = vmul.f32 %v5607_v19, %v3456_v20 }
0x191e   :  { %v3371_v39 = vpop.permute.xlu1 %3370 }
0x191f   :  { %v3375_v38 = vmul.f32 %v3371_v39, %v7519_v0  ;;  %v3458_v25 = vadd.f32 %v5607_v19, %v3457_v1 }
0x1921   :  { %3380 = vrot.lane.b32.xlu2 %v3375_v38, %s5753_s2  ;;  %v3462_v39 = vsel %vm3461_vm9, %v5607_v19, %v3458_v25  ;;  %v3466_v38 = vor.u32 1.1754944e-38, %v3465_v52  ;;  %v3401_v19 = vmul.f32 %v7519_v0, %v7448_v61  ;;  %v3491_v52 = vsub.f32 1.0, %v3452_v37 }
0x1923   :  { %v3467_v28 = vsel %vm3464_vm7, %v3466_v38, %v3462_v39 }
0x1924   :  { %v3492_v39 = vsub.f32 1.0, %v3467_v28 }
0x1943   :  { %v3472_v15 = vpop.permute.xlu2 %3471 }
0x1944   :  { %v3477_v18 = vmul.f32 %v3472_v15, %v3452_v37  ;;  %v3400_v15 = vmul.f32 %v7515_v62, %v7443_v3 }
0x1946   :  { %3481 = vrot.lane.b32.xlu0 %v3477_v18, %s5753_s2 }
0x1963   :  { %v3474_v8 = vpop.permute.xlu0 %3473 }
0x1964   :  { %v3478_v56 = vmul.f32 %v3474_v8, %v3467_v28 }
0x1966   :  { %3483 = vrot.lane.b32.xlu1 %v3478_v56, %s5753_s2 }
0x197b   :  { %v3381_v21 = vpop.permute.xlu2 %3380 }
0x197c   :  { %v3385_v27 = vadd.f32 %v5273_v7, %v3381_v21 }
0x197e   :  { %5608 = vtanh.f32 %v3385_v27 }
0x1984   :  { %v5609_v53 = vpop.eup %5608 }
0x1985   :  { %3394 = vrot.lane.b32.xlu0 %v5609_v53, %s5754_s5 }
0x198b   :  { %v3379_v59 = vpop.permute.xlu1 %3378 }
0x198c   :  { %v3384_v42 = vadd.f32 %v5272_v24, %v3379_v59  ;;  %v3388_v24 = vsub.f32 1.0, %v7515_v62 }
0x198e   :  { %5610 = vtanh.f32 %v3384_v42 }
0x1994   :  { %v5611_v57 = vpop.eup %5610 }
0x1995   :  { %3392 = vrot.lane.b32.xlu2 %v5611_v57, %s5754_s5 }
0x19b8   :  { %v3482_v50 = vpop.permute.xlu0 %3481 }
0x19b9   :  { %v3487_v23 = vadd.f32 %v5276_v22, %v3482_v50  ;;  %v7585_v50 = vld [vmem:[#allocation2 + $0x18] sm:$0xff]  }
0x19bb   :  { %5612 = vtanh.f32 %v3487_v23  ;;  %v5280_v23 = vunpack.c.l.bf16 %v7585_v50 }
0x19c1   :  { %v5613_v60 = vpop.eup %5612 }
0x19c2   :  { %3495 = vrot.lane.b32.xlu1 %v5613_v60, %s5754_s5 }
0x19d8   :  { %v3484_v7 = vpop.permute.xlu1 %3483 }
0x19d9   :  { %v3488_v14 = vadd.f32 %v5277_v12, %v3484_v7 }
0x19db   :  { %5614 = vtanh.f32 %v3488_v14 }
0x19e1   :  { %v5615_v36 = vpop.eup %5614 }
0x19e2   :  { %3497 = vrot.lane.b32.xlu2 %v5615_v36, %s5754_s5 }
0x19ef   :  { %v3393_v45 = vpop.permute.xlu2 %3392 }
0x19f0   :  { %v3398_v26 = vmul.f32 %v3393_v45, %v3388_v24  ;;  %v7593_v24 = vld [vmem:[%s8063_s17] ss:$0 sm:$0xff] }
0x19f2   :  { %v3402_v18 = vadd.f32 %v3400_v15, %v3398_v26 }
0x19f4   :  { %v7545_v20 = vsel %vm1159_vm6, %v3402_v18, %v7443_v3  ;;  %v3504_v3 = vmul.f32 %v3467_v28, %v7463_v43 }
0x19f7   :  { %v3395_v22 = vpop.permute.xlu0 %3394 }
0x19f8   :  { %v3399_v2 = vmul.f32 %v3395_v22, %v3389_v16  ;;  %v5281_v16 = vunpack.c.h.bf16 %v7585_v50 }
0x19fa   :  { %v3403_v12 = vadd.f32 %v3401_v19, %v3399_v2 }
0x19fc   :  { %v7550_v1 = vsel %vm1160_vm8, %v3403_v12, %v7448_v61 }
0x19fd   :  { %v3513_v62 = vpack.c.bf16 %v7550_v1, %v7545_v20 }
0x19ff   :  { %3515 = vrot.lane.b32.xlu0 %v3513_v62, %s5754_s5 }
0x1a34   :  { %v3496_v25 = vpop.permute.xlu1 %3495 }
0x1a35   :  { %v3501_v0 = vmul.f32 %v3496_v25, %v3491_v52 }
0x1a37   :  { %v3505_v8 = vadd.f32 %v3503_v4, %v3501_v0 }
0x1a39   :  { %v7560_v61 = vsel %vm1173_vm13, %v3505_v8, %v7458_v51  ;;  %v7578_v51 = vld [vmem:[%s8062_s16] sm:$0xff] }
0x1a3c   :  { %v3498_v38 = vpop.permute.xlu2 %3497 }
0x1a3d   :  { %v3502_v56 = vmul.f32 %v3498_v38, %v3492_v39 }
0x1a3f   :  { %v3506_v21 = vadd.f32 %v3504_v3, %v3502_v56 }
0x1a41   :  { %v7565_v27 = vsel %vm1174_vm2, %v3506_v21, %v7463_v43 }
0x1a42   :  { %v3616_v37 = vpack.c.bf16 %v7565_v27, %v7560_v61 }
0x1a44   :  { %3618 = vrot.lane.b32.xlu1 %v3616_v37, %s5754_s5 }
0x1a71   :  { %v3516_v53 = vpop.permute.xlu0 %3515 }
0x1a72   :  { %5053 = vmatmul.msk.bf16.vlgmr.msrb.gmra.mxu2 %vm124_vm0, %v3516_v53 }
0x1a73   :  { %3946 = vmatpush.bf16.msrb.mxu2 %v7472_v13 }
0x1a77   :  { %3947 = vmatpush.bf16.msrb.mxu2 %v7478_v31 }
0x1ab6   :  { %v3619_v28 = vpop.permute.xlu1 %3618 }
0x1ab7   :  { %5056 = vmatmul.msk.bf16.vlgmr.msrb.gmra.mxu3 %vm124_vm0, %v3619_v28 }
0x1ab8   :  { %4049 = vmatpush.bf16.msrb.mxu3 %v7485_v29 }
0x1abc   :  { %4050 = vmatpush.bf16.msrb.mxu3 %v7578_v51 }
0x1af5   :  { %v3529_v43 = vpop.f32.mrf.mxu2 }
0x1af6   :  { %v3530_v59 = vadd.f32 %v7492_v58, %v3529_v43 }
0x1af8   :  { %3578 = vrot.lane.b32.xlu2 %v3530_v59, %s5753_s2  ;;  %v3536_v60 = vadd.f32 %v5280_v23, %v3530_v59 }
0x1afa   :  { %v5054_v7 = vmul.f32 -1.442695, %v3536_v60 }
0x1afc   :  { %5616 = vpow2.f32 %v5054_v7 }
0x1afd   :  { %v3531_v42 = vpop.f32.mrf.mxu2 }
0x1afe   :  { %v3532_v57 = vadd.f32 %v7492_v58, %v3531_v42  ;;  %v7606_v42 = vld [vmem:[#allocation3 + $0x20] sm:$0xff]  }
0x1aff   :  { %v5285_v60 = vunpack.c.h.bf16 %v7606_v42 }
0x1b00   :  { %3580 = vrot.lane.b32.xlu0 %v3532_v57, %s5753_s2  ;;  %v3537_v18 = vadd.f32 %v5281_v16, %v3532_v57 }
0x1b02   :  { %v5617_v14 = vpop.eup %5616  ;;  %v5055_v62 = vmul.f32 -1.442695, %v3537_v18 }
0x1b03   :  { %v3544_v36 = vadd.f32 1.0, %v5617_v14 }
0x1b05   :  { %5618 = vrcp.f32 %v3544_v36  ;;  %v3557_v0 = vand.u32 2147483648, %v3544_v36  ;;  %vm3551_vm1 = vweird.f32 %v3544_v36  ;;  %v3555_v4 = vand.u32 2147483647, %v3544_v36 }
0x1b06   :  { %5620 = vpow2.f32 %v5055_v62 }
0x1b07   :  { %v3558_v8 = vor.u32 1.1754944e-38, %v3557_v0  ;;  %vm3556_vm15 = vcmp.eq.f32.partialorder %v3555_v4, 8.507059e+37 }
0x1b0b   :  { %v5619_v15 = vpop.eup %5618 }
0x1b0c   :  { %v3547_v22 = vmul.f32 %v5619_v15, %v3544_v36  ;;  %vm3552_vm14 = vweird.f32 %v5619_v15  ;;  %v5621_v39 = vpop.eup %5620 }
0x1b0d   :  { %vm3553_vm4 = vmor %vm3551_vm1, %vm3552_vm14  ;;  %v3545_v3 = vadd.f32 1.0, %v5621_v39 }
0x1b0e   :  { %v3548_v12 = vsub.f32 1.0, %v3547_v22 }
0x1b0f   :  { %5622 = vrcp.f32 %v3545_v3  ;;  %v3572_v7 = vand.u32 2147483648, %v3545_v3  ;;  %vm3566_vm12 = vweird.f32 %v3545_v3  ;;  %v3570_v14 = vand.u32 2147483647, %v3545_v3 }
0x1b10   :  { %v3549_v25 = vmul.f32 %v5619_v15, %v3548_v12 }
0x1b11   :  { %vm3571_vm7 = vcmp.eq.f32.partialorder %v3570_v14, 8.507059e+37 }
0x1b12   :  { %v3550_v52 = vadd.f32 %v5619_v15, %v3549_v25  ;;  %v5284_v25 = vunpack.c.l.bf16 %v7606_v42 }
0x1b14   :  { %v3554_v38 = vsel %vm3553_vm4, %v5619_v15, %v3550_v52  ;;  %v3573_v15 = vor.u32 1.1754944e-38, %v3572_v7 }
0x1b15   :  { %v7602_v56 = vsel %vm3556_vm15, %v3558_v8, %v3554_v38  ;;  %v5623_v53 = vpop.eup %5622 }
0x1b16   :  { %v3562_v28 = vmul.f32 %v5623_v53, %v3545_v3  ;;  %vm3567_vm5 = vweird.f32 %v5623_v53 }
0x1b17   :  { %vm3568_vm9 = vmor %vm3566_vm12, %vm3567_vm5 }
0x1b18   :  { %v3563_v43 = vsub.f32 1.0, %v3562_v28 }
0x1b1a   :  { %v3564_v59 = vmul.f32 %v5623_v53, %v3563_v43 }
0x1b1c   :  { %v3565_v57 = vadd.f32 %v5623_v53, %v3564_v59 }
0x1b3a   :  { %v3632_v45 = vpop.f32.mrf.mxu3 }
0x1b3b   :  { %v3633_v26 = vadd.f32 %v7593_v24, %v3632_v45  ;;  %v3569_v45 = vsel %vm3568_vm9, %v5623_v53, %v3565_v57 }
0x1b3d   :  { %3681 = vrot.lane.b32.xlu1 %v3633_v26, %s5753_s2  ;;  %v3639_v52 = vadd.f32 %v5284_v25, %v3633_v26 }
0x1b3f   :  { %v5057_v4 = vmul.f32 -1.442695, %v3639_v52 }
0x1b42   :  { %v3634_v19 = vpop.f32.mrf.mxu3 }
0x1b43   :  { %v3635_v2 = vadd.f32 %v7593_v24, %v3634_v19  ;;  %v7611_v19 = vsel %vm3571_vm7, %v3573_v15, %v3569_v45 }
0x1b44   :  { %v3611_v42 = vmul.f32 %v7611_v19, %v7550_v1 }
0x1b45   :  { %3683 = vrot.lane.b32.xlu2 %v3635_v2, %s5753_s2  ;;  %v3640_v36 = vadd.f32 %v5285_v60, %v3635_v2 }
0x1b47   :  { %v5058_v22 = vmul.f32 -1.442695, %v3640_v36 }
0x1b49   :  { %5624 = vpow2.f32 %v5058_v22 }
0x1b4f   :  { %v5625_v62 = vpop.eup %5624 }
0x1b50   :  { %v3648_v0 = vadd.f32 1.0, %v5625_v62 }
0x1b52   :  { %v3579_v21 = vpop.permute.xlu2 %3578  ;;  %5626 = vrcp.f32 %v3648_v0  ;;  %v3675_v28 = vand.u32 2147483648, %v3648_v0  ;;  %vm3669_vm1 = vweird.f32 %v3648_v0  ;;  %v3673_v43 = vand.u32 2147483647, %v3648_v0 }
0x1b53   :  { %v3584_v37 = vmul.f32 %v3579_v21, %v7602_v56  ;;  %5628 = vpow2.f32 %v5057_v4 }
0x1b54   :  { %v3676_v57 = vor.u32 1.1754944e-38, %v3675_v28  ;;  %vm3674_vm15 = vcmp.eq.f32.partialorder %v3673_v43, 8.507059e+37 }
0x1b55   :  { %3588 = vrot.lane.b32.xlu0 %v3584_v37, %s5753_s2 }
0x1b58   :  { %v5627_v2 = vpop.eup %5626 }
0x1b59   :  { %v5629_v39 = vpop.eup %5628  ;;  %v3665_v38 = vmul.f32 %v5627_v2, %v3648_v0  ;;  %vm3670_vm14 = vweird.f32 %v5627_v2 }
0x1b5a   :  { %v3647_v8 = vadd.f32 1.0, %v5629_v39  ;;  %vm3671_vm4 = vmor %vm3669_vm1, %vm3670_vm14  ;;  %vm8132_vm14 = vcmp.eq.s32.totalorder %v6610_v44, 1  ;;  %vm8133_vm1 = vcmp.eq.s32.totalorder %v6563_v5, 1 }
0x1b5b   :  { %v3666_v3 = vsub.f32 1.0, %v3665_v38 }
0x1b5c   :  { %5630 = vrcp.f32 %v3647_v8  ;;  %vm3654_vm12 = vweird.f32 %v3647_v8 }
0x1b5d   :  { %v3667_v21 = vmul.f32 %v5627_v2, %v3666_v3 }
0x1b5f   :  { %v3668_v37 = vadd.f32 %v5627_v2, %v3667_v21 }
0x1b61   :  { %v3672_v59 = vsel %vm3671_vm4, %v5627_v2, %v3668_v37  ;;  %vm8134_vm4 = vcmp.eq.s32.totalorder %v6578_v17, 1 }
0x1b62   :  { %v5631_v53 = vpop.eup %5630  ;;  %v3677_v14 = vsel %vm3674_vm15, %v3676_v57, %v3672_v59 }
0x1b63   :  { %v3650_v26 = vmul.f32 %v5631_v53, %v3647_v8  ;;  %vm3655_vm5 = vweird.f32 %v5631_v53 }
0x1b64   :  { %vm3656_vm9 = vmor %vm3654_vm12, %vm3655_vm5 }
0x1b65   :  { %v3651_v45 = vsub.f32 1.0, %v3650_v26 }
0x1b67   :  { %v3652_v15 = vmul.f32 %v5631_v53, %v3651_v45 }
0x1b69   :  { %v3653_v22 = vadd.f32 %v5631_v53, %v3652_v15 }
0x1b6b   :  { %v3657_v62 = vsel %vm3656_vm9, %v5631_v53, %v3653_v22 }
0x1b72   :  { %v3581_v18 = vpop.permute.xlu0 %3580 }
0x1b73   :  { %v3585_v12 = vmul.f32 %v3581_v18, %v7611_v19  ;;  %v3660_v18 = vand.u32 2147483648, %v3647_v8 }
0x1b75   :  { %3590 = vrot.lane.b32.xlu1 %v3585_v12, %s5753_s2  ;;  %v3658_v12 = vand.u32 2147483647, %v3647_v8  ;;  %v3661_v52 = vor.u32 1.1754944e-38, %v3660_v18 }
0x1b77   :  { %vm3659_vm7 = vcmp.eq.f32.partialorder %v3658_v12, 8.507059e+37 }
0x1b78   :  { %v3662_v4 = vsel %vm3659_vm7, %v3661_v52, %v3657_v62 }
0x1b79   :  { %v3701_v62 = vsub.f32 1.0, %v3662_v4  ;;  %v3713_v52 = vmul.f32 %v3662_v4, %v7560_v61 }
0x1b9f   :  { %v3684_v7 = vpop.permute.xlu2 %3683 }
0x1ba0   :  { %v3688_v36 = vmul.f32 %v3684_v7, %v3677_v14  ;;  %v3610_v7 = vmul.f32 %v7602_v56, %v7545_v20 }
0x1ba2   :  { %3693 = vrot.lane.b32.xlu0 %v3688_v36, %s5753_s2 }
0x1baf   :  { %v3682_v0 = vpop.permute.xlu1 %3681 }
0x1bb0   :  { %v3687_v2 = vmul.f32 %v3682_v0, %v3662_v4  ;;  %v3702_v0 = vsub.f32 1.0, %v3677_v14 }
0x1bb2   :  { %3691 = vrot.lane.b32.xlu2 %v3687_v2, %s5753_s2 }
0x1bc7   :  { %v3589_v39 = vpop.permute.xlu0 %3588 }
0x1bc8   :  { %v3594_v38 = vadd.f32 %v5280_v23, %v3589_v39 }
0x1bca   :  { %5632 = vtanh.f32 %v3594_v38 }
0x1bd0   :  { %v5633_v3 = vpop.eup %5632 }
0x1bd1   :  { %3602 = vrot.lane.b32.xlu1 %v5633_v3, %s5754_s5 }
0x1be7   :  { %v3591_v21 = vpop.permute.xlu1 %3590 }
0x1be8   :  { %v3595_v8 = vadd.f32 %v5281_v16, %v3591_v21  ;;  %v3598_v16 = vsub.f32 1.0, %v7602_v56 }
0x1bea   :  { %5634 = vtanh.f32 %v3595_v8 }
0x1bf0   :  { %v5635_v37 = vpop.eup %5634 }
0x1bf1   :  { %3604 = vrot.lane.b32.xlu2 %v5635_v37, %s5754_s5 }
0x1c0c   :  { %v3692_v53 = vpop.permute.xlu2 %3691 }
0x1c0d   :  { %v3697_v28 = vadd.f32 %v5284_v25, %v3692_v53  ;;  %v3599_v25 = vsub.f32 1.0, %v7611_v19 }
0x1c0f   :  { %5636 = vtanh.f32 %v3697_v28  ;;  %v7672_v28 = vld [vmem:[#allocation2 + $0x20] sm:$0xff]  }
0x1c14   :  { %v3694_v43 = vpop.permute.xlu0 %3693 }
0x1c15   :  { %v5637_v59 = vpop.eup %5636  ;;  %v3698_v23 = vadd.f32 %v5285_v60, %v3694_v43  ;;  %v5289_v43 = vunpack.c.h.bf16 %v7672_v28 }
0x1c16   :  { %3705 = vrot.lane.b32.xlu0 %v5637_v59, %s5754_s5 }
0x1c17   :  { %5638 = vtanh.f32 %v3698_v23 }
0x1c1d   :  { %v5639_v26 = vpop.eup %5638 }
0x1c1e   :  { %3707 = vrot.lane.b32.xlu1 %v5639_v26, %s5754_s5 }
0x1c43   :  { %v3603_v50 = vpop.permute.xlu1 %3602 }
0x1c44   :  { %v3608_v57 = vmul.f32 %v3603_v50, %v3598_v16  ;;  %v5288_v50 = vunpack.c.l.bf16 %v7672_v28 }
0x1c46   :  { %v3612_v45 = vadd.f32 %v3610_v7, %v3608_v57 }
0x1c48   :  { %v7637_v22 = vsel %vm1449_vm11, %v3612_v45, %v7545_v20  ;;  %v3714_v20 = vmul.f32 %v3677_v14, %v7565_v27 }
0x1c4b   :  { %v3605_v36 = vpop.permute.xlu2 %3604 }
0x1c4c   :  { %v3609_v60 = vmul.f32 %v3605_v36, %v3599_v25 }
0x1c4e   :  { %v3613_v15 = vadd.f32 %v3611_v42, %v3609_v60 }
0x1c50   :  { %v7642_v18 = vsel %vm8132_vm14, %v3613_v15, %v7550_v1 }
0x1c51   :  { %v3723_v56 = vpack.c.bf16 %v7642_v18, %v7637_v22 }
0x1c53   :  { %3725 = vrot.lane.b32.xlu2 %v3723_v56, %s5754_s5 }
0x1c88   :  { %v3706_v12 = vpop.permute.xlu0 %3705 }
0x1c89   :  { %v3711_v19 = vmul.f32 %v3706_v12, %v3701_v62 }
0x1c8b   :  { %v3715_v39 = vadd.f32 %v3713_v52, %v3711_v19 }
0x1c8d   :  { %v7652_v1 = vsel %vm8133_vm1, %v3715_v39, %v7560_v61 }
0x1c90   :  { %v3708_v2 = vpop.permute.xlu1 %3707 }
0x1c91   :  { %v3712_v38 = vmul.f32 %v3708_v2, %v3702_v0 }
0x1c93   :  { %v3716_v3 = vadd.f32 %v3714_v20, %v3712_v38 }
0x1c95   :  { %v7657_v21 = vsel %vm8134_vm4, %v3716_v3, %v7565_v27 }
0x1c96   :  { %v3826_v4 = vpack.c.bf16 %v7657_v21, %v7652_v1 }
0x1c98   :  { %3828 = vrot.lane.b32.xlu0 %v3826_v4, %s5754_s5 }
0x1cad   :  { %v3726_v8 = vpop.permute.xlu2 %3725 }
0x1cae   :  { %5059 = vmatmul.msk.bf16.vlgmr.msra.gmra.mxu2 %vm124_vm0, %v3726_v8 }
0x1caf   :  { %4156 = vmatpush.bf16.msra.mxu2 %v7472_v13 }
0x1cb3   :  { %4157 = vmatpush.bf16.msra.mxu2 %v7478_v31 }
0x1d0a   :  { %v3829_v14 = vpop.permute.xlu0 %3828 }
0x1d0b   :  { %5062 = vmatmul.msk.bf16.vlgmr.msra.gmra.mxu3 %vm124_vm0, %v3829_v14 }
0x1d0c   :  { %4259 = vmatpush.bf16.msra.mxu3 %v7485_v29 }
0x1d10   :  { %4260 = vmatpush.bf16.msra.mxu3 %v7578_v51 }
0x1d31   :  { %v3739_v61 = vpop.f32.mrf.mxu2 }
0x1d32   :  { %v3740_v27 = vadd.f32 %v7492_v58, %v3739_v61 }
0x1d34   :  { %3788 = vrot.lane.b32.xlu1 %v3740_v27, %s5753_s2  ;;  %v3746_v16 = vadd.f32 %v5288_v50, %v3740_v27 }
0x1d36   :  { %v5060_v7 = vmul.f32 -1.442695, %v3746_v16 }
0x1d39   :  { %v3741_v37 = vpop.f32.mrf.mxu2 }
0x1d3a   :  { %v3742_v53 = vadd.f32 %v7492_v58, %v3741_v37 }
0x1d3c   :  { %3790 = vrot.lane.b32.xlu2 %v3742_v53, %s5753_s2  ;;  %v3747_v59 = vadd.f32 %v5289_v43, %v3742_v53 }
0x1d3e   :  { %v5061_v23 = vmul.f32 -1.442695, %v3747_v59 }
0x1d40   :  { %5640 = vpow2.f32 %v5061_v23 }
0x1d46   :  { %v5641_v26 = vpop.eup %5640 }
0x1d47   :  { %v3755_v57 = vadd.f32 1.0, %v5641_v26 }
0x1d49   :  { %5642 = vrcp.f32 %v3755_v57  ;;  %v3782_v52 = vand.u32 2147483648, %v3755_v57  ;;  %vm3776_vm5 = vweird.f32 %v3755_v57  ;;  %v3780_v0 = vand.u32 2147483647, %v3755_v57 }
0x1d4a   :  { %5644 = vpow2.f32 %v5060_v7 }
0x1d4b   :  { %v3783_v20 = vor.u32 1.1754944e-38, %v3782_v52  ;;  %vm3781_vm9 = vcmp.eq.f32.partialorder %v3780_v0, 8.507059e+37 }
0x1d4f   :  { %v5643_v25 = vpop.eup %5642 }
0x1d50   :  { %v5645_v36 = vpop.eup %5644  ;;  %v3772_v45 = vmul.f32 %v5643_v25, %v3755_v57  ;;  %vm3777_vm15 = vweird.f32 %v5643_v25 }
0x1d51   :  { %v3754_v42 = vadd.f32 1.0, %v5645_v36  ;;  %vm3778_vm12 = vmor %vm3776_vm5, %vm3777_vm15 }
0x1d52   :  { %v3773_v60 = vsub.f32 1.0, %v3772_v45 }
0x1d53   :  { %5646 = vrcp.f32 %v3754_v42  ;;  %v3767_v53 = vand.u32 2147483648, %v3754_v42  ;;  %vm3761_vm14 = vweird.f32 %v3754_v42  ;;  %v3765_v59 = vand.u32 2147483647, %v3754_v42 }
0x1d54   :  { %v3774_v15 = vmul.f32 %v5643_v25, %v3773_v60 }
0x1d55   :  { %v3768_v26 = vor.u32 1.1754944e-38, %v3767_v53  ;;  %vm3766_vm4 = vcmp.eq.f32.partialorder %v3765_v59, 8.507059e+37 }
0x1d56   :  { %v3775_v62 = vadd.f32 %v5643_v25, %v3774_v15 }
0x1d58   :  { %v3779_v2 = vsel %vm3778_vm12, %v5643_v25, %v3775_v62  ;;  %v7692_v25 = vld [vmem:[#allocation3 + $0x18] sm:$0xff]  }
0x1d59   :  { %v5647_v19 = vpop.eup %5646  ;;  %v7682_v4 = vsel %vm3781_vm9, %v3783_v20, %v3779_v2  ;;  %v5292_v36 = vunpack.c.l.bf16 %v7692_v25 }
0x1d5a   :  { %v3757_v39 = vmul.f32 %v5647_v19, %v3754_v42  ;;  %vm3762_vm7 = vweird.f32 %v5647_v19  ;;  %v5293_v42 = vunpack.c.h.bf16 %v7692_v25 }
0x1d5b   :  { %vm3763_vm1 = vmor %vm3761_vm14, %vm3762_vm7 }
0x1d5c   :  { %v3758_v61 = vsub.f32 1.0, %v3757_v39 }
0x1d5e   :  { %v3759_v27 = vmul.f32 %v5647_v19, %v3758_v61 }
0x1d60   :  { %v3760_v37 = vadd.f32 %v5647_v19, %v3759_v27 }
0x1d62   :  { %v3764_v23 = vsel %vm3763_vm1, %v5647_v19, %v3760_v37 }
0x1d63   :  { %v7688_v57 = vsel %vm3766_vm4, %v3768_v26, %v3764_v23 }
0x1d8e   :  { %v3842_v56 = vpop.f32.mrf.mxu3 }
0x1d8f   :  { %v3843_v12 = vadd.f32 %v7593_v24, %v3842_v56 }
0x1d91   :  { %3891 = vrot.lane.b32.xlu0 %v3843_v12, %s5753_s2  ;;  %v3849_v45 = vadd.f32 %v5292_v36, %v3843_v12 }
0x1d93   :  { %v5063_v60 = vmul.f32 -1.442695, %v3849_v45 }
0x1d95   :  { %5648 = vpow2.f32 %v5063_v60 }
0x1d96   :  { %v3844_v38 = vpop.f32.mrf.mxu3  ;;  %v3791_v3 = vpop.permute.xlu2 %3790 }
0x1d97   :  { %v3845_v8 = vadd.f32 %v7593_v24, %v3844_v38  ;;  %v3795_v14 = vmul.f32 %v3791_v3, %v7682_v4 }
0x1d99   :  { %3800 = vrot.lane.b32.xlu0 %v3795_v14, %s5753_s2  ;;  %3893 = vrot.lane.b32.xlu1 %v3845_v8, %s5753_s2  ;;  %v3850_v15 = vadd.f32 %v5293_v42, %v3845_v8 }
0x1d9b   :  { %v5064_v56 = vmul.f32 -1.442695, %v3850_v15  ;;  %v5649_v62 = vpop.eup %5648 }
0x1d9c   :  { %v3857_v19 = vadd.f32 1.0, %v5649_v62 }
0x1d9d   :  { %5650 = vpow2.f32 %v5064_v56 }
0x1d9e   :  { %5652 = vrcp.f32 %v3857_v19  ;;  %v3870_v27 = vand.u32 2147483648, %v3857_v19  ;;  %vm3864_vm5 = vweird.f32 %v3857_v19  ;;  %v3868_v8 = vand.u32 2147483647, %v3857_v19 }
0x1da0   :  { %v3871_v59 = vor.u32 1.1754944e-38, %v3870_v27  ;;  %vm3869_vm9 = vcmp.eq.f32.partialorder %v3868_v8, 8.507059e+37  ;;  %v3808_v8 = vsub.f32 1.0, %v7688_v57 }
0x1da3   :  { %v5651_v52 = vpop.eup %5650 }
0x1da4   :  { %v3858_v0 = vadd.f32 1.0, %v5651_v52  ;;  %v5653_v2 = vpop.eup %5652 }
0x1da5   :  { %v3860_v39 = vmul.f32 %v5653_v2, %v3857_v19  ;;  %vm3865_vm15 = vweird.f32 %v5653_v2 }
0x1da6   :  { %v3789_v16 = vpop.permute.xlu1 %3788  ;;  %5654 = vrcp.f32 %v3858_v0  ;;  %vm3866_vm12 = vmor %vm3864_vm5, %vm3865_vm15  ;;  %v3885_v15 = vand.u32 2147483648, %v3858_v0  ;;  %vm3879_vm14 = vweird.f32 %v3858_v0  ;;  %v3883_v56 = vand.u32 2147483647, %v3858_v0 }
0x1da7   :  { %v3794_v7 = vmul.f32 %v3789_v16, %v7688_v57  ;;  %v3861_v20 = vsub.f32 1.0, %v3860_v39  ;;  %vm8135_vm15 = vcmp.eq.s32.totalorder %v6563_v5, 1  ;;  %vm8136_vm5 = vcmp.eq.s32.totalorder %v6578_v17, 1 }
0x1da8   :  { %v3886_v19 = vor.u32 1.1754944e-38, %v3885_v15  ;;  %vm3884_vm4 = vcmp.eq.f32.partialorder %v3883_v56, 8.507059e+37 }
0x1da9   :  { %3798 = vrot.lane.b32.xlu2 %v3794_v7, %s5753_s2  ;;  %v3862_v3 = vmul.f32 %v5653_v2, %v3861_v20 }
0x1dab   :  { %v3863_v12 = vadd.f32 %v5653_v2, %v3862_v3 }
0x1dac   :  { %v5655_v38 = vpop.eup %5654 }
0x1dad   :  { %v3875_v14 = vmul.f32 %v5655_v38, %v3858_v0  ;;  %v3867_v37 = vsel %vm3866_vm12, %v5653_v2, %v3863_v12  ;;  %vm3880_vm7 = vweird.f32 %v5655_v38  ;;  %vm8137_vm12 = vcmp.eq.s32.totalorder %v6610_v44, 1 }
0x1dae   :  { %v3872_v26 = vsel %vm3869_vm9, %v3871_v59, %v3867_v37  ;;  %vm3881_vm1 = vmor %vm3879_vm14, %vm3880_vm7 }
0x1daf   :  { %v3876_v61 = vsub.f32 1.0, %v3875_v14  ;;  %v3911_v15 = vsub.f32 1.0, %v3872_v26  ;;  %v3923_v56 = vmul.f32 %v3872_v26, %v7652_v1 }
0x1db1   :  { %v3877_v53 = vmul.f32 %v5655_v38, %v3876_v61 }
0x1db3   :  { %v3878_v60 = vadd.f32 %v5655_v38, %v3877_v53  ;;  %v3820_v53 = vmul.f32 %v7688_v57, %v7637_v22 }
0x1db5   :  { %v3882_v62 = vsel %vm3881_vm1, %v5655_v38, %v3878_v60 }
0x1db6   :  { %v3887_v2 = vsel %vm3884_vm4, %v3886_v19, %v3882_v62 }
0x1db7   :  { %v3912_v62 = vsub.f32 1.0, %v3887_v2 }
0x1e03   :  { %v3892_v23 = vpop.permute.xlu0 %3891  ;;  %v3799_v16 = vpop.permute.xlu2 %3798 }
0x1e04   :  { %v3897_v7 = vmul.f32 %v3892_v23, %v3872_v26  ;;  %v3804_v45 = vadd.f32 %v5288_v50, %v3799_v16  ;;  %v3821_v16 = vmul.f32 %v7682_v4, %v7642_v18 }
0x1e06   :  { %5656 = vtanh.f32 %v3804_v45  ;;  %3901 = vrot.lane.b32.xlu1 %v3897_v7, %s5753_s2 }
0x1e0b   :  { %v3801_v52 = vpop.permute.xlu0 %3800  ;;  %v3894_v39 = vpop.permute.xlu1 %3893 }
0x1e0c   :  { %v5657_v20 = vpop.eup %5656  ;;  %v3805_v3 = vadd.f32 %v5289_v43, %v3801_v52  ;;  %v3898_v50 = vmul.f32 %v3894_v39, %v3887_v2 }
0x1e0d   :  { %3812 = vrot.lane.b32.xlu0 %v5657_v20, %s5754_s5 }
0x1e0e   :  { %5658 = vtanh.f32 %v3805_v3  ;;  %3903 = vrot.lane.b32.xlu2 %v3898_v50, %s5753_s2 }
0x1e14   :  { %v5659_v14 = vpop.eup %5658 }
0x1e15   :  { %3814 = vrot.lane.b32.xlu1 %v5659_v14, %s5754_s5 }
0x1e68   :  { %v3904_v0 = vpop.permute.xlu2 %3903 }
0x1e69   :  { %v3908_v38 = vadd.f32 %v5293_v42, %v3904_v0  ;;  %v3809_v42 = vsub.f32 1.0, %v7682_v4 }
0x1e6b   :  { %5660 = vtanh.f32 %v3908_v38 }
0x1e71   :  { %v5661_v12 = vpop.eup %5660 }
0x1e72   :  { %3917 = vrot.lane.b32.xlu0 %v5661_v12, %s5754_s5 }
0x1e78   :  { %v3902_v61 = vpop.permute.xlu1 %3901 }
0x1e79   :  { %v3907_v28 = vadd.f32 %v5292_v36, %v3902_v61 }
0x1e7b   :  { %5662 = vtanh.f32 %v3907_v28 }
0x1e7f   :  { %v3813_v27 = vpop.permute.xlu0 %3812 }
0x1e80   :  { %v3818_v37 = vmul.f32 %v3813_v27, %v3808_v8 }
0x1e81   :  { %v5663_v43 = vpop.eup %5662 }
0x1e82   :  { %3915 = vrot.lane.b32.xlu2 %v5663_v43, %s5754_s5  ;;  %v3822_v23 = vadd.f32 %v3820_v53, %v3818_v37 }
0x1e84   :  { %v7719_v7 = vsel %vm8135_vm15, %v3822_v23, %v7637_v22  ;;  %v3924_v22 = vmul.f32 %v3887_v2, %v7657_v21 }
0x1e87   :  { %v3815_v59 = vpop.permute.xlu1 %3814 }
0x1e88   :  { %v3819_v25 = vmul.f32 %v3815_v59, %v3809_v42 }
0x1e8a   :  { %v3823_v36 = vadd.f32 %v3821_v16, %v3819_v25  ;;  %v7766_v16 = vld [vmem:[#allocation3 + $0x10] sm:$0xff]  }
0x1e8c   :  { %v7724_v45 = vsel %vm8136_vm5, %v3823_v36, %v7642_v18 }
0x1e8d   :  { %v3933_v57 = vpack.c.bf16 %v7724_v45, %v7719_v7 }
0x1e8f   :  { %3935 = vrot.lane.b32.xlu1 %v3933_v57, %s5754_s5  ;;  %v5300_v57 = vunpack.c.l.bf16 %v7766_v16 }
0x1edc   :  { %v3916_v60 = vpop.permute.xlu2 %3915 }
0x1edd   :  { %v3921_v4 = vmul.f32 %v3916_v60, %v3911_v15 }
0x1edf   :  { %v3925_v5 = vadd.f32 %v3923_v56, %v3921_v4 }
0x1ee1   :  { %v7734_v17 = vsel %vm1449_vm11, %v3925_v5, %v7652_v1 }
0x1ee4   :  { %v3918_v19 = vpop.permute.xlu0 %3917 }
0x1ee5   :  { %v3922_v52 = vmul.f32 %v3918_v19, %v3912_v62 }
0x1ee7   :  { %v3926_v39 = vadd.f32 %v3924_v22, %v3922_v52 }
0x1ee9   :  { %v7739_v18 = vsel %vm8137_vm12, %v3926_v39, %v7657_v21 }
0x1eea   :  { %v4036_v26 = vpack.c.bf16 %v7739_v18, %v7734_v17 }
0x1eec   :  { %4038 = vrot.lane.b32.xlu2 %v4036_v26, %s5754_s5 }
0x1f01   :  { %v3936_v20 = vpop.permute.xlu1 %3935 }
0x1f02   :  { %5065 = vmatmul.msk.bf16.vlgmr.msrb.gmra.mxu2 %vm124_vm0, %v3936_v20 }
0x1f03   :  { %4366 = vmatpush.bf16.msrb.mxu2 %v7472_v13  ;;  %v7754_v13 = vld [vmem:[#allocation2 + $0x28] sm:$0xff]  }
0x1f04   :  { %v5297_v14 = vunpack.c.h.bf16 %v7754_v13 }
0x1f07   :  { %4367 = vmatpush.bf16.msrb.mxu2 %v7478_v31  ;;  %v5296_v31 = vunpack.c.l.bf16 %v7754_v13 }
0x1f46   :  { %v4039_v10 = vpop.permute.xlu2 %4038 }
0x1f47   :  { %5068 = vmatmul.msk.bf16.vlgmr.msrb.gmra.mxu3 %vm124_vm0, %v4039_v10 }
0x1f48   :  { %4469 = vmatpush.bf16.msrb.mxu3 %v7485_v29 }
0x1f4c   :  { %4470 = vmatpush.bf16.msrb.mxu3 %v7578_v51 }
0x1f85   :  { %v3949_v44 = vpop.f32.mrf.mxu2 }
0x1f86   :  { %v3950_v1 = vadd.f32 %v7492_v58, %v3949_v44 }
0x1f88   :  { %3998 = vrot.lane.b32.xlu0 %v3950_v1, %s5753_s2  ;;  %v3956_v3 = vadd.f32 %v5296_v31, %v3950_v1 }
0x1f8a   :  { %v5066_v50 = vmul.f32 -1.442695, %v3956_v3 }
0x1f8c   :  { %5664 = vpow2.f32 %v5066_v50 }
0x1f8d   :  { %v3951_v21 = vpop.f32.mrf.mxu2 }
0x1f8e   :  { %v3952_v2 = vadd.f32 %v7492_v58, %v3951_v21 }
0x1f90   :  { %4000 = vrot.lane.b32.xlu1 %v3952_v2, %s5753_s2  ;;  %v3957_v58 = vadd.f32 %v5297_v14, %v3952_v2 }
0x1f92   :  { %v5067_v12 = vmul.f32 -1.442695, %v3957_v58  ;;  %v5665_v61 = vpop.eup %5664  ;;  %v5301_v58 = vunpack.c.h.bf16 %v7766_v16 }
0x1f93   :  { %v3964_v28 = vadd.f32 1.0, %v5665_v61 }
0x1f94   :  { %5666 = vpow2.f32 %v5067_v12 }
0x1f95   :  { %5668 = vrcp.f32 %v3964_v28  ;;  %v3977_v60 = vand.u32 2147483648, %v3964_v28  ;;  %vm3971_vm9 = vweird.f32 %v3964_v28  ;;  %v3975_v15 = vand.u32 2147483647, %v3964_v28 }
0x1f97   :  { %v3978_v19 = vor.u32 1.1754944e-38, %v3977_v60  ;;  %vm3976_vm14 = vcmp.eq.f32.partialorder %v3975_v15, 8.507059e+37 }
0x1f9a   :  { %v5667_v43 = vpop.eup %5666 }
0x1f9b   :  { %v3965_v27 = vadd.f32 1.0, %v5667_v43  ;;  %v5669_v8 = vpop.eup %5668 }
0x1f9c   :  { %v3967_v37 = vmul.f32 %v5669_v8, %v3964_v28  ;;  %vm3972_vm11 = vweird.f32 %v5669_v8 }
0x1f9d   :  { %5670 = vrcp.f32 %v3965_v27  ;;  %vm3973_vm7 = vmor %vm3971_vm9, %vm3972_vm11  ;;  %v3992_v20 = vand.u32 2147483648, %v3965_v27  ;;  %vm3986_vm4 = vweird.f32 %v3965_v27  ;;  %v3990_v10 = vand.u32 2147483647, %v3965_v27 }
0x1f9e   :  { %v3968_v53 = vsub.f32 1.0, %v3967_v37 }
0x1f9f   :  { %v3993_v1 = vor.u32 1.1754944e-38, %v3992_v20  ;;  %vm3991_vm5 = vcmp.eq.f32.partialorder %v3990_v10, 8.507059e+37 }
0x1fa0   :  { %v3969_v59 = vmul.f32 %v5669_v8, %v3968_v53 }
0x1fa2   :  { %v3970_v25 = vadd.f32 %v5669_v8, %v3969_v59 }
0x1fa3   :  { %v5671_v42 = vpop.eup %5670 }
0x1fa4   :  { %v3982_v23 = vmul.f32 %v5671_v42, %v3965_v27  ;;  %v3974_v56 = vsel %vm3973_vm7, %v5669_v8, %v3970_v25  ;;  %vm3987_vm1 = vweird.f32 %v5671_v42 }
0x1fa5   :  { %v7771_v22 = vsel %vm3976_vm14, %v3978_v19, %v3974_v56  ;;  %vm3988_vm15 = vmor %vm3986_vm4, %vm3987_vm1 }
0x1fa6   :  { %v3983_v36 = vsub.f32 1.0, %v3982_v23 }
0x1fa8   :  { %v3984_v62 = vmul.f32 %v5671_v42, %v3983_v36 }
0x1faa   :  { %v3985_v26 = vadd.f32 %v5671_v42, %v3984_v62 }
0x1fac   :  { %v3989_v44 = vsel %vm3988_vm15, %v5671_v42, %v3985_v26 }
0x1fad   :  { %v7775_v2 = vsel %vm3991_vm5, %v3993_v1, %v3989_v44 }
0x1fae   :  { %v4019_v16 = vsub.f32 1.0, %v7775_v2 }
0x1fca   :  { %v4052_v29 = vpop.f32.mrf.mxu3 }
0x1fcb   :  { %v4053_v51 = vadd.f32 %v7593_v24, %v4052_v29 }
0x1fcd   :  { %4101 = vrot.lane.b32.xlu2 %v4053_v51, %s5753_s2  ;;  %v4059_v4 = vadd.f32 %v5300_v57, %v4053_v51 }
0x1fcf   :  { %v5069_v5 = vmul.f32 -1.442695, %v4059_v4 }
0x1fd1   :  { %5672 = vpow2.f32 %v5069_v5 }
0x1fd2   :  { %v4054_v0 = vpop.f32.mrf.mxu3 }
0x1fd3   :  { %v4055_v38 = vadd.f32 %v7593_v24, %v4054_v0 }
0x1fd5   :  { %4103 = vrot.lane.b32.xlu0 %v4055_v38, %s5753_s2  ;;  %v4060_v12 = vadd.f32 %v5301_v58, %v4055_v38 }
0x1fd7   :  { %v5673_v29 = vpop.eup %5672  ;;  %v5070_v28 = vmul.f32 -1.442695, %v4060_v12 }
0x1fd8   :  { %v4067_v51 = vadd.f32 1.0, %v5673_v29 }
0x1fda   :  { %5674 = vrcp.f32 %v4067_v51  ;;  %v4080_v8 = vand.u32 2147483648, %v4067_v51  ;;  %vm4074_vm11 = vweird.f32 %v4067_v51  ;;  %v4078_v37 = vand.u32 2147483647, %v4067_v51 }
0x1fdb   :  { %5676 = vpow2.f32 %v5070_v28 }
0x1fdc   :  { %v4081_v59 = vor.u32 1.1754944e-38, %v4080_v8  ;;  %vm4079_vm7 = vcmp.eq.f32.partialorder %v4078_v37, 8.507059e+37  ;;  %v4031_v37 = vmul.f32 %v7775_v2, %v7724_v45 }
0x1fe0   :  { %v5675_v50 = vpop.eup %5674 }
0x1fe1   :  { %v4070_v0 = vmul.f32 %v5675_v50, %v4067_v51  ;;  %vm4075_vm12 = vweird.f32 %v5675_v50  ;;  %v5677_v53 = vpop.eup %5676 }
0x1fe2   :  { %vm4076_vm9 = vmor %vm4074_vm11, %vm4075_vm12  ;;  %v4068_v23 = vadd.f32 1.0, %v5677_v53 }
0x1fe3   :  { %v4071_v61 = vsub.f32 1.0, %v4070_v0 }
0x1fe4   :  { %5678 = vrcp.f32 %v4068_v23  ;;  %v4095_v19 = vand.u32 2147483648, %v4068_v23  ;;  %vm4089_vm1 = vweird.f32 %v4068_v23  ;;  %v4093_v5 = vand.u32 2147483647, %v4068_v23 }
0x1fe5   :  { %v4072_v43 = vmul.f32 %v5675_v50, %v4071_v61 }
0x1fe6   :  { %vm4094_vm15 = vcmp.eq.f32.partialorder %v4093_v5, 8.507059e+37 }
0x1fe7   :  { %v4073_v27 = vadd.f32 %v5675_v50, %v4072_v43 }
0x1fe9   :  { %v4077_v42 = vsel %vm4076_vm9, %v5675_v50, %v4073_v27  ;;  %v4030_v27 = vmul.f32 %v7771_v22, %v7719_v7 }
0x1fea   :  { %v4082_v36 = vsel %vm4079_vm7, %v4081_v59, %v4077_v42  ;;  %v5679_v38 = vpop.eup %5678 }
0x1feb   :  { %v4085_v15 = vmul.f32 %v5679_v38, %v4068_v23  ;;  %vm4090_vm14 = vweird.f32 %v5679_v38 }
0x1fec   :  { %vm4091_vm4 = vmor %vm4089_vm1, %vm4090_vm14 }
0x1fed   :  { %v4086_v4 = vsub.f32 1.0, %v4085_v15 }
0x1fef   :  { %v4087_v56 = vmul.f32 %v5679_v38, %v4086_v4 }
0x1ff1   :  { %v4088_v62 = vadd.f32 %v5679_v38, %v4087_v56 }
0x1ffa   :  { %v3999_v52 = vpop.permute.xlu0 %3998 }
0x1ffb   :  { %v4004_v39 = vmul.f32 %v3999_v52, %v7771_v22  ;;  %v4092_v52 = vsel %vm4091_vm4, %v5679_v38, %v4088_v62 }
0x1ffd   :  { %4008 = vrot.lane.b32.xlu1 %v4004_v39, %s5753_s2  ;;  %v4096_v39 = vor.u32 1.1754944e-38, %v4095_v19 }
0x1fff   :  { %v4097_v20 = vsel %vm4094_vm15, %v4096_v39, %v4092_v52  ;;  %v7837_v52 = vld [vmem:[#allocation2 + $0x30] sm:$0xff]  }
0x2000   :  { %v4122_v38 = vsub.f32 1.0, %v4097_v20  ;;  %v5304_v39 = vunpack.c.l.bf16 %v7837_v52 }
0x2002   :  { %v4001_v21 = vpop.permute.xlu1 %4000 }
0x2003   :  { %v4005_v3 = vmul.f32 %v4001_v21, %v7775_v2 }
0x2005   :  { %4010 = vrot.lane.b32.xlu2 %v4005_v3, %s5753_s2 }
0x2027   :  { %v4102_v25 = vpop.permute.xlu2 %4101 }
0x2028   :  { %v4107_v60 = vmul.f32 %v4102_v25, %v4082_v36  ;;  %v4121_v25 = vsub.f32 1.0, %v4082_v36 }
0x202a   :  { %4111 = vrot.lane.b32.xlu0 %v4107_v60, %s5753_s2  ;;  %v4133_v60 = vmul.f32 %v4082_v36, %v7734_v17 }
0x2047   :  { %v4104_v26 = vpop.permute.xlu0 %4103 }
0x2048   :  { %v4108_v10 = vmul.f32 %v4104_v26, %v4097_v20 }
0x204a   :  { %4113 = vrot.lane.b32.xlu1 %v4108_v10, %s5753_s2 }
0x205f   :  { %v4011_v44 = vpop.permute.xlu2 %4010 }
0x2060   :  { %v4015_v1 = vadd.f32 %v5297_v14, %v4011_v44 }
0x2062   :  { %5680 = vtanh.f32 %v4015_v1 }
0x2068   :  { %v5681_v21 = vpop.eup %5680 }
0x2069   :  { %4024 = vrot.lane.b32.xlu0 %v5681_v21, %s5754_s5 }
0x206f   :  { %v4009_v3 = vpop.permute.xlu1 %4008 }
0x2070   :  { %v4014_v29 = vadd.f32 %v5296_v31, %v4009_v3  ;;  %v4018_v31 = vsub.f32 1.0, %v7771_v22 }
0x2072   :  { %5682 = vtanh.f32 %v4014_v29  ;;  %v5305_v29 = vunpack.c.h.bf16 %v7837_v52 }
0x2078   :  { %v5683_v51 = vpop.eup %5682 }
0x2079   :  { %4022 = vrot.lane.b32.xlu2 %v5683_v51, %s5754_s5 }
0x209c   :  { %v4112_v50 = vpop.permute.xlu0 %4111 }
0x209d   :  { %v4117_v0 = vadd.f32 %v5300_v57, %v4112_v50 }
0x209f   :  { %5684 = vtanh.f32 %v4117_v0 }
0x20a5   :  { %v5685_v12 = vpop.eup %5684 }
0x20a6   :  { %4125 = vrot.lane.b32.xlu1 %v5685_v12, %s5754_s5 }
0x20bc   :  { %v4114_v14 = vpop.permute.xlu1 %4113 }
0x20bd   :  { %v4118_v61 = vadd.f32 %v5301_v58, %v4114_v14 }
0x20bf   :  { %5686 = vtanh.f32 %v4118_v61 }
0x20c5   :  { %v5687_v28 = vpop.eup %5686 }
0x20c6   :  { %4127 = vrot.lane.b32.xlu2 %v5687_v28, %s5754_s5 }
0x20d3   :  { %v4023_v13 = vpop.permute.xlu2 %4022 }
0x20d4   :  { %v4028_v43 = vmul.f32 %v4023_v13, %v4018_v31 }
0x20d6   :  { %v4032_v8 = vadd.f32 %v4030_v27, %v4028_v43 }
0x20d8   :  { %v7801_v42 = vsel %vm1173_vm13, %v4032_v8, %v7719_v7  ;;  %v4134_v7 = vmul.f32 %v4097_v20, %v7739_v18 }
0x20db   :  { %v4025_v57 = vpop.permute.xlu0 %4024 }
0x20dc   :  { %v4029_v53 = vmul.f32 %v4025_v57, %v4019_v16 }
0x20de   :  { %v4033_v58 = vadd.f32 %v4031_v37, %v4029_v53 }
0x20e0   :  { %v7806_v59 = vsel %vm1174_vm2, %v4033_v58, %v7724_v45 }
0x20e1   :  { %v4143_v22 = vpack.c.bf16 %v7806_v59, %v7801_v42 }
0x20e3   :  { %4145 = vrot.lane.b32.xlu0 %v4143_v22, %s5754_s5 }
0x2118   :  { %v4126_v23 = vpop.permute.xlu1 %4125 }
0x2119   :  { %v4131_v2 = vmul.f32 %v4126_v23, %v4121_v25 }
0x211b   :  { %v4135_v6 = vadd.f32 %v4133_v60, %v4131_v2  ;;  %v7853_v2 = vld [vmem:[#allocation3 + $0x8] sm:$0xff]  }
0x211d   :  { %v7816_v30 = vsel %vm1159_vm6, %v4135_v6, %v7734_v17 }
0x2120   :  { %v4128_v15 = vpop.permute.xlu2 %4127 }
0x2121   :  { %v4132_v4 = vmul.f32 %v4128_v15, %v4122_v38  ;;  %v5309_v38 = vunpack.c.h.bf16 %v7853_v2 }
0x2123   :  { %v4136_v56 = vadd.f32 %v4134_v7, %v4132_v4 }
0x2125   :  { %v7821_v45 = vsel %vm1160_vm8, %v4136_v56, %v7739_v18 }
0x2126   :  { %v4246_v36 = vpack.c.bf16 %v7821_v45, %v7816_v30 }
0x2128   :  { %4248 = vrot.lane.b32.xlu1 %v4246_v36, %s5754_s5 }
0x2155   :  { %v4146_v62 = vpop.permute.xlu0 %4145 }
0x2156   :  { %5071 = vmatmul.msk.bf16.vlgmr.msra.gmra.mxu2 %vm124_vm0, %v4146_v62 }
0x219a   :  { %v4249_v19 = vpop.permute.xlu1 %4248 }
0x219b   :  { %5074 = vmatmul.msk.bf16.vlgmr.msra.gmra.mxu3 %vm124_vm0, %v4249_v19 }
0x21d9   :  { %v4159_v5 = vpop.f32.mrf.mxu2 }
0x21da   :  { %v4160_v54 = vadd.f32 %v7831_v40, %v4159_v5 }
0x21dc   :  { %4208 = vrot.lane.b32.xlu2 %v4160_v54, %s5753_s2  ;;  %v4166_v26 = vadd.f32 %v5304_v39, %v4160_v54 }
0x21de   :  { %v5072_v20 = vmul.f32 -1.442695, %v4166_v26 }
0x21e0   :  { %5688 = vpow2.f32 %v5072_v20 }
0x21e1   :  { %v4161_v17 = vpop.f32.mrf.mxu2 }
0x21e2   :  { %v4162_v18 = vadd.f32 %v7831_v40, %v4161_v17  ;;  %v5308_v17 = vunpack.c.l.bf16 %v7853_v2 }
0x21e4   :  { %4210 = vrot.lane.b32.xlu0 %v4162_v18, %s5753_s2  ;;  %v4167_v50 = vadd.f32 %v5305_v29, %v4162_v18 }
0x21e6   :  { %v5689_v10 = vpop.eup %5688  ;;  %v5073_v61 = vmul.f32 -1.442695, %v4167_v50 }
0x21e7   :  { %v4174_v44 = vadd.f32 1.0, %v5689_v10 }
0x21e9   :  { %5690 = vrcp.f32 %v4174_v44  ;;  %v4187_v31 = vand.u32 2147483648, %v4174_v44  ;;  %vm4181_vm2 = vweird.f32 %v4174_v44  ;;  %v4185_v43 = vand.u32 2147483647, %v4174_v44 }
0x21ea   :  { %5692 = vpow2.f32 %v5073_v61 }
0x21eb   :  { %v4188_v57 = vor.u32 1.1754944e-38, %v4187_v31  ;;  %vm4186_vm8 = vcmp.eq.f32.partialorder %v4185_v43, 8.507059e+37 }
0x21ef   :  { %v5691_v3 = vpop.eup %5690 }
0x21f0   :  { %v4177_v51 = vmul.f32 %v5691_v3, %v4174_v44  ;;  %vm4182_vm13 = vweird.f32 %v5691_v3  ;;  %v5693_v27 = vpop.eup %5692 }
0x21f1   :  { %vm4183_vm6 = vmor %vm4181_vm2, %vm4182_vm13  ;;  %v4175_v8 = vadd.f32 1.0, %v5693_v27 }
0x21f2   :  { %v4178_v14 = vsub.f32 1.0, %v4177_v51 }
0x21f3   :  { %5694 = vrcp.f32 %v4175_v8  ;;  %v4202_v15 = vand.u32 2147483648, %v4175_v8  ;;  %vm4196_vm12 = vweird.f32 %v4175_v8  ;;  %v4200_v6 = vand.u32 2147483647, %v4175_v8 }
0x21f4   :  { %v4179_v28 = vmul.f32 %v5691_v3, %v4178_v14 }
0x21f5   :  { %v4203_v56 = vor.u32 1.1754944e-38, %v4202_v15  ;;  %vm4201_vm9 = vcmp.eq.f32.partialorder %v4200_v6, 8.507059e+37 }
0x21f6   :  { %v4180_v13 = vadd.f32 %v5691_v3, %v4179_v28 }
0x21f8   :  { %v4184_v16 = vsel %vm4183_vm6, %v5691_v3, %v4180_v13 }
0x21f9   :  { %v7849_v53 = vsel %vm4186_vm8, %v4188_v57, %v4184_v16  ;;  %v5695_v58 = vpop.eup %5694  ;;  %vm8138_vm8 = vcmp.eq.s32.totalorder %v6262_v63, 1 }
0x21fa   :  { %v4192_v22 = vmul.f32 %v5695_v58, %v4175_v8  ;;  %vm4197_vm5 = vweird.f32 %v5695_v58 }
0x21fb   :  { %vm4198_vm11 = vmor %vm4196_vm12, %vm4197_vm5  ;;  %vm8139_vm5 = vcmp.eq.s32.totalorder %v6277_v49, 1  ;;  %vm8140_vm12 = vcmp.eq.s32.totalorder %v6314_v34, 1 }
0x21fc   :  { %v4193_v23 = vsub.f32 1.0, %v4192_v22 }
0x21fe   :  { %v4194_v25 = vmul.f32 %v5695_v58, %v4193_v23 }
0x2200   :  { %v4195_v60 = vadd.f32 %v5695_v58, %v4194_v25 }
0x2202   :  { %v4199_v4 = vsel %vm4198_vm11, %v5695_v58, %v4195_v60 }
0x2203   :  { %v7858_v19 = vsel %vm4201_vm9, %v4203_v56, %v4199_v4 }
0x2204   :  { %v4241_v2 = vmul.f32 %v7858_v19, %v7806_v59 }
0x221e   :  { %v4262_v1 = vpop.f32.mrf.mxu3 }
0x221f   :  { %v4263_v21 = vadd.f32 %v7593_v24, %v4262_v1 }
0x2221   :  { %4311 = vrot.lane.b32.xlu1 %v4263_v21, %s5753_s2  ;;  %v4269_v18 = vadd.f32 %v5308_v17, %v4263_v21 }
0x2223   :  { %v5075_v20 = vmul.f32 -1.442695, %v4269_v18 }
0x2226   :  { %v4264_v0 = vpop.f32.mrf.mxu3 }
0x2227   :  { %v4265_v12 = vadd.f32 %v7593_v24, %v4264_v0 }
0x2229   :  { %4313 = vrot.lane.b32.xlu2 %v4265_v12, %s5753_s2  ;;  %v4270_v7 = vadd.f32 %v5309_v38, %v4265_v12 }
0x222b   :  { %v5076_v36 = vmul.f32 -1.442695, %v4270_v7 }
0x222d   :  { %5696 = vpow2.f32 %v5076_v36 }
0x2233   :  { %v5697_v54 = vpop.eup %5696 }
0x2234   :  { %v4278_v26 = vadd.f32 1.0, %v5697_v54 }
0x2236   :  { %v4209_v37 = vpop.permute.xlu2 %4208  ;;  %5698 = vrcp.f32 %v4278_v26  ;;  %v4305_v14 = vand.u32 2147483648, %v4278_v26  ;;  %vm4299_vm14 = vweird.f32 %v4278_v26  ;;  %v4303_v61 = vand.u32 2147483647, %v4278_v26 }
0x2237   :  { %v4214_v24 = vmul.f32 %v4209_v37, %v7849_v53  ;;  %5700 = vpow2.f32 %v5075_v20 }
0x2238   :  { %v4306_v13 = vor.u32 1.1754944e-38, %v4305_v14  ;;  %vm4304_vm4 = vcmp.eq.f32.partialorder %v4303_v61, 8.507059e+37 }
0x2239   :  { %4218 = vrot.lane.b32.xlu0 %v4214_v24, %s5753_s2 }
0x223c   :  { %v5699_v10 = vpop.eup %5698 }
0x223d   :  { %v5701_v44 = vpop.eup %5700  ;;  %v4295_v1 = vmul.f32 %v5699_v10, %v4278_v26  ;;  %vm4300_vm7 = vweird.f32 %v5699_v10 }
0x223e   :  { %v4277_v3 = vadd.f32 1.0, %v5701_v44  ;;  %vm4301_vm1 = vmor %vm4299_vm14, %vm4300_vm7 }
0x223f   :  { %v4296_v51 = vsub.f32 1.0, %v4295_v1 }
0x2240   :  { %5702 = vrcp.f32 %v4277_v3  ;;  %v4290_v37 = vand.u32 2147483648, %v4277_v3  ;;  %vm4284_vm13 = vweird.f32 %v4277_v3  ;;  %v4288_v24 = vand.u32 2147483647, %v4277_v3 }
0x2241   :  { %v4297_v50 = vmul.f32 %v5699_v10, %v4296_v51 }
0x2242   :  { %v4291_v22 = vor.u32 1.1754944e-38, %v4290_v37  ;;  %vm4289_vm6 = vcmp.eq.f32.partialorder %v4288_v24, 8.507059e+37 }
0x2243   :  { %v4298_v0 = vadd.f32 %v5699_v10, %v4297_v50 }
0x2245   :  { %v4302_v28 = vsel %vm4301_vm1, %v5699_v10, %v4298_v0  ;;  %v4240_v10 = vmul.f32 %v7849_v53, %v7801_v42 }
0x2246   :  { %v5703_v12 = vpop.eup %5702  ;;  %v4307_v31 = vsel %vm4304_vm4, %v4306_v13, %v4302_v28 }
0x2247   :  { %v4280_v21 = vmul.f32 %v5703_v12, %v4277_v3  ;;  %vm4285_vm15 = vweird.f32 %v5703_v12  ;;  %v4332_v61 = vsub.f32 1.0, %v4307_v31 }
0x2248   :  { %vm4286_vm2 = vmor %vm4284_vm13, %vm4285_vm15 }
0x2249   :  { %v4281_v16 = vsub.f32 1.0, %v4280_v21 }
0x224b   :  { %v4282_v57 = vmul.f32 %v5703_v12, %v4281_v16 }
0x224d   :  { %v4283_v8 = vadd.f32 %v5703_v12, %v4282_v57 }
0x224f   :  { %v4287_v58 = vsel %vm4286_vm2, %v5703_v12, %v4283_v8 }
0x2250   :  { %v4292_v25 = vsel %vm4289_vm6, %v4291_v22, %v4287_v58 }
0x2251   :  { %v4331_v12 = vsub.f32 1.0, %v4292_v25  ;;  %v4343_v14 = vmul.f32 %v4292_v25, %v7816_v30 }
0x2256   :  { %v4211_v62 = vpop.permute.xlu0 %4210 }
0x2257   :  { %v4215_v5 = vmul.f32 %v4211_v62, %v7858_v19 }
0x2259   :  { %4220 = vrot.lane.b32.xlu1 %v4215_v5, %s5753_s2 }
0x2283   :  { %v4314_v43 = vpop.permute.xlu2 %4313 }
0x2284   :  { %v4318_v27 = vmul.f32 %v4314_v43, %v4307_v31 }
0x2286   :  { %4323 = vrot.lane.b32.xlu0 %v4318_v27, %s5753_s2 }
0x2293   :  { %v4312_v23 = vpop.permute.xlu1 %4311 }
0x2294   :  { %v4317_v60 = vmul.f32 %v4312_v23, %v4292_v25 }
0x2296   :  { %4321 = vrot.lane.b32.xlu2 %v4317_v60, %s5753_s2 }
0x22ab   :  { %v4219_v15 = vpop.permute.xlu0 %4218 }
0x22ac   :  { %v4224_v6 = vadd.f32 %v5304_v39, %v4219_v15 }
0x22ae   :  { %5704 = vtanh.f32 %v4224_v6 }
0x22b4   :  { %v5705_v7 = vpop.eup %5704 }
0x22b5   :  { %4232 = vrot.lane.b32.xlu1 %v5705_v7, %s5754_s5 }
0x22cb   :  { %v4221_v4 = vpop.permute.xlu1 %4220 }
0x22cc   :  { %v4225_v56 = vadd.f32 %v5305_v29, %v4221_v4  ;;  %v4228_v29 = vsub.f32 1.0, %v7849_v53 }
0x22ce   :  { %5706 = vtanh.f32 %v4225_v56 }
0x22d4   :  { %v5707_v36 = vpop.eup %5706 }
0x22d5   :  { %4234 = vrot.lane.b32.xlu2 %v5707_v36, %s5754_s5  ;;  %v5751_v36 = vld [vmem:[%s8063_s17] ss:$0 sm:$0xff]  ;;  %s5755_s17 = smov 32  }
0x22f0   :  { %v4322_v62 = vpop.permute.xlu2 %4321 }
0x22f1   :  { %v4327_v5 = vadd.f32 %v5308_v17, %v4322_v62  ;;  %v4229_v17 = vsub.f32 1.0, %v7858_v19 }
0x22f3   :  { %5708 = vtanh.f32 %v4327_v5 }
0x22f8   :  { %v4324_v54 = vpop.permute.xlu0 %4323 }
0x22f9   :  { %v5709_v18 = vpop.eup %5708  ;;  %v4328_v39 = vadd.f32 %v5309_v38, %v4324_v54 }
0x22fa   :  { %4335 = vrot.lane.b32.xlu0 %v5709_v18, %s5754_s5 }
0x22fb   :  { %5710 = vtanh.f32 %v4328_v39 }
0x2301   :  { %v5711_v26 = vpop.eup %5710 }
0x2302   :  { %4337 = vrot.lane.b32.xlu1 %v5711_v26, %s5754_s5 }
0x2327   :  { %v4233_v52 = vpop.permute.xlu1 %4232 }
0x2328   :  { %v4238_v20 = vmul.f32 %v4233_v52, %v4228_v29 }
0x232a   :  { %v4242_v1 = vadd.f32 %v4240_v10, %v4238_v20 }
0x232c   :  { %v7884_v51 = vsel %vm8138_vm8, %v4242_v1, %v7801_v42  ;;  %v4344_v42 = vmul.f32 %v4307_v31, %v7821_v45 }
0x232f   :  { %v4235_v44 = vpop.permute.xlu2 %4234 }
0x2330   :  { %v4239_v38 = vmul.f32 %v4235_v44, %v4229_v17 }
0x2332   :  { %v4243_v3 = vadd.f32 %v4241_v2, %v4239_v38 }
0x2334   :  { %v7889_v50 = vsel %vm8139_vm5, %v4243_v3, %v7806_v59 }
0x2335   :  { %v4353_v53 = vpack.c.bf16 %v7889_v50, %v7884_v51 }
0x2337   :  { %4355 = vrot.lane.b32.xlu2 %v4353_v53, %s5754_s5 }
0x236c   :  { %v4336_v0 = vpop.permute.xlu0 %4335 }
0x236d   :  { %v4341_v19 = vmul.f32 %v4336_v0, %v4331_v12 }
0x236f   :  { %v4345_v63 = vadd.f32 %v4343_v14, %v4341_v19 }
0x2371   :  { %v7899_v49 = vsel %vm869_vm3, %v4345_v63, %v7816_v30  ;;  %v7936_v63 = vld [vmem:[#allocation3] sm:$0xff]  }
0x2374   :  { %v4338_v28 = vpop.permute.xlu1 %4337 }
0x2375   :  { %v4342_v21 = vmul.f32 %v4338_v28, %v4332_v61 }
0x2377   :  { %v4346_v13 = vadd.f32 %v4344_v42, %v4342_v21  ;;  %v5316_v42 = vunpack.c.l.bf16 %v7936_v63 }
0x2379   :  { %v7904_v59 = vsel %vm8140_vm12, %v4346_v13, %v7821_v45  ;;  %v7915_v45 = vld [vmem:[#allocation2 + $0x38] sm:$0xff]  }
0x237a   :  { %v4456_v43 = vpack.c.bf16 %v7904_v59, %v7899_v49  ;;  %v5313_v57 = vunpack.c.h.bf16 %v7915_v45  ;;  %v5312_v58 = vunpack.c.l.bf16 %v7915_v45 }
0x237c   :  { %4458 = vrot.lane.b32.xlu0 %v4456_v43, %s5754_s5  ;;  %v5317_v43 = vunpack.c.h.bf16 %v7936_v63 }
0x2391   :  { %v4356_v27 = vpop.permute.xlu2 %4355 }
0x2392   :  { %5077 = vmatmul.msk.bf16.vlgmr.msrb.gmra.mxu2 %vm124_vm0, %v4356_v27 }
0x23ee   :  { %v4459_v31 = vpop.permute.xlu0 %4458 }
0x23ef   :  { %5080 = vmatmul.msk.bf16.vlgmr.msrb.gmra.mxu3 %vm124_vm0, %v4459_v31 }
0x2415   :  { %v4369_v16 = vpop.f32.mrf.mxu2 }
0x2416   :  { %v4370_v32 = vadd.f32 %v7831_v40, %v4369_v16 }
0x2418   :  { %4418 = vrot.lane.b32.xlu1 %v4370_v32, %s5753_s2  ;;  %v4376_v22 = vadd.f32 %v5312_v58, %v4370_v32 }
0x241a   :  { %v5078_v25 = vmul.f32 -1.442695, %v4376_v22 }
0x241d   :  { %v4371_v30 = vpop.f32.mrf.mxu2 }
0x241e   :  { %v4372_v34 = vadd.f32 %v7831_v40, %v4371_v30 }
0x2420   :  { %4420 = vrot.lane.b32.xlu2 %v4372_v34, %s5753_s2  ;;  %v4377_v8 = vadd.f32 %v5313_v57, %v4372_v34 }
0x2422   :  { %v5079_v37 = vmul.f32 -1.442695, %v4377_v8 }
0x2424   :  { %5712 = vpow2.f32 %v5079_v37 }
0x242a   :  { %v5713_v24 = vpop.eup %5712 }
0x242b   :  { %v4385_v23 = vadd.f32 1.0, %v5713_v24 }
0x242d   :  { %5714 = vrcp.f32 %v4385_v23  ;;  %v4412_v18 = vand.u32 2147483648, %v4385_v23  ;;  %vm4406_vm11 = vweird.f32 %v4385_v23  ;;  %v4410_v39 = vand.u32 2147483647, %v4385_v23 }
0x242e   :  { %5716 = vpow2.f32 %v5078_v25 }
0x242f   :  { %v4413_v29 = vor.u32 1.1754944e-38, %v4412_v18  ;;  %vm4411_vm7 = vcmp.eq.f32.partialorder %v4410_v39, 8.507059e+37 }
0x2433   :  { %v5715_v40 = vpop.eup %5714 }
0x2434   :  { %v5717_v60 = vpop.eup %5716  ;;  %v4402_v15 = vmul.f32 %v5715_v40, %v4385_v23  ;;  %vm4407_vm3 = vweird.f32 %v5715_v40 }
0x2435   :  { %v4384_v6 = vadd.f32 1.0, %v5717_v60  ;;  %vm4408_vm9 = vmor %vm4406_vm11, %vm4407_vm3 }
0x2436   :  { %v4403_v7 = vsub.f32 1.0, %v4402_v15 }
0x2437   :  { %5718 = vrcp.f32 %v4384_v6  ;;  %v4397_v53 = vand.u32 2147483648, %v4384_v6  ;;  %vm4391_vm1 = vweird.f32 %v4384_v6  ;;  %v4395_v0 = vand.u32 2147483647, %v4384_v6 }
0x2438   :  { %v4404_v4 = vmul.f32 %v5715_v40, %v4403_v7 }
0x2439   :  { %v4398_v19 = vor.u32 1.1754944e-38, %v4397_v53  ;;  %vm4396_vm15 = vcmp.eq.f32.partialorder %v4395_v0, 8.507059e+37 }
0x243a   :  { %v4405_v5 = vadd.f32 %v5715_v40, %v4404_v4 }
0x243c   :  { %v4409_v26 = vsel %vm4408_vm9, %v5715_v40, %v4405_v5  ;;  %vm8141_vm9 = vcmp.eq.s32.totalorder %v6111_v48, 1  ;;  %v5185_v48 = vld [vmem:[%s8064_s18 + $0x28] sm:$0xff] }
0x243d   :  { %v5719_v54 = vpop.eup %5718  ;;  %v7927_v10 = vsel %vm4411_vm7, %v4413_v29, %v4409_v26  ;;  %vm8142_vm7 = vcmp.eq.s32.totalorder %v6142_v11, 1  ;;  %v5184_v11 = vld [vmem:[%s8064_s18 + $0x20] sm:$0xff] }
0x243e   :  { %v4387_v52 = vmul.f32 %v5719_v54, %v4384_v6  ;;  %vm4392_vm14 = vweird.f32 %v5719_v54  ;;  %v4439_v47 = vsub.f32 1.0, %v7927_v10 }
0x243f   :  { %vm4393_vm4 = vmor %vm4391_vm1, %vm4392_vm14  ;;  %vm8143_vm14 = vcmp.eq.s32.totalorder %v6183_v41, 1  ;;  %vm8144_vm1 = vcmp.eq.s32.totalorder %v6174_v35, 1 }
0x2440   :  { %v4388_v2 = vsub.f32 1.0, %v4387_v52 }
0x2442   :  { %v4389_v38 = vmul.f32 %v5719_v54, %v4388_v2 }
0x2444   :  { %v4390_v3 = vadd.f32 %v5719_v54, %v4389_v38 }
0x2446   :  { %v4394_v12 = vsel %vm4393_vm4, %v5719_v54, %v4390_v3  ;;  %vm4589_vm4 = vcmask 785408  }
0x2447   :  { %v7932_v14 = vsel %vm4396_vm15, %v4398_v19, %v4394_v12 }
0x2448   :  { %v4450_v9 = vmul.f32 %v7932_v14, %v7884_v51 }
0x2472   :  { %v4472_v56 = vpop.f32.mrf.mxu3 }
0x2473   :  { %v4473_v62 = vadd.f32 %v5751_v36, %v4472_v56 }
0x2475   :  { %4521 = vrot.lane.b32.xlu0 %v4473_v62, %s5753_s2  ;;  %v4479_v21 = vadd.f32 %v5316_v42, %v4473_v62 }
0x2477   :  { %v5081_v13 = vmul.f32 -1.442695, %v4479_v21 }
0x2479   :  { %5720 = vpow2.f32 %v5081_v13 }
0x247a   :  { %v4421_v20 = vpop.permute.xlu2 %4420  ;;  %v4474_v17 = vpop.f32.mrf.mxu3 }
0x247b   :  { %v4425_v44 = vmul.f32 %v4421_v20, %v7927_v10  ;;  %v4475_v1 = vadd.f32 %v5751_v36, %v4474_v17 }
0x247d   :  { %4523 = vrot.lane.b32.xlu1 %v4475_v1, %s5753_s2  ;;  %4430 = vrot.lane.b32.xlu0 %v4425_v44, %s5753_s2  ;;  %v4480_v27 = vadd.f32 %v5317_v43, %v4475_v1 }
0x247f   :  { %v5082_v31 = vmul.f32 -1.442695, %v4480_v27  ;;  %v5721_v16 = vpop.eup %5720 }
0x2480   :  { %v4487_v32 = vadd.f32 1.0, %v5721_v16 }
0x2481   :  { %5722 = vpow2.f32 %v5082_v31 }
0x2482   :  { %5724 = vrcp.f32 %v4487_v32  ;;  %v4500_v15 = vand.u32 2147483648, %v4487_v32  ;;  %vm4494_vm2 = vweird.f32 %v4487_v32  ;;  %v4498_v6 = vand.u32 2147483647, %v4487_v32 }
0x2484   :  { %v4501_v56 = vor.u32 1.1754944e-38, %v4500_v15  ;;  %vm4499_vm8 = vcmp.eq.f32.partialorder %v4498_v6, 8.507059e+37 }
0x2487   :  { %v5723_v30 = vpop.eup %5722 }
0x2488   :  { %v4488_v34 = vadd.f32 1.0, %v5723_v30  ;;  %v5725_v8 = vpop.eup %5724  ;;  %v5181_v30 = vld [vmem:[%s8064_s18 + $0x8] sm:$0xff] }
0x2489   :  { %v4490_v37 = vmul.f32 %v5725_v8, %v4487_v32  ;;  %vm4495_vm13 = vweird.f32 %v5725_v8 }
0x248a   :  { %v4419_v61 = vpop.permute.xlu1 %4418  ;;  %5726 = vrcp.f32 %v4488_v34  ;;  %vm4496_vm6 = vmor %vm4494_vm2, %vm4495_vm13  ;;  %v4515_v26 = vand.u32 2147483648, %v4488_v34  ;;  %vm4509_vm12 = vweird.f32 %v4488_v34  ;;  %v4513_v52 = vand.u32 2147483647, %v4488_v34 }
0x248b   :  { %v4424_v28 = vmul.f32 %v4419_v61, %v7932_v14  ;;  %v4491_v24 = vsub.f32 1.0, %v4490_v37  ;;  %v5180_v37 = vld [vmem:[%s8064_s18] sm:$0xff] }
0x248c   :  { %v4516_v20 = vor.u32 1.1754944e-38, %v4515_v26  ;;  %vm4514_vm11 = vcmp.eq.f32.partialorder %v4513_v52, 8.507059e+37 }
0x248d   :  { %4428 = vrot.lane.b32.xlu2 %v4424_v28, %s5753_s2  ;;  %v4492_v23 = vmul.f32 %v5725_v8, %v4491_v24  ;;  %v4438_v28 = vsub.f32 1.0, %v7932_v14  ;;  %v5187_v14 = vld [vmem:[%s8064_s18 + $0x38] sm:$0xff] }
0x248e   :  { %4661 = vmatpush.bf16.msra.mxu0 %v5187_v14 }
0x248f   :  { %v4493_v40 = vadd.f32 %v5725_v8, %v4492_v23 }
0x2490   :  { %v5727_v22 = vpop.eup %5726 }
0x2491   :  { %v4505_v25 = vmul.f32 %v5727_v22, %v4488_v34  ;;  %v4497_v7 = vsel %vm4496_vm6, %v5725_v8, %v4493_v40  ;;  %vm4510_vm5 = vweird.f32 %v5727_v22 }
0x2492   :  { %v7942_v5 = vsel %vm4499_vm8, %v4501_v56, %v4497_v7  ;;  %vm4511_vm3 = vmor %vm4509_vm12, %vm4510_vm5  ;;  %v5189_v56 = vld [vmem:[%s8068_s22 + $0x8] sm:$0xff] }
0x2493   :  { %v4506_v60 = vsub.f32 1.0, %v4505_v25  ;;  %v4541_v34 = vsub.f32 1.0, %v7942_v5  ;;  %v4553_v24 = vmul.f32 %v7942_v5, %v7899_v49  ;;  %4719 = vmatpush.bf16.msra.mxu1 %v5189_v56 }
0x2495   :  { %v4507_v4 = vmul.f32 %v5727_v22, %v4506_v60 }
0x2497   :  { %v4508_v39 = vadd.f32 %v5727_v22, %v4507_v4 }
0x2499   :  { %v4512_v29 = vsel %vm4511_vm3, %v5727_v22, %v4508_v39 }
0x249a   :  { %v7948_v44 = vsel %vm4514_vm11, %v4516_v20, %v4512_v29 }
0x249b   :  { %v4542_v22 = vsub.f32 1.0, %v7948_v44  ;;  %v4554_v40 = vmul.f32 %v7948_v44, %v7904_v59 }
0x24e7   :  { %v4429_v36 = vpop.permute.xlu2 %4428  ;;  %v4522_v62 = vpop.permute.xlu0 %4521 }
0x24e8   :  { %v4434_v54 = vadd.f32 %v5312_v58, %v4429_v36  ;;  %v4527_v18 = vmul.f32 %v4522_v62, %v7942_v5  ;;  %v5188_v36 = vld [vmem:[%s8068_s22] sm:$0xff] }
0x24e9   :  { %4720 = vmatpush.bf16.msra.mxu1 %v5188_v36 }
0x24ea   :  { %5728 = vtanh.f32 %v4434_v54  ;;  %4531 = vrot.lane.b32.xlu1 %v4527_v18, %s5753_s2 }
0x24ef   :  { %v4524_v17 = vpop.permute.xlu1 %4523  ;;  %v4431_v1 = vpop.permute.xlu0 %4430 }
0x24f0   :  { %v5729_v2 = vpop.eup %5728  ;;  %v4528_v58 = vmul.f32 %v4524_v17, %v7948_v44  ;;  %v4435_v38 = vadd.f32 %v5313_v57, %v4431_v1 }
0x24f1   :  { %4442 = vrot.lane.b32.xlu0 %v5729_v2, %s5754_s5  ;;  %v5348_v2 = vld [vmem:[%s8065_s19] ss:$0 sm:$0xff] }
0x24f2   :  { %5730 = vtanh.f32 %v4435_v38  ;;  %4533 = vrot.lane.b32.xlu2 %v4528_v58, %s5753_s2 }
0x24f8   :  { %v5731_v3 = vpop.eup %5730 }
0x24f9   :  { %4444 = vrot.lane.b32.xlu1 %v5731_v3, %s5754_s5  ;;  %v5350_v3 = vld [vmem:[%s8067_s21] ss:$0 sm:$0xff] }
0x2501   :  { %5326 = vrot.lane.b32.xlu1 %v5325_v46, %s5754_s5 }
0x254c   :  { %v4534_v53 = vpop.permute.xlu2 %4533 }
0x254d   :  { %v4538_v0 = vadd.f32 %v5317_v43, %v4534_v53  ;;  %v4451_v43 = vmul.f32 %v7927_v10, %v7889_v50  ;;  %v5186_v10 = vld [vmem:[%s8064_s18 + $0x30] sm:$0xff] }
0x254e   :  { %4662 = vmatpush.bf16.msra.mxu0 %v5186_v10 }
0x254f   :  { %5732 = vtanh.f32 %v4538_v0 }
0x2552   :  { %4663 = vmatpush.bf16.msra.mxu0 %v5185_v48 }
0x2555   :  { %v5733_v12 = vpop.eup %5732 }
0x2556   :  { %4547 = vrot.lane.b32.xlu0 %v5733_v12, %s5754_s5  ;;  %4664 = vmatpush.bf16.msra.mxu0 %v5184_v11 }
0x255c   :  { %v4532_v45 = vpop.permute.xlu1 %4531 }
0x255d   :  { %v4537_v57 = vadd.f32 %v5316_v42, %v4532_v45 }
0x255f   :  { %5734 = vtanh.f32 %v4537_v57 }
0x2563   :  { %v4443_v61 = vpop.permute.xlu0 %4442 }
0x2564   :  { %v4448_v21 = vmul.f32 %v4443_v61, %v4438_v28 }
0x2565   :  { %v5735_v19 = vpop.eup %5734 }
0x2566   :  { %4545 = vrot.lane.b32.xlu2 %v5735_v19, %s5754_s5  ;;  %v4452_v13 = vadd.f32 %v4450_v9, %v4448_v21  ;;  %v5351_v21 = vld [vmem:[%s8069_s23] ss:$0 sm:$0xff] }
0x2568   :  { %v4557_v27 = vsel %vm8141_vm9, %v4452_v13, %v7884_v51  ;;  %v5183_v51 = vld [vmem:[%s8064_s18 + $0x18] sm:$0xff] }
0x2569   :  { %4665 = vmatpush.bf16.msra.mxu0 %v5183_v51 }
0x256b   :  { %v4445_v46 = vpop.permute.xlu1 %4444 }
0x256c   :  { %v4449_v63 = vmul.f32 %v4445_v46, %v4439_v47 }
0x256e   :  { %v4453_v42 = vadd.f32 %v4451_v43, %v4449_v63 }
0x2570   :  { %v4558_v31 = vsel %vm8142_vm7, %v4453_v42, %v7889_v50  ;;  %v5182_v50 = vld [vmem:[%s8064_s18 + $0x10] sm:$0xff] }
0x2571   :  { %v5330_v16 = vpack.i.bf16 %v4558_v31, %v4557_v27  ;;  %4666 = vmatpush.bf16.msra.mxu0 %v5182_v50 }
0x2573   :  { %5331 = vrot.lane.b32.xlu2 %v5330_v16, %s5755_s17  ;;  %v5327_v62 = vpop.permute.xlu1 %5326 }
0x2574   :  { %v5328_v5 = vunpack.i.l.bf16 %v5327_v62 }
0x2575   :  { %4667 = vmatpush.bf16.msra.mxu0 %v5181_v30 }
0x2576   :  { %v4585_v39 = vsel %vm124_vm0, %v5328_v5, %v7141_v55  ;;  %v5349_v55 = vld [vmem:[%s8066_s20] ss:$0 sm:$0xff] }
0x2579   :  { %4668 = vmatpush.bf16.msra.mxu0 %v5180_v37 }
0x25c0   :  { %v4546_v32 = vpop.permute.xlu2 %4545 }
0x25c1   :  { %v4551_v8 = vmul.f32 %v4546_v32, %v4541_v34 }
0x25c3   :  { %v4555_v25 = vadd.f32 %v4553_v24, %v4551_v8 }
0x25c5   :  { %v4559_v6 = vsel %vm8143_vm14, %v4555_v25, %v7899_v49  ;;  %v5329_v49 = vunpack.i.h.bf16 %v5327_v62 }
0x25c7   :  { %v4586_v18 = vsel %vm124_vm0, %v5329_v49, %v7148_v33 }
0x25c8   :  { %v4548_v23 = vpop.permute.xlu0 %4547 }
0x25c9   :  { %v4552_v60 = vmul.f32 %v4548_v23, %v4542_v22 }
0x25cb   :  { %v4556_v15 = vadd.f32 %v4554_v40, %v4552_v60 }
0x25cd   :  { %v4560_v7 = vsel %vm8144_vm1, %v4556_v15, %v7904_v59  ;;  %v5332_v41 = vpop.permute.xlu2 %5331 }
0x25ce   :  { %v5335_v4 = vpack.i.bf16 %v4560_v7, %v4559_v6  ;;  %v5334_v54 = vunpack.i.h.bf16 %v5332_v41  ;;  %v5333_v35 = vunpack.i.l.bf16 %v5332_v41 }
0x25d0   :  { %5336 = vrot.lane.b32.xlu0 %v5335_v4, %s5753_s2  ;;  %v4587_v29 = vsel %vm2632_vm10, %v4585_v39, %v5333_v35  ;;  %v4588_v20 = vsel %vm2632_vm10, %v4586_v18, %v5334_v54 }
0x2642   :  { %v5337_v59 = vpop.permute.xlu0 %5336 }
0x2643   :  { %v5339_v26 = vunpack.i.h.bf16 %v5337_v59  ;;  %v5338_v52 = vunpack.i.l.bf16 %v5337_v59 }
0x2645   :  { %v4590_v17 = vsel %vm4589_vm4, %v4587_v29, %v5338_v52  ;;  %v4591_v44 = vsel %vm4589_vm4, %v4588_v20, %v5339_v26 }
0x2646   :  { %v4592_v1 = vpack.c.bf16 %v4591_v44, %v4590_v17 }
0x2648   :  { %4669 = vmatmul.bf16.vlgmr.msra.gmra.mxu0 %v4592_v1 }
0x26c5   :  { %v4670_v58 = vpop.f32.mrf.mxu0 }
0x26c6   :  { %v4671_v38 = vadd.f32 %v5348_v2, %v4670_v58 }
0x26c8   :  { %v4679_v33 = vmul.f32 %v5349_v55, %v4671_v38 }
0x26ca   :  { %v4685_v12 = vadd.f32 %v5350_v3, %v4679_v33 }
0x26cc   :  { %v4687_v19 = vmax.f32 %v4685_v12, 0.0 }
0x26cd   :  { %v4672_v53 = vpop.f32.mrf.mxu0 }
0x26ce   :  { %v4673_v0 = vadd.f32 %v5348_v2, %v4672_v53 }
0x26d0   :  { %v4680_v45 = vmul.f32 %v5349_v55, %v4673_v0 }
0x26d2   :  { %v4686_v57 = vadd.f32 %v5350_v3, %v4680_v45 }
0x26d4   :  { %v4688_v61 = vmax.f32 %v4686_v57, 0.0 }
0x26d6   :  { %v4689_v28 = vpack.c.bf16 %v4688_v61, %v4687_v19 }
0x26d8   :  { %5123 = vmatmul.msk.bf16.vlgmr.msra.gmra.mxu1 %vm124_vm0, %v4689_v28 }
0x2755   :  { %v4722_v9 = vpop.f32.mrf.mxu1 }
0x2756   :  { %v4723_v47 = vadd.f32 %v5351_v21, %v4722_v9 }
0x2758   :  { %v4727_v46 = vmax.f32 %v4723_v47, 0.0 }
0x275a   :  { %4729 = vst.msk [vmem:[%s8070_s24] sm:$0xff] %vm124_vm0, %v4727_v46 }
0x275d   :  { %v4724_v13 = vpop.f32.mrf.mxu1 }
0x275e   :  { %v4725_v43 = vadd.f32 %v5351_v21, %v4724_v13 }
0x2760   :  { %v4728_v63 = vmax.f32 %v4725_v43, 0.0 }
0x2762   :  { %4730 = vst.msk [vmem:[%s8070_s24 + $0x8] sm:$0xff] %vm124_vm0, %v4728_v63 }

</bundles_post_ra>
